<compile_context>
chip_gen: v7x
topology: tpu7x:2x2x1
jax: 0.10.0
libtpu: 0.0.40
codegen_flags: <defaults>
</compile_context>

<pallas_src>
import functools

import jax
import jax.numpy as jnp
from jax.experimental import pallas as pl
from jax.experimental.pallas import tpu as pltpu

BN_EPS = 1e-5

# Whole-array-in-VMEM spec (no blocking, no grid).
_VMEM = pl.BlockSpec(memory_space=pltpu.MemorySpace.VMEM)


# ---------------------------------------------------------------------------
# Kernels
# ---------------------------------------------------------------------------
def _conv_kernel(x_ref, w_ref, sc_ref, sh_ref, o_ref, *, oh, ow, pre_act,
                 compute_dtype):
    """Conv2d(k=4, s=2, p=1) as a 2x2-tap GEMM over a space-to-depth input.

    x_ref : (N, oh+1, ow+1, 4*C)  zero-padded, space-to-depth packed input
    w_ref : (4, 4*C, OC)          tap-major weight (tap = di*2 + dj)
    sc/sh : (1, OC)               folded bias + eval-mode BatchNorm
    o_ref : (N*oh*ow, OC)         f32 output
    """
    x = x_ref[...]                                   # compact, f32
    if pre_act == "lrelu":
        x = jnp.where(x > 0, x, 0.2 * x)
    elif pre_act == "relu":
        x = jnp.maximum(x, 0.0)
    n = x.shape[0]
    k = x.shape[-1]
    m = n * oh * ow
    acc = jnp.zeros((m, o_ref.shape[-1]), jnp.float32)
    for di in range(2):
        for dj in range(2):
            a = (x[:, di:di + oh, dj:dj + ow, :]
                 .reshape(m, k).astype(compute_dtype))
            acc = acc + jnp.dot(a, w_ref[di * 2 + dj],
                                preferred_element_type=jnp.float32)
    o_ref[...] = acc * sc_ref[...] + sh_ref[...]


def _deconv_kernel(*refs, n_in, h, w, oc, compute_dtype, post_tanh):
    """ConvTranspose2d(k=4, s=2, p=1) via the 4-phase decomposition.

    refs = (x_0..x_{n_in-1}, w_0..w_{n_in-1}, sc, sh, o)
    x_t : (N, h+2, w+2, C_t)  zero-padded inputs (skip-concat fused here)
    w_t : (16, C_t, OC)       taps ordered (py, px, a, b)
    o   : (4, N*h*w, OC)      phase-packed f32 output
    """
    xs = refs[:n_in]
    ws = refs[n_in:2 * n_in]
    sc_ref, sh_ref, o_ref = refs[2 * n_in], refs[2 * n_in + 1], refs[-1]
    n = xs[0].shape[0]
    m = n * h * w
    # ReLU pre-activation applied once, on the compact inputs.
    xv = [jnp.maximum(r[...], 0.0) for r in xs]
    scale = sc_ref[...]
    shift = sh_ref[...]
    for py in range(2):
        for px in range(2):
            acc = jnp.zeros((m, oc), jnp.float32)
            for t in range(n_in):
                xt = xv[t]
                c = xt.shape[-1]
                for a in range(2):
                    for b in range(2):
                        patch = xt[:, py + a:py + a + h, px + b:px + b + w, :]
                        acc = acc + jnp.dot(
                            patch.reshape(m, c).astype(compute_dtype),
                            ws[t][((py * 2 + px) * 2 + a) * 2 + b],
                            preferred_element_type=jnp.float32)
            out = acc * scale + shift
            if post_tanh:
                out = jnp.tanh(out)
            o_ref[py * 2 + px] = out


# ---------------------------------------------------------------------------
# Compact (1x-sized) plain-JAX glue: padding / packing / weight reorg
# ---------------------------------------------------------------------------
def _scale_shift(bias, bn):
    # Fold conv bias + eval-mode BatchNorm into per-channel (scale, shift).
    if bn is None:
        return jnp.ones_like(bias), bias
    gamma, beta, mean, var = bn
    s = gamma / jnp.sqrt(var + BN_EPS)
    return s, (bias - mean) * s + beta


def _space_to_depth(x):
    # (N, H, W, C) -> pad 1 -> (N, H/2+1, W/2+1, 4*C), channel = (r*2+c)*C+ic
    n, h, w, c = x.shape
    xp = jnp.pad(x, ((0, 0), (1, 1), (1, 1), (0, 0)))
    hb, wb = (h + 2) // 2, (w + 2) // 2
    return (xp.reshape(n, hb, 2, wb, 2, c)
            .transpose(0, 1, 3, 2, 4, 5)
            .reshape(n, hb, wb, 4 * c))


def _conv_weight(w, dtype):
    # w: (OC, IC, 4, 4) -> (4, 4*IC, OC); tap = di*2+dj, row = (r*2+c)*IC+ic
    oc, ic = w.shape[0], w.shape[1]
    wr = w.reshape(oc, ic, 2, 2, 2, 2)             # (oc, ic, di, r, dj, c)
    wt = jnp.transpose(wr, (2, 4, 3, 5, 1, 0))     # (di, dj, r, c, ic, oc)
    return wt.reshape(4, 4 * ic, oc).astype(dtype)


def _deconv_weight(w, dtype):
    # w: (C, OC, 4, 4) ConvTranspose weight slice.
    # Output phase (py, px), tap (a, b) uses kernel element (3-2a-py, 3-2b-px).
    taps = []
    for py in range(2):
        for px in range(2):
            for a in range(2):
                for b in range(2):
                    taps.append(w[:, :, 3 - 2 * a - py, 3 - 2 * b - px])
    return jnp.stack(taps, axis=0).astype(dtype)       # (16, C, OC)


# ---------------------------------------------------------------------------
# Layer wrappers
# ---------------------------------------------------------------------------
def conv_block(x, p, *, pre_act, bn, compute_dtype):
    n, h, w, _ = x.shape
    oh, ow = h // 2, w // 2
    oc = p["w"].shape[0]
    xs = _space_to_depth(x)
    wmat = _conv_weight(p["w"], compute_dtype)
    sc, sh = _scale_shift(p["b"], p.get("bn") if bn else None)
    kern = functools.partial(_conv_kernel, oh=oh, ow=ow, pre_act=pre_act,
                             compute_dtype=compute_dtype)
    out = pl.pallas_call(
        kern,
        out_shape=jax.ShapeDtypeStruct((n * oh * ow, oc), jnp.float32),
        in_specs=[_VMEM] * 4,
        out_specs=_VMEM,
    )(xs, wmat, sc.reshape(1, oc), sh.reshape(1, oc))
    return out.reshape(n, oh, ow, oc)


def deconv_block(xs, p, *, bn, post_tanh=False, compute_dtype):
    # xs: list of NHWC tensors whose channel concat is the layer input
    # (skip connection fused inside the kernel -- no HBM concatenate).
    n, h, w, _ = xs[0].shape
    oc = p["w"].shape[1]
    sc, sh = _scale_shift(p["b"], p.get("bn") if bn else None)
    xps, ws = [], []
    off = 0
    for xx in xs:
        c = xx.shape[-1]
        xps.append(jnp.pad(xx, ((0, 0), (1, 1), (1, 1), (0, 0))))
        ws.append(_deconv_weight(p["w"][off:off + c], compute_dtype))
        off += c
    m = n * h * w
    kern = functools.partial(_deconv_kernel, n_in=len(xs), h=h, w=w, oc=oc,
                             compute_dtype=compute_dtype, post_tanh=post_tanh)
    out = pl.pallas_call(
        kern,
        out_shape=jax.ShapeDtypeStruct((4, m, oc), jnp.float32),
        in_specs=[_VMEM] * (2 * len(xs) + 2),
        out_specs=_VMEM,
    )(*xps, *ws, sc.reshape(1, oc), sh.reshape(1, oc))
    # Interleave the 4 output-parity phases: (4, N*h*w, OC) -> (N, 2h, 2w, OC)
    return (out.reshape(2, 2, n, h, w, oc)
            .transpose(2, 3, 0, 4, 1, 5)
            .reshape(n, 2 * h, 2 * w, oc))


def generator_forward(params, x_nchw, compute_dtype=jnp.bfloat16):
    cdt = compute_dtype
    x = jnp.transpose(x_nchw, (0, 2, 3, 1))                  # NCHW -> NHWC
    e1 = conv_block(x, params["en1"], pre_act=None, bn=False, compute_dtype=cdt)
    e2 = conv_block(e1, params["en2"], pre_act="lrelu", bn=True, compute_dtype=cdt)
    e3 = conv_block(e2, params["en3"], pre_act="lrelu", bn=True, compute_dtype=cdt)
    e4 = conv_block(e3, params["en4"], pre_act="lrelu", bn=False, compute_dtype=cdt)
    d1 = deconv_block([e4], params["de1"], bn=True, compute_dtype=cdt)
    # TODO(synk): Dropout(p=0.5) on de1 is identity here (eval-mode semantics).
    d2 = deconv_block([d1, e3], params["de2"], bn=True, compute_dtype=cdt)
    d3 = deconv_block([d2, e2], params["de3"], bn=True, compute_dtype=cdt)
    out = deconv_block([d3, e1], params["de4"], bn=False, post_tanh=True,
                       compute_dtype=cdt)
    return jnp.transpose(out, (0, 3, 1, 2))                  # NHWC -> NCHW


# ---------------------------------------------------------------------------
# Deterministic parameter init (shapes from the PyTorch module __init__)
# ---------------------------------------------------------------------------
def init_params(key, in_ch, out_ch, ngf):
    def _bn(k, oc):
        k1, k2, k3, k4 = jax.random.split(k, 4)
        return (1.0 + 0.1 * jax.random.normal(k1, (oc,), jnp.float32),   # gamma
                0.1 * jax.random.normal(k2, (oc,), jnp.float32),         # beta
                0.1 * jax.random.normal(k3, (oc,), jnp.float32),         # run_mean
                0.5 + jax.random.uniform(k4, (oc,), jnp.float32))        # run_var

    def conv_p(k, ic, oc, bn):
        k1, k2, k3 = jax.random.split(k, 3)
        p = {"w": 0.05 * jax.random.normal(k1, (oc, ic, 4, 4), jnp.float32),
             "b": 0.05 * jax.random.normal(k2, (oc,), jnp.float32)}
        if bn:
            p["bn"] = _bn(k3, oc)
        return p

    def deconv_p(k, ic, oc, bn):
        k1, k2, k3 = jax.random.split(k, 3)
        p = {"w": 0.05 * jax.random.normal(k1, (ic, oc, 4, 4), jnp.float32),
             "b": 0.05 * jax.random.normal(k2, (oc,), jnp.float32)}
        if bn:
            p["bn"] = _bn(k3, oc)
        return p

    ks = jax.random.split(key, 8)
    return {
        "en1": conv_p(ks[0], in_ch, ngf, bn=False),
        "en2": conv_p(ks[1], ngf, ngf * 2, bn=True),
        "en3": conv_p(ks[2], ngf * 2, ngf * 4, bn=True),
        "en4": conv_p(ks[3], ngf * 4, ngf * 8, bn=False),
        "de1": deconv_p(ks[4], ngf * 8, ngf * 4, bn=True),
        "de2": deconv_p(ks[5], ngf * 4 * 2, ngf * 2, bn=True),
        "de3": deconv_p(ks[6], ngf * 2 * 2, ngf, bn=True),
        "de4": deconv_p(ks[7], ngf * 2, out_ch, bn=False),
    }


# ---------------------------------------------------------------------------
# Pure-JAX (lax.conv) reference of the same forward pass, for verification
# ---------------------------------------------------------------------------
def ref_forward(params, x):
    def lrelu(v):
        return jnp.where(v > 0, v, 0.2 * v)

    def bn(v, p):
        gamma, beta, mean, var = p
        inv = gamma / jnp.sqrt(var + BN_EPS)
        return v * inv[None, :, None, None] + \
            (beta - mean * inv)[None, :, None, None]

    def conv(v, p):
        y = jax.lax.conv_general_dilated(
            v, p["w"], (2, 2), ((1, 1), (1, 1)),
            dimension_numbers=("NCHW", "OIHW", "NCHW"))
        return y + p["b"][None, :, None, None]

    def deconv(v, p):
        wc = jnp.transpose(p["w"][:, :, ::-1, ::-1], (1, 0, 2, 3))
        y = jax.lax.conv_general_dilated(
            v, wc, (1, 1), ((2, 2), (2, 2)), lhs_dilation=(2, 2),
            dimension_numbers=("NCHW", "OIHW", "NCHW"))
        return y + p["b"][None, :, None, None]

    e1 = conv(x, params["en1"])
    e2 = bn(conv(lrelu(e1), params["en2"]), params["en2"]["bn"])
    e3 = bn(conv(lrelu(e2), params["en3"]), params["en3"]["bn"])
    e4 = conv(lrelu(e3), params["en4"])
    d1 = bn(deconv(jnp.maximum(e4, 0), params["de1"]), params["de1"]["bn"])
    d1c = jnp.concatenate([d1, e3], axis=1)
    d2 = bn(deconv(jnp.maximum(d1c, 0), params["de2"]), params["de2"]["bn"])
    d2c = jnp.concatenate([d2, e2], axis=1)
    d3 = bn(deconv(jnp.maximum(d2c, 0), params["de3"]), params["de3"]["bn"])
    d3c = jnp.concatenate([d3, e1], axis=1)
    return jnp.tanh(deconv(jnp.maximum(d3c, 0), params["de4"]))


if __name__ == "__main__":
    in_ch, out_ch, ngf = 4, 3, 8
    key = jax.random.PRNGKey(0)
    kp, kx = jax.random.split(key)
    params = init_params(kp, in_ch, out_ch, ngf)
    x = jax.random.normal(kx, (2, in_ch, 16, 16), jnp.float32)   # NCHW

    fwd_bf16 = jax.jit(functools.partial(generator_forward,
                                         compute_dtype=jnp.bfloat16))
    fwd_f32 = jax.jit(functools.partial(generator_forward,
                                        compute_dtype=jnp.float32))

    out_bf16 = jax.block_until_ready(fwd_bf16(params, x))
    out_f32 = jax.block_until_ready(fwd_f32(params, x))
    ref = jax.block_until_ready(jax.jit(ref_forward)(params, x))

    assert out_bf16.shape == (2, out_ch, 16, 16), out_bf16.shape
    # Tight structural check on the f32 compute path.
    err32 = float(jnp.max(jnp.abs(out_f32 - ref)))
    assert err32 < 5e-4, err32
    # Looser check on the bf16 MXU path (bf16 operands, f32 accumulation).
    err16_max = float(jnp.max(jnp.abs(out_bf16 - ref)))
    err16_mean = float(jnp.mean(jnp.abs(out_bf16 - ref)))
    assert err16_max < 1e-1, err16_max
    assert err16_mean < 2e-2, err16_mean

    print("KERNEL_OK")
</pallas_src>

<mosaic_0001>
module attributes {stable_mosaic.version = 11 : i64} {
  func.func @_conv_kernel(%arg0: memref<2x9x9x16xf32, #tpu.memory_space<vmem>>, %arg1: memref<4x16x8xbf16, #tpu.memory_space<vmem>>, %arg2: memref<1x8xf32, #tpu.memory_space<vmem>>, %arg3: memref<1x8xf32, #tpu.memory_space<vmem>>, %arg4: memref<128x8xf32, #tpu.memory_space<vmem>>) attributes {dimension_semantics = [], scalar_prefetch = 0 : i64, scratch_operands = 0 : i64, tpu.core_type = #tpu.core_type<tc>} {
    %c0 = arith.constant 0 : index
    %c0_0 = arith.constant 0 : index
    %c0_1 = arith.constant 0 : index
    %c0_2 = arith.constant 0 : index
    %0 = vector.load %arg0[%c0, %c0_0, %c0_1, %c0_2] : memref<2x9x9x16xf32, #tpu.memory_space<vmem>>, vector<2x9x9x16xf32>
    %cst = arith.constant 0.000000e+00 : f32
    %1 = vector.broadcast %cst : f32 to vector<128x8xf32>
    %2 = vector.extract_strided_slice %0 {offsets = [0, 0, 0, 0], sizes = [2, 8, 8, 16], strides = [1, 1, 1, 1]} : vector<2x9x9x16xf32> to vector<2x8x8x16xf32>
    %3 = vector.shape_cast %2 : vector<2x8x8x16xf32> to vector<128x16xf32>
    %4 = arith.truncf %3 : vector<128x16xf32> to vector<128x16xbf16>
    %c0_3 = arith.constant 0 : index
    %c0_4 = arith.constant 0 : index
    %c0_5 = arith.constant 0 : index
    %5 = vector.load %arg1[%c0_3, %c0_4, %c0_5] : memref<4x16x8xbf16, #tpu.memory_space<vmem>>, vector<1x16x8xbf16>
    %6 = vector.shape_cast %5 : vector<1x16x8xbf16> to vector<16x8xbf16>
    %cst_6 = arith.constant dense<0.000000e+00> : vector<128x8xf32>
    %7 = tpu.matmul %4, %6, %cst_6 {dimension_numbers = #tpu.dot_dimension_numbers<[1], [0], [0], [1], [0, 0, 1, 1], [], []>} : vector<128x16xbf16>, vector<16x8xbf16>, vector<128x8xf32> -> vector<128x8xf32>
    %8 = arith.addf %1, %7 : vector<128x8xf32>
    %9 = vector.extract_strided_slice %0 {offsets = [0, 0, 1, 0], sizes = [2, 8, 8, 16], strides = [1, 1, 1, 1]} : vector<2x9x9x16xf32> to vector<2x8x8x16xf32>
    %10 = vector.shape_cast %9 : vector<2x8x8x16xf32> to vector<128x16xf32>
    %11 = arith.truncf %10 : vector<128x16xf32> to vector<128x16xbf16>
    %c1 = arith.constant 1 : index
    %c0_7 = arith.constant 0 : index
    %c0_8 = arith.constant 0 : index
    %12 = vector.load %arg1[%c1, %c0_7, %c0_8] : memref<4x16x8xbf16, #tpu.memory_space<vmem>>, vector<1x16x8xbf16>
    %13 = vector.shape_cast %12 : vector<1x16x8xbf16> to vector<16x8xbf16>
    %cst_9 = arith.constant dense<0.000000e+00> : vector<128x8xf32>
    %14 = tpu.matmul %11, %13, %cst_9 {dimension_numbers = #tpu.dot_dimension_numbers<[1], [0], [0], [1], [0, 0, 1, 1], [], []>} : vector<128x16xbf16>, vector<16x8xbf16>, vector<128x8xf32> -> vector<128x8xf32>
    %15 = arith.addf %8, %14 : vector<128x8xf32>
    %16 = vector.extract_strided_slice %0 {offsets = [0, 1, 0, 0], sizes = [2, 8, 8, 16], strides = [1, 1, 1, 1]} : vector<2x9x9x16xf32> to vector<2x8x8x16xf32>
    %17 = vector.shape_cast %16 : vector<2x8x8x16xf32> to vector<128x16xf32>
    %18 = arith.truncf %17 : vector<128x16xf32> to vector<128x16xbf16>
    %c2 = arith.constant 2 : index
    %c0_10 = arith.constant 0 : index
    %c0_11 = arith.constant 0 : index
    %19 = vector.load %arg1[%c2, %c0_10, %c0_11] : memref<4x16x8xbf16, #tpu.memory_space<vmem>>, vector<1x16x8xbf16>
    %20 = vector.shape_cast %19 : vector<1x16x8xbf16> to vector<16x8xbf16>
    %cst_12 = arith.constant dense<0.000000e+00> : vector<128x8xf32>
    %21 = tpu.matmul %18, %20, %cst_12 {dimension_numbers = #tpu.dot_dimension_numbers<[1], [0], [0], [1], [0, 0, 1, 1], [], []>} : vector<128x16xbf16>, vector<16x8xbf16>, vector<128x8xf32> -> vector<128x8xf32>
    %22 = arith.addf %15, %21 : vector<128x8xf32>
    %23 = vector.extract_strided_slice %0 {offsets = [0, 1, 1, 0], sizes = [2, 8, 8, 16], strides = [1, 1, 1, 1]} : vector<2x9x9x16xf32> to vector<2x8x8x16xf32>
    %24 = vector.shape_cast %23 : vector<2x8x8x16xf32> to vector<128x16xf32>
    %25 = arith.truncf %24 : vector<128x16xf32> to vector<128x16xbf16>
    %c3 = arith.constant 3 : index
    %c0_13 = arith.constant 0 : index
    %c0_14 = arith.constant 0 : index
    %26 = vector.load %arg1[%c3, %c0_13, %c0_14] : memref<4x16x8xbf16, #tpu.memory_space<vmem>>, vector<1x16x8xbf16>
    %27 = vector.shape_cast %26 : vector<1x16x8xbf16> to vector<16x8xbf16>
    %cst_15 = arith.constant dense<0.000000e+00> : vector<128x8xf32>
    %28 = tpu.matmul %25, %27, %cst_15 {dimension_numbers = #tpu.dot_dimension_numbers<[1], [0], [0], [1], [0, 0, 1, 1], [], []>} : vector<128x16xbf16>, vector<16x8xbf16>, vector<128x8xf32> -> vector<128x8xf32>
    %29 = arith.addf %22, %28 : vector<128x8xf32>
    %c0_16 = arith.constant 0 : index
    %c0_17 = arith.constant 0 : index
    %30 = vector.load %arg2[%c0_16, %c0_17] : memref<1x8xf32, #tpu.memory_space<vmem>>, vector<1x8xf32>
    %31 = vector.broadcast %30 : vector<1x8xf32> to vector<128x8xf32>
    %32 = arith.mulf %29, %31 : vector<128x8xf32>
    %c0_18 = arith.constant 0 : index
    %c0_19 = arith.constant 0 : index
    %33 = vector.load %arg3[%c0_18, %c0_19] : memref<1x8xf32, #tpu.memory_space<vmem>>, vector<1x8xf32>
    %34 = vector.broadcast %33 : vector<1x8xf32> to vector<128x8xf32>
    %35 = arith.addf %32, %34 : vector<128x8xf32>
    %c0_20 = arith.constant 0 : index
    %c0_21 = arith.constant 0 : index
    %36 = vector.load %arg4[%c0_20, %c0_21] : memref<128x8xf32, #tpu.memory_space<vmem>>, vector<128x8xf32>
    tpu.vector_store %arg4[%c0_20, %c0_21], %35 {strides = array<i32>} : memref<128x8xf32, #tpu.memory_space<vmem>>, vector<128x8xf32>,
    return
  }
}

module attributes {stable_mosaic.version = 11 : i64} {
  func.func @_conv_kernel(%arg0: memref<2x5x5x32xf32, #tpu.memory_space<vmem>>, %arg1: memref<4x32x16xbf16, #tpu.memory_space<vmem>>, %arg2: memref<1x16xf32, #tpu.memory_space<vmem>>, %arg3: memref<1x16xf32, #tpu.memory_space<vmem>>, %arg4: memref<32x16xf32, #tpu.memory_space<vmem>>) attributes {dimension_semantics = [], scalar_prefetch = 0 : i64, scratch_operands = 0 : i64, tpu.core_type = #tpu.core_type<tc>} {
    %c0 = arith.constant 0 : index
    %c0_0 = arith.constant 0 : index
    %c0_1 = arith.constant 0 : index
    %c0_2 = arith.constant 0 : index
    %0 = vector.load %arg0[%c0, %c0_0, %c0_1, %c0_2] : memref<2x5x5x32xf32, #tpu.memory_space<vmem>>, vector<2x5x5x32xf32>
    %cst = arith.constant 0.000000e+00 : f32
    %1 = vector.broadcast %cst : f32 to vector<2x5x5x32xf32>
    %2 = arith.cmpf ogt, %0, %1 : vector<2x5x5x32xf32>
    %cst_3 = arith.constant 2.000000e-01 : f32
    %3 = vector.broadcast %cst_3 : f32 to vector<2x5x5x32xf32>
    %4 = arith.mulf %3, %0 : vector<2x5x5x32xf32>
    %5 = arith.select %2, %0, %4 : vector<2x5x5x32xi1>, vector<2x5x5x32xf32>
    %cst_4 = arith.constant 0.000000e+00 : f32
    %6 = vector.broadcast %cst_4 : f32 to vector<32x16xf32>
    %7 = vector.extract_strided_slice %5 {offsets = [0, 0, 0, 0], sizes = [2, 4, 4, 32], strides = [1, 1, 1, 1]} : vector<2x5x5x32xf32> to vector<2x4x4x32xf32>
    %8 = vector.shape_cast %7 : vector<2x4x4x32xf32> to vector<32x32xf32>
    %9 = arith.truncf %8 : vector<32x32xf32> to vector<32x32xbf16>
    %c0_5 = arith.constant 0 : index
    %c0_6 = arith.constant 0 : index
    %c0_7 = arith.constant 0 : index
    %10 = vector.load %arg1[%c0_5, %c0_6, %c0_7] : memref<4x32x16xbf16, #tpu.memory_space<vmem>>, vector<1x32x16xbf16>
    %11 = vector.shape_cast %10 : vector<1x32x16xbf16> to vector<32x16xbf16>
    %cst_8 = arith.constant dense<0.000000e+00> : vector<32x16xf32>
    %12 = tpu.matmul %9, %11, %cst_8 {dimension_numbers = #tpu.dot_dimension_numbers<[1], [0], [0], [1], [0, 0, 1, 1], [], []>} : vector<32x32xbf16>, vector<32x16xbf16>, vector<32x16xf32> -> vector<32x16xf32>
    %13 = arith.addf %6, %12 : vector<32x16xf32>
    %14 = vector.extract_strided_slice %5 {offsets = [0, 0, 1, 0], sizes = [2, 4, 4, 32], strides = [1, 1, 1, 1]} : vector<2x5x5x32xf32> to vector<2x4x4x32xf32>
    %15 = vector.shape_cast %14 : vector<2x4x4x32xf32> to vector<32x32xf32>
    %16 = arith.truncf %15 : vector<32x32xf32> to vector<32x32xbf16>
    %c1 = arith.constant 1 : index
    %c0_9 = arith.constant 0 : index
    %c0_10 = arith.constant 0 : index
    %17 = vector.load %arg1[%c1, %c0_9, %c0_10] : memref<4x32x16xbf16, #tpu.memory_space<vmem>>, vector<1x32x16xbf16>
    %18 = vector.shape_cast %17 : vector<1x32x16xbf16> to vector<32x16xbf16>
    %cst_11 = arith.constant dense<0.000000e+00> : vector<32x16xf32>
    %19 = tpu.matmul %16, %18, %cst_11 {dimension_numbers = #tpu.dot_dimension_numbers<[1], [0], [0], [1], [0, 0, 1, 1], [], []>} : vector<32x32xbf16>, vector<32x16xbf16>, vector<32x16xf32> -> vector<32x16xf32>
    %20 = arith.addf %13, %19 : vector<32x16xf32>
    %21 = vector.extract_strided_slice %5 {offsets = [0, 1, 0, 0], sizes = [2, 4, 4, 32], strides = [1, 1, 1, 1]} : vector<2x5x5x32xf32> to vector<2x4x4x32xf32>
    %22 = vector.shape_cast %21 : vector<2x4x4x32xf32> to vector<32x32xf32>
    %23 = arith.truncf %22 : vector<32x32xf32> to vector<32x32xbf16>
    %c2 = arith.constant 2 : index
    %c0_12 = arith.constant 0 : index
    %c0_13 = arith.constant 0 : index
    %24 = vector.load %arg1[%c2, %c0_12, %c0_13] : memref<4x32x16xbf16, #tpu.memory_space<vmem>>, vector<1x32x16xbf16>
    %25 = vector.shape_cast %24 : vector<1x32x16xbf16> to vector<32x16xbf16>
    %cst_14 = arith.constant dense<0.000000e+00> : vector<32x16xf32>
    %26 = tpu.matmul %23, %25, %cst_14 {dimension_numbers = #tpu.dot_dimension_numbers<[1], [0], [0], [1], [0, 0, 1, 1], [], []>} : vector<32x32xbf16>, vector<32x16xbf16>, vector<32x16xf32> -> vector<32x16xf32>
    %27 = arith.addf %20, %26 : vector<32x16xf32>
    %28 = vector.extract_strided_slice %5 {offsets = [0, 1, 1, 0], sizes = [2, 4, 4, 32], strides = [1, 1, 1, 1]} : vector<2x5x5x32xf32> to vector<2x4x4x32xf32>
    %29 = vector.shape_cast %28 : vector<2x4x4x32xf32> to vector<32x32xf32>
    %30 = arith.truncf %29 : vector<32x32xf32> to vector<32x32xbf16>
    %c3 = arith.constant 3 : index
    %c0_15 = arith.constant 0 : index
    %c0_16 = arith.constant 0 : index
    %31 = vector.load %arg1[%c3, %c0_15, %c0_16] : memref<4x32x16xbf16, #tpu.memory_space<vmem>>, vector<1x32x16xbf16>
    %32 = vector.shape_cast %31 : vector<1x32x16xbf16> to vector<32x16xbf16>
    %cst_17 = arith.constant dense<0.000000e+00> : vector<32x16xf32>
    %33 = tpu.matmul %30, %32, %cst_17 {dimension_numbers = #tpu.dot_dimension_numbers<[1], [0], [0], [1], [0, 0, 1, 1], [], []>} : vector<32x32xbf16>, vector<32x16xbf16>, vector<32x16xf32> -> vector<32x16xf32>
    %34 = arith.addf %27, %33 : vector<32x16xf32>
    %c0_18 = arith.constant 0 : index
    %c0_19 = arith.constant 0 : index
    %35 = vector.load %arg2[%c0_18, %c0_19] : memref<1x16xf32, #tpu.memory_space<vmem>>, vector<1x16xf32>
    %36 = vector.broadcast %35 : vector<1x16xf32> to vector<32x16xf32>
    %37 = arith.mulf %34, %36 : vector<32x16xf32>
    %c0_20 = arith.constant 0 : index
    %c0_21 = arith.constant 0 : index
    %38 = vector.load %arg3[%c0_20, %c0_21] : memref<1x16xf32, #tpu.memory_space<vmem>>, vector<1x16xf32>
    %39 = vector.broadcast %38 : vector<1x16xf32> to vector<32x16xf32>
    %40 = arith.addf %37, %39 : vector<32x16xf32>
    %c0_22 = arith.constant 0 : index
    %c0_23 = arith.constant 0 : index
    %41 = vector.load %arg4[%c0_22, %c0_23] : memref<32x16xf32, #tpu.memory_space<vmem>>, vector<32x16xf32>
    tpu.vector_store %arg4[%c0_22, %c0_23], %40 {strides = array<i32>} : memref<32x16xf32, #tpu.memory_space<vmem>>, vector<32x16xf32>,
    return
  }
}

module attributes {stable_mosaic.version = 11 : i64} {
  func.func @_conv_kernel(%arg0: memref<2x3x3x64xf32, #tpu.memory_space<vmem>>, %arg1: memref<4x64x32xbf16, #tpu.memory_space<vmem>>, %arg2: memref<1x32xf32, #tpu.memory_space<vmem>>, %arg3: memref<1x32xf32, #tpu.memory_space<vmem>>, %arg4: memref<8x32xf32, #tpu.memory_space<vmem>>) attributes {dimension_semantics = [], scalar_prefetch = 0 : i64, scratch_operands = 0 : i64, tpu.core_type = #tpu.core_type<tc>} {
    %c0 = arith.constant 0 : index
    %c0_0 = arith.constant 0 : index
    %c0_1 = arith.constant 0 : index
    %c0_2 = arith.constant 0 : index
    %0 = vector.load %arg0[%c0, %c0_0, %c0_1, %c0_2] : memref<2x3x3x64xf32, #tpu.memory_space<vmem>>, vector<2x3x3x64xf32>
    %cst = arith.constant 0.000000e+00 : f32
    %1 = vector.broadcast %cst : f32 to vector<2x3x3x64xf32>
    %2 = arith.cmpf ogt, %0, %1 : vector<2x3x3x64xf32>
    %cst_3 = arith.constant 2.000000e-01 : f32
    %3 = vector.broadcast %cst_3 : f32 to vector<2x3x3x64xf32>
    %4 = arith.mulf %3, %0 : vector<2x3x3x64xf32>
    %5 = arith.select %2, %0, %4 : vector<2x3x3x64xi1>, vector<2x3x3x64xf32>
    %cst_4 = arith.constant 0.000000e+00 : f32
    %6 = vector.broadcast %cst_4 : f32 to vector<8x32xf32>
    %7 = vector.extract_strided_slice %5 {offsets = [0, 0, 0, 0], sizes = [2, 2, 2, 64], strides = [1, 1, 1, 1]} : vector<2x3x3x64xf32> to vector<2x2x2x64xf32>
    %8 = vector.shape_cast %7 : vector<2x2x2x64xf32> to vector<8x64xf32>
    %9 = arith.truncf %8 : vector<8x64xf32> to vector<8x64xbf16>
    %c0_5 = arith.constant 0 : index
    %c0_6 = arith.constant 0 : index
    %c0_7 = arith.constant 0 : index
    %10 = vector.load %arg1[%c0_5, %c0_6, %c0_7] : memref<4x64x32xbf16, #tpu.memory_space<vmem>>, vector<1x64x32xbf16>
    %11 = vector.shape_cast %10 : vector<1x64x32xbf16> to vector<64x32xbf16>
    %cst_8 = arith.constant dense<0.000000e+00> : vector<8x32xf32>
    %12 = tpu.matmul %9, %11, %cst_8 {dimension_numbers = #tpu.dot_dimension_numbers<[1], [0], [0], [1], [0, 0, 1, 1], [], []>} : vector<8x64xbf16>, vector<64x32xbf16>, vector<8x32xf32> -> vector<8x32xf32>
    %13 = arith.addf %6, %12 : vector<8x32xf32>
    %14 = vector.extract_strided_slice %5 {offsets = [0, 0, 1, 0], sizes = [2, 2, 2, 64], strides = [1, 1, 1, 1]} : vector<2x3x3x64xf32> to vector<2x2x2x64xf32>
    %15 = vector.shape_cast %14 : vector<2x2x2x64xf32> to vector<8x64xf32>
    %16 = arith.truncf %15 : vector<8x64xf32> to vector<8x64xbf16>
    %c1 = arith.constant 1 : index
    %c0_9 = arith.constant 0 : index
    %c0_10 = arith.constant 0 : index
    %17 = vector.load %arg1[%c1, %c0_9, %c0_10] : memref<4x64x32xbf16, #tpu.memory_space<vmem>>, vector<1x64x32xbf16>
    %18 = vector.shape_cast %17 : vector<1x64x32xbf16> to vector<64x32xbf16>
    %cst_11 = arith.constant dense<0.000000e+00> : vector<8x32xf32>
    %19 = tpu.matmul %16, %18, %cst_11 {dimension_numbers = #tpu.dot_dimension_numbers<[1], [0], [0], [1], [0, 0, 1, 1], [], []>} : vector<8x64xbf16>, vector<64x32xbf16>, vector<8x32xf32> -> vector<8x32xf32>
    %20 = arith.addf %13, %19 : vector<8x32xf32>
    %21 = vector.extract_strided_slice %5 {offsets = [0, 1, 0, 0], sizes = [2, 2, 2, 64], strides = [1, 1, 1, 1]} : vector<2x3x3x64xf32> to vector<2x2x2x64xf32>
    %22 = vector.shape_cast %21 : vector<2x2x2x64xf32> to vector<8x64xf32>
    %23 = arith.truncf %22 : vector<8x64xf32> to vector<8x64xbf16>
    %c2 = arith.constant 2 : index
    %c0_12 = arith.constant 0 : index
    %c0_13 = arith.constant 0 : index
    %24 = vector.load %arg1[%c2, %c0_12, %c0_13] : memref<4x64x32xbf16, #tpu.memory_space<vmem>>, vector<1x64x32xbf16>
    %25 = vector.shape_cast %24 : vector<1x64x32xbf16> to vector<64x32xbf16>
    %cst_14 = arith.constant dense<0.000000e+00> : vector<8x32xf32>
    %26 = tpu.matmul %23, %25, %cst_14 {dimension_numbers = #tpu.dot_dimension_numbers<[1], [0], [0], [1], [0, 0, 1, 1], [], []>} : vector<8x64xbf16>, vector<64x32xbf16>, vector<8x32xf32> -> vector<8x32xf32>
    %27 = arith.addf %20, %26 : vector<8x32xf32>
    %28 = vector.extract_strided_slice %5 {offsets = [0, 1, 1, 0], sizes = [2, 2, 2, 64], strides = [1, 1, 1, 1]} : vector<2x3x3x64xf32> to vector<2x2x2x64xf32>
    %29 = vector.shape_cast %28 : vector<2x2x2x64xf32> to vector<8x64xf32>
    %30 = arith.truncf %29 : vector<8x64xf32> to vector<8x64xbf16>
    %c3 = arith.constant 3 : index
    %c0_15 = arith.constant 0 : index
    %c0_16 = arith.constant 0 : index
    %31 = vector.load %arg1[%c3, %c0_15, %c0_16] : memref<4x64x32xbf16, #tpu.memory_space<vmem>>, vector<1x64x32xbf16>
    %32 = vector.shape_cast %31 : vector<1x64x32xbf16> to vector<64x32xbf16>
    %cst_17 = arith.constant dense<0.000000e+00> : vector<8x32xf32>
    %33 = tpu.matmul %30, %32, %cst_17 {dimension_numbers = #tpu.dot_dimension_numbers<[1], [0], [0], [1], [0, 0, 1, 1], [], []>} : vector<8x64xbf16>, vector<64x32xbf16>, vector<8x32xf32> -> vector<8x32xf32>
    %34 = arith.addf %27, %33 : vector<8x32xf32>
    %c0_18 = arith.constant 0 : index
    %c0_19 = arith.constant 0 : index
    %35 = vector.load %arg2[%c0_18, %c0_19] : memref<1x32xf32, #tpu.memory_space<vmem>>, vector<1x32xf32>
    %36 = vector.broadcast %35 : vector<1x32xf32> to vector<8x32xf32>
    %37 = arith.mulf %34, %36 : vector<8x32xf32>
    %c0_20 = arith.constant 0 : index
    %c0_21 = arith.constant 0 : index
    %38 = vector.load %arg3[%c0_20, %c0_21] : memref<1x32xf32, #tpu.memory_space<vmem>>, vector<1x32xf32>
    %39 = vector.broadcast %38 : vector<1x32xf32> to vector<8x32xf32>
    %40 = arith.addf %37, %39 : vector<8x32xf32>
    %c0_22 = arith.constant 0 : index
    %c0_23 = arith.constant 0 : index
    %41 = vector.load %arg4[%c0_22, %c0_23] : memref<8x32xf32, #tpu.memory_space<vmem>>, vector<8x32xf32>
    tpu.vector_store %arg4[%c0_22, %c0_23], %40 {strides = array<i32>} : memref<8x32xf32, #tpu.memory_space<vmem>>, vector<8x32xf32>,
    return
  }
}

module attributes {stable_mosaic.version = 11 : i64} {
  func.func @_conv_kernel(%arg0: memref<2x2x2x128xf32, #tpu.memory_space<vmem>>, %arg1: memref<4x128x64xbf16, #tpu.memory_space<vmem>>, %arg2: memref<1x64xf32, #tpu.memory_space<vmem>>, %arg3: memref<1x64xf32, #tpu.memory_space<vmem>>, %arg4: memref<2x64xf32, #tpu.memory_space<vmem>>) attributes {dimension_semantics = [], scalar_prefetch = 0 : i64, scratch_operands = 0 : i64, tpu.core_type = #tpu.core_type<tc>} {
    %c0 = arith.constant 0 : index
    %c0_0 = arith.constant 0 : index
    %c0_1 = arith.constant 0 : index
    %c0_2 = arith.constant 0 : index
    %0 = vector.load %arg0[%c0, %c0_0, %c0_1, %c0_2] : memref<2x2x2x128xf32, #tpu.memory_space<vmem>>, vector<2x2x2x128xf32>
    %cst = arith.constant 0.000000e+00 : f32
    %1 = vector.broadcast %cst : f32 to vector<2x2x2x128xf32>
    %2 = arith.cmpf ogt, %0, %1 : vector<2x2x2x128xf32>
    %cst_3 = arith.constant 2.000000e-01 : f32
    %3 = vector.broadcast %cst_3 : f32 to vector<2x2x2x128xf32>
    %4 = arith.mulf %3, %0 : vector<2x2x2x128xf32>
    %5 = arith.select %2, %0, %4 : vector<2x2x2x128xi1>, vector<2x2x2x128xf32>
    %cst_4 = arith.constant 0.000000e+00 : f32
    %6 = vector.broadcast %cst_4 : f32 to vector<2x64xf32>
    %7 = vector.extract_strided_slice %5 {offsets = [0, 0, 0, 0], sizes = [2, 1, 1, 128], strides = [1, 1, 1, 1]} : vector<2x2x2x128xf32> to vector<2x1x1x128xf32>
    %8 = vector.shape_cast %7 : vector<2x1x1x128xf32> to vector<2x128xf32>
    %9 = arith.truncf %8 : vector<2x128xf32> to vector<2x128xbf16>
    %c0_5 = arith.constant 0 : index
    %c0_6 = arith.constant 0 : index
    %c0_7 = arith.constant 0 : index
    %10 = vector.load %arg1[%c0_5, %c0_6, %c0_7] : memref<4x128x64xbf16, #tpu.memory_space<vmem>>, vector<1x128x64xbf16>
    %11 = vector.shape_cast %10 : vector<1x128x64xbf16> to vector<128x64xbf16>
    %cst_8 = arith.constant dense<0.000000e+00> : vector<2x64xf32>
    %12 = tpu.matmul %9, %11, %cst_8 {dimension_numbers = #tpu.dot_dimension_numbers<[1], [0], [0], [1], [0, 0, 1, 1], [], []>} : vector<2x128xbf16>, vector<128x64xbf16>, vector<2x64xf32> -> vector<2x64xf32>
    %13 = arith.addf %6, %12 : vector<2x64xf32>
    %14 = vector.extract_strided_slice %5 {offsets = [0, 0, 1, 0], sizes = [2, 1, 1, 128], strides = [1, 1, 1, 1]} : vector<2x2x2x128xf32> to vector<2x1x1x128xf32>
    %15 = vector.shape_cast %14 : vector<2x1x1x128xf32> to vector<2x128xf32>
    %16 = arith.truncf %15 : vector<2x128xf32> to vector<2x128xbf16>
    %c1 = arith.constant 1 : index
    %c0_9 = arith.constant 0 : index
    %c0_10 = arith.constant 0 : index
    %17 = vector.load %arg1[%c1, %c0_9, %c0_10] : memref<4x128x64xbf16, #tpu.memory_space<vmem>>, vector<1x128x64xbf16>
    %18 = vector.shape_cast %17 : vector<1x128x64xbf16> to vector<128x64xbf16>
    %cst_11 = arith.constant dense<0.000000e+00> : vector<2x64xf32>
    %19 = tpu.matmul %16, %18, %cst_11 {dimension_numbers = #tpu.dot_dimension_numbers<[1], [0], [0], [1], [0, 0, 1, 1], [], []>} : vector<2x128xbf16>, vector<128x64xbf16>, vector<2x64xf32> -> vector<2x64xf32>
    %20 = arith.addf %13, %19 : vector<2x64xf32>
    %21 = vector.extract_strided_slice %5 {offsets = [0, 1, 0, 0], sizes = [2, 1, 1, 128], strides = [1, 1, 1, 1]} : vector<2x2x2x128xf32> to vector<2x1x1x128xf32>
    %22 = vector.shape_cast %21 : vector<2x1x1x128xf32> to vector<2x128xf32>
    %23 = arith.truncf %22 : vector<2x128xf32> to vector<2x128xbf16>
    %c2 = arith.constant 2 : index
    %c0_12 = arith.constant 0 : index
    %c0_13 = arith.constant 0 : index
    %24 = vector.load %arg1[%c2, %c0_12, %c0_13] : memref<4x128x64xbf16, #tpu.memory_space<vmem>>, vector<1x128x64xbf16>
    %25 = vector.shape_cast %24 : vector<1x128x64xbf16> to vector<128x64xbf16>
    %cst_14 = arith.constant dense<0.000000e+00> : vector<2x64xf32>
    %26 = tpu.matmul %23, %25, %cst_14 {dimension_numbers = #tpu.dot_dimension_numbers<[1], [0], [0], [1], [0, 0, 1, 1], [], []>} : vector<2x128xbf16>, vector<128x64xbf16>, vector<2x64xf32> -> vector<2x64xf32>
    %27 = arith.addf %20, %26 : vector<2x64xf32>
    %28 = vector.extract_strided_slice %5 {offsets = [0, 1, 1, 0], sizes = [2, 1, 1, 128], strides = [1, 1, 1, 1]} : vector<2x2x2x128xf32> to vector<2x1x1x128xf32>
    %29 = vector.shape_cast %28 : vector<2x1x1x128xf32> to vector<2x128xf32>
    %30 = arith.truncf %29 : vector<2x128xf32> to vector<2x128xbf16>
    %c3 = arith.constant 3 : index
    %c0_15 = arith.constant 0 : index
    %c0_16 = arith.constant 0 : index
    %31 = vector.load %arg1[%c3, %c0_15, %c0_16] : memref<4x128x64xbf16, #tpu.memory_space<vmem>>, vector<1x128x64xbf16>
    %32 = vector.shape_cast %31 : vector<1x128x64xbf16> to vector<128x64xbf16>
    %cst_17 = arith.constant dense<0.000000e+00> : vector<2x64xf32>
    %33 = tpu.matmul %30, %32, %cst_17 {dimension_numbers = #tpu.dot_dimension_numbers<[1], [0], [0], [1], [0, 0, 1, 1], [], []>} : vector<2x128xbf16>, vector<128x64xbf16>, vector<2x64xf32> -> vector<2x64xf32>
    %34 = arith.addf %27, %33 : vector<2x64xf32>
    %c0_18 = arith.constant 0 : index
    %c0_19 = arith.constant 0 : index
    %35 = vector.load %arg2[%c0_18, %c0_19] : memref<1x64xf32, #tpu.memory_space<vmem>>, vector<1x64xf32>
    %36 = vector.broadcast %35 : vector<1x64xf32> to vector<2x64xf32>
    %37 = arith.mulf %34, %36 : vector<2x64xf32>
    %c0_20 = arith.constant 0 : index
    %c0_21 = arith.constant 0 : index
    %38 = vector.load %arg3[%c0_20, %c0_21] : memref<1x64xf32, #tpu.memory_space<vmem>>, vector<1x64xf32>
    %39 = vector.broadcast %38 : vector<1x64xf32> to vector<2x64xf32>
    %40 = arith.addf %37, %39 : vector<2x64xf32>
    %c0_22 = arith.constant 0 : index
    %c0_23 = arith.constant 0 : index
    %41 = vector.load %arg4[%c0_22, %c0_23] : memref<2x64xf32, #tpu.memory_space<vmem>>, vector<2x64xf32>
    tpu.vector_store %arg4[%c0_22, %c0_23], %40 {strides = array<i32>} : memref<2x64xf32, #tpu.memory_space<vmem>>, vector<2x64xf32>,
    return
  }
}

module attributes {stable_mosaic.version = 11 : i64} {
  func.func @_deconv_kernel(%arg0: memref<2x3x3x64xf32, #tpu.memory_space<vmem>>, %arg1: memref<16x64x32xbf16, #tpu.memory_space<vmem>>, %arg2: memref<1x32xf32, #tpu.memory_space<vmem>>, %arg3: memref<1x32xf32, #tpu.memory_space<vmem>>, %arg4: memref<4x2x32xf32, #tpu.memory_space<vmem>>) attributes {dimension_semantics = [], scalar_prefetch = 0 : i64, scratch_operands = 0 : i64, tpu.core_type = #tpu.core_type<tc>} {
    %c0 = arith.constant 0 : index
    %c0_0 = arith.constant 0 : index
    %c0_1 = arith.constant 0 : index
    %c0_2 = arith.constant 0 : index
    %0 = vector.load %arg0[%c0, %c0_0, %c0_1, %c0_2] : memref<2x3x3x64xf32, #tpu.memory_space<vmem>>, vector<2x3x3x64xf32>
    %cst = arith.constant 0.000000e+00 : f32
    %1 = vector.broadcast %cst : f32 to vector<2x3x3x64xf32>
    %2 = arith.maximumf %0, %1 : vector<2x3x3x64xf32>
    %c0_3 = arith.constant 0 : index
    %c0_4 = arith.constant 0 : index
    %3 = vector.load %arg2[%c0_3, %c0_4] : memref<1x32xf32, #tpu.memory_space<vmem>>, vector<1x32xf32>
    %c0_5 = arith.constant 0 : index
    %c0_6 = arith.constant 0 : index
    %4 = vector.load %arg3[%c0_5, %c0_6] : memref<1x32xf32, #tpu.memory_space<vmem>>, vector<1x32xf32>
    %cst_7 = arith.constant 0.000000e+00 : f32
    %5 = vector.broadcast %cst_7 : f32 to vector<2x32xf32>
    %6 = vector.extract_strided_slice %2 {offsets = [0, 0, 0, 0], sizes = [2, 1, 1, 64], strides = [1, 1, 1, 1]} : vector<2x3x3x64xf32> to vector<2x1x1x64xf32>
    %7 = vector.shape_cast %6 : vector<2x1x1x64xf32> to vector<2x64xf32>
    %8 = arith.truncf %7 : vector<2x64xf32> to vector<2x64xbf16>
    %c0_8 = arith.constant 0 : index
    %c0_9 = arith.constant 0 : index
    %c0_10 = arith.constant 0 : index
    %9 = vector.load %arg1[%c0_8, %c0_9, %c0_10] : memref<16x64x32xbf16, #tpu.memory_space<vmem>>, vector<1x64x32xbf16>
    %10 = vector.shape_cast %9 : vector<1x64x32xbf16> to vector<64x32xbf16>
    %cst_11 = arith.constant dense<0.000000e+00> : vector<2x32xf32>
    %11 = tpu.matmul %8, %10, %cst_11 {dimension_numbers = #tpu.dot_dimension_numbers<[1], [0], [0], [1], [0, 0, 1, 1], [], []>} : vector<2x64xbf16>, vector<64x32xbf16>, vector<2x32xf32> -> vector<2x32xf32>
    %12 = arith.addf %5, %11 : vector<2x32xf32>
    %13 = vector.extract_strided_slice %2 {offsets = [0, 0, 1, 0], sizes = [2, 1, 1, 64], strides = [1, 1, 1, 1]} : vector<2x3x3x64xf32> to vector<2x1x1x64xf32>
    %14 = vector.shape_cast %13 : vector<2x1x1x64xf32> to vector<2x64xf32>
    %15 = arith.truncf %14 : vector<2x64xf32> to vector<2x64xbf16>
    %c1 = arith.constant 1 : index
    %c0_12 = arith.constant 0 : index
    %c0_13 = arith.constant 0 : index
    %16 = vector.load %arg1[%c1, %c0_12, %c0_13] : memref<16x64x32xbf16, #tpu.memory_space<vmem>>, vector<1x64x32xbf16>
    %17 = vector.shape_cast %16 : vector<1x64x32xbf16> to vector<64x32xbf16>
    %cst_14 = arith.constant dense<0.000000e+00> : vector<2x32xf32>
    %18 = tpu.matmul %15, %17, %cst_14 {dimension_numbers = #tpu.dot_dimension_numbers<[1], [0], [0], [1], [0, 0, 1, 1], [], []>} : vector<2x64xbf16>, vector<64x32xbf16>, vector<2x32xf32> -> vector<2x32xf32>
    %19 = arith.addf %12, %18 : vector<2x32xf32>
    %20 = vector.extract_strided_slice %2 {offsets = [0, 1, 0, 0], sizes = [2, 1, 1, 64], strides = [1, 1, 1, 1]} : vector<2x3x3x64xf32> to vector<2x1x1x64xf32>
    %21 = vector.shape_cast %20 : vector<2x1x1x64xf32> to vector<2x64xf32>
    %22 = arith.truncf %21 : vector<2x64xf32> to vector<2x64xbf16>
    %c2 = arith.constant 2 : index
    %c0_15 = arith.constant 0 : index
    %c0_16 = arith.constant 0 : index
    %23 = vector.load %arg1[%c2, %c0_15, %c0_16] : memref<16x64x32xbf16, #tpu.memory_space<vmem>>, vector<1x64x32xbf16>
    %24 = vector.shape_cast %23 : vector<1x64x32xbf16> to vector<64x32xbf16>
    %cst_17 = arith.constant dense<0.000000e+00> : vector<2x32xf32>
    %25 = tpu.matmul %22, %24, %cst_17 {dimension_numbers = #tpu.dot_dimension_numbers<[1], [0], [0], [1], [0, 0, 1, 1], [], []>} : vector<2x64xbf16>, vector<64x32xbf16>, vector<2x32xf32> -> vector<2x32xf32>
    %26 = arith.addf %19, %25 : vector<2x32xf32>
    %27 = vector.extract_strided_slice %2 {offsets = [0, 1, 1, 0], sizes = [2, 1, 1, 64], strides = [1, 1, 1, 1]} : vector<2x3x3x64xf32> to vector<2x1x1x64xf32>
    %28 = vector.shape_cast %27 : vector<2x1x1x64xf32> to vector<2x64xf32>
    %29 = arith.truncf %28 : vector<2x64xf32> to vector<2x64xbf16>
    %c3 = arith.constant 3 : index
    %c0_18 = arith.constant 0 : index
    %c0_19 = arith.constant 0 : index
    %30 = vector.load %arg1[%c3, %c0_18, %c0_19] : memref<16x64x32xbf16, #tpu.memory_space<vmem>>, vector<1x64x32xbf16>
    %31 = vector.shape_cast %30 : vector<1x64x32xbf16> to vector<64x32xbf16>
    %cst_20 = arith.constant dense<0.000000e+00> : vector<2x32xf32>
    %32 = tpu.matmul %29, %31, %cst_20 {dimension_numbers = #tpu.dot_dimension_numbers<[1], [0], [0], [1], [0, 0, 1, 1], [], []>} : vector<2x64xbf16>, vector<64x32xbf16>, vector<2x32xf32> -> vector<2x32xf32>
    %33 = arith.addf %26, %32 : vector<2x32xf32>
    %34 = vector.broadcast %3 : vector<1x32xf32> to vector<2x32xf32>
    %35 = arith.mulf %33, %34 : vector<2x32xf32>
    %36 = vector.broadcast %4 : vector<1x32xf32> to vector<2x32xf32>
    %37 = arith.addf %35, %36 : vector<2x32xf32>
    %c0_21 = arith.constant 0 : index
    %c0_22 = arith.constant 0 : index
    %c0_23 = arith.constant 0 : index
    %38 = vector.load %arg4[%c0_21, %c0_22, %c0_23] : memref<4x2x32xf32, #tpu.memory_space<vmem>>, vector<1x2x32xf32>
    %39 = vector.shape_cast %38 : vector<1x2x32xf32> to vector<2x32xf32>
    %40 = vector.shape_cast %37 : vector<2x32xf32> to vector<1x2x32xf32>
    tpu.vector_store %arg4[%c0_21, %c0_22, %c0_23], %40 {strides = array<i32>} : memref<4x2x32xf32, #tpu.memory_space<vmem>>, vector<1x2x32xf32>,
    %cst_24 = arith.constant 0.000000e+00 : f32
    %41 = vector.broadcast %cst_24 : f32 to vector<2x32xf32>
    %42 = vector.extract_strided_slice %2 {offsets = [0, 0, 1, 0], sizes = [2, 1, 1, 64], strides = [1, 1, 1, 1]} : vector<2x3x3x64xf32> to vector<2x1x1x64xf32>
    %43 = vector.shape_cast %42 : vector<2x1x1x64xf32> to vector<2x64xf32>
    %44 = arith.truncf %43 : vector<2x64xf32> to vector<2x64xbf16>
    %c4 = arith.constant 4 : index
    %c0_25 = arith.constant 0 : index
    %c0_26 = arith.constant 0 : index
    %45 = vector.load %arg1[%c4, %c0_25, %c0_26] : memref<16x64x32xbf16, #tpu.memory_space<vmem>>, vector<1x64x32xbf16>
    %46 = vector.shape_cast %45 : vector<1x64x32xbf16> to vector<64x32xbf16>
    %cst_27 = arith.constant dense<0.000000e+00> : vector<2x32xf32>
    %47 = tpu.matmul %44, %46, %cst_27 {dimension_numbers = #tpu.dot_dimension_numbers<[1], [0], [0], [1], [0, 0, 1, 1], [], []>} : vector<2x64xbf16>, vector<64x32xbf16>, vector<2x32xf32> -> vector<2x32xf32>
    %48 = arith.addf %41, %47 : vector<2x32xf32>
    %49 = vector.extract_strided_slice %2 {offsets = [0, 0, 2, 0], sizes = [2, 1, 1, 64], strides = [1, 1, 1, 1]} : vector<2x3x3x64xf32> to vector<2x1x1x64xf32>
    %50 = vector.shape_cast %49 : vector<2x1x1x64xf32> to vector<2x64xf32>
    %51 = arith.truncf %50 : vector<2x64xf32> to vector<2x64xbf16>
    %c5 = arith.constant 5 : index
    %c0_28 = arith.constant 0 : index
    %c0_29 = arith.constant 0 : index
    %52 = vector.load %arg1[%c5, %c0_28, %c0_29] : memref<16x64x32xbf16, #tpu.memory_space<vmem>>, vector<1x64x32xbf16>
    %53 = vector.shape_cast %52 : vector<1x64x32xbf16> to vector<64x32xbf16>
    %cst_30 = arith.constant dense<0.000000e+00> : vector<2x32xf32>
    %54 = tpu.matmul %51, %53, %cst_30 {dimension_numbers = #tpu.dot_dimension_numbers<[1], [0], [0], [1], [0, 0, 1, 1], [], []>} : vector<2x64xbf16>, vector<64x32xbf16>, vector<2x32xf32> -> vector<2x32xf32>
    %55 = arith.addf %48, %54 : vector<2x32xf32>
    %56 = vector.extract_strided_slice %2 {offsets = [0, 1, 1, 0], sizes = [2, 1, 1, 64], strides = [1, 1, 1, 1]} : vector<2x3x3x64xf32> to vector<2x1x1x64xf32>
    %57 = vector.shape_cast %56 : vector<2x1x1x64xf32> to vector<2x64xf32>
    %58 = arith.truncf %57 : vector<2x64xf32> to vector<2x64xbf16>
    %c6 = arith.constant 6 : index
    %c0_31 = arith.constant 0 : index
    %c0_32 = arith.constant 0 : index
    %59 = vector.load %arg1[%c6, %c0_31, %c0_32] : memref<16x64x32xbf16, #tpu.memory_space<vmem>>, vector<1x64x32xbf16>
    %60 = vector.shape_cast %59 : vector<1x64x32xbf16> to vector<64x32xbf16>
    %cst_33 = arith.constant dense<0.000000e+00> : vector<2x32xf32>
    %61 = tpu.matmul %58, %60, %cst_33 {dimension_numbers = #tpu.dot_dimension_numbers<[1], [0], [0], [1], [0, 0, 1, 1], [], []>} : vector<2x64xbf16>, vector<64x32xbf16>, vector<2x32xf32> -> vector<2x32xf32>
    %62 = arith.addf %55, %61 : vector<2x32xf32>
    %63 = vector.extract_strided_slice %2 {offsets = [0, 1, 2, 0], sizes = [2, 1, 1, 64], strides = [1, 1, 1, 1]} : vector<2x3x3x64xf32> to vector<2x1x1x64xf32>
    %64 = vector.shape_cast %63 : vector<2x1x1x64xf32> to vector<2x64xf32>
    %65 = arith.truncf %64 : vector<2x64xf32> to vector<2x64xbf16>
    %c7 = arith.constant 7 : index
    %c0_34 = arith.constant 0 : index
    %c0_35 = arith.constant 0 : index
    %66 = vector.load %arg1[%c7, %c0_34, %c0_35] : memref<16x64x32xbf16, #tpu.memory_space<vmem>>, vector<1x64x32xbf16>
    %67 = vector.shape_cast %66 : vector<1x64x32xbf16> to vector<64x32xbf16>
    %cst_36 = arith.constant dense<0.000000e+00> : vector<2x32xf32>
    %68 = tpu.matmul %65, %67, %cst_36 {dimension_numbers = #tpu.dot_dimension_numbers<[1], [0], [0], [1], [0, 0, 1, 1], [], []>} : vector<2x64xbf16>, vector<64x32xbf16>, vector<2x32xf32> -> vector<2x32xf32>
    %69 = arith.addf %62, %68 : vector<2x32xf32>
    %70 = vector.broadcast %3 : vector<1x32xf32> to vector<2x32xf32>
    %71 = arith.mulf %69, %70 : vector<2x32xf32>
    %72 = vector.broadcast %4 : vector<1x32xf32> to vector<2x32xf32>
    %73 = arith.addf %71, %72 : vector<2x32xf32>
    %c1_37 = arith.constant 1 : index
    %c0_38 = arith.constant 0 : index
    %c0_39 = arith.constant 0 : index
    %74 = vector.load %arg4[%c1_37, %c0_38, %c0_39] : memref<4x2x32xf32, #tpu.memory_space<vmem>>, vector<1x2x32xf32>
    %75 = vector.shape_cast %74 : vector<1x2x32xf32> to vector<2x32xf32>
    %76 = vector.shape_cast %73 : vector<2x32xf32> to vector<1x2x32xf32>
    tpu.vector_store %arg4[%c1_37, %c0_38, %c0_39], %76 {strides = array<i32>} : memref<4x2x32xf32, #tpu.memory_space<vmem>>, vector<1x2x32xf32>,
    %cst_40 = arith.constant 0.000000e+00 : f32
    %77 = vector.broadcast %cst_40 : f32 to vector<2x32xf32>
    %78 = vector.extract_strided_slice %2 {offsets = [0, 1, 0, 0], sizes = [2, 1, 1, 64], strides = [1, 1, 1, 1]} : vector<2x3x3x64xf32> to vector<2x1x1x64xf32>
    %79 = vector.shape_cast %78 : vector<2x1x1x64xf32> to vector<2x64xf32>
    %80 = arith.truncf %79 : vector<2x64xf32> to vector<2x64xbf16>
    %c8 = arith.constant 8 : index
    %c0_41 = arith.constant 0 : index
    %c0_42 = arith.constant 0 : index
    %81 = vector.load %arg1[%c8, %c0_41, %c0_42] : memref<16x64x32xbf16, #tpu.memory_space<vmem>>, vector<1x64x32xbf16>
    %82 = vector.shape_cast %81 : vector<1x64x32xbf16> to vector<64x32xbf16>
    %cst_43 = arith.constant dense<0.000000e+00> : vector<2x32xf32>
    %83 = tpu.matmul %80, %82, %cst_43 {dimension_numbers = #tpu.dot_dimension_numbers<[1], [0], [0], [1], [0, 0, 1, 1], [], []>} : vector<2x64xbf16>, vector<64x32xbf16>, vector<2x32xf32> -> vector<2x32xf32>
    %84 = arith.addf %77, %83 : vector<2x32xf32>
    %85 = vector.extract_strided_slice %2 {offsets = [0, 1, 1, 0], sizes = [2, 1, 1, 64], strides = [1, 1, 1, 1]} : vector<2x3x3x64xf32> to vector<2x1x1x64xf32>
    %86 = vector.shape_cast %85 : vector<2x1x1x64xf32> to vector<2x64xf32>
    %87 = arith.truncf %86 : vector<2x64xf32> to vector<2x64xbf16>
    %c9 = arith.constant 9 : index
    %c0_44 = arith.constant 0 : index
    %c0_45 = arith.constant 0 : index
    %88 = vector.load %arg1[%c9, %c0_44, %c0_45] : memref<16x64x32xbf16, #tpu.memory_space<vmem>>, vector<1x64x32xbf16>
    %89 = vector.shape_cast %88 : vector<1x64x32xbf16> to vector<64x32xbf16>
    %cst_46 = arith.constant dense<0.000000e+00> : vector<2x32xf32>
    %90 = tpu.matmul %87, %89, %cst_46 {dimension_numbers = #tpu.dot_dimension_numbers<[1], [0], [0], [1], [0, 0, 1, 1], [], []>} : vector<2x64xbf16>, vector<64x32xbf16>, vector<2x32xf32> -> vector<2x32xf32>
    %91 = arith.addf %84, %90 : vector<2x32xf32>
    %92 = vector.extract_strided_slice %2 {offsets = [0, 2, 0, 0], sizes = [2, 1, 1, 64], strides = [1, 1, 1, 1]} : vector<2x3x3x64xf32> to vector<2x1x1x64xf32>
    %93 = vector.shape_cast %92 : vector<2x1x1x64xf32> to vector<2x64xf32>
    %94 = arith.truncf %93 : vector<2x64xf32> to vector<2x64xbf16>
    %c10 = arith.constant 10 : index
    %c0_47 = arith.constant 0 : index
    %c0_48 = arith.constant 0 : index
    %95 = vector.load %arg1[%c10, %c0_47, %c0_48] : memref<16x64x32xbf16, #tpu.memory_space<vmem>>, vector<1x64x32xbf16>
    %96 = vector.shape_cast %95 : vector<1x64x32xbf16> to vector<64x32xbf16>
    %cst_49 = arith.constant dense<0.000000e+00> : vector<2x32xf32>
    %97 = tpu.matmul %94, %96, %cst_49 {dimension_numbers = #tpu.dot_dimension_numbers<[1], [0], [0], [1], [0, 0, 1, 1], [], []>} : vector<2x64xbf16>, vector<64x32xbf16>, vector<2x32xf32> -> vector<2x32xf32>
    %98 = arith.addf %91, %97 : vector<2x32xf32>
    %99 = vector.extract_strided_slice %2 {offsets = [0, 2, 1, 0], sizes = [2, 1, 1, 64], strides = [1, 1, 1, 1]} : vector<2x3x3x64xf32> to vector<2x1x1x64xf32>
    %100 = vector.shape_cast %99 : vector<2x1x1x64xf32> to vector<2x64xf32>
    %101 = arith.truncf %100 : vector<2x64xf32> to vector<2x64xbf16>
    %c11 = arith.constant 11 : index
    %c0_50 = arith.constant 0 : index
    %c0_51 = arith.constant 0 : index
    %102 = vector.load %arg1[%c11, %c0_50, %c0_51] : memref<16x64x32xbf16, #tpu.memory_space<vmem>>, vector<1x64x32xbf16>
    %103 = vector.shape_cast %102 : vector<1x64x32xbf16> to vector<64x32xbf16>
    %cst_52 = arith.constant dense<0.000000e+00> : vector<2x32xf32>
    %104 = tpu.matmul %101, %103, %cst_52 {dimension_numbers = #tpu.dot_dimension_numbers<[1], [0], [0], [1], [0, 0, 1, 1], [], []>} : vector<2x64xbf16>, vector<64x32xbf16>, vector<2x32xf32> -> vector<2x32xf32>
    %105 = arith.addf %98, %104 : vector<2x32xf32>
    %106 = vector.broadcast %3 : vector<1x32xf32> to vector<2x32xf32>
    %107 = arith.mulf %105, %106 : vector<2x32xf32>
    %108 = vector.broadcast %4 : vector<1x32xf32> to vector<2x32xf32>
    %109 = arith.addf %107, %108 : vector<2x32xf32>
    %c2_53 = arith.constant 2 : index
    %c0_54 = arith.constant 0 : index
    %c0_55 = arith.constant 0 : index
    %110 = vector.load %arg4[%c2_53, %c0_54, %c0_55] : memref<4x2x32xf32, #tpu.memory_space<vmem>>, vector<1x2x32xf32>
    %111 = vector.shape_cast %110 : vector<1x2x32xf32> to vector<2x32xf32>
    %112 = vector.shape_cast %109 : vector<2x32xf32> to vector<1x2x32xf32>
    tpu.vector_store %arg4[%c2_53, %c0_54, %c0_55], %112 {strides = array<i32>} : memref<4x2x32xf32, #tpu.memory_space<vmem>>, vector<1x2x32xf32>,
    %cst_56 = arith.constant 0.000000e+00 : f32
    %113 = vector.broadcast %cst_56 : f32 to vector<2x32xf32>
    %114 = vector.extract_strided_slice %2 {offsets = [0, 1, 1, 0], sizes = [2, 1, 1, 64], strides = [1, 1, 1, 1]} : vector<2x3x3x64xf32> to vector<2x1x1x64xf32>
    %115 = vector.shape_cast %114 : vector<2x1x1x64xf32> to vector<2x64xf32>
    %116 = arith.truncf %115 : vector<2x64xf32> to vector<2x64xbf16>
    %c12 = arith.constant 12 : index
    %c0_57 = arith.constant 0 : index
    %c0_58 = arith.constant 0 : index
    %117 = vector.load %arg1[%c12, %c0_57, %c0_58] : memref<16x64x32xbf16, #tpu.memory_space<vmem>>, vector<1x64x32xbf16>
    %118 = vector.shape_cast %117 : vector<1x64x32xbf16> to vector<64x32xbf16>
    %cst_59 = arith.constant dense<0.000000e+00> : vector<2x32xf32>
    %119 = tpu.matmul %116, %118, %cst_59 {dimension_numbers = #tpu.dot_dimension_numbers<[1], [0], [0], [1], [0, 0, 1, 1], [], []>} : vector<2x64xbf16>, vector<64x32xbf16>, vector<2x32xf32> -> vector<2x32xf32>
    %120 = arith.addf %113, %119 : vector<2x32xf32>
    %121 = vector.extract_strided_slice %2 {offsets = [0, 1, 2, 0], sizes = [2, 1, 1, 64], strides = [1, 1, 1, 1]} : vector<2x3x3x64xf32> to vector<2x1x1x64xf32>
    %122 = vector.shape_cast %121 : vector<2x1x1x64xf32> to vector<2x64xf32>
    %123 = arith.truncf %122 : vector<2x64xf32> to vector<2x64xbf16>
    %c13 = arith.constant 13 : index
    %c0_60 = arith.constant 0 : index
    %c0_61 = arith.constant 0 : index
    %124 = vector.load %arg1[%c13, %c0_60, %c0_61] : memref<16x64x32xbf16, #tpu.memory_space<vmem>>, vector<1x64x32xbf16>
    %125 = vector.shape_cast %124 : vector<1x64x32xbf16> to vector<64x32xbf16>
    %cst_62 = arith.constant dense<0.000000e+00> : vector<2x32xf32>
    %126 = tpu.matmul %123, %125, %cst_62 {dimension_numbers = #tpu.dot_dimension_numbers<[1], [0], [0], [1], [0, 0, 1, 1], [], []>} : vector<2x64xbf16>, vector<64x32xbf16>, vector<2x32xf32> -> vector<2x32xf32>
    %127 = arith.addf %120, %126 : vector<2x32xf32>
    %128 = vector.extract_strided_slice %2 {offsets = [0, 2, 1, 0], sizes = [2, 1, 1, 64], strides = [1, 1, 1, 1]} : vector<2x3x3x64xf32> to vector<2x1x1x64xf32>
    %129 = vector.shape_cast %128 : vector<2x1x1x64xf32> to vector<2x64xf32>
    %130 = arith.truncf %129 : vector<2x64xf32> to vector<2x64xbf16>
    %c14 = arith.constant 14 : index
    %c0_63 = arith.constant 0 : index
    %c0_64 = arith.constant 0 : index
    %131 = vector.load %arg1[%c14, %c0_63, %c0_64] : memref<16x64x32xbf16, #tpu.memory_space<vmem>>, vector<1x64x32xbf16>
    %132 = vector.shape_cast %131 : vector<1x64x32xbf16> to vector<64x32xbf16>
    %cst_65 = arith.constant dense<0.000000e+00> : vector<2x32xf32>
    %133 = tpu.matmul %130, %132, %cst_65 {dimension_numbers = #tpu.dot_dimension_numbers<[1], [0], [0], [1], [0, 0, 1, 1], [], []>} : vector<2x64xbf16>, vector<64x32xbf16>, vector<2x32xf32> -> vector<2x32xf32>
    %134 = arith.addf %127, %133 : vector<2x32xf32>
    %135 = vector.extract_strided_slice %2 {offsets = [0, 2, 2, 0], sizes = [2, 1, 1, 64], strides = [1, 1, 1, 1]} : vector<2x3x3x64xf32> to vector<2x1x1x64xf32>
    %136 = vector.shape_cast %135 : vector<2x1x1x64xf32> to vector<2x64xf32>
    %137 = arith.truncf %136 : vector<2x64xf32> to vector<2x64xbf16>
    %c15 = arith.constant 15 : index
    %c0_66 = arith.constant 0 : index
    %c0_67 = arith.constant 0 : index
    %138 = vector.load %arg1[%c15, %c0_66, %c0_67] : memref<16x64x32xbf16, #tpu.memory_space<vmem>>, vector<1x64x32xbf16>
    %139 = vector.shape_cast %138 : vector<1x64x32xbf16> to vector<64x32xbf16>
    %cst_68 = arith.constant dense<0.000000e+00> : vector<2x32xf32>
    %140 = tpu.matmul %137, %139, %cst_68 {dimension_numbers = #tpu.dot_dimension_numbers<[1], [0], [0], [1], [0, 0, 1, 1], [], []>} : vector<2x64xbf16>, vector<64x32xbf16>, vector<2x32xf32> -> vector<2x32xf32>
    %141 = arith.addf %134, %140 : vector<2x32xf32>
    %142 = vector.broadcast %3 : vector<1x32xf32> to vector<2x32xf32>
    %143 = arith.mulf %141, %142 : vector<2x32xf32>
    %144 = vector.broadcast %4 : vector<1x32xf32> to vector<2x32xf32>
    %145 = arith.addf %143, %144 : vector<2x32xf32>
    %c3_69 = arith.constant 3 : index
    %c0_70 = arith.constant 0 : index
    %c0_71 = arith.constant 0 : index
    %146 = vector.load %arg4[%c3_69, %c0_70, %c0_71] : memref<4x2x32xf32, #tpu.memory_space<vmem>>, vector<1x2x32xf32>
    %147 = vector.shape_cast %146 : vector<1x2x32xf32> to vector<2x32xf32>
    %148 = vector.shape_cast %145 : vector<2x32xf32> to vector<1x2x32xf32>
    tpu.vector_store %arg4[%c3_69, %c0_70, %c0_71], %148 {strides = array<i32>} : memref<4x2x32xf32, #tpu.memory_space<vmem>>, vector<1x2x32xf32>,
    return
  }
}

module attributes {stable_mosaic.version = 11 : i64} {
  func.func @_deconv_kernel(%arg0: memref<2x4x4x32xf32, #tpu.memory_space<vmem>>, %arg1: memref<2x4x4x32xf32, #tpu.memory_space<vmem>>, %arg2: memref<16x32x16xbf16, #tpu.memory_space<vmem>>, %arg3: memref<16x32x16xbf16, #tpu.memory_space<vmem>>, %arg4: memref<1x16xf32, #tpu.memory_space<vmem>>, %arg5: memref<1x16xf32, #tpu.memory_space<vmem>>, %arg6: memref<4x8x16xf32, #tpu.memory_space<vmem>>) attributes {dimension_semantics = [], scalar_prefetch = 0 : i64, scratch_operands = 0 : i64, tpu.core_type = #tpu.core_type<tc>} {
    %c0 = arith.constant 0 : index
    %c0_0 = arith.constant 0 : index
    %c0_1 = arith.constant 0 : index
    %c0_2 = arith.constant 0 : index
    %0 = vector.load %arg0[%c0, %c0_0, %c0_1, %c0_2] : memref<2x4x4x32xf32, #tpu.memory_space<vmem>>, vector<2x4x4x32xf32>
    %cst = arith.constant 0.000000e+00 : f32
    %1 = vector.broadcast %cst : f32 to vector<2x4x4x32xf32>
    %2 = arith.maximumf %0, %1 : vector<2x4x4x32xf32>
    %c0_3 = arith.constant 0 : index
    %c0_4 = arith.constant 0 : index
    %c0_5 = arith.constant 0 : index
    %c0_6 = arith.constant 0 : index
    %3 = vector.load %arg1[%c0_3, %c0_4, %c0_5, %c0_6] : memref<2x4x4x32xf32, #tpu.memory_space<vmem>>, vector<2x4x4x32xf32>
    %cst_7 = arith.constant 0.000000e+00 : f32
    %4 = vector.broadcast %cst_7 : f32 to vector<2x4x4x32xf32>
    %5 = arith.maximumf %3, %4 : vector<2x4x4x32xf32>
    %c0_8 = arith.constant 0 : index
    %c0_9 = arith.constant 0 : index
    %6 = vector.load %arg4[%c0_8, %c0_9] : memref<1x16xf32, #tpu.memory_space<vmem>>, vector<1x16xf32>
    %c0_10 = arith.constant 0 : index
    %c0_11 = arith.constant 0 : index
    %7 = vector.load %arg5[%c0_10, %c0_11] : memref<1x16xf32, #tpu.memory_space<vmem>>, vector<1x16xf32>
    %cst_12 = arith.constant 0.000000e+00 : f32
    %8 = vector.broadcast %cst_12 : f32 to vector<8x16xf32>
    %9 = vector.extract_strided_slice %2 {offsets = [0, 0, 0, 0], sizes = [2, 2, 2, 32], strides = [1, 1, 1, 1]} : vector<2x4x4x32xf32> to vector<2x2x2x32xf32>
    %10 = vector.shape_cast %9 : vector<2x2x2x32xf32> to vector<8x32xf32>
    %11 = arith.truncf %10 : vector<8x32xf32> to vector<8x32xbf16>
    %c0_13 = arith.constant 0 : index
    %c0_14 = arith.constant 0 : index
    %c0_15 = arith.constant 0 : index
    %12 = vector.load %arg2[%c0_13, %c0_14, %c0_15] : memref<16x32x16xbf16, #tpu.memory_space<vmem>>, vector<1x32x16xbf16>
    %13 = vector.shape_cast %12 : vector<1x32x16xbf16> to vector<32x16xbf16>
    %cst_16 = arith.constant dense<0.000000e+00> : vector<8x16xf32>
    %14 = tpu.matmul %11, %13, %cst_16 {dimension_numbers = #tpu.dot_dimension_numbers<[1], [0], [0], [1], [0, 0, 1, 1], [], []>} : vector<8x32xbf16>, vector<32x16xbf16>, vector<8x16xf32> -> vector<8x16xf32>
    %15 = arith.addf %8, %14 : vector<8x16xf32>
    %16 = vector.extract_strided_slice %2 {offsets = [0, 0, 1, 0], sizes = [2, 2, 2, 32], strides = [1, 1, 1, 1]} : vector<2x4x4x32xf32> to vector<2x2x2x32xf32>
    %17 = vector.shape_cast %16 : vector<2x2x2x32xf32> to vector<8x32xf32>
    %18 = arith.truncf %17 : vector<8x32xf32> to vector<8x32xbf16>
    %c1 = arith.constant 1 : index
    %c0_17 = arith.constant 0 : index
    %c0_18 = arith.constant 0 : index
    %19 = vector.load %arg2[%c1, %c0_17, %c0_18] : memref<16x32x16xbf16, #tpu.memory_space<vmem>>, vector<1x32x16xbf16>
    %20 = vector.shape_cast %19 : vector<1x32x16xbf16> to vector<32x16xbf16>
    %cst_19 = arith.constant dense<0.000000e+00> : vector<8x16xf32>
    %21 = tpu.matmul %18, %20, %cst_19 {dimension_numbers = #tpu.dot_dimension_numbers<[1], [0], [0], [1], [0, 0, 1, 1], [], []>} : vector<8x32xbf16>, vector<32x16xbf16>, vector<8x16xf32> -> vector<8x16xf32>
    %22 = arith.addf %15, %21 : vector<8x16xf32>
    %23 = vector.extract_strided_slice %2 {offsets = [0, 1, 0, 0], sizes = [2, 2, 2, 32], strides = [1, 1, 1, 1]} : vector<2x4x4x32xf32> to vector<2x2x2x32xf32>
    %24 = vector.shape_cast %23 : vector<2x2x2x32xf32> to vector<8x32xf32>
    %25 = arith.truncf %24 : vector<8x32xf32> to vector<8x32xbf16>
    %c2 = arith.constant 2 : index
    %c0_20 = arith.constant 0 : index
    %c0_21 = arith.constant 0 : index
    %26 = vector.load %arg2[%c2, %c0_20, %c0_21] : memref<16x32x16xbf16, #tpu.memory_space<vmem>>, vector<1x32x16xbf16>
    %27 = vector.shape_cast %26 : vector<1x32x16xbf16> to vector<32x16xbf16>
    %cst_22 = arith.constant dense<0.000000e+00> : vector<8x16xf32>
    %28 = tpu.matmul %25, %27, %cst_22 {dimension_numbers = #tpu.dot_dimension_numbers<[1], [0], [0], [1], [0, 0, 1, 1], [], []>} : vector<8x32xbf16>, vector<32x16xbf16>, vector<8x16xf32> -> vector<8x16xf32>
    %29 = arith.addf %22, %28 : vector<8x16xf32>
    %30 = vector.extract_strided_slice %2 {offsets = [0, 1, 1, 0], sizes = [2, 2, 2, 32], strides = [1, 1, 1, 1]} : vector<2x4x4x32xf32> to vector<2x2x2x32xf32>
    %31 = vector.shape_cast %30 : vector<2x2x2x32xf32> to vector<8x32xf32>
    %32 = arith.truncf %31 : vector<8x32xf32> to vector<8x32xbf16>
    %c3 = arith.constant 3 : index
    %c0_23 = arith.constant 0 : index
    %c0_24 = arith.constant 0 : index
    %33 = vector.load %arg2[%c3, %c0_23, %c0_24] : memref<16x32x16xbf16, #tpu.memory_space<vmem>>, vector<1x32x16xbf16>
    %34 = vector.shape_cast %33 : vector<1x32x16xbf16> to vector<32x16xbf16>
    %cst_25 = arith.constant dense<0.000000e+00> : vector<8x16xf32>
    %35 = tpu.matmul %32, %34, %cst_25 {dimension_numbers = #tpu.dot_dimension_numbers<[1], [0], [0], [1], [0, 0, 1, 1], [], []>} : vector<8x32xbf16>, vector<32x16xbf16>, vector<8x16xf32> -> vector<8x16xf32>
    %36 = arith.addf %29, %35 : vector<8x16xf32>
    %37 = vector.extract_strided_slice %5 {offsets = [0, 0, 0, 0], sizes = [2, 2, 2, 32], strides = [1, 1, 1, 1]} : vector<2x4x4x32xf32> to vector<2x2x2x32xf32>
    %38 = vector.shape_cast %37 : vector<2x2x2x32xf32> to vector<8x32xf32>
    %39 = arith.truncf %38 : vector<8x32xf32> to vector<8x32xbf16>
    %c0_26 = arith.constant 0 : index
    %c0_27 = arith.constant 0 : index
    %c0_28 = arith.constant 0 : index
    %40 = vector.load %arg3[%c0_26, %c0_27, %c0_28] : memref<16x32x16xbf16, #tpu.memory_space<vmem>>, vector<1x32x16xbf16>
    %41 = vector.shape_cast %40 : vector<1x32x16xbf16> to vector<32x16xbf16>
    %cst_29 = arith.constant dense<0.000000e+00> : vector<8x16xf32>
    %42 = tpu.matmul %39, %41, %cst_29 {dimension_numbers = #tpu.dot_dimension_numbers<[1], [0], [0], [1], [0, 0, 1, 1], [], []>} : vector<8x32xbf16>, vector<32x16xbf16>, vector<8x16xf32> -> vector<8x16xf32>
    %43 = arith.addf %36, %42 : vector<8x16xf32>
    %44 = vector.extract_strided_slice %5 {offsets = [0, 0, 1, 0], sizes = [2, 2, 2, 32], strides = [1, 1, 1, 1]} : vector<2x4x4x32xf32> to vector<2x2x2x32xf32>
    %45 = vector.shape_cast %44 : vector<2x2x2x32xf32> to vector<8x32xf32>
    %46 = arith.truncf %45 : vector<8x32xf32> to vector<8x32xbf16>
    %c1_30 = arith.constant 1 : index
    %c0_31 = arith.constant 0 : index
    %c0_32 = arith.constant 0 : index
    %47 = vector.load %arg3[%c1_30, %c0_31, %c0_32] : memref<16x32x16xbf16, #tpu.memory_space<vmem>>, vector<1x32x16xbf16>
    %48 = vector.shape_cast %47 : vector<1x32x16xbf16> to vector<32x16xbf16>
    %cst_33 = arith.constant dense<0.000000e+00> : vector<8x16xf32>
    %49 = tpu.matmul %46, %48, %cst_33 {dimension_numbers = #tpu.dot_dimension_numbers<[1], [0], [0], [1], [0, 0, 1, 1], [], []>} : vector<8x32xbf16>, vector<32x16xbf16>, vector<8x16xf32> -> vector<8x16xf32>
    %50 = arith.addf %43, %49 : vector<8x16xf32>
    %51 = vector.extract_strided_slice %5 {offsets = [0, 1, 0, 0], sizes = [2, 2, 2, 32], strides = [1, 1, 1, 1]} : vector<2x4x4x32xf32> to vector<2x2x2x32xf32>
    %52 = vector.shape_cast %51 : vector<2x2x2x32xf32> to vector<8x32xf32>
    %53 = arith.truncf %52 : vector<8x32xf32> to vector<8x32xbf16>
    %c2_34 = arith.constant 2 : index
    %c0_35 = arith.constant 0 : index
    %c0_36 = arith.constant 0 : index
    %54 = vector.load %arg3[%c2_34, %c0_35, %c0_36] : memref<16x32x16xbf16, #tpu.memory_space<vmem>>, vector<1x32x16xbf16>
    %55 = vector.shape_cast %54 : vector<1x32x16xbf16> to vector<32x16xbf16>
    %cst_37 = arith.constant dense<0.000000e+00> : vector<8x16xf32>
    %56 = tpu.matmul %53, %55, %cst_37 {dimension_numbers = #tpu.dot_dimension_numbers<[1], [0], [0], [1], [0, 0, 1, 1], [], []>} : vector<8x32xbf16>, vector<32x16xbf16>, vector<8x16xf32> -> vector<8x16xf32>
    %57 = arith.addf %50, %56 : vector<8x16xf32>
    %58 = vector.extract_strided_slice %5 {offsets = [0, 1, 1, 0], sizes = [2, 2, 2, 32], strides = [1, 1, 1, 1]} : vector<2x4x4x32xf32> to vector<2x2x2x32xf32>
    %59 = vector.shape_cast %58 : vector<2x2x2x32xf32> to vector<8x32xf32>
    %60 = arith.truncf %59 : vector<8x32xf32> to vector<8x32xbf16>
    %c3_38 = arith.constant 3 : index
    %c0_39 = arith.constant 0 : index
    %c0_40 = arith.constant 0 : index
    %61 = vector.load %arg3[%c3_38, %c0_39, %c0_40] : memref<16x32x16xbf16, #tpu.memory_space<vmem>>, vector<1x32x16xbf16>
    %62 = vector.shape_cast %61 : vector<1x32x16xbf16> to vector<32x16xbf16>
    %cst_41 = arith.constant dense<0.000000e+00> : vector<8x16xf32>
    %63 = tpu.matmul %60, %62, %cst_41 {dimension_numbers = #tpu.dot_dimension_numbers<[1], [0], [0], [1], [0, 0, 1, 1], [], []>} : vector<8x32xbf16>, vector<32x16xbf16>, vector<8x16xf32> -> vector<8x16xf32>
    %64 = arith.addf %57, %63 : vector<8x16xf32>
    %65 = vector.broadcast %6 : vector<1x16xf32> to vector<8x16xf32>
    %66 = arith.mulf %64, %65 : vector<8x16xf32>
    %67 = vector.broadcast %7 : vector<1x16xf32> to vector<8x16xf32>
    %68 = arith.addf %66, %67 : vector<8x16xf32>
    %c0_42 = arith.constant 0 : index
    %c0_43 = arith.constant 0 : index
    %c0_44 = arith.constant 0 : index
    %69 = vector.load %arg6[%c0_42, %c0_43, %c0_44] : memref<4x8x16xf32, #tpu.memory_space<vmem>>, vector<1x8x16xf32>
    %70 = vector.shape_cast %69 : vector<1x8x16xf32> to vector<8x16xf32>
    %71 = vector.shape_cast %68 : vector<8x16xf32> to vector<1x8x16xf32>
    tpu.vector_store %arg6[%c0_42, %c0_43, %c0_44], %71 {strides = array<i32>} : memref<4x8x16xf32, #tpu.memory_space<vmem>>, vector<1x8x16xf32>,
    %cst_45 = arith.constant 0.000000e+00 : f32
    %72 = vector.broadcast %cst_45 : f32 to vector<8x16xf32>
    %73 = vector.extract_strided_slice %2 {offsets = [0, 0, 1, 0], sizes = [2, 2, 2, 32], strides = [1, 1, 1, 1]} : vector<2x4x4x32xf32> to vector<2x2x2x32xf32>
    %74 = vector.shape_cast %73 : vector<2x2x2x32xf32> to vector<8x32xf32>
    %75 = arith.truncf %74 : vector<8x32xf32> to vector<8x32xbf16>
    %c4 = arith.constant 4 : index
    %c0_46 = arith.constant 0 : index
    %c0_47 = arith.constant 0 : index
    %76 = vector.load %arg2[%c4, %c0_46, %c0_47] : memref<16x32x16xbf16, #tpu.memory_space<vmem>>, vector<1x32x16xbf16>
    %77 = vector.shape_cast %76 : vector<1x32x16xbf16> to vector<32x16xbf16>
    %cst_48 = arith.constant dense<0.000000e+00> : vector<8x16xf32>
    %78 = tpu.matmul %75, %77, %cst_48 {dimension_numbers = #tpu.dot_dimension_numbers<[1], [0], [0], [1], [0, 0, 1, 1], [], []>} : vector<8x32xbf16>, vector<32x16xbf16>, vector<8x16xf32> -> vector<8x16xf32>
    %79 = arith.addf %72, %78 : vector<8x16xf32>
    %80 = vector.extract_strided_slice %2 {offsets = [0, 0, 2, 0], sizes = [2, 2, 2, 32], strides = [1, 1, 1, 1]} : vector<2x4x4x32xf32> to vector<2x2x2x32xf32>
    %81 = vector.shape_cast %80 : vector<2x2x2x32xf32> to vector<8x32xf32>
    %82 = arith.truncf %81 : vector<8x32xf32> to vector<8x32xbf16>
    %c5 = arith.constant 5 : index
    %c0_49 = arith.constant 0 : index
    %c0_50 = arith.constant 0 : index
    %83 = vector.load %arg2[%c5, %c0_49, %c0_50] : memref<16x32x16xbf16, #tpu.memory_space<vmem>>, vector<1x32x16xbf16>
    %84 = vector.shape_cast %83 : vector<1x32x16xbf16> to vector<32x16xbf16>
    %cst_51 = arith.constant dense<0.000000e+00> : vector<8x16xf32>
    %85 = tpu.matmul %82, %84, %cst_51 {dimension_numbers = #tpu.dot_dimension_numbers<[1], [0], [0], [1], [0, 0, 1, 1], [], []>} : vector<8x32xbf16>, vector<32x16xbf16>, vector<8x16xf32> -> vector<8x16xf32>
    %86 = arith.addf %79, %85 : vector<8x16xf32>
    %87 = vector.extract_strided_slice %2 {offsets = [0, 1, 1, 0], sizes = [2, 2, 2, 32], strides = [1, 1, 1, 1]} : vector<2x4x4x32xf32> to vector<2x2x2x32xf32>
    %88 = vector.shape_cast %87 : vector<2x2x2x32xf32> to vector<8x32xf32>
    %89 = arith.truncf %88 : vector<8x32xf32> to vector<8x32xbf16>
    %c6 = arith.constant 6 : index
    %c0_52 = arith.constant 0 : index
    %c0_53 = arith.constant 0 : index
    %90 = vector.load %arg2[%c6, %c0_52, %c0_53] : memref<16x32x16xbf16, #tpu.memory_space<vmem>>, vector<1x32x16xbf16>
    %91 = vector.shape_cast %90 : vector<1x32x16xbf16> to vector<32x16xbf16>
    %cst_54 = arith.constant dense<0.000000e+00> : vector<8x16xf32>
    %92 = tpu.matmul %89, %91, %cst_54 {dimension_numbers = #tpu.dot_dimension_numbers<[1], [0], [0], [1], [0, 0, 1, 1], [], []>} : vector<8x32xbf16>, vector<32x16xbf16>, vector<8x16xf32> -> vector<8x16xf32>
    %93 = arith.addf %86, %92 : vector<8x16xf32>
    %94 = vector.extract_strided_slice %2 {offsets = [0, 1, 2, 0], sizes = [2, 2, 2, 32], strides = [1, 1, 1, 1]} : vector<2x4x4x32xf32> to vector<2x2x2x32xf32>
    %95 = vector.shape_cast %94 : vector<2x2x2x32xf32> to vector<8x32xf32>
    %96 = arith.truncf %95 : vector<8x32xf32> to vector<8x32xbf16>
    %c7 = arith.constant 7 : index
    %c0_55 = arith.constant 0 : index
    %c0_56 = arith.constant 0 : index
    %97 = vector.load %arg2[%c7, %c0_55, %c0_56] : memref<16x32x16xbf16, #tpu.memory_space<vmem>>, vector<1x32x16xbf16>
    %98 = vector.shape_cast %97 : vector<1x32x16xbf16> to vector<32x16xbf16>
    %cst_57 = arith.constant dense<0.000000e+00> : vector<8x16xf32>
    %99 = tpu.matmul %96, %98, %cst_57 {dimension_numbers = #tpu.dot_dimension_numbers<[1], [0], [0], [1], [0, 0, 1, 1], [], []>} : vector<8x32xbf16>, vector<32x16xbf16>, vector<8x16xf32> -> vector<8x16xf32>
    %100 = arith.addf %93, %99 : vector<8x16xf32>
    %101 = vector.extract_strided_slice %5 {offsets = [0, 0, 1, 0], sizes = [2, 2, 2, 32], strides = [1, 1, 1, 1]} : vector<2x4x4x32xf32> to vector<2x2x2x32xf32>
    %102 = vector.shape_cast %101 : vector<2x2x2x32xf32> to vector<8x32xf32>
    %103 = arith.truncf %102 : vector<8x32xf32> to vector<8x32xbf16>
    %c4_58 = arith.constant 4 : index
    %c0_59 = arith.constant 0 : index
    %c0_60 = arith.constant 0 : index
    %104 = vector.load %arg3[%c4_58, %c0_59, %c0_60] : memref<16x32x16xbf16, #tpu.memory_space<vmem>>, vector<1x32x16xbf16>
    %105 = vector.shape_cast %104 : vector<1x32x16xbf16> to vector<32x16xbf16>
    %cst_61 = arith.constant dense<0.000000e+00> : vector<8x16xf32>
    %106 = tpu.matmul %103, %105, %cst_61 {dimension_numbers = #tpu.dot_dimension_numbers<[1], [0], [0], [1], [0, 0, 1, 1], [], []>} : vector<8x32xbf16>, vector<32x16xbf16>, vector<8x16xf32> -> vector<8x16xf32>
    %107 = arith.addf %100, %106 : vector<8x16xf32>
    %108 = vector.extract_strided_slice %5 {offsets = [0, 0, 2, 0], sizes = [2, 2, 2, 32], strides = [1, 1, 1, 1]} : vector<2x4x4x32xf32> to vector<2x2x2x32xf32>
    %109 = vector.shape_cast %108 : vector<2x2x2x32xf32> to vector<8x32xf32>
    %110 = arith.truncf %109 : vector<8x32xf32> to vector<8x32xbf16>
    %c5_62 = arith.constant 5 : index
    %c0_63 = arith.constant 0 : index
    %c0_64 = arith.constant 0 : index
    %111 = vector.load %arg3[%c5_62, %c0_63, %c0_64] : memref<16x32x16xbf16, #tpu.memory_space<vmem>>, vector<1x32x16xbf16>
    %112 = vector.shape_cast %111 : vector<1x32x16xbf16> to vector<32x16xbf16>
    %cst_65 = arith.constant dense<0.000000e+00> : vector<8x16xf32>
    %113 = tpu.matmul %110, %112, %cst_65 {dimension_numbers = #tpu.dot_dimension_numbers<[1], [0], [0], [1], [0, 0, 1, 1], [], []>} : vector<8x32xbf16>, vector<32x16xbf16>, vector<8x16xf32> -> vector<8x16xf32>
    %114 = arith.addf %107, %113 : vector<8x16xf32>
    %115 = vector.extract_strided_slice %5 {offsets = [0, 1, 1, 0], sizes = [2, 2, 2, 32], strides = [1, 1, 1, 1]} : vector<2x4x4x32xf32> to vector<2x2x2x32xf32>
    %116 = vector.shape_cast %115 : vector<2x2x2x32xf32> to vector<8x32xf32>
    %117 = arith.truncf %116 : vector<8x32xf32> to vector<8x32xbf16>
    %c6_66 = arith.constant 6 : index
    %c0_67 = arith.constant 0 : index
    %c0_68 = arith.constant 0 : index
    %118 = vector.load %arg3[%c6_66, %c0_67, %c0_68] : memref<16x32x16xbf16, #tpu.memory_space<vmem>>, vector<1x32x16xbf16>
    %119 = vector.shape_cast %118 : vector<1x32x16xbf16> to vector<32x16xbf16>
    %cst_69 = arith.constant dense<0.000000e+00> : vector<8x16xf32>
    %120 = tpu.matmul %117, %119, %cst_69 {dimension_numbers = #tpu.dot_dimension_numbers<[1], [0], [0], [1], [0, 0, 1, 1], [], []>} : vector<8x32xbf16>, vector<32x16xbf16>, vector<8x16xf32> -> vector<8x16xf32>
    %121 = arith.addf %114, %120 : vector<8x16xf32>
    %122 = vector.extract_strided_slice %5 {offsets = [0, 1, 2, 0], sizes = [2, 2, 2, 32], strides = [1, 1, 1, 1]} : vector<2x4x4x32xf32> to vector<2x2x2x32xf32>
    %123 = vector.shape_cast %122 : vector<2x2x2x32xf32> to vector<8x32xf32>
    %124 = arith.truncf %123 : vector<8x32xf32> to vector<8x32xbf16>
    %c7_70 = arith.constant 7 : index
    %c0_71 = arith.constant 0 : index
    %c0_72 = arith.constant 0 : index
    %125 = vector.load %arg3[%c7_70, %c0_71, %c0_72] : memref<16x32x16xbf16, #tpu.memory_space<vmem>>, vector<1x32x16xbf16>
    %126 = vector.shape_cast %125 : vector<1x32x16xbf16> to vector<32x16xbf16>
    %cst_73 = arith.constant dense<0.000000e+00> : vector<8x16xf32>
    %127 = tpu.matmul %124, %126, %cst_73 {dimension_numbers = #tpu.dot_dimension_numbers<[1], [0], [0], [1], [0, 0, 1, 1], [], []>} : vector<8x32xbf16>, vector<32x16xbf16>, vector<8x16xf32> -> vector<8x16xf32>
    %128 = arith.addf %121, %127 : vector<8x16xf32>
    %129 = vector.broadcast %6 : vector<1x16xf32> to vector<8x16xf32>
    %130 = arith.mulf %128, %129 : vector<8x16xf32>
    %131 = vector.broadcast %7 : vector<1x16xf32> to vector<8x16xf32>
    %132 = arith.addf %130, %131 : vector<8x16xf32>
    %c1_74 = arith.constant 1 : index
    %c0_75 = arith.constant 0 : index
    %c0_76 = arith.constant 0 : index
    %133 = vector.load %arg6[%c1_74, %c0_75, %c0_76] : memref<4x8x16xf32, #tpu.memory_space<vmem>>, vector<1x8x16xf32>
    %134 = vector.shape_cast %133 : vector<1x8x16xf32> to vector<8x16xf32>
    %135 = vector.shape_cast %132 : vector<8x16xf32> to vector<1x8x16xf32>
    tpu.vector_store %arg6[%c1_74, %c0_75, %c0_76], %135 {strides = array<i32>} : memref<4x8x16xf32, #tpu.memory_space<vmem>>, vector<1x8x16xf32>,
    %cst_77 = arith.constant 0.000000e+00 : f32
    %136 = vector.broadcast %cst_77 : f32 to vector<8x16xf32>
    %137 = vector.extract_strided_slice %2 {offsets = [0, 1, 0, 0], sizes = [2, 2, 2, 32], strides = [1, 1, 1, 1]} : vector<2x4x4x32xf32> to vector<2x2x2x32xf32>
    %138 = vector.shape_cast %137 : vector<2x2x2x32xf32> to vector<8x32xf32>
    %139 = arith.truncf %138 : vector<8x32xf32> to vector<8x32xbf16>
    %c8 = arith.constant 8 : index
    %c0_78 = arith.constant 0 : index
    %c0_79 = arith.constant 0 : index
    %140 = vector.load %arg2[%c8, %c0_78, %c0_79] : memref<16x32x16xbf16, #tpu.memory_space<vmem>>, vector<1x32x16xbf16>
    %141 = vector.shape_cast %140 : vector<1x32x16xbf16> to vector<32x16xbf16>
    %cst_80 = arith.constant dense<0.000000e+00> : vector<8x16xf32>
    %142 = tpu.matmul %139, %141, %cst_80 {dimension_numbers = #tpu.dot_dimension_numbers<[1], [0], [0], [1], [0, 0, 1, 1], [], []>} : vector<8x32xbf16>, vector<32x16xbf16>, vector<8x16xf32> -> vector<8x16xf32>
    %143 = arith.addf %136, %142 : vector<8x16xf32>
    %144 = vector.extract_strided_slice %2 {offsets = [0, 1, 1, 0], sizes = [2, 2, 2, 32], strides = [1, 1, 1, 1]} : vector<2x4x4x32xf32> to vector<2x2x2x32xf32>
    %145 = vector.shape_cast %144 : vector<2x2x2x32xf32> to vector<8x32xf32>
    %146 = arith.truncf %145 : vector<8x32xf32> to vector<8x32xbf16>
    %c9 = arith.constant 9 : index
    %c0_81 = arith.constant 0 : index
    %c0_82 = arith.constant 0 : index
    %147 = vector.load %arg2[%c9, %c0_81, %c0_82] : memref<16x32x16xbf16, #tpu.memory_space<vmem>>, vector<1x32x16xbf16>
    %148 = vector.shape_cast %147 : vector<1x32x16xbf16> to vector<32x16xbf16>
    %cst_83 = arith.constant dense<0.000000e+00> : vector<8x16xf32>
    %149 = tpu.matmul %146, %148, %cst_83 {dimension_numbers = #tpu.dot_dimension_numbers<[1], [0], [0], [1], [0, 0, 1, 1], [], []>} : vector<8x32xbf16>, vector<32x16xbf16>, vector<8x16xf32> -> vector<8x16xf32>
    %150 = arith.addf %143, %149 : vector<8x16xf32>
    %151 = vector.extract_strided_slice %2 {offsets = [0, 2, 0, 0], sizes = [2, 2, 2, 32], strides = [1, 1, 1, 1]} : vector<2x4x4x32xf32> to vector<2x2x2x32xf32>
    %152 = vector.shape_cast %151 : vector<2x2x2x32xf32> to vector<8x32xf32>
    %153 = arith.truncf %152 : vector<8x32xf32> to vector<8x32xbf16>
    %c10 = arith.constant 10 : index
    %c0_84 = arith.constant 0 : index
    %c0_85 = arith.constant 0 : index
    %154 = vector.load %arg2[%c10, %c0_84, %c0_85] : memref<16x32x16xbf16, #tpu.memory_space<vmem>>, vector<1x32x16xbf16>
    %155 = vector.shape_cast %154 : vector<1x32x16xbf16> to vector<32x16xbf16>
    %cst_86 = arith.constant dense<0.000000e+00> : vector<8x16xf32>
    %156 = tpu.matmul %153, %155, %cst_86 {dimension_numbers = #tpu.dot_dimension_numbers<[1], [0], [0], [1], [0, 0, 1, 1], [], []>} : vector<8x32xbf16>, vector<32x16xbf16>, vector<8x16xf32> -> vector<8x16xf32>
    %157 = arith.addf %150, %156 : vector<8x16xf32>
    %158 = vector.extract_strided_slice %2 {offsets = [0, 2, 1, 0], sizes = [2, 2, 2, 32], strides = [1, 1, 1, 1]} : vector<2x4x4x32xf32> to vector<2x2x2x32xf32>
    %159 = vector.shape_cast %158 : vector<2x2x2x32xf32> to vector<8x32xf32>
    %160 = arith.truncf %159 : vector<8x32xf32> to vector<8x32xbf16>
    %c11 = arith.constant 11 : index
    %c0_87 = arith.constant 0 : index
    %c0_88 = arith.constant 0 : index
    %161 = vector.load %arg2[%c11, %c0_87, %c0_88] : memref<16x32x16xbf16, #tpu.memory_space<vmem>>, vector<1x32x16xbf16>
    %162 = vector.shape_cast %161 : vector<1x32x16xbf16> to vector<32x16xbf16>
    %cst_89 = arith.constant dense<0.000000e+00> : vector<8x16xf32>
    %163 = tpu.matmul %160, %162, %cst_89 {dimension_numbers = #tpu.dot_dimension_numbers<[1], [0], [0], [1], [0, 0, 1, 1], [], []>} : vector<8x32xbf16>, vector<32x16xbf16>, vector<8x16xf32> -> vector<8x16xf32>
    %164 = arith.addf %157, %163 : vector<8x16xf32>
    %165 = vector.extract_strided_slice %5 {offsets = [0, 1, 0, 0], sizes = [2, 2, 2, 32], strides = [1, 1, 1, 1]} : vector<2x4x4x32xf32> to vector<2x2x2x32xf32>
    %166 = vector.shape_cast %165 : vector<2x2x2x32xf32> to vector<8x32xf32>
    %167 = arith.truncf %166 : vector<8x32xf32> to vector<8x32xbf16>
    %c8_90 = arith.constant 8 : index
    %c0_91 = arith.constant 0 : index
    %c0_92 = arith.constant 0 : index
    %168 = vector.load %arg3[%c8_90, %c0_91, %c0_92] : memref<16x32x16xbf16, #tpu.memory_space<vmem>>, vector<1x32x16xbf16>
    %169 = vector.shape_cast %168 : vector<1x32x16xbf16> to vector<32x16xbf16>
    %cst_93 = arith.constant dense<0.000000e+00> : vector<8x16xf32>
    %170 = tpu.matmul %167, %169, %cst_93 {dimension_numbers = #tpu.dot_dimension_numbers<[1], [0], [0], [1], [0, 0, 1, 1], [], []>} : vector<8x32xbf16>, vector<32x16xbf16>, vector<8x16xf32> -> vector<8x16xf32>
    %171 = arith.addf %164, %170 : vector<8x16xf32>
    %172 = vector.extract_strided_slice %5 {offsets = [0, 1, 1, 0], sizes = [2, 2, 2, 32], strides = [1, 1, 1, 1]} : vector<2x4x4x32xf32> to vector<2x2x2x32xf32>
    %173 = vector.shape_cast %172 : vector<2x2x2x32xf32> to vector<8x32xf32>
    %174 = arith.truncf %173 : vector<8x32xf32> to vector<8x32xbf16>
    %c9_94 = arith.constant 9 : index
    %c0_95 = arith.constant 0 : index
    %c0_96 = arith.constant 0 : index
    %175 = vector.load %arg3[%c9_94, %c0_95, %c0_96] : memref<16x32x16xbf16, #tpu.memory_space<vmem>>, vector<1x32x16xbf16>
    %176 = vector.shape_cast %175 : vector<1x32x16xbf16> to vector<32x16xbf16>
    %cst_97 = arith.constant dense<0.000000e+00> : vector<8x16xf32>
    %177 = tpu.matmul %174, %176, %cst_97 {dimension_numbers = #tpu.dot_dimension_numbers<[1], [0], [0], [1], [0, 0, 1, 1], [], []>} : vector<8x32xbf16>, vector<32x16xbf16>, vector<8x16xf32> -> vector<8x16xf32>
    %178 = arith.addf %171, %177 : vector<8x16xf32>
    %179 = vector.extract_strided_slice %5 {offsets = [0, 2, 0, 0], sizes = [2, 2, 2, 32], strides = [1, 1, 1, 1]} : vector<2x4x4x32xf32> to vector<2x2x2x32xf32>
    %180 = vector.shape_cast %179 : vector<2x2x2x32xf32> to vector<8x32xf32>
    %181 = arith.truncf %180 : vector<8x32xf32> to vector<8x32xbf16>
    %c10_98 = arith.constant 10 : index
    %c0_99 = arith.constant 0 : index
    %c0_100 = arith.constant 0 : index
    %182 = vector.load %arg3[%c10_98, %c0_99, %c0_100] : memref<16x32x16xbf16, #tpu.memory_space<vmem>>, vector<1x32x16xbf16>
    %183 = vector.shape_cast %182 : vector<1x32x16xbf16> to vector<32x16xbf16>
    %cst_101 = arith.constant dense<0.000000e+00> : vector<8x16xf32>
    %184 = tpu.matmul %181, %183, %cst_101 {dimension_numbers = #tpu.dot_dimension_numbers<[1], [0], [0], [1], [0, 0, 1, 1], [], []>} : vector<8x32xbf16>, vector<32x16xbf16>, vector<8x16xf32> -> vector<8x16xf32>
    %185 = arith.addf %178, %184 : vector<8x16xf32>
    %186 = vector.extract_strided_slice %5 {offsets = [0, 2, 1, 0], sizes = [2, 2, 2, 32], strides = [1, 1, 1, 1]} : vector<2x4x4x32xf32> to vector<2x2x2x32xf32>
    %187 = vector.shape_cast %186 : vector<2x2x2x32xf32> to vector<8x32xf32>
    %188 = arith.truncf %187 : vector<8x32xf32> to vector<8x32xbf16>
    %c11_102 = arith.constant 11 : index
    %c0_103 = arith.constant 0 : index
    %c0_104 = arith.constant 0 : index
    %189 = vector.load %arg3[%c11_102, %c0_103, %c0_104] : memref<16x32x16xbf16, #tpu.memory_space<vmem>>, vector<1x32x16xbf16>
    %190 = vector.shape_cast %189 : vector<1x32x16xbf16> to vector<32x16xbf16>
    %cst_105 = arith.constant dense<0.000000e+00> : vector<8x16xf32>
    %191 = tpu.matmul %188, %190, %cst_105 {dimension_numbers = #tpu.dot_dimension_numbers<[1], [0], [0], [1], [0, 0, 1, 1], [], []>} : vector<8x32xbf16>, vector<32x16xbf16>, vector<8x16xf32> -> vector<8x16xf32>
    %192 = arith.addf %185, %191 : vector<8x16xf32>
    %193 = vector.broadcast %6 : vector<1x16xf32> to vector<8x16xf32>
    %194 = arith.mulf %192, %193 : vector<8x16xf32>
    %195 = vector.broadcast %7 : vector<1x16xf32> to vector<8x16xf32>
    %196 = arith.addf %194, %195 : vector<8x16xf32>
    %c2_106 = arith.constant 2 : index
    %c0_107 = arith.constant 0 : index
    %c0_108 = arith.constant 0 : index
    %197 = vector.load %arg6[%c2_106, %c0_107, %c0_108] : memref<4x8x16xf32, #tpu.memory_space<vmem>>, vector<1x8x16xf32>
    %198 = vector.shape_cast %197 : vector<1x8x16xf32> to vector<8x16xf32>
    %199 = vector.shape_cast %196 : vector<8x16xf32> to vector<1x8x16xf32>
    tpu.vector_store %arg6[%c2_106, %c0_107, %c0_108], %199 {strides = array<i32>} : memref<4x8x16xf32, #tpu.memory_space<vmem>>, vector<1x8x16xf32>,
    %cst_109 = arith.constant 0.000000e+00 : f32
    %200 = vector.broadcast %cst_109 : f32 to vector<8x16xf32>
    %201 = vector.extract_strided_slice %2 {offsets = [0, 1, 1, 0], sizes = [2, 2, 2, 32], strides = [1, 1, 1, 1]} : vector<2x4x4x32xf32> to vector<2x2x2x32xf32>
    %202 = vector.shape_cast %201 : vector<2x2x2x32xf32> to vector<8x32xf32>
    %203 = arith.truncf %202 : vector<8x32xf32> to vector<8x32xbf16>
    %c12 = arith.constant 12 : index
    %c0_110 = arith.constant 0 : index
    %c0_111 = arith.constant 0 : index
    %204 = vector.load %arg2[%c12, %c0_110, %c0_111] : memref<16x32x16xbf16, #tpu.memory_space<vmem>>, vector<1x32x16xbf16>
    %205 = vector.shape_cast %204 : vector<1x32x16xbf16> to vector<32x16xbf16>
    %cst_112 = arith.constant dense<0.000000e+00> : vector<8x16xf32>
    %206 = tpu.matmul %203, %205, %cst_112 {dimension_numbers = #tpu.dot_dimension_numbers<[1], [0], [0], [1], [0, 0, 1, 1], [], []>} : vector<8x32xbf16>, vector<32x16xbf16>, vector<8x16xf32> -> vector<8x16xf32>
    %207 = arith.addf %200, %206 : vector<8x16xf32>
    %208 = vector.extract_strided_slice %2 {offsets = [0, 1, 2, 0], sizes = [2, 2, 2, 32], strides = [1, 1, 1, 1]} : vector<2x4x4x32xf32> to vector<2x2x2x32xf32>
    %209 = vector.shape_cast %208 : vector<2x2x2x32xf32> to vector<8x32xf32>
    %210 = arith.truncf %209 : vector<8x32xf32> to vector<8x32xbf16>
    %c13 = arith.constant 13 : index
    %c0_113 = arith.constant 0 : index
    %c0_114 = arith.constant 0 : index
    %211 = vector.load %arg2[%c13, %c0_113, %c0_114] : memref<16x32x16xbf16, #tpu.memory_space<vmem>>, vector<1x32x16xbf16>
    %212 = vector.shape_cast %211 : vector<1x32x16xbf16> to vector<32x16xbf16>
    %cst_115 = arith.constant dense<0.000000e+00> : vector<8x16xf32>
    %213 = tpu.matmul %210, %212, %cst_115 {dimension_numbers = #tpu.dot_dimension_numbers<[1], [0], [0], [1], [0, 0, 1, 1], [], []>} : vector<8x32xbf16>, vector<32x16xbf16>, vector<8x16xf32> -> vector<8x16xf32>
    %214 = arith.addf %207, %213 : vector<8x16xf32>
    %215 = vector.extract_strided_slice %2 {offsets = [0, 2, 1, 0], sizes = [2, 2, 2, 32], strides = [1, 1, 1, 1]} : vector<2x4x4x32xf32> to vector<2x2x2x32xf32>
    %216 = vector.shape_cast %215 : vector<2x2x2x32xf32> to vector<8x32xf32>
    %217 = arith.truncf %216 : vector<8x32xf32> to vector<8x32xbf16>
    %c14 = arith.constant 14 : index
    %c0_116 = arith.constant 0 : index
    %c0_117 = arith.constant 0 : index
    %218 = vector.load %arg2[%c14, %c0_116, %c0_117] : memref<16x32x16xbf16, #tpu.memory_space<vmem>>, vector<1x32x16xbf16>
    %219 = vector.shape_cast %218 : vector<1x32x16xbf16> to vector<32x16xbf16>
    %cst_118 = arith.constant dense<0.000000e+00> : vector<8x16xf32>
    %220 = tpu.matmul %217, %219, %cst_118 {dimension_numbers = #tpu.dot_dimension_numbers<[1], [0], [0], [1], [0, 0, 1, 1], [], []>} : vector<8x32xbf16>, vector<32x16xbf16>, vector<8x16xf32> -> vector<8x16xf32>
    %221 = arith.addf %214, %220 : vector<8x16xf32>
    %222 = vector.extract_strided_slice %2 {offsets = [0, 2, 2, 0], sizes = [2, 2, 2, 32], strides = [1, 1, 1, 1]} : vector<2x4x4x32xf32> to vector<2x2x2x32xf32>
    %223 = vector.shape_cast %222 : vector<2x2x2x32xf32> to vector<8x32xf32>
    %224 = arith.truncf %223 : vector<8x32xf32> to vector<8x32xbf16>
    %c15 = arith.constant 15 : index
    %c0_119 = arith.constant 0 : index
    %c0_120 = arith.constant 0 : index
    %225 = vector.load %arg2[%c15, %c0_119, %c0_120] : memref<16x32x16xbf16, #tpu.memory_space<vmem>>, vector<1x32x16xbf16>
    %226 = vector.shape_cast %225 : vector<1x32x16xbf16> to vector<32x16xbf16>
    %cst_121 = arith.constant dense<0.000000e+00> : vector<8x16xf32>
    %227 = tpu.matmul %224, %226, %cst_121 {dimension_numbers = #tpu.dot_dimension_numbers<[1], [0], [0], [1], [0, 0, 1, 1], [], []>} : vector<8x32xbf16>, vector<32x16xbf16>, vector<8x16xf32> -> vector<8x16xf32>
    %228 = arith.addf %221, %227 : vector<8x16xf32>
    %229 = vector.extract_strided_slice %5 {offsets = [0, 1, 1, 0], sizes = [2, 2, 2, 32], strides = [1, 1, 1, 1]} : vector<2x4x4x32xf32> to vector<2x2x2x32xf32>
    %230 = vector.shape_cast %229 : vector<2x2x2x32xf32> to vector<8x32xf32>
    %231 = arith.truncf %230 : vector<8x32xf32> to vector<8x32xbf16>
    %c12_122 = arith.constant 12 : index
    %c0_123 = arith.constant 0 : index
    %c0_124 = arith.constant 0 : index
    %232 = vector.load %arg3[%c12_122, %c0_123, %c0_124] : memref<16x32x16xbf16, #tpu.memory_space<vmem>>, vector<1x32x16xbf16>
    %233 = vector.shape_cast %232 : vector<1x32x16xbf16> to vector<32x16xbf16>
    %cst_125 = arith.constant dense<0.000000e+00> : vector<8x16xf32>
    %234 = tpu.matmul %231, %233, %cst_125 {dimension_numbers = #tpu.dot_dimension_numbers<[1], [0], [0], [1], [0, 0, 1, 1], [], []>} : vector<8x32xbf16>, vector<32x16xbf16>, vector<8x16xf32> -> vector<8x16xf32>
    %235 = arith.addf %228, %234 : vector<8x16xf32>
    %236 = vector.extract_strided_slice %5 {offsets = [0, 1, 2, 0], sizes = [2, 2, 2, 32], strides = [1, 1, 1, 1]} : vector<2x4x4x32xf32> to vector<2x2x2x32xf32>
    %237 = vector.shape_cast %236 : vector<2x2x2x32xf32> to vector<8x32xf32>
    %238 = arith.truncf %237 : vector<8x32xf32> to vector<8x32xbf16>
    %c13_126 = arith.constant 13 : index
    %c0_127 = arith.constant 0 : index
    %c0_128 = arith.constant 0 : index
    %239 = vector.load %arg3[%c13_126, %c0_127, %c0_128] : memref<16x32x16xbf16, #tpu.memory_space<vmem>>, vector<1x32x16xbf16>
    %240 = vector.shape_cast %239 : vector<1x32x16xbf16> to vector<32x16xbf16>
    %cst_129 = arith.constant dense<0.000000e+00> : vector<8x16xf32>
    %241 = tpu.matmul %238, %240, %cst_129 {dimension_numbers = #tpu.dot_dimension_numbers<[1], [0], [0], [1], [0, 0, 1, 1], [], []>} : vector<8x32xbf16>, vector<32x16xbf16>, vector<8x16xf32> -> vector<8x16xf32>
    %242 = arith.addf %235, %241 : vector<8x16xf32>
    %243 = vector.extract_strided_slice %5 {offsets = [0, 2, 1, 0], sizes = [2, 2, 2, 32], strides = [1, 1, 1, 1]} : vector<2x4x4x32xf32> to vector<2x2x2x32xf32>
    %244 = vector.shape_cast %243 : vector<2x2x2x32xf32> to vector<8x32xf32>
    %245 = arith.truncf %244 : vector<8x32xf32> to vector<8x32xbf16>
    %c14_130 = arith.constant 14 : index
    %c0_131 = arith.constant 0 : index
    %c0_132 = arith.constant 0 : index
    %246 = vector.load %arg3[%c14_130, %c0_131, %c0_132] : memref<16x32x16xbf16, #tpu.memory_space<vmem>>, vector<1x32x16xbf16>
    %247 = vector.shape_cast %246 : vector<1x32x16xbf16> to vector<32x16xbf16>
    %cst_133 = arith.constant dense<0.000000e+00> : vector<8x16xf32>
    %248 = tpu.matmul %245, %247, %cst_133 {dimension_numbers = #tpu.dot_dimension_numbers<[1], [0], [0], [1], [0, 0, 1, 1], [], []>} : vector<8x32xbf16>, vector<32x16xbf16>, vector<8x16xf32> -> vector<8x16xf32>
    %249 = arith.addf %242, %248 : vector<8x16xf32>
    %250 = vector.extract_strided_slice %5 {offsets = [0, 2, 2, 0], sizes = [2, 2, 2, 32], strides = [1, 1, 1, 1]} : vector<2x4x4x32xf32> to vector<2x2x2x32xf32>
    %251 = vector.shape_cast %250 : vector<2x2x2x32xf32> to vector<8x32xf32>
    %252 = arith.truncf %251 : vector<8x32xf32> to vector<8x32xbf16>
    %c15_134 = arith.constant 15 : index
    %c0_135 = arith.constant 0 : index
    %c0_136 = arith.constant 0 : index
    %253 = vector.load %arg3[%c15_134, %c0_135, %c0_136] : memref<16x32x16xbf16, #tpu.memory_space<vmem>>, vector<1x32x16xbf16>
    %254 = vector.shape_cast %253 : vector<1x32x16xbf16> to vector<32x16xbf16>
    %cst_137 = arith.constant dense<0.000000e+00> : vector<8x16xf32>
    %255 = tpu.matmul %252, %254, %cst_137 {dimension_numbers = #tpu.dot_dimension_numbers<[1], [0], [0], [1], [0, 0, 1, 1], [], []>} : vector<8x32xbf16>, vector<32x16xbf16>, vector<8x16xf32> -> vector<8x16xf32>
    %256 = arith.addf %249, %255 : vector<8x16xf32>
    %257 = vector.broadcast %6 : vector<1x16xf32> to vector<8x16xf32>
    %258 = arith.mulf %256, %257 : vector<8x16xf32>
    %259 = vector.broadcast %7 : vector<1x16xf32> to vector<8x16xf32>
    %260 = arith.addf %258, %259 : vector<8x16xf32>
    %c3_138 = arith.constant 3 : index
    %c0_139 = arith.constant 0 : index
    %c0_140 = arith.constant 0 : index
    %261 = vector.load %arg6[%c3_138, %c0_139, %c0_140] : memref<4x8x16xf32, #tpu.memory_space<vmem>>, vector<1x8x16xf32>
    %262 = vector.shape_cast %261 : vector<1x8x16xf32> to vector<8x16xf32>
    %263 = vector.shape_cast %260 : vector<8x16xf32> to vector<1x8x16xf32>
    tpu.vector_store %arg6[%c3_138, %c0_139, %c0_140], %263 {strides = array<i32>} : memref<4x8x16xf32, #tpu.memory_space<vmem>>, vector<1x8x16xf32>,
    return
  }
}

module attributes {stable_mosaic.version = 11 : i64} {
  func.func @_deconv_kernel(%arg0: memref<2x6x6x16xf32, #tpu.memory_space<vmem>>, %arg1: memref<2x6x6x16xf32, #tpu.memory_space<vmem>>, %arg2: memref<16x16x8xbf16, #tpu.memory_space<vmem>>, %arg3: memref<16x16x8xbf16, #tpu.memory_space<vmem>>, %arg4: memref<1x8xf32, #tpu.memory_space<vmem>>, %arg5: memref<1x8xf32, #tpu.memory_space<vmem>>, %arg6: memref<4x32x8xf32, #tpu.memory_space<vmem>>) attributes {dimension_semantics = [], scalar_prefetch = 0 : i64, scratch_operands = 0 : i64, tpu.core_type = #tpu.core_type<tc>} {
    %c0 = arith.constant 0 : index
    %c0_0 = arith.constant 0 : index
    %c0_1 = arith.constant 0 : index
    %c0_2 = arith.constant 0 : index
    %0 = vector.load %arg0[%c0, %c0_0, %c0_1, %c0_2] : memref<2x6x6x16xf32, #tpu.memory_space<vmem>>, vector<2x6x6x16xf32>
    %cst = arith.constant 0.000000e+00 : f32
    %1 = vector.broadcast %cst : f32 to vector<2x6x6x16xf32>
    %2 = arith.maximumf %0, %1 : vector<2x6x6x16xf32>
    %c0_3 = arith.constant 0 : index
    %c0_4 = arith.constant 0 : index
    %c0_5 = arith.constant 0 : index
    %c0_6 = arith.constant 0 : index
    %3 = vector.load %arg1[%c0_3, %c0_4, %c0_5, %c0_6] : memref<2x6x6x16xf32, #tpu.memory_space<vmem>>, vector<2x6x6x16xf32>
    %cst_7 = arith.constant 0.000000e+00 : f32
    %4 = vector.broadcast %cst_7 : f32 to vector<2x6x6x16xf32>
    %5 = arith.maximumf %3, %4 : vector<2x6x6x16xf32>
    %c0_8 = arith.constant 0 : index
    %c0_9 = arith.constant 0 : index
    %6 = vector.load %arg4[%c0_8, %c0_9] : memref<1x8xf32, #tpu.memory_space<vmem>>, vector<1x8xf32>
    %c0_10 = arith.constant 0 : index
    %c0_11 = arith.constant 0 : index
    %7 = vector.load %arg5[%c0_10, %c0_11] : memref<1x8xf32, #tpu.memory_space<vmem>>, vector<1x8xf32>
    %cst_12 = arith.constant 0.000000e+00 : f32
    %8 = vector.broadcast %cst_12 : f32 to vector<32x8xf32>
    %9 = vector.extract_strided_slice %2 {offsets = [0, 0, 0, 0], sizes = [2, 4, 4, 16], strides = [1, 1, 1, 1]} : vector<2x6x6x16xf32> to vector<2x4x4x16xf32>
    %10 = vector.shape_cast %9 : vector<2x4x4x16xf32> to vector<32x16xf32>
    %11 = arith.truncf %10 : vector<32x16xf32> to vector<32x16xbf16>
    %c0_13 = arith.constant 0 : index
    %c0_14 = arith.constant 0 : index
    %c0_15 = arith.constant 0 : index
    %12 = vector.load %arg2[%c0_13, %c0_14, %c0_15] : memref<16x16x8xbf16, #tpu.memory_space<vmem>>, vector<1x16x8xbf16>
    %13 = vector.shape_cast %12 : vector<1x16x8xbf16> to vector<16x8xbf16>
    %cst_16 = arith.constant dense<0.000000e+00> : vector<32x8xf32>
    %14 = tpu.matmul %11, %13, %cst_16 {dimension_numbers = #tpu.dot_dimension_numbers<[1], [0], [0], [1], [0, 0, 1, 1], [], []>} : vector<32x16xbf16>, vector<16x8xbf16>, vector<32x8xf32> -> vector<32x8xf32>
    %15 = arith.addf %8, %14 : vector<32x8xf32>
    %16 = vector.extract_strided_slice %2 {offsets = [0, 0, 1, 0], sizes = [2, 4, 4, 16], strides = [1, 1, 1, 1]} : vector<2x6x6x16xf32> to vector<2x4x4x16xf32>
    %17 = vector.shape_cast %16 : vector<2x4x4x16xf32> to vector<32x16xf32>
    %18 = arith.truncf %17 : vector<32x16xf32> to vector<32x16xbf16>
    %c1 = arith.constant 1 : index
    %c0_17 = arith.constant 0 : index
    %c0_18 = arith.constant 0 : index
    %19 = vector.load %arg2[%c1, %c0_17, %c0_18] : memref<16x16x8xbf16, #tpu.memory_space<vmem>>, vector<1x16x8xbf16>
    %20 = vector.shape_cast %19 : vector<1x16x8xbf16> to vector<16x8xbf16>
    %cst_19 = arith.constant dense<0.000000e+00> : vector<32x8xf32>
    %21 = tpu.matmul %18, %20, %cst_19 {dimension_numbers = #tpu.dot_dimension_numbers<[1], [0], [0], [1], [0, 0, 1, 1], [], []>} : vector<32x16xbf16>, vector<16x8xbf16>, vector<32x8xf32> -> vector<32x8xf32>
    %22 = arith.addf %15, %21 : vector<32x8xf32>
    %23 = vector.extract_strided_slice %2 {offsets = [0, 1, 0, 0], sizes = [2, 4, 4, 16], strides = [1, 1, 1, 1]} : vector<2x6x6x16xf32> to vector<2x4x4x16xf32>
    %24 = vector.shape_cast %23 : vector<2x4x4x16xf32> to vector<32x16xf32>
    %25 = arith.truncf %24 : vector<32x16xf32> to vector<32x16xbf16>
    %c2 = arith.constant 2 : index
    %c0_20 = arith.constant 0 : index
    %c0_21 = arith.constant 0 : index
    %26 = vector.load %arg2[%c2, %c0_20, %c0_21] : memref<16x16x8xbf16, #tpu.memory_space<vmem>>, vector<1x16x8xbf16>
    %27 = vector.shape_cast %26 : vector<1x16x8xbf16> to vector<16x8xbf16>
    %cst_22 = arith.constant dense<0.000000e+00> : vector<32x8xf32>
    %28 = tpu.matmul %25, %27, %cst_22 {dimension_numbers = #tpu.dot_dimension_numbers<[1], [0], [0], [1], [0, 0, 1, 1], [], []>} : vector<32x16xbf16>, vector<16x8xbf16>, vector<32x8xf32> -> vector<32x8xf32>
    %29 = arith.addf %22, %28 : vector<32x8xf32>
    %30 = vector.extract_strided_slice %2 {offsets = [0, 1, 1, 0], sizes = [2, 4, 4, 16], strides = [1, 1, 1, 1]} : vector<2x6x6x16xf32> to vector<2x4x4x16xf32>
    %31 = vector.shape_cast %30 : vector<2x4x4x16xf32> to vector<32x16xf32>
    %32 = arith.truncf %31 : vector<32x16xf32> to vector<32x16xbf16>
    %c3 = arith.constant 3 : index
    %c0_23 = arith.constant 0 : index
    %c0_24 = arith.constant 0 : index
    %33 = vector.load %arg2[%c3, %c0_23, %c0_24] : memref<16x16x8xbf16, #tpu.memory_space<vmem>>, vector<1x16x8xbf16>
    %34 = vector.shape_cast %33 : vector<1x16x8xbf16> to vector<16x8xbf16>
    %cst_25 = arith.constant dense<0.000000e+00> : vector<32x8xf32>
    %35 = tpu.matmul %32, %34, %cst_25 {dimension_numbers = #tpu.dot_dimension_numbers<[1], [0], [0], [1], [0, 0, 1, 1], [], []>} : vector<32x16xbf16>, vector<16x8xbf16>, vector<32x8xf32> -> vector<32x8xf32>
    %36 = arith.addf %29, %35 : vector<32x8xf32>
    %37 = vector.extract_strided_slice %5 {offsets = [0, 0, 0, 0], sizes = [2, 4, 4, 16], strides = [1, 1, 1, 1]} : vector<2x6x6x16xf32> to vector<2x4x4x16xf32>
    %38 = vector.shape_cast %37 : vector<2x4x4x16xf32> to vector<32x16xf32>
    %39 = arith.truncf %38 : vector<32x16xf32> to vector<32x16xbf16>
    %c0_26 = arith.constant 0 : index
    %c0_27 = arith.constant 0 : index
    %c0_28 = arith.constant 0 : index
    %40 = vector.load %arg3[%c0_26, %c0_27, %c0_28] : memref<16x16x8xbf16, #tpu.memory_space<vmem>>, vector<1x16x8xbf16>
    %41 = vector.shape_cast %40 : vector<1x16x8xbf16> to vector<16x8xbf16>
    %cst_29 = arith.constant dense<0.000000e+00> : vector<32x8xf32>
    %42 = tpu.matmul %39, %41, %cst_29 {dimension_numbers = #tpu.dot_dimension_numbers<[1], [0], [0], [1], [0, 0, 1, 1], [], []>} : vector<32x16xbf16>, vector<16x8xbf16>, vector<32x8xf32> -> vector<32x8xf32>
    %43 = arith.addf %36, %42 : vector<32x8xf32>
    %44 = vector.extract_strided_slice %5 {offsets = [0, 0, 1, 0], sizes = [2, 4, 4, 16], strides = [1, 1, 1, 1]} : vector<2x6x6x16xf32> to vector<2x4x4x16xf32>
    %45 = vector.shape_cast %44 : vector<2x4x4x16xf32> to vector<32x16xf32>
    %46 = arith.truncf %45 : vector<32x16xf32> to vector<32x16xbf16>
    %c1_30 = arith.constant 1 : index
    %c0_31 = arith.constant 0 : index
    %c0_32 = arith.constant 0 : index
    %47 = vector.load %arg3[%c1_30, %c0_31, %c0_32] : memref<16x16x8xbf16, #tpu.memory_space<vmem>>, vector<1x16x8xbf16>
    %48 = vector.shape_cast %47 : vector<1x16x8xbf16> to vector<16x8xbf16>
    %cst_33 = arith.constant dense<0.000000e+00> : vector<32x8xf32>
    %49 = tpu.matmul %46, %48, %cst_33 {dimension_numbers = #tpu.dot_dimension_numbers<[1], [0], [0], [1], [0, 0, 1, 1], [], []>} : vector<32x16xbf16>, vector<16x8xbf16>, vector<32x8xf32> -> vector<32x8xf32>
    %50 = arith.addf %43, %49 : vector<32x8xf32>
    %51 = vector.extract_strided_slice %5 {offsets = [0, 1, 0, 0], sizes = [2, 4, 4, 16], strides = [1, 1, 1, 1]} : vector<2x6x6x16xf32> to vector<2x4x4x16xf32>
    %52 = vector.shape_cast %51 : vector<2x4x4x16xf32> to vector<32x16xf32>
    %53 = arith.truncf %52 : vector<32x16xf32> to vector<32x16xbf16>
    %c2_34 = arith.constant 2 : index
    %c0_35 = arith.constant 0 : index
    %c0_36 = arith.constant 0 : index
    %54 = vector.load %arg3[%c2_34, %c0_35, %c0_36] : memref<16x16x8xbf16, #tpu.memory_space<vmem>>, vector<1x16x8xbf16>
    %55 = vector.shape_cast %54 : vector<1x16x8xbf16> to vector<16x8xbf16>
    %cst_37 = arith.constant dense<0.000000e+00> : vector<32x8xf32>
    %56 = tpu.matmul %53, %55, %cst_37 {dimension_numbers = #tpu.dot_dimension_numbers<[1], [0], [0], [1], [0, 0, 1, 1], [], []>} : vector<32x16xbf16>, vector<16x8xbf16>, vector<32x8xf32> -> vector<32x8xf32>
    %57 = arith.addf %50, %56 : vector<32x8xf32>
    %58 = vector.extract_strided_slice %5 {offsets = [0, 1, 1, 0], sizes = [2, 4, 4, 16], strides = [1, 1, 1, 1]} : vector<2x6x6x16xf32> to vector<2x4x4x16xf32>
    %59 = vector.shape_cast %58 : vector<2x4x4x16xf32> to vector<32x16xf32>
    %60 = arith.truncf %59 : vector<32x16xf32> to vector<32x16xbf16>
    %c3_38 = arith.constant 3 : index
    %c0_39 = arith.constant 0 : index
    %c0_40 = arith.constant 0 : index
    %61 = vector.load %arg3[%c3_38, %c0_39, %c0_40] : memref<16x16x8xbf16, #tpu.memory_space<vmem>>, vector<1x16x8xbf16>
    %62 = vector.shape_cast %61 : vector<1x16x8xbf16> to vector<16x8xbf16>
    %cst_41 = arith.constant dense<0.000000e+00> : vector<32x8xf32>
    %63 = tpu.matmul %60, %62, %cst_41 {dimension_numbers = #tpu.dot_dimension_numbers<[1], [0], [0], [1], [0, 0, 1, 1], [], []>} : vector<32x16xbf16>, vector<16x8xbf16>, vector<32x8xf32> -> vector<32x8xf32>
    %64 = arith.addf %57, %63 : vector<32x8xf32>
    %65 = vector.broadcast %6 : vector<1x8xf32> to vector<32x8xf32>
    %66 = arith.mulf %64, %65 : vector<32x8xf32>
    %67 = vector.broadcast %7 : vector<1x8xf32> to vector<32x8xf32>
    %68 = arith.addf %66, %67 : vector<32x8xf32>
    %c0_42 = arith.constant 0 : index
    %c0_43 = arith.constant 0 : index
    %c0_44 = arith.constant 0 : index
    %69 = vector.load %arg6[%c0_42, %c0_43, %c0_44] : memref<4x32x8xf32, #tpu.memory_space<vmem>>, vector<1x32x8xf32>
    %70 = vector.shape_cast %69 : vector<1x32x8xf32> to vector<32x8xf32>
    %71 = vector.shape_cast %68 : vector<32x8xf32> to vector<1x32x8xf32>
    tpu.vector_store %arg6[%c0_42, %c0_43, %c0_44], %71 {strides = array<i32>} : memref<4x32x8xf32, #tpu.memory_space<vmem>>, vector<1x32x8xf32>,
    %cst_45 = arith.constant 0.000000e+00 : f32
    %72 = vector.broadcast %cst_45 : f32 to vector<32x8xf32>
    %73 = vector.extract_strided_slice %2 {offsets = [0, 0, 1, 0], sizes = [2, 4, 4, 16], strides = [1, 1, 1, 1]} : vector<2x6x6x16xf32> to vector<2x4x4x16xf32>
    %74 = vector.shape_cast %73 : vector<2x4x4x16xf32> to vector<32x16xf32>
    %75 = arith.truncf %74 : vector<32x16xf32> to vector<32x16xbf16>
    %c4 = arith.constant 4 : index
    %c0_46 = arith.constant 0 : index
    %c0_47 = arith.constant 0 : index
    %76 = vector.load %arg2[%c4, %c0_46, %c0_47] : memref<16x16x8xbf16, #tpu.memory_space<vmem>>, vector<1x16x8xbf16>
    %77 = vector.shape_cast %76 : vector<1x16x8xbf16> to vector<16x8xbf16>
    %cst_48 = arith.constant dense<0.000000e+00> : vector<32x8xf32>
    %78 = tpu.matmul %75, %77, %cst_48 {dimension_numbers = #tpu.dot_dimension_numbers<[1], [0], [0], [1], [0, 0, 1, 1], [], []>} : vector<32x16xbf16>, vector<16x8xbf16>, vector<32x8xf32> -> vector<32x8xf32>
    %79 = arith.addf %72, %78 : vector<32x8xf32>
    %80 = vector.extract_strided_slice %2 {offsets = [0, 0, 2, 0], sizes = [2, 4, 4, 16], strides = [1, 1, 1, 1]} : vector<2x6x6x16xf32> to vector<2x4x4x16xf32>
    %81 = vector.shape_cast %80 : vector<2x4x4x16xf32> to vector<32x16xf32>
    %82 = arith.truncf %81 : vector<32x16xf32> to vector<32x16xbf16>
    %c5 = arith.constant 5 : index
    %c0_49 = arith.constant 0 : index
    %c0_50 = arith.constant 0 : index
    %83 = vector.load %arg2[%c5, %c0_49, %c0_50] : memref<16x16x8xbf16, #tpu.memory_space<vmem>>, vector<1x16x8xbf16>
    %84 = vector.shape_cast %83 : vector<1x16x8xbf16> to vector<16x8xbf16>
    %cst_51 = arith.constant dense<0.000000e+00> : vector<32x8xf32>
    %85 = tpu.matmul %82, %84, %cst_51 {dimension_numbers = #tpu.dot_dimension_numbers<[1], [0], [0], [1], [0, 0, 1, 1], [], []>} : vector<32x16xbf16>, vector<16x8xbf16>, vector<32x8xf32> -> vector<32x8xf32>
    %86 = arith.addf %79, %85 : vector<32x8xf32>
    %87 = vector.extract_strided_slice %2 {offsets = [0, 1, 1, 0], sizes = [2, 4, 4, 16], strides = [1, 1, 1, 1]} : vector<2x6x6x16xf32> to vector<2x4x4x16xf32>
    %88 = vector.shape_cast %87 : vector<2x4x4x16xf32> to vector<32x16xf32>
    %89 = arith.truncf %88 : vector<32x16xf32> to vector<32x16xbf16>
    %c6 = arith.constant 6 : index
    %c0_52 = arith.constant 0 : index
    %c0_53 = arith.constant 0 : index
    %90 = vector.load %arg2[%c6, %c0_52, %c0_53] : memref<16x16x8xbf16, #tpu.memory_space<vmem>>, vector<1x16x8xbf16>
    %91 = vector.shape_cast %90 : vector<1x16x8xbf16> to vector<16x8xbf16>
    %cst_54 = arith.constant dense<0.000000e+00> : vector<32x8xf32>
    %92 = tpu.matmul %89, %91, %cst_54 {dimension_numbers = #tpu.dot_dimension_numbers<[1], [0], [0], [1], [0, 0, 1, 1], [], []>} : vector<32x16xbf16>, vector<16x8xbf16>, vector<32x8xf32> -> vector<32x8xf32>
    %93 = arith.addf %86, %92 : vector<32x8xf32>
    %94 = vector.extract_strided_slice %2 {offsets = [0, 1, 2, 0], sizes = [2, 4, 4, 16], strides = [1, 1, 1, 1]} : vector<2x6x6x16xf32> to vector<2x4x4x16xf32>
    %95 = vector.shape_cast %94 : vector<2x4x4x16xf32> to vector<32x16xf32>
    %96 = arith.truncf %95 : vector<32x16xf32> to vector<32x16xbf16>
    %c7 = arith.constant 7 : index
    %c0_55 = arith.constant 0 : index
    %c0_56 = arith.constant 0 : index
    %97 = vector.load %arg2[%c7, %c0_55, %c0_56] : memref<16x16x8xbf16, #tpu.memory_space<vmem>>, vector<1x16x8xbf16>
    %98 = vector.shape_cast %97 : vector<1x16x8xbf16> to vector<16x8xbf16>
    %cst_57 = arith.constant dense<0.000000e+00> : vector<32x8xf32>
    %99 = tpu.matmul %96, %98, %cst_57 {dimension_numbers = #tpu.dot_dimension_numbers<[1], [0], [0], [1], [0, 0, 1, 1], [], []>} : vector<32x16xbf16>, vector<16x8xbf16>, vector<32x8xf32> -> vector<32x8xf32>
    %100 = arith.addf %93, %99 : vector<32x8xf32>
    %101 = vector.extract_strided_slice %5 {offsets = [0, 0, 1, 0], sizes = [2, 4, 4, 16], strides = [1, 1, 1, 1]} : vector<2x6x6x16xf32> to vector<2x4x4x16xf32>
    %102 = vector.shape_cast %101 : vector<2x4x4x16xf32> to vector<32x16xf32>
    %103 = arith.truncf %102 : vector<32x16xf32> to vector<32x16xbf16>
    %c4_58 = arith.constant 4 : index
    %c0_59 = arith.constant 0 : index
    %c0_60 = arith.constant 0 : index
    %104 = vector.load %arg3[%c4_58, %c0_59, %c0_60] : memref<16x16x8xbf16, #tpu.memory_space<vmem>>, vector<1x16x8xbf16>
    %105 = vector.shape_cast %104 : vector<1x16x8xbf16> to vector<16x8xbf16>
    %cst_61 = arith.constant dense<0.000000e+00> : vector<32x8xf32>
    %106 = tpu.matmul %103, %105, %cst_61 {dimension_numbers = #tpu.dot_dimension_numbers<[1], [0], [0], [1], [0, 0, 1, 1], [], []>} : vector<32x16xbf16>, vector<16x8xbf16>, vector<32x8xf32> -> vector<32x8xf32>
    %107 = arith.addf %100, %106 : vector<32x8xf32>
    %108 = vector.extract_strided_slice %5 {offsets = [0, 0, 2, 0], sizes = [2, 4, 4, 16], strides = [1, 1, 1, 1]} : vector<2x6x6x16xf32> to vector<2x4x4x16xf32>
    %109 = vector.shape_cast %108 : vector<2x4x4x16xf32> to vector<32x16xf32>
    %110 = arith.truncf %109 : vector<32x16xf32> to vector<32x16xbf16>
    %c5_62 = arith.constant 5 : index
    %c0_63 = arith.constant 0 : index
    %c0_64 = arith.constant 0 : index
    %111 = vector.load %arg3[%c5_62, %c0_63, %c0_64] : memref<16x16x8xbf16, #tpu.memory_space<vmem>>, vector<1x16x8xbf16>
    %112 = vector.shape_cast %111 : vector<1x16x8xbf16> to vector<16x8xbf16>
    %cst_65 = arith.constant dense<0.000000e+00> : vector<32x8xf32>
    %113 = tpu.matmul %110, %112, %cst_65 {dimension_numbers = #tpu.dot_dimension_numbers<[1], [0], [0], [1], [0, 0, 1, 1], [], []>} : vector<32x16xbf16>, vector<16x8xbf16>, vector<32x8xf32> -> vector<32x8xf32>
    %114 = arith.addf %107, %113 : vector<32x8xf32>
    %115 = vector.extract_strided_slice %5 {offsets = [0, 1, 1, 0], sizes = [2, 4, 4, 16], strides = [1, 1, 1, 1]} : vector<2x6x6x16xf32> to vector<2x4x4x16xf32>
    %116 = vector.shape_cast %115 : vector<2x4x4x16xf32> to vector<32x16xf32>
    %117 = arith.truncf %116 : vector<32x16xf32> to vector<32x16xbf16>
    %c6_66 = arith.constant 6 : index
    %c0_67 = arith.constant 0 : index
    %c0_68 = arith.constant 0 : index
    %118 = vector.load %arg3[%c6_66, %c0_67, %c0_68] : memref<16x16x8xbf16, #tpu.memory_space<vmem>>, vector<1x16x8xbf16>
    %119 = vector.shape_cast %118 : vector<1x16x8xbf16> to vector<16x8xbf16>
    %cst_69 = arith.constant dense<0.000000e+00> : vector<32x8xf32>
    %120 = tpu.matmul %117, %119, %cst_69 {dimension_numbers = #tpu.dot_dimension_numbers<[1], [0], [0], [1], [0, 0, 1, 1], [], []>} : vector<32x16xbf16>, vector<16x8xbf16>, vector<32x8xf32> -> vector<32x8xf32>
    %121 = arith.addf %114, %120 : vector<32x8xf32>
    %122 = vector.extract_strided_slice %5 {offsets = [0, 1, 2, 0], sizes = [2, 4, 4, 16], strides = [1, 1, 1, 1]} : vector<2x6x6x16xf32> to vector<2x4x4x16xf32>
    %123 = vector.shape_cast %122 : vector<2x4x4x16xf32> to vector<32x16xf32>
    %124 = arith.truncf %123 : vector<32x16xf32> to vector<32x16xbf16>
    %c7_70 = arith.constant 7 : index
    %c0_71 = arith.constant 0 : index
    %c0_72 = arith.constant 0 : index
    %125 = vector.load %arg3[%c7_70, %c0_71, %c0_72] : memref<16x16x8xbf16, #tpu.memory_space<vmem>>, vector<1x16x8xbf16>
    %126 = vector.shape_cast %125 : vector<1x16x8xbf16> to vector<16x8xbf16>
    %cst_73 = arith.constant dense<0.000000e+00> : vector<32x8xf32>
    %127 = tpu.matmul %124, %126, %cst_73 {dimension_numbers = #tpu.dot_dimension_numbers<[1], [0], [0], [1], [0, 0, 1, 1], [], []>} : vector<32x16xbf16>, vector<16x8xbf16>, vector<32x8xf32> -> vector<32x8xf32>
    %128 = arith.addf %121, %127 : vector<32x8xf32>
    %129 = vector.broadcast %6 : vector<1x8xf32> to vector<32x8xf32>
    %130 = arith.mulf %128, %129 : vector<32x8xf32>
    %131 = vector.broadcast %7 : vector<1x8xf32> to vector<32x8xf32>
    %132 = arith.addf %130, %131 : vector<32x8xf32>
    %c1_74 = arith.constant 1 : index
    %c0_75 = arith.constant 0 : index
    %c0_76 = arith.constant 0 : index
    %133 = vector.load %arg6[%c1_74, %c0_75, %c0_76] : memref<4x32x8xf32, #tpu.memory_space<vmem>>, vector<1x32x8xf32>
    %134 = vector.shape_cast %133 : vector<1x32x8xf32> to vector<32x8xf32>
    %135 = vector.shape_cast %132 : vector<32x8xf32> to vector<1x32x8xf32>
    tpu.vector_store %arg6[%c1_74, %c0_75, %c0_76], %135 {strides = array<i32>} : memref<4x32x8xf32, #tpu.memory_space<vmem>>, vector<1x32x8xf32>,
    %cst_77 = arith.constant 0.000000e+00 : f32
    %136 = vector.broadcast %cst_77 : f32 to vector<32x8xf32>
    %137 = vector.extract_strided_slice %2 {offsets = [0, 1, 0, 0], sizes = [2, 4, 4, 16], strides = [1, 1, 1, 1]} : vector<2x6x6x16xf32> to vector<2x4x4x16xf32>
    %138 = vector.shape_cast %137 : vector<2x4x4x16xf32> to vector<32x16xf32>
    %139 = arith.truncf %138 : vector<32x16xf32> to vector<32x16xbf16>
    %c8 = arith.constant 8 : index
    %c0_78 = arith.constant 0 : index
    %c0_79 = arith.constant 0 : index
    %140 = vector.load %arg2[%c8, %c0_78, %c0_79] : memref<16x16x8xbf16, #tpu.memory_space<vmem>>, vector<1x16x8xbf16>
    %141 = vector.shape_cast %140 : vector<1x16x8xbf16> to vector<16x8xbf16>
    %cst_80 = arith.constant dense<0.000000e+00> : vector<32x8xf32>
    %142 = tpu.matmul %139, %141, %cst_80 {dimension_numbers = #tpu.dot_dimension_numbers<[1], [0], [0], [1], [0, 0, 1, 1], [], []>} : vector<32x16xbf16>, vector<16x8xbf16>, vector<32x8xf32> -> vector<32x8xf32>
    %143 = arith.addf %136, %142 : vector<32x8xf32>
    %144 = vector.extract_strided_slice %2 {offsets = [0, 1, 1, 0], sizes = [2, 4, 4, 16], strides = [1, 1, 1, 1]} : vector<2x6x6x16xf32> to vector<2x4x4x16xf32>
    %145 = vector.shape_cast %144 : vector<2x4x4x16xf32> to vector<32x16xf32>
    %146 = arith.truncf %145 : vector<32x16xf32> to vector<32x16xbf16>
    %c9 = arith.constant 9 : index
    %c0_81 = arith.constant 0 : index
    %c0_82 = arith.constant 0 : index
    %147 = vector.load %arg2[%c9, %c0_81, %c0_82] : memref<16x16x8xbf16, #tpu.memory_space<vmem>>, vector<1x16x8xbf16>
    %148 = vector.shape_cast %147 : vector<1x16x8xbf16> to vector<16x8xbf16>
    %cst_83 = arith.constant dense<0.000000e+00> : vector<32x8xf32>
    %149 = tpu.matmul %146, %148, %cst_83 {dimension_numbers = #tpu.dot_dimension_numbers<[1], [0], [0], [1], [0, 0, 1, 1], [], []>} : vector<32x16xbf16>, vector<16x8xbf16>, vector<32x8xf32> -> vector<32x8xf32>
    %150 = arith.addf %143, %149 : vector<32x8xf32>
    %151 = vector.extract_strided_slice %2 {offsets = [0, 2, 0, 0], sizes = [2, 4, 4, 16], strides = [1, 1, 1, 1]} : vector<2x6x6x16xf32> to vector<2x4x4x16xf32>
    %152 = vector.shape_cast %151 : vector<2x4x4x16xf32> to vector<32x16xf32>
    %153 = arith.truncf %152 : vector<32x16xf32> to vector<32x16xbf16>
    %c10 = arith.constant 10 : index
    %c0_84 = arith.constant 0 : index
    %c0_85 = arith.constant 0 : index
    %154 = vector.load %arg2[%c10, %c0_84, %c0_85] : memref<16x16x8xbf16, #tpu.memory_space<vmem>>, vector<1x16x8xbf16>
    %155 = vector.shape_cast %154 : vector<1x16x8xbf16> to vector<16x8xbf16>
    %cst_86 = arith.constant dense<0.000000e+00> : vector<32x8xf32>
    %156 = tpu.matmul %153, %155, %cst_86 {dimension_numbers = #tpu.dot_dimension_numbers<[1], [0], [0], [1], [0, 0, 1, 1], [], []>} : vector<32x16xbf16>, vector<16x8xbf16>, vector<32x8xf32> -> vector<32x8xf32>
    %157 = arith.addf %150, %156 : vector<32x8xf32>
    %158 = vector.extract_strided_slice %2 {offsets = [0, 2, 1, 0], sizes = [2, 4, 4, 16], strides = [1, 1, 1, 1]} : vector<2x6x6x16xf32> to vector<2x4x4x16xf32>
    %159 = vector.shape_cast %158 : vector<2x4x4x16xf32> to vector<32x16xf32>
    %160 = arith.truncf %159 : vector<32x16xf32> to vector<32x16xbf16>
    %c11 = arith.constant 11 : index
    %c0_87 = arith.constant 0 : index
    %c0_88 = arith.constant 0 : index
    %161 = vector.load %arg2[%c11, %c0_87, %c0_88] : memref<16x16x8xbf16, #tpu.memory_space<vmem>>, vector<1x16x8xbf16>
    %162 = vector.shape_cast %161 : vector<1x16x8xbf16> to vector<16x8xbf16>
    %cst_89 = arith.constant dense<0.000000e+00> : vector<32x8xf32>
    %163 = tpu.matmul %160, %162, %cst_89 {dimension_numbers = #tpu.dot_dimension_numbers<[1], [0], [0], [1], [0, 0, 1, 1], [], []>} : vector<32x16xbf16>, vector<16x8xbf16>, vector<32x8xf32> -> vector<32x8xf32>
    %164 = arith.addf %157, %163 : vector<32x8xf32>
    %165 = vector.extract_strided_slice %5 {offsets = [0, 1, 0, 0], sizes = [2, 4, 4, 16], strides = [1, 1, 1, 1]} : vector<2x6x6x16xf32> to vector<2x4x4x16xf32>
    %166 = vector.shape_cast %165 : vector<2x4x4x16xf32> to vector<32x16xf32>
    %167 = arith.truncf %166 : vector<32x16xf32> to vector<32x16xbf16>
    %c8_90 = arith.constant 8 : index
    %c0_91 = arith.constant 0 : index
    %c0_92 = arith.constant 0 : index
    %168 = vector.load %arg3[%c8_90, %c0_91, %c0_92] : memref<16x16x8xbf16, #tpu.memory_space<vmem>>, vector<1x16x8xbf16>
    %169 = vector.shape_cast %168 : vector<1x16x8xbf16> to vector<16x8xbf16>
    %cst_93 = arith.constant dense<0.000000e+00> : vector<32x8xf32>
    %170 = tpu.matmul %167, %169, %cst_93 {dimension_numbers = #tpu.dot_dimension_numbers<[1], [0], [0], [1], [0, 0, 1, 1], [], []>} : vector<32x16xbf16>, vector<16x8xbf16>, vector<32x8xf32> -> vector<32x8xf32>
    %171 = arith.addf %164, %170 : vector<32x8xf32>
    %172 = vector.extract_strided_slice %5 {offsets = [0, 1, 1, 0], sizes = [2, 4, 4, 16], strides = [1, 1, 1, 1]} : vector<2x6x6x16xf32> to vector<2x4x4x16xf32>
    %173 = vector.shape_cast %172 : vector<2x4x4x16xf32> to vector<32x16xf32>
    %174 = arith.truncf %173 : vector<32x16xf32> to vector<32x16xbf16>
    %c9_94 = arith.constant 9 : index
    %c0_95 = arith.constant 0 : index
    %c0_96 = arith.constant 0 : index
    %175 = vector.load %arg3[%c9_94, %c0_95, %c0_96] : memref<16x16x8xbf16, #tpu.memory_space<vmem>>, vector<1x16x8xbf16>
    %176 = vector.shape_cast %175 : vector<1x16x8xbf16> to vector<16x8xbf16>
    %cst_97 = arith.constant dense<0.000000e+00> : vector<32x8xf32>
    %177 = tpu.matmul %174, %176, %cst_97 {dimension_numbers = #tpu.dot_dimension_numbers<[1], [0], [0], [1], [0, 0, 1, 1], [], []>} : vector<32x16xbf16>, vector<16x8xbf16>, vector<32x8xf32> -> vector<32x8xf32>
    %178 = arith.addf %171, %177 : vector<32x8xf32>
    %179 = vector.extract_strided_slice %5 {offsets = [0, 2, 0, 0], sizes = [2, 4, 4, 16], strides = [1, 1, 1, 1]} : vector<2x6x6x16xf32> to vector<2x4x4x16xf32>
    %180 = vector.shape_cast %179 : vector<2x4x4x16xf32> to vector<32x16xf32>
    %181 = arith.truncf %180 : vector<32x16xf32> to vector<32x16xbf16>
    %c10_98 = arith.constant 10 : index
    %c0_99 = arith.constant 0 : index
    %c0_100 = arith.constant 0 : index
    %182 = vector.load %arg3[%c10_98, %c0_99, %c0_100] : memref<16x16x8xbf16, #tpu.memory_space<vmem>>, vector<1x16x8xbf16>
    %183 = vector.shape_cast %182 : vector<1x16x8xbf16> to vector<16x8xbf16>
    %cst_101 = arith.constant dense<0.000000e+00> : vector<32x8xf32>
    %184 = tpu.matmul %181, %183, %cst_101 {dimension_numbers = #tpu.dot_dimension_numbers<[1], [0], [0], [1], [0, 0, 1, 1], [], []>} : vector<32x16xbf16>, vector<16x8xbf16>, vector<32x8xf32> -> vector<32x8xf32>
    %185 = arith.addf %178, %184 : vector<32x8xf32>
    %186 = vector.extract_strided_slice %5 {offsets = [0, 2, 1, 0], sizes = [2, 4, 4, 16], strides = [1, 1, 1, 1]} : vector<2x6x6x16xf32> to vector<2x4x4x16xf32>
    %187 = vector.shape_cast %186 : vector<2x4x4x16xf32> to vector<32x16xf32>
    %188 = arith.truncf %187 : vector<32x16xf32> to vector<32x16xbf16>
    %c11_102 = arith.constant 11 : index
    %c0_103 = arith.constant 0 : index
    %c0_104 = arith.constant 0 : index
    %189 = vector.load %arg3[%c11_102, %c0_103, %c0_104] : memref<16x16x8xbf16, #tpu.memory_space<vmem>>, vector<1x16x8xbf16>
    %190 = vector.shape_cast %189 : vector<1x16x8xbf16> to vector<16x8xbf16>
    %cst_105 = arith.constant dense<0.000000e+00> : vector<32x8xf32>
    %191 = tpu.matmul %188, %190, %cst_105 {dimension_numbers = #tpu.dot_dimension_numbers<[1], [0], [0], [1], [0, 0, 1, 1], [], []>} : vector<32x16xbf16>, vector<16x8xbf16>, vector<32x8xf32> -> vector<32x8xf32>
    %192 = arith.addf %185, %191 : vector<32x8xf32>
    %193 = vector.broadcast %6 : vector<1x8xf32> to vector<32x8xf32>
    %194 = arith.mulf %192, %193 : vector<32x8xf32>
    %195 = vector.broadcast %7 : vector<1x8xf32> to vector<32x8xf32>
    %196 = arith.addf %194, %195 : vector<32x8xf32>
    %c2_106 = arith.constant 2 : index
    %c0_107 = arith.constant 0 : index
    %c0_108 = arith.constant 0 : index
    %197 = vector.load %arg6[%c2_106, %c0_107, %c0_108] : memref<4x32x8xf32, #tpu.memory_space<vmem>>, vector<1x32x8xf32>
    %198 = vector.shape_cast %197 : vector<1x32x8xf32> to vector<32x8xf32>
    %199 = vector.shape_cast %196 : vector<32x8xf32> to vector<1x32x8xf32>
    tpu.vector_store %arg6[%c2_106, %c0_107, %c0_108], %199 {strides = array<i32>} : memref<4x32x8xf32, #tpu.memory_space<vmem>>, vector<1x32x8xf32>,
    %cst_109 = arith.constant 0.000000e+00 : f32
    %200 = vector.broadcast %cst_109 : f32 to vector<32x8xf32>
    %201 = vector.extract_strided_slice %2 {offsets = [0, 1, 1, 0], sizes = [2, 4, 4, 16], strides = [1, 1, 1, 1]} : vector<2x6x6x16xf32> to vector<2x4x4x16xf32>
    %202 = vector.shape_cast %201 : vector<2x4x4x16xf32> to vector<32x16xf32>
    %203 = arith.truncf %202 : vector<32x16xf32> to vector<32x16xbf16>
    %c12 = arith.constant 12 : index
    %c0_110 = arith.constant 0 : index
    %c0_111 = arith.constant 0 : index
    %204 = vector.load %arg2[%c12, %c0_110, %c0_111] : memref<16x16x8xbf16, #tpu.memory_space<vmem>>, vector<1x16x8xbf16>
    %205 = vector.shape_cast %204 : vector<1x16x8xbf16> to vector<16x8xbf16>
    %cst_112 = arith.constant dense<0.000000e+00> : vector<32x8xf32>
    %206 = tpu.matmul %203, %205, %cst_112 {dimension_numbers = #tpu.dot_dimension_numbers<[1], [0], [0], [1], [0, 0, 1, 1], [], []>} : vector<32x16xbf16>, vector<16x8xbf16>, vector<32x8xf32> -> vector<32x8xf32>
    %207 = arith.addf %200, %206 : vector<32x8xf32>
    %208 = vector.extract_strided_slice %2 {offsets = [0, 1, 2, 0], sizes = [2, 4, 4, 16], strides = [1, 1, 1, 1]} : vector<2x6x6x16xf32> to vector<2x4x4x16xf32>
    %209 = vector.shape_cast %208 : vector<2x4x4x16xf32> to vector<32x16xf32>
    %210 = arith.truncf %209 : vector<32x16xf32> to vector<32x16xbf16>
    %c13 = arith.constant 13 : index
    %c0_113 = arith.constant 0 : index
    %c0_114 = arith.constant 0 : index
    %211 = vector.load %arg2[%c13, %c0_113, %c0_114] : memref<16x16x8xbf16, #tpu.memory_space<vmem>>, vector<1x16x8xbf16>
    %212 = vector.shape_cast %211 : vector<1x16x8xbf16> to vector<16x8xbf16>
    %cst_115 = arith.constant dense<0.000000e+00> : vector<32x8xf32>
    %213 = tpu.matmul %210, %212, %cst_115 {dimension_numbers = #tpu.dot_dimension_numbers<[1], [0], [0], [1], [0, 0, 1, 1], [], []>} : vector<32x16xbf16>, vector<16x8xbf16>, vector<32x8xf32> -> vector<32x8xf32>
    %214 = arith.addf %207, %213 : vector<32x8xf32>
    %215 = vector.extract_strided_slice %2 {offsets = [0, 2, 1, 0], sizes = [2, 4, 4, 16], strides = [1, 1, 1, 1]} : vector<2x6x6x16xf32> to vector<2x4x4x16xf32>
    %216 = vector.shape_cast %215 : vector<2x4x4x16xf32> to vector<32x16xf32>
    %217 = arith.truncf %216 : vector<32x16xf32> to vector<32x16xbf16>
    %c14 = arith.constant 14 : index
    %c0_116 = arith.constant 0 : index
    %c0_117 = arith.constant 0 : index
    %218 = vector.load %arg2[%c14, %c0_116, %c0_117] : memref<16x16x8xbf16, #tpu.memory_space<vmem>>, vector<1x16x8xbf16>
    %219 = vector.shape_cast %218 : vector<1x16x8xbf16> to vector<16x8xbf16>
    %cst_118 = arith.constant dense<0.000000e+00> : vector<32x8xf32>
    %220 = tpu.matmul %217, %219, %cst_118 {dimension_numbers = #tpu.dot_dimension_numbers<[1], [0], [0], [1], [0, 0, 1, 1], [], []>} : vector<32x16xbf16>, vector<16x8xbf16>, vector<32x8xf32> -> vector<32x8xf32>
    %221 = arith.addf %214, %220 : vector<32x8xf32>
    %222 = vector.extract_strided_slice %2 {offsets = [0, 2, 2, 0], sizes = [2, 4, 4, 16], strides = [1, 1, 1, 1]} : vector<2x6x6x16xf32> to vector<2x4x4x16xf32>
    %223 = vector.shape_cast %222 : vector<2x4x4x16xf32> to vector<32x16xf32>
    %224 = arith.truncf %223 : vector<32x16xf32> to vector<32x16xbf16>
    %c15 = arith.constant 15 : index
    %c0_119 = arith.constant 0 : index
    %c0_120 = arith.constant 0 : index
    %225 = vector.load %arg2[%c15, %c0_119, %c0_120] : memref<16x16x8xbf16, #tpu.memory_space<vmem>>, vector<1x16x8xbf16>
    %226 = vector.shape_cast %225 : vector<1x16x8xbf16> to vector<16x8xbf16>
    %cst_121 = arith.constant dense<0.000000e+00> : vector<32x8xf32>
    %227 = tpu.matmul %224, %226, %cst_121 {dimension_numbers = #tpu.dot_dimension_numbers<[1], [0], [0], [1], [0, 0, 1, 1], [], []>} : vector<32x16xbf16>, vector<16x8xbf16>, vector<32x8xf32> -> vector<32x8xf32>
    %228 = arith.addf %221, %227 : vector<32x8xf32>
    %229 = vector.extract_strided_slice %5 {offsets = [0, 1, 1, 0], sizes = [2, 4, 4, 16], strides = [1, 1, 1, 1]} : vector<2x6x6x16xf32> to vector<2x4x4x16xf32>
    %230 = vector.shape_cast %229 : vector<2x4x4x16xf32> to vector<32x16xf32>
    %231 = arith.truncf %230 : vector<32x16xf32> to vector<32x16xbf16>
    %c12_122 = arith.constant 12 : index
    %c0_123 = arith.constant 0 : index
    %c0_124 = arith.constant 0 : index
    %232 = vector.load %arg3[%c12_122, %c0_123, %c0_124] : memref<16x16x8xbf16, #tpu.memory_space<vmem>>, vector<1x16x8xbf16>
    %233 = vector.shape_cast %232 : vector<1x16x8xbf16> to vector<16x8xbf16>
    %cst_125 = arith.constant dense<0.000000e+00> : vector<32x8xf32>
    %234 = tpu.matmul %231, %233, %cst_125 {dimension_numbers = #tpu.dot_dimension_numbers<[1], [0], [0], [1], [0, 0, 1, 1], [], []>} : vector<32x16xbf16>, vector<16x8xbf16>, vector<32x8xf32> -> vector<32x8xf32>
    %235 = arith.addf %228, %234 : vector<32x8xf32>
    %236 = vector.extract_strided_slice %5 {offsets = [0, 1, 2, 0], sizes = [2, 4, 4, 16], strides = [1, 1, 1, 1]} : vector<2x6x6x16xf32> to vector<2x4x4x16xf32>
    %237 = vector.shape_cast %236 : vector<2x4x4x16xf32> to vector<32x16xf32>
    %238 = arith.truncf %237 : vector<32x16xf32> to vector<32x16xbf16>
    %c13_126 = arith.constant 13 : index
    %c0_127 = arith.constant 0 : index
    %c0_128 = arith.constant 0 : index
    %239 = vector.load %arg3[%c13_126, %c0_127, %c0_128] : memref<16x16x8xbf16, #tpu.memory_space<vmem>>, vector<1x16x8xbf16>
    %240 = vector.shape_cast %239 : vector<1x16x8xbf16> to vector<16x8xbf16>
    %cst_129 = arith.constant dense<0.000000e+00> : vector<32x8xf32>
    %241 = tpu.matmul %238, %240, %cst_129 {dimension_numbers = #tpu.dot_dimension_numbers<[1], [0], [0], [1], [0, 0, 1, 1], [], []>} : vector<32x16xbf16>, vector<16x8xbf16>, vector<32x8xf32> -> vector<32x8xf32>
    %242 = arith.addf %235, %241 : vector<32x8xf32>
    %243 = vector.extract_strided_slice %5 {offsets = [0, 2, 1, 0], sizes = [2, 4, 4, 16], strides = [1, 1, 1, 1]} : vector<2x6x6x16xf32> to vector<2x4x4x16xf32>
    %244 = vector.shape_cast %243 : vector<2x4x4x16xf32> to vector<32x16xf32>
    %245 = arith.truncf %244 : vector<32x16xf32> to vector<32x16xbf16>
    %c14_130 = arith.constant 14 : index
    %c0_131 = arith.constant 0 : index
    %c0_132 = arith.constant 0 : index
    %246 = vector.load %arg3[%c14_130, %c0_131, %c0_132] : memref<16x16x8xbf16, #tpu.memory_space<vmem>>, vector<1x16x8xbf16>
    %247 = vector.shape_cast %246 : vector<1x16x8xbf16> to vector<16x8xbf16>
    %cst_133 = arith.constant dense<0.000000e+00> : vector<32x8xf32>
    %248 = tpu.matmul %245, %247, %cst_133 {dimension_numbers = #tpu.dot_dimension_numbers<[1], [0], [0], [1], [0, 0, 1, 1], [], []>} : vector<32x16xbf16>, vector<16x8xbf16>, vector<32x8xf32> -> vector<32x8xf32>
    %249 = arith.addf %242, %248 : vector<32x8xf32>
    %250 = vector.extract_strided_slice %5 {offsets = [0, 2, 2, 0], sizes = [2, 4, 4, 16], strides = [1, 1, 1, 1]} : vector<2x6x6x16xf32> to vector<2x4x4x16xf32>
    %251 = vector.shape_cast %250 : vector<2x4x4x16xf32> to vector<32x16xf32>
    %252 = arith.truncf %251 : vector<32x16xf32> to vector<32x16xbf16>
    %c15_134 = arith.constant 15 : index
    %c0_135 = arith.constant 0 : index
    %c0_136 = arith.constant 0 : index
    %253 = vector.load %arg3[%c15_134, %c0_135, %c0_136] : memref<16x16x8xbf16, #tpu.memory_space<vmem>>, vector<1x16x8xbf16>
    %254 = vector.shape_cast %253 : vector<1x16x8xbf16> to vector<16x8xbf16>
    %cst_137 = arith.constant dense<0.000000e+00> : vector<32x8xf32>
    %255 = tpu.matmul %252, %254, %cst_137 {dimension_numbers = #tpu.dot_dimension_numbers<[1], [0], [0], [1], [0, 0, 1, 1], [], []>} : vector<32x16xbf16>, vector<16x8xbf16>, vector<32x8xf32> -> vector<32x8xf32>
    %256 = arith.addf %249, %255 : vector<32x8xf32>
    %257 = vector.broadcast %6 : vector<1x8xf32> to vector<32x8xf32>
    %258 = arith.mulf %256, %257 : vector<32x8xf32>
    %259 = vector.broadcast %7 : vector<1x8xf32> to vector<32x8xf32>
    %260 = arith.addf %258, %259 : vector<32x8xf32>
    %c3_138 = arith.constant 3 : index
    %c0_139 = arith.constant 0 : index
    %c0_140 = arith.constant 0 : index
    %261 = vector.load %arg6[%c3_138, %c0_139, %c0_140] : memref<4x32x8xf32, #tpu.memory_space<vmem>>, vector<1x32x8xf32>
    %262 = vector.shape_cast %261 : vector<1x32x8xf32> to vector<32x8xf32>
    %263 = vector.shape_cast %260 : vector<32x8xf32> to vector<1x32x8xf32>
    tpu.vector_store %arg6[%c3_138, %c0_139, %c0_140], %263 {strides = array<i32>} : memref<4x32x8xf32, #tpu.memory_space<vmem>>, vector<1x32x8xf32>,
    return
  }
}

module attributes {stable_mosaic.version = 11 : i64} {
  func.func @_deconv_kernel(%arg0: memref<2x10x10x8xf32, #tpu.memory_space<vmem>>, %arg1: memref<2x10x10x8xf32, #tpu.memory_space<vmem>>, %arg2: memref<16x8x3xbf16, #tpu.memory_space<vmem>>, %arg3: memref<16x8x3xbf16, #tpu.memory_space<vmem>>, %arg4: memref<1x3xf32, #tpu.memory_space<vmem>>, %arg5: memref<1x3xf32, #tpu.memory_space<vmem>>, %arg6: memref<4x128x3xf32, #tpu.memory_space<vmem>>) attributes {dimension_semantics = [], scalar_prefetch = 0 : i64, scratch_operands = 0 : i64, tpu.core_type = #tpu.core_type<tc>} {
    %c0 = arith.constant 0 : index
    %c0_0 = arith.constant 0 : index
    %c0_1 = arith.constant 0 : index
    %c0_2 = arith.constant 0 : index
    %0 = vector.load %arg0[%c0, %c0_0, %c0_1, %c0_2] : memref<2x10x10x8xf32, #tpu.memory_space<vmem>>, vector<2x10x10x8xf32>
    %cst = arith.constant 0.000000e+00 : f32
    %1 = vector.broadcast %cst : f32 to vector<2x10x10x8xf32>
    %2 = arith.maximumf %0, %1 : vector<2x10x10x8xf32>
    %c0_3 = arith.constant 0 : index
    %c0_4 = arith.constant 0 : index
    %c0_5 = arith.constant 0 : index
    %c0_6 = arith.constant 0 : index
    %3 = vector.load %arg1[%c0_3, %c0_4, %c0_5, %c0_6] : memref<2x10x10x8xf32, #tpu.memory_space<vmem>>, vector<2x10x10x8xf32>
    %cst_7 = arith.constant 0.000000e+00 : f32
    %4 = vector.broadcast %cst_7 : f32 to vector<2x10x10x8xf32>
    %5 = arith.maximumf %3, %4 : vector<2x10x10x8xf32>
    %c0_8 = arith.constant 0 : index
    %c0_9 = arith.constant 0 : index
    %6 = vector.load %arg4[%c0_8, %c0_9] : memref<1x3xf32, #tpu.memory_space<vmem>>, vector<1x3xf32>
    %c0_10 = arith.constant 0 : index
    %c0_11 = arith.constant 0 : index
    %7 = vector.load %arg5[%c0_10, %c0_11] : memref<1x3xf32, #tpu.memory_space<vmem>>, vector<1x3xf32>
    %cst_12 = arith.constant 0.000000e+00 : f32
    %8 = vector.broadcast %cst_12 : f32 to vector<128x3xf32>
    %9 = vector.extract_strided_slice %2 {offsets = [0, 0, 0, 0], sizes = [2, 8, 8, 8], strides = [1, 1, 1, 1]} : vector<2x10x10x8xf32> to vector<2x8x8x8xf32>
    %10 = vector.shape_cast %9 : vector<2x8x8x8xf32> to vector<128x8xf32>
    %11 = arith.truncf %10 : vector<128x8xf32> to vector<128x8xbf16>
    %c0_13 = arith.constant 0 : index
    %c0_14 = arith.constant 0 : index
    %c0_15 = arith.constant 0 : index
    %12 = vector.load %arg2[%c0_13, %c0_14, %c0_15] : memref<16x8x3xbf16, #tpu.memory_space<vmem>>, vector<1x8x3xbf16>
    %13 = vector.shape_cast %12 : vector<1x8x3xbf16> to vector<8x3xbf16>
    %cst_16 = arith.constant dense<0.000000e+00> : vector<128x3xf32>
    %14 = tpu.matmul %11, %13, %cst_16 {dimension_numbers = #tpu.dot_dimension_numbers<[1], [0], [0], [1], [0, 0, 1, 1], [], []>} : vector<128x8xbf16>, vector<8x3xbf16>, vector<128x3xf32> -> vector<128x3xf32>
    %15 = arith.addf %8, %14 : vector<128x3xf32>
    %16 = vector.extract_strided_slice %2 {offsets = [0, 0, 1, 0], sizes = [2, 8, 8, 8], strides = [1, 1, 1, 1]} : vector<2x10x10x8xf32> to vector<2x8x8x8xf32>
    %17 = vector.shape_cast %16 : vector<2x8x8x8xf32> to vector<128x8xf32>
    %18 = arith.truncf %17 : vector<128x8xf32> to vector<128x8xbf16>
    %c1 = arith.constant 1 : index
    %c0_17 = arith.constant 0 : index
    %c0_18 = arith.constant 0 : index
    %19 = vector.load %arg2[%c1, %c0_17, %c0_18] : memref<16x8x3xbf16, #tpu.memory_space<vmem>>, vector<1x8x3xbf16>
    %20 = vector.shape_cast %19 : vector<1x8x3xbf16> to vector<8x3xbf16>
    %cst_19 = arith.constant dense<0.000000e+00> : vector<128x3xf32>
    %21 = tpu.matmul %18, %20, %cst_19 {dimension_numbers = #tpu.dot_dimension_numbers<[1], [0], [0], [1], [0, 0, 1, 1], [], []>} : vector<128x8xbf16>, vector<8x3xbf16>, vector<128x3xf32> -> vector<128x3xf32>
    %22 = arith.addf %15, %21 : vector<128x3xf32>
    %23 = vector.extract_strided_slice %2 {offsets = [0, 1, 0, 0], sizes = [2, 8, 8, 8], strides = [1, 1, 1, 1]} : vector<2x10x10x8xf32> to vector<2x8x8x8xf32>
    %24 = vector.shape_cast %23 : vector<2x8x8x8xf32> to vector<128x8xf32>
    %25 = arith.truncf %24 : vector<128x8xf32> to vector<128x8xbf16>
    %c2 = arith.constant 2 : index
    %c0_20 = arith.constant 0 : index
    %c0_21 = arith.constant 0 : index
    %26 = vector.load %arg2[%c2, %c0_20, %c0_21] : memref<16x8x3xbf16, #tpu.memory_space<vmem>>, vector<1x8x3xbf16>
    %27 = vector.shape_cast %26 : vector<1x8x3xbf16> to vector<8x3xbf16>
    %cst_22 = arith.constant dense<0.000000e+00> : vector<128x3xf32>
    %28 = tpu.matmul %25, %27, %cst_22 {dimension_numbers = #tpu.dot_dimension_numbers<[1], [0], [0], [1], [0, 0, 1, 1], [], []>} : vector<128x8xbf16>, vector<8x3xbf16>, vector<128x3xf32> -> vector<128x3xf32>
    %29 = arith.addf %22, %28 : vector<128x3xf32>
    %30 = vector.extract_strided_slice %2 {offsets = [0, 1, 1, 0], sizes = [2, 8, 8, 8], strides = [1, 1, 1, 1]} : vector<2x10x10x8xf32> to vector<2x8x8x8xf32>
    %31 = vector.shape_cast %30 : vector<2x8x8x8xf32> to vector<128x8xf32>
    %32 = arith.truncf %31 : vector<128x8xf32> to vector<128x8xbf16>
    %c3 = arith.constant 3 : index
    %c0_23 = arith.constant 0 : index
    %c0_24 = arith.constant 0 : index
    %33 = vector.load %arg2[%c3, %c0_23, %c0_24] : memref<16x8x3xbf16, #tpu.memory_space<vmem>>, vector<1x8x3xbf16>
    %34 = vector.shape_cast %33 : vector<1x8x3xbf16> to vector<8x3xbf16>
    %cst_25 = arith.constant dense<0.000000e+00> : vector<128x3xf32>
    %35 = tpu.matmul %32, %34, %cst_25 {dimension_numbers = #tpu.dot_dimension_numbers<[1], [0], [0], [1], [0, 0, 1, 1], [], []>} : vector<128x8xbf16>, vector<8x3xbf16>, vector<128x3xf32> -> vector<128x3xf32>
    %36 = arith.addf %29, %35 : vector<128x3xf32>
    %37 = vector.extract_strided_slice %5 {offsets = [0, 0, 0, 0], sizes = [2, 8, 8, 8], strides = [1, 1, 1, 1]} : vector<2x10x10x8xf32> to vector<2x8x8x8xf32>
    %38 = vector.shape_cast %37 : vector<2x8x8x8xf32> to vector<128x8xf32>
    %39 = arith.truncf %38 : vector<128x8xf32> to vector<128x8xbf16>
    %c0_26 = arith.constant 0 : index
    %c0_27 = arith.constant 0 : index
    %c0_28 = arith.constant 0 : index
    %40 = vector.load %arg3[%c0_26, %c0_27, %c0_28] : memref<16x8x3xbf16, #tpu.memory_space<vmem>>, vector<1x8x3xbf16>
    %41 = vector.shape_cast %40 : vector<1x8x3xbf16> to vector<8x3xbf16>
    %cst_29 = arith.constant dense<0.000000e+00> : vector<128x3xf32>
    %42 = tpu.matmul %39, %41, %cst_29 {dimension_numbers = #tpu.dot_dimension_numbers<[1], [0], [0], [1], [0, 0, 1, 1], [], []>} : vector<128x8xbf16>, vector<8x3xbf16>, vector<128x3xf32> -> vector<128x3xf32>
    %43 = arith.addf %36, %42 : vector<128x3xf32>
    %44 = vector.extract_strided_slice %5 {offsets = [0, 0, 1, 0], sizes = [2, 8, 8, 8], strides = [1, 1, 1, 1]} : vector<2x10x10x8xf32> to vector<2x8x8x8xf32>
    %45 = vector.shape_cast %44 : vector<2x8x8x8xf32> to vector<128x8xf32>
    %46 = arith.truncf %45 : vector<128x8xf32> to vector<128x8xbf16>
    %c1_30 = arith.constant 1 : index
    %c0_31 = arith.constant 0 : index
    %c0_32 = arith.constant 0 : index
    %47 = vector.load %arg3[%c1_30, %c0_31, %c0_32] : memref<16x8x3xbf16, #tpu.memory_space<vmem>>, vector<1x8x3xbf16>
    %48 = vector.shape_cast %47 : vector<1x8x3xbf16> to vector<8x3xbf16>
    %cst_33 = arith.constant dense<0.000000e+00> : vector<128x3xf32>
    %49 = tpu.matmul %46, %48, %cst_33 {dimension_numbers = #tpu.dot_dimension_numbers<[1], [0], [0], [1], [0, 0, 1, 1], [], []>} : vector<128x8xbf16>, vector<8x3xbf16>, vector<128x3xf32> -> vector<128x3xf32>
    %50 = arith.addf %43, %49 : vector<128x3xf32>
    %51 = vector.extract_strided_slice %5 {offsets = [0, 1, 0, 0], sizes = [2, 8, 8, 8], strides = [1, 1, 1, 1]} : vector<2x10x10x8xf32> to vector<2x8x8x8xf32>
    %52 = vector.shape_cast %51 : vector<2x8x8x8xf32> to vector<128x8xf32>
    %53 = arith.truncf %52 : vector<128x8xf32> to vector<128x8xbf16>
    %c2_34 = arith.constant 2 : index
    %c0_35 = arith.constant 0 : index
    %c0_36 = arith.constant 0 : index
    %54 = vector.load %arg3[%c2_34, %c0_35, %c0_36] : memref<16x8x3xbf16, #tpu.memory_space<vmem>>, vector<1x8x3xbf16>
    %55 = vector.shape_cast %54 : vector<1x8x3xbf16> to vector<8x3xbf16>
    %cst_37 = arith.constant dense<0.000000e+00> : vector<128x3xf32>
    %56 = tpu.matmul %53, %55, %cst_37 {dimension_numbers = #tpu.dot_dimension_numbers<[1], [0], [0], [1], [0, 0, 1, 1], [], []>} : vector<128x8xbf16>, vector<8x3xbf16>, vector<128x3xf32> -> vector<128x3xf32>
    %57 = arith.addf %50, %56 : vector<128x3xf32>
    %58 = vector.extract_strided_slice %5 {offsets = [0, 1, 1, 0], sizes = [2, 8, 8, 8], strides = [1, 1, 1, 1]} : vector<2x10x10x8xf32> to vector<2x8x8x8xf32>
    %59 = vector.shape_cast %58 : vector<2x8x8x8xf32> to vector<128x8xf32>
    %60 = arith.truncf %59 : vector<128x8xf32> to vector<128x8xbf16>
    %c3_38 = arith.constant 3 : index
    %c0_39 = arith.constant 0 : index
    %c0_40 = arith.constant 0 : index
    %61 = vector.load %arg3[%c3_38, %c0_39, %c0_40] : memref<16x8x3xbf16, #tpu.memory_space<vmem>>, vector<1x8x3xbf16>
    %62 = vector.shape_cast %61 : vector<1x8x3xbf16> to vector<8x3xbf16>
    %cst_41 = arith.constant dense<0.000000e+00> : vector<128x3xf32>
    %63 = tpu.matmul %60, %62, %cst_41 {dimension_numbers = #tpu.dot_dimension_numbers<[1], [0], [0], [1], [0, 0, 1, 1], [], []>} : vector<128x8xbf16>, vector<8x3xbf16>, vector<128x3xf32> -> vector<128x3xf32>
    %64 = arith.addf %57, %63 : vector<128x3xf32>
    %65 = vector.broadcast %6 : vector<1x3xf32> to vector<128x3xf32>
    %66 = arith.mulf %64, %65 : vector<128x3xf32>
    %67 = vector.broadcast %7 : vector<1x3xf32> to vector<128x3xf32>
    %68 = arith.addf %66, %67 : vector<128x3xf32>
    %69 = math.tanh %68 : vector<128x3xf32>
    %c0_42 = arith.constant 0 : index
    %c0_43 = arith.constant 0 : index
    %c0_44 = arith.constant 0 : index
    %70 = vector.load %arg6[%c0_42, %c0_43, %c0_44] : memref<4x128x3xf32, #tpu.memory_space<vmem>>, vector<1x128x3xf32>
    %71 = vector.shape_cast %70 : vector<1x128x3xf32> to vector<128x3xf32>
    %72 = vector.shape_cast %69 : vector<128x3xf32> to vector<1x128x3xf32>
    tpu.vector_store %arg6[%c0_42, %c0_43, %c0_44], %72 {strides = array<i32>} : memref<4x128x3xf32, #tpu.memory_space<vmem>>, vector<1x128x3xf32>,
    %cst_45 = arith.constant 0.000000e+00 : f32
    %73 = vector.broadcast %cst_45 : f32 to vector<128x3xf32>
    %74 = vector.extract_strided_slice %2 {offsets = [0, 0, 1, 0], sizes = [2, 8, 8, 8], strides = [1, 1, 1, 1]} : vector<2x10x10x8xf32> to vector<2x8x8x8xf32>
    %75 = vector.shape_cast %74 : vector<2x8x8x8xf32> to vector<128x8xf32>
    %76 = arith.truncf %75 : vector<128x8xf32> to vector<128x8xbf16>
    %c4 = arith.constant 4 : index
    %c0_46 = arith.constant 0 : index
    %c0_47 = arith.constant 0 : index
    %77 = vector.load %arg2[%c4, %c0_46, %c0_47] : memref<16x8x3xbf16, #tpu.memory_space<vmem>>, vector<1x8x3xbf16>
    %78 = vector.shape_cast %77 : vector<1x8x3xbf16> to vector<8x3xbf16>
    %cst_48 = arith.constant dense<0.000000e+00> : vector<128x3xf32>
    %79 = tpu.matmul %76, %78, %cst_48 {dimension_numbers = #tpu.dot_dimension_numbers<[1], [0], [0], [1], [0, 0, 1, 1], [], []>} : vector<128x8xbf16>, vector<8x3xbf16>, vector<128x3xf32> -> vector<128x3xf32>
    %80 = arith.addf %73, %79 : vector<128x3xf32>
    %81 = vector.extract_strided_slice %2 {offsets = [0, 0, 2, 0], sizes = [2, 8, 8, 8], strides = [1, 1, 1, 1]} : vector<2x10x10x8xf32> to vector<2x8x8x8xf32>
    %82 = vector.shape_cast %81 : vector<2x8x8x8xf32> to vector<128x8xf32>
    %83 = arith.truncf %82 : vector<128x8xf32> to vector<128x8xbf16>
    %c5 = arith.constant 5 : index
    %c0_49 = arith.constant 0 : index
    %c0_50 = arith.constant 0 : index
    %84 = vector.load %arg2[%c5, %c0_49, %c0_50] : memref<16x8x3xbf16, #tpu.memory_space<vmem>>, vector<1x8x3xbf16>
    %85 = vector.shape_cast %84 : vector<1x8x3xbf16> to vector<8x3xbf16>
    %cst_51 = arith.constant dense<0.000000e+00> : vector<128x3xf32>
    %86 = tpu.matmul %83, %85, %cst_51 {dimension_numbers = #tpu.dot_dimension_numbers<[1], [0], [0], [1], [0, 0, 1, 1], [], []>} : vector<128x8xbf16>, vector<8x3xbf16>, vector<128x3xf32> -> vector<128x3xf32>
    %87 = arith.addf %80, %86 : vector<128x3xf32>
    %88 = vector.extract_strided_slice %2 {offsets = [0, 1, 1, 0], sizes = [2, 8, 8, 8], strides = [1, 1, 1, 1]} : vector<2x10x10x8xf32> to vector<2x8x8x8xf32>
    %89 = vector.shape_cast %88 : vector<2x8x8x8xf32> to vector<128x8xf32>
    %90 = arith.truncf %89 : vector<128x8xf32> to vector<128x8xbf16>
    %c6 = arith.constant 6 : index
    %c0_52 = arith.constant 0 : index
    %c0_53 = arith.constant 0 : index
    %91 = vector.load %arg2[%c6, %c0_52, %c0_53] : memref<16x8x3xbf16, #tpu.memory_space<vmem>>, vector<1x8x3xbf16>
    %92 = vector.shape_cast %91 : vector<1x8x3xbf16> to vector<8x3xbf16>
    %cst_54 = arith.constant dense<0.000000e+00> : vector<128x3xf32>
    %93 = tpu.matmul %90, %92, %cst_54 {dimension_numbers = #tpu.dot_dimension_numbers<[1], [0], [0], [1], [0, 0, 1, 1], [], []>} : vector<128x8xbf16>, vector<8x3xbf16>, vector<128x3xf32> -> vector<128x3xf32>
    %94 = arith.addf %87, %93 : vector<128x3xf32>
    %95 = vector.extract_strided_slice %2 {offsets = [0, 1, 2, 0], sizes = [2, 8, 8, 8], strides = [1, 1, 1, 1]} : vector<2x10x10x8xf32> to vector<2x8x8x8xf32>
    %96 = vector.shape_cast %95 : vector<2x8x8x8xf32> to vector<128x8xf32>
    %97 = arith.truncf %96 : vector<128x8xf32> to vector<128x8xbf16>
    %c7 = arith.constant 7 : index
    %c0_55 = arith.constant 0 : index
    %c0_56 = arith.constant 0 : index
    %98 = vector.load %arg2[%c7, %c0_55, %c0_56] : memref<16x8x3xbf16, #tpu.memory_space<vmem>>, vector<1x8x3xbf16>
    %99 = vector.shape_cast %98 : vector<1x8x3xbf16> to vector<8x3xbf16>
    %cst_57 = arith.constant dense<0.000000e+00> : vector<128x3xf32>
    %100 = tpu.matmul %97, %99, %cst_57 {dimension_numbers = #tpu.dot_dimension_numbers<[1], [0], [0], [1], [0, 0, 1, 1], [], []>} : vector<128x8xbf16>, vector<8x3xbf16>, vector<128x3xf32> -> vector<128x3xf32>
    %101 = arith.addf %94, %100 : vector<128x3xf32>
    %102 = vector.extract_strided_slice %5 {offsets = [0, 0, 1, 0], sizes = [2, 8, 8, 8], strides = [1, 1, 1, 1]} : vector<2x10x10x8xf32> to vector<2x8x8x8xf32>
    %103 = vector.shape_cast %102 : vector<2x8x8x8xf32> to vector<128x8xf32>
    %104 = arith.truncf %103 : vector<128x8xf32> to vector<128x8xbf16>
    %c4_58 = arith.constant 4 : index
    %c0_59 = arith.constant 0 : index
    %c0_60 = arith.constant 0 : index
    %105 = vector.load %arg3[%c4_58, %c0_59, %c0_60] : memref<16x8x3xbf16, #tpu.memory_space<vmem>>, vector<1x8x3xbf16>
    %106 = vector.shape_cast %105 : vector<1x8x3xbf16> to vector<8x3xbf16>
    %cst_61 = arith.constant dense<0.000000e+00> : vector<128x3xf32>
    %107 = tpu.matmul %104, %106, %cst_61 {dimension_numbers = #tpu.dot_dimension_numbers<[1], [0], [0], [1], [0, 0, 1, 1], [], []>} : vector<128x8xbf16>, vector<8x3xbf16>, vector<128x3xf32> -> vector<128x3xf32>
    %108 = arith.addf %101, %107 : vector<128x3xf32>
    %109 = vector.extract_strided_slice %5 {offsets = [0, 0, 2, 0], sizes = [2, 8, 8, 8], strides = [1, 1, 1, 1]} : vector<2x10x10x8xf32> to vector<2x8x8x8xf32>
    %110 = vector.shape_cast %109 : vector<2x8x8x8xf32> to vector<128x8xf32>
    %111 = arith.truncf %110 : vector<128x8xf32> to vector<128x8xbf16>
    %c5_62 = arith.constant 5 : index
    %c0_63 = arith.constant 0 : index
    %c0_64 = arith.constant 0 : index
    %112 = vector.load %arg3[%c5_62, %c0_63, %c0_64] : memref<16x8x3xbf16, #tpu.memory_space<vmem>>, vector<1x8x3xbf16>
    %113 = vector.shape_cast %112 : vector<1x8x3xbf16> to vector<8x3xbf16>
    %cst_65 = arith.constant dense<0.000000e+00> : vector<128x3xf32>
    %114 = tpu.matmul %111, %113, %cst_65 {dimension_numbers = #tpu.dot_dimension_numbers<[1], [0], [0], [1], [0, 0, 1, 1], [], []>} : vector<128x8xbf16>, vector<8x3xbf16>, vector<128x3xf32> -> vector<128x3xf32>
    %115 = arith.addf %108, %114 : vector<128x3xf32>
    %116 = vector.extract_strided_slice %5 {offsets = [0, 1, 1, 0], sizes = [2, 8, 8, 8], strides = [1, 1, 1, 1]} : vector<2x10x10x8xf32> to vector<2x8x8x8xf32>
    %117 = vector.shape_cast %116 : vector<2x8x8x8xf32> to vector<128x8xf32>
    %118 = arith.truncf %117 : vector<128x8xf32> to vector<128x8xbf16>
    %c6_66 = arith.constant 6 : index
    %c0_67 = arith.constant 0 : index
    %c0_68 = arith.constant 0 : index
    %119 = vector.load %arg3[%c6_66, %c0_67, %c0_68] : memref<16x8x3xbf16, #tpu.memory_space<vmem>>, vector<1x8x3xbf16>
    %120 = vector.shape_cast %119 : vector<1x8x3xbf16> to vector<8x3xbf16>
    %cst_69 = arith.constant dense<0.000000e+00> : vector<128x3xf32>
    %121 = tpu.matmul %118, %120, %cst_69 {dimension_numbers = #tpu.dot_dimension_numbers<[1], [0], [0], [1], [0, 0, 1, 1], [], []>} : vector<128x8xbf16>, vector<8x3xbf16>, vector<128x3xf32> -> vector<128x3xf32>
    %122 = arith.addf %115, %121 : vector<128x3xf32>
    %123 = vector.extract_strided_slice %5 {offsets = [0, 1, 2, 0], sizes = [2, 8, 8, 8], strides = [1, 1, 1, 1]} : vector<2x10x10x8xf32> to vector<2x8x8x8xf32>
    %124 = vector.shape_cast %123 : vector<2x8x8x8xf32> to vector<128x8xf32>
    %125 = arith.truncf %124 : vector<128x8xf32> to vector<128x8xbf16>
    %c7_70 = arith.constant 7 : index
    %c0_71 = arith.constant 0 : index
    %c0_72 = arith.constant 0 : index
    %126 = vector.load %arg3[%c7_70, %c0_71, %c0_72] : memref<16x8x3xbf16, #tpu.memory_space<vmem>>, vector<1x8x3xbf16>
    %127 = vector.shape_cast %126 : vector<1x8x3xbf16> to vector<8x3xbf16>
    %cst_73 = arith.constant dense<0.000000e+00> : vector<128x3xf32>
    %128 = tpu.matmul %125, %127, %cst_73 {dimension_numbers = #tpu.dot_dimension_numbers<[1], [0], [0], [1], [0, 0, 1, 1], [], []>} : vector<128x8xbf16>, vector<8x3xbf16>, vector<128x3xf32> -> vector<128x3xf32>
    %129 = arith.addf %122, %128 : vector<128x3xf32>
    %130 = vector.broadcast %6 : vector<1x3xf32> to vector<128x3xf32>
    %131 = arith.mulf %129, %130 : vector<128x3xf32>
    %132 = vector.broadcast %7 : vector<1x3xf32> to vector<128x3xf32>
    %133 = arith.addf %131, %132 : vector<128x3xf32>
    %134 = math.tanh %133 : vector<128x3xf32>
    %c1_74 = arith.constant 1 : index
    %c0_75 = arith.constant 0 : index
    %c0_76 = arith.constant 0 : index
    %135 = vector.load %arg6[%c1_74, %c0_75, %c0_76] : memref<4x128x3xf32, #tpu.memory_space<vmem>>, vector<1x128x3xf32>
    %136 = vector.shape_cast %135 : vector<1x128x3xf32> to vector<128x3xf32>
    %137 = vector.shape_cast %134 : vector<128x3xf32> to vector<1x128x3xf32>
    tpu.vector_store %arg6[%c1_74, %c0_75, %c0_76], %137 {strides = array<i32>} : memref<4x128x3xf32, #tpu.memory_space<vmem>>, vector<1x128x3xf32>,
    %cst_77 = arith.constant 0.000000e+00 : f32
    %138 = vector.broadcast %cst_77 : f32 to vector<128x3xf32>
    %139 = vector.extract_strided_slice %2 {offsets = [0, 1, 0, 0], sizes = [2, 8, 8, 8], strides = [1, 1, 1, 1]} : vector<2x10x10x8xf32> to vector<2x8x8x8xf32>
    %140 = vector.shape_cast %139 : vector<2x8x8x8xf32> to vector<128x8xf32>
    %141 = arith.truncf %140 : vector<128x8xf32> to vector<128x8xbf16>
    %c8 = arith.constant 8 : index
    %c0_78 = arith.constant 0 : index
    %c0_79 = arith.constant 0 : index
    %142 = vector.load %arg2[%c8, %c0_78, %c0_79] : memref<16x8x3xbf16, #tpu.memory_space<vmem>>, vector<1x8x3xbf16>
    %143 = vector.shape_cast %142 : vector<1x8x3xbf16> to vector<8x3xbf16>
    %cst_80 = arith.constant dense<0.000000e+00> : vector<128x3xf32>
    %144 = tpu.matmul %141, %143, %cst_80 {dimension_numbers = #tpu.dot_dimension_numbers<[1], [0], [0], [1], [0, 0, 1, 1], [], []>} : vector<128x8xbf16>, vector<8x3xbf16>, vector<128x3xf32> -> vector<128x3xf32>
    %145 = arith.addf %138, %144 : vector<128x3xf32>
    %146 = vector.extract_strided_slice %2 {offsets = [0, 1, 1, 0], sizes = [2, 8, 8, 8], strides = [1, 1, 1, 1]} : vector<2x10x10x8xf32> to vector<2x8x8x8xf32>
    %147 = vector.shape_cast %146 : vector<2x8x8x8xf32> to vector<128x8xf32>
    %148 = arith.truncf %147 : vector<128x8xf32> to vector<128x8xbf16>
    %c9 = arith.constant 9 : index
    %c0_81 = arith.constant 0 : index
    %c0_82 = arith.constant 0 : index
    %149 = vector.load %arg2[%c9, %c0_81, %c0_82] : memref<16x8x3xbf16, #tpu.memory_space<vmem>>, vector<1x8x3xbf16>
    %150 = vector.shape_cast %149 : vector<1x8x3xbf16> to vector<8x3xbf16>
    %cst_83 = arith.constant dense<0.000000e+00> : vector<128x3xf32>
    %151 = tpu.matmul %148, %150, %cst_83 {dimension_numbers = #tpu.dot_dimension_numbers<[1], [0], [0], [1], [0, 0, 1, 1], [], []>} : vector<128x8xbf16>, vector<8x3xbf16>, vector<128x3xf32> -> vector<128x3xf32>
    %152 = arith.addf %145, %151 : vector<128x3xf32>
    %153 = vector.extract_strided_slice %2 {offsets = [0, 2, 0, 0], sizes = [2, 8, 8, 8], strides = [1, 1, 1, 1]} : vector<2x10x10x8xf32> to vector<2x8x8x8xf32>
    %154 = vector.shape_cast %153 : vector<2x8x8x8xf32> to vector<128x8xf32>
    %155 = arith.truncf %154 : vector<128x8xf32> to vector<128x8xbf16>
    %c10 = arith.constant 10 : index
    %c0_84 = arith.constant 0 : index
    %c0_85 = arith.constant 0 : index
    %156 = vector.load %arg2[%c10, %c0_84, %c0_85] : memref<16x8x3xbf16, #tpu.memory_space<vmem>>, vector<1x8x3xbf16>
    %157 = vector.shape_cast %156 : vector<1x8x3xbf16> to vector<8x3xbf16>
    %cst_86 = arith.constant dense<0.000000e+00> : vector<128x3xf32>
    %158 = tpu.matmul %155, %157, %cst_86 {dimension_numbers = #tpu.dot_dimension_numbers<[1], [0], [0], [1], [0, 0, 1, 1], [], []>} : vector<128x8xbf16>, vector<8x3xbf16>, vector<128x3xf32> -> vector<128x3xf32>
    %159 = arith.addf %152, %158 : vector<128x3xf32>
    %160 = vector.extract_strided_slice %2 {offsets = [0, 2, 1, 0], sizes = [2, 8, 8, 8], strides = [1, 1, 1, 1]} : vector<2x10x10x8xf32> to vector<2x8x8x8xf32>
    %161 = vector.shape_cast %160 : vector<2x8x8x8xf32> to vector<128x8xf32>
    %162 = arith.truncf %161 : vector<128x8xf32> to vector<128x8xbf16>
    %c11 = arith.constant 11 : index
    %c0_87 = arith.constant 0 : index
    %c0_88 = arith.constant 0 : index
    %163 = vector.load %arg2[%c11, %c0_87, %c0_88] : memref<16x8x3xbf16, #tpu.memory_space<vmem>>, vector<1x8x3xbf16>
    %164 = vector.shape_cast %163 : vector<1x8x3xbf16> to vector<8x3xbf16>
    %cst_89 = arith.constant dense<0.000000e+00> : vector<128x3xf32>
    %165 = tpu.matmul %162, %164, %cst_89 {dimension_numbers = #tpu.dot_dimension_numbers<[1], [0], [0], [1], [0, 0, 1, 1], [], []>} : vector<128x8xbf16>, vector<8x3xbf16>, vector<128x3xf32> -> vector<128x3xf32>
    %166 = arith.addf %159, %165 : vector<128x3xf32>
    %167 = vector.extract_strided_slice %5 {offsets = [0, 1, 0, 0], sizes = [2, 8, 8, 8], strides = [1, 1, 1, 1]} : vector<2x10x10x8xf32> to vector<2x8x8x8xf32>
    %168 = vector.shape_cast %167 : vector<2x8x8x8xf32> to vector<128x8xf32>
    %169 = arith.truncf %168 : vector<128x8xf32> to vector<128x8xbf16>
    %c8_90 = arith.constant 8 : index
    %c0_91 = arith.constant 0 : index
    %c0_92 = arith.constant 0 : index
    %170 = vector.load %arg3[%c8_90, %c0_91, %c0_92] : memref<16x8x3xbf16, #tpu.memory_space<vmem>>, vector<1x8x3xbf16>
    %171 = vector.shape_cast %170 : vector<1x8x3xbf16> to vector<8x3xbf16>
    %cst_93 = arith.constant dense<0.000000e+00> : vector<128x3xf32>
    %172 = tpu.matmul %169, %171, %cst_93 {dimension_numbers = #tpu.dot_dimension_numbers<[1], [0], [0], [1], [0, 0, 1, 1], [], []>} : vector<128x8xbf16>, vector<8x3xbf16>, vector<128x3xf32> -> vector<128x3xf32>
    %173 = arith.addf %166, %172 : vector<128x3xf32>
    %174 = vector.extract_strided_slice %5 {offsets = [0, 1, 1, 0], sizes = [2, 8, 8, 8], strides = [1, 1, 1, 1]} : vector<2x10x10x8xf32> to vector<2x8x8x8xf32>
    %175 = vector.shape_cast %174 : vector<2x8x8x8xf32> to vector<128x8xf32>
    %176 = arith.truncf %175 : vector<128x8xf32> to vector<128x8xbf16>
    %c9_94 = arith.constant 9 : index
    %c0_95 = arith.constant 0 : index
    %c0_96 = arith.constant 0 : index
    %177 = vector.load %arg3[%c9_94, %c0_95, %c0_96] : memref<16x8x3xbf16, #tpu.memory_space<vmem>>, vector<1x8x3xbf16>
    %178 = vector.shape_cast %177 : vector<1x8x3xbf16> to vector<8x3xbf16>
    %cst_97 = arith.constant dense<0.000000e+00> : vector<128x3xf32>
    %179 = tpu.matmul %176, %178, %cst_97 {dimension_numbers = #tpu.dot_dimension_numbers<[1], [0], [0], [1], [0, 0, 1, 1], [], []>} : vector<128x8xbf16>, vector<8x3xbf16>, vector<128x3xf32> -> vector<128x3xf32>
    %180 = arith.addf %173, %179 : vector<128x3xf32>
    %181 = vector.extract_strided_slice %5 {offsets = [0, 2, 0, 0], sizes = [2, 8, 8, 8], strides = [1, 1, 1, 1]} : vector<2x10x10x8xf32> to vector<2x8x8x8xf32>
    %182 = vector.shape_cast %181 : vector<2x8x8x8xf32> to vector<128x8xf32>
    %183 = arith.truncf %182 : vector<128x8xf32> to vector<128x8xbf16>
    %c10_98 = arith.constant 10 : index
    %c0_99 = arith.constant 0 : index
    %c0_100 = arith.constant 0 : index
    %184 = vector.load %arg3[%c10_98, %c0_99, %c0_100] : memref<16x8x3xbf16, #tpu.memory_space<vmem>>, vector<1x8x3xbf16>
    %185 = vector.shape_cast %184 : vector<1x8x3xbf16> to vector<8x3xbf16>
    %cst_101 = arith.constant dense<0.000000e+00> : vector<128x3xf32>
    %186 = tpu.matmul %183, %185, %cst_101 {dimension_numbers = #tpu.dot_dimension_numbers<[1], [0], [0], [1], [0, 0, 1, 1], [], []>} : vector<128x8xbf16>, vector<8x3xbf16>, vector<128x3xf32> -> vector<128x3xf32>
    %187 = arith.addf %180, %186 : vector<128x3xf32>
    %188 = vector.extract_strided_slice %5 {offsets = [0, 2, 1, 0], sizes = [2, 8, 8, 8], strides = [1, 1, 1, 1]} : vector<2x10x10x8xf32> to vector<2x8x8x8xf32>
    %189 = vector.shape_cast %188 : vector<2x8x8x8xf32> to vector<128x8xf32>
    %190 = arith.truncf %189 : vector<128x8xf32> to vector<128x8xbf16>
    %c11_102 = arith.constant 11 : index
    %c0_103 = arith.constant 0 : index
    %c0_104 = arith.constant 0 : index
    %191 = vector.load %arg3[%c11_102, %c0_103, %c0_104] : memref<16x8x3xbf16, #tpu.memory_space<vmem>>, vector<1x8x3xbf16>
    %192 = vector.shape_cast %191 : vector<1x8x3xbf16> to vector<8x3xbf16>
    %cst_105 = arith.constant dense<0.000000e+00> : vector<128x3xf32>
    %193 = tpu.matmul %190, %192, %cst_105 {dimension_numbers = #tpu.dot_dimension_numbers<[1], [0], [0], [1], [0, 0, 1, 1], [], []>} : vector<128x8xbf16>, vector<8x3xbf16>, vector<128x3xf32> -> vector<128x3xf32>
    %194 = arith.addf %187, %193 : vector<128x3xf32>
    %195 = vector.broadcast %6 : vector<1x3xf32> to vector<128x3xf32>
    %196 = arith.mulf %194, %195 : vector<128x3xf32>
    %197 = vector.broadcast %7 : vector<1x3xf32> to vector<128x3xf32>
    %198 = arith.addf %196, %197 : vector<128x3xf32>
    %199 = math.tanh %198 : vector<128x3xf32>
    %c2_106 = arith.constant 2 : index
    %c0_107 = arith.constant 0 : index
    %c0_108 = arith.constant 0 : index
    %200 = vector.load %arg6[%c2_106, %c0_107, %c0_108] : memref<4x128x3xf32, #tpu.memory_space<vmem>>, vector<1x128x3xf32>
    %201 = vector.shape_cast %200 : vector<1x128x3xf32> to vector<128x3xf32>
    %202 = vector.shape_cast %199 : vector<128x3xf32> to vector<1x128x3xf32>
    tpu.vector_store %arg6[%c2_106, %c0_107, %c0_108], %202 {strides = array<i32>} : memref<4x128x3xf32, #tpu.memory_space<vmem>>, vector<1x128x3xf32>,
    %cst_109 = arith.constant 0.000000e+00 : f32
    %203 = vector.broadcast %cst_109 : f32 to vector<128x3xf32>
    %204 = vector.extract_strided_slice %2 {offsets = [0, 1, 1, 0], sizes = [2, 8, 8, 8], strides = [1, 1, 1, 1]} : vector<2x10x10x8xf32> to vector<2x8x8x8xf32>
    %205 = vector.shape_cast %204 : vector<2x8x8x8xf32> to vector<128x8xf32>
    %206 = arith.truncf %205 : vector<128x8xf32> to vector<128x8xbf16>
    %c12 = arith.constant 12 : index
    %c0_110 = arith.constant 0 : index
    %c0_111 = arith.constant 0 : index
    %207 = vector.load %arg2[%c12, %c0_110, %c0_111] : memref<16x8x3xbf16, #tpu.memory_space<vmem>>, vector<1x8x3xbf16>
    %208 = vector.shape_cast %207 : vector<1x8x3xbf16> to vector<8x3xbf16>
    %cst_112 = arith.constant dense<0.000000e+00> : vector<128x3xf32>
    %209 = tpu.matmul %206, %208, %cst_112 {dimension_numbers = #tpu.dot_dimension_numbers<[1], [0], [0], [1], [0, 0, 1, 1], [], []>} : vector<128x8xbf16>, vector<8x3xbf16>, vector<128x3xf32> -> vector<128x3xf32>
    %210 = arith.addf %203, %209 : vector<128x3xf32>
    %211 = vector.extract_strided_slice %2 {offsets = [0, 1, 2, 0], sizes = [2, 8, 8, 8], strides = [1, 1, 1, 1]} : vector<2x10x10x8xf32> to vector<2x8x8x8xf32>
    %212 = vector.shape_cast %211 : vector<2x8x8x8xf32> to vector<128x8xf32>
    %213 = arith.truncf %212 : vector<128x8xf32> to vector<128x8xbf16>
    %c13 = arith.constant 13 : index
    %c0_113 = arith.constant 0 : index
    %c0_114 = arith.constant 0 : index
    %214 = vector.load %arg2[%c13, %c0_113, %c0_114] : memref<16x8x3xbf16, #tpu.memory_space<vmem>>, vector<1x8x3xbf16>
    %215 = vector.shape_cast %214 : vector<1x8x3xbf16> to vector<8x3xbf16>
    %cst_115 = arith.constant dense<0.000000e+00> : vector<128x3xf32>
    %216 = tpu.matmul %213, %215, %cst_115 {dimension_numbers = #tpu.dot_dimension_numbers<[1], [0], [0], [1], [0, 0, 1, 1], [], []>} : vector<128x8xbf16>, vector<8x3xbf16>, vector<128x3xf32> -> vector<128x3xf32>
    %217 = arith.addf %210, %216 : vector<128x3xf32>
    %218 = vector.extract_strided_slice %2 {offsets = [0, 2, 1, 0], sizes = [2, 8, 8, 8], strides = [1, 1, 1, 1]} : vector<2x10x10x8xf32> to vector<2x8x8x8xf32>
    %219 = vector.shape_cast %218 : vector<2x8x8x8xf32> to vector<128x8xf32>
    %220 = arith.truncf %219 : vector<128x8xf32> to vector<128x8xbf16>
    %c14 = arith.constant 14 : index
    %c0_116 = arith.constant 0 : index
    %c0_117 = arith.constant 0 : index
    %221 = vector.load %arg2[%c14, %c0_116, %c0_117] : memref<16x8x3xbf16, #tpu.memory_space<vmem>>, vector<1x8x3xbf16>
    %222 = vector.shape_cast %221 : vector<1x8x3xbf16> to vector<8x3xbf16>
    %cst_118 = arith.constant dense<0.000000e+00> : vector<128x3xf32>
    %223 = tpu.matmul %220, %222, %cst_118 {dimension_numbers = #tpu.dot_dimension_numbers<[1], [0], [0], [1], [0, 0, 1, 1], [], []>} : vector<128x8xbf16>, vector<8x3xbf16>, vector<128x3xf32> -> vector<128x3xf32>
    %224 = arith.addf %217, %223 : vector<128x3xf32>
    %225 = vector.extract_strided_slice %2 {offsets = [0, 2, 2, 0], sizes = [2, 8, 8, 8], strides = [1, 1, 1, 1]} : vector<2x10x10x8xf32> to vector<2x8x8x8xf32>
    %226 = vector.shape_cast %225 : vector<2x8x8x8xf32> to vector<128x8xf32>
    %227 = arith.truncf %226 : vector<128x8xf32> to vector<128x8xbf16>
    %c15 = arith.constant 15 : index
    %c0_119 = arith.constant 0 : index
    %c0_120 = arith.constant 0 : index
    %228 = vector.load %arg2[%c15, %c0_119, %c0_120] : memref<16x8x3xbf16, #tpu.memory_space<vmem>>, vector<1x8x3xbf16>
    %229 = vector.shape_cast %228 : vector<1x8x3xbf16> to vector<8x3xbf16>
    %cst_121 = arith.constant dense<0.000000e+00> : vector<128x3xf32>
    %230 = tpu.matmul %227, %229, %cst_121 {dimension_numbers = #tpu.dot_dimension_numbers<[1], [0], [0], [1], [0, 0, 1, 1], [], []>} : vector<128x8xbf16>, vector<8x3xbf16>, vector<128x3xf32> -> vector<128x3xf32>
    %231 = arith.addf %224, %230 : vector<128x3xf32>
    %232 = vector.extract_strided_slice %5 {offsets = [0, 1, 1, 0], sizes = [2, 8, 8, 8], strides = [1, 1, 1, 1]} : vector<2x10x10x8xf32> to vector<2x8x8x8xf32>
    %233 = vector.shape_cast %232 : vector<2x8x8x8xf32> to vector<128x8xf32>
    %234 = arith.truncf %233 : vector<128x8xf32> to vector<128x8xbf16>
    %c12_122 = arith.constant 12 : index
    %c0_123 = arith.constant 0 : index
    %c0_124 = arith.constant 0 : index
    %235 = vector.load %arg3[%c12_122, %c0_123, %c0_124] : memref<16x8x3xbf16, #tpu.memory_space<vmem>>, vector<1x8x3xbf16>
    %236 = vector.shape_cast %235 : vector<1x8x3xbf16> to vector<8x3xbf16>
    %cst_125 = arith.constant dense<0.000000e+00> : vector<128x3xf32>
    %237 = tpu.matmul %234, %236, %cst_125 {dimension_numbers = #tpu.dot_dimension_numbers<[1], [0], [0], [1], [0, 0, 1, 1], [], []>} : vector<128x8xbf16>, vector<8x3xbf16>, vector<128x3xf32> -> vector<128x3xf32>
    %238 = arith.addf %231, %237 : vector<128x3xf32>
    %239 = vector.extract_strided_slice %5 {offsets = [0, 1, 2, 0], sizes = [2, 8, 8, 8], strides = [1, 1, 1, 1]} : vector<2x10x10x8xf32> to vector<2x8x8x8xf32>
    %240 = vector.shape_cast %239 : vector<2x8x8x8xf32> to vector<128x8xf32>
    %241 = arith.truncf %240 : vector<128x8xf32> to vector<128x8xbf16>
    %c13_126 = arith.constant 13 : index
    %c0_127 = arith.constant 0 : index
    %c0_128 = arith.constant 0 : index
    %242 = vector.load %arg3[%c13_126, %c0_127, %c0_128] : memref<16x8x3xbf16, #tpu.memory_space<vmem>>, vector<1x8x3xbf16>
    %243 = vector.shape_cast %242 : vector<1x8x3xbf16> to vector<8x3xbf16>
    %cst_129 = arith.constant dense<0.000000e+00> : vector<128x3xf32>
    %244 = tpu.matmul %241, %243, %cst_129 {dimension_numbers = #tpu.dot_dimension_numbers<[1], [0], [0], [1], [0, 0, 1, 1], [], []>} : vector<128x8xbf16>, vector<8x3xbf16>, vector<128x3xf32> -> vector<128x3xf32>
    %245 = arith.addf %238, %244 : vector<128x3xf32>
    %246 = vector.extract_strided_slice %5 {offsets = [0, 2, 1, 0], sizes = [2, 8, 8, 8], strides = [1, 1, 1, 1]} : vector<2x10x10x8xf32> to vector<2x8x8x8xf32>
    %247 = vector.shape_cast %246 : vector<2x8x8x8xf32> to vector<128x8xf32>
    %248 = arith.truncf %247 : vector<128x8xf32> to vector<128x8xbf16>
    %c14_130 = arith.constant 14 : index
    %c0_131 = arith.constant 0 : index
    %c0_132 = arith.constant 0 : index
    %249 = vector.load %arg3[%c14_130, %c0_131, %c0_132] : memref<16x8x3xbf16, #tpu.memory_space<vmem>>, vector<1x8x3xbf16>
    %250 = vector.shape_cast %249 : vector<1x8x3xbf16> to vector<8x3xbf16>
    %cst_133 = arith.constant dense<0.000000e+00> : vector<128x3xf32>
    %251 = tpu.matmul %248, %250, %cst_133 {dimension_numbers = #tpu.dot_dimension_numbers<[1], [0], [0], [1], [0, 0, 1, 1], [], []>} : vector<128x8xbf16>, vector<8x3xbf16>, vector<128x3xf32> -> vector<128x3xf32>
    %252 = arith.addf %245, %251 : vector<128x3xf32>
    %253 = vector.extract_strided_slice %5 {offsets = [0, 2, 2, 0], sizes = [2, 8, 8, 8], strides = [1, 1, 1, 1]} : vector<2x10x10x8xf32> to vector<2x8x8x8xf32>
    %254 = vector.shape_cast %253 : vector<2x8x8x8xf32> to vector<128x8xf32>
    %255 = arith.truncf %254 : vector<128x8xf32> to vector<128x8xbf16>
    %c15_134 = arith.constant 15 : index
    %c0_135 = arith.constant 0 : index
    %c0_136 = arith.constant 0 : index
    %256 = vector.load %arg3[%c15_134, %c0_135, %c0_136] : memref<16x8x3xbf16, #tpu.memory_space<vmem>>, vector<1x8x3xbf16>
    %257 = vector.shape_cast %256 : vector<1x8x3xbf16> to vector<8x3xbf16>
    %cst_137 = arith.constant dense<0.000000e+00> : vector<128x3xf32>
    %258 = tpu.matmul %255, %257, %cst_137 {dimension_numbers = #tpu.dot_dimension_numbers<[1], [0], [0], [1], [0, 0, 1, 1], [], []>} : vector<128x8xbf16>, vector<8x3xbf16>, vector<128x3xf32> -> vector<128x3xf32>
    %259 = arith.addf %252, %258 : vector<128x3xf32>
    %260 = vector.broadcast %6 : vector<1x3xf32> to vector<128x3xf32>
    %261 = arith.mulf %259, %260 : vector<128x3xf32>
    %262 = vector.broadcast %7 : vector<1x3xf32> to vector<128x3xf32>
    %263 = arith.addf %261, %262 : vector<128x3xf32>
    %264 = math.tanh %263 : vector<128x3xf32>
    %c3_138 = arith.constant 3 : index
    %c0_139 = arith.constant 0 : index
    %c0_140 = arith.constant 0 : index
    %265 = vector.load %arg6[%c3_138, %c0_139, %c0_140] : memref<4x128x3xf32, #tpu.memory_space<vmem>>, vector<1x128x3xf32>
    %266 = vector.shape_cast %265 : vector<1x128x3xf32> to vector<128x3xf32>
    %267 = vector.shape_cast %264 : vector<128x3xf32> to vector<1x128x3xf32>
    tpu.vector_store %arg6[%c3_138, %c0_139, %c0_140], %267 {strides = array<i32>} : memref<4x128x3xf32, #tpu.memory_space<vmem>>, vector<1x128x3xf32>,
    return
  }
}

</mosaic_0001>

<bundles_post_ra>
// kernel: generator_forward.8
= control target key start
LH: loop header
LB: loop body
LE: loop exit
PB: predicated region body
PF: predicated region fallthrough
CT: control target
= control target key end

     0   :  { %vm96_vm0 = vcmask 1046528   ;;  %vm178_vm1 = vcmask 130048   ;;  %vm793_vm2 = vcmask 64512   ;;  %s1428_s1 = inlined_call_operand.vmem [shape: bf16[4,16,8], index: 1, kind: input, shape index: {}]   ;;  %s1429_s0 = inlined_call_operand.vmem [shape: f32[2,9,9,16], index: 0, kind: input, shape index: {}]   ;;  %s1430_s2 = inlined_call_operand.vmem [shape: f32[1,8], index: 2, kind: input, shape index: {}]   ;;  %s1431_s3 = inlined_call_operand.vmem [shape: f32[1,8], index: 3, kind: input, shape index: {}]   ;;  %s1432_s4 = inlined_call_operand.vmem [shape: f32[128,8], index: 4, kind: output, shape index: {}]  }
   0x1   :  { %v1014_v0 = vld [vmem:[%s1428_s1 + $0x8] sm:$0xff]   ;;  %v1015_v1 = vld [vmem:[%s1428_s1 + $0x10] sm:$0xff]   ;;  %v1052_v2 = vld [vmem:[%s1429_s0] sm:$0xff] }
   0x2   :  { %894 = vmatprep.subr.bf16.mxu1 %v1014_v0  ;;  %v19_v3 = vld [vmem:[%s1429_s0 + $0x8] sm:$0x1]  ;;  %v1060_v4 = vld [vmem:[%s1429_s0 + $0x10] sm:$0xff]  ;;  %930 = vmatprep.subr.bf16.mxu0 %v1015_v1  ;;  %v21_v5 = vld [vmem:[%s1429_s0 + $0x18] sm:$0x1]  ;;  %v97_v8 = vrot.slane %v1052_v2, 1 }
   0x3   :  { %895 = vmatpush3.bf16.msra.mxu1 %v1014_v0  ;;  %v1068_v6 = vld [vmem:[%s1429_s0 + $0x20] sm:$0xff]  ;;  %v23_v7 = vld [vmem:[%s1429_s0 + $0x28] sm:$0x1]  ;;  %931 = vmatpush3.bf16.msra.mxu0 %v1015_v1  ;;  %v1077_v9 = vld [vmem:[%s1429_s0 + $0x30] sm:$0xff]  ;;  %v98_v12 = vrot.slane %v19_v3, 1  ;;  %v100_v13 = vrot.slane %v1060_v4, 1 }
   0x4   :  { %v25_v10 = vld [vmem:[%s1429_s0 + $0x38] sm:$0x1]  ;;  %v1085_v11 = vld [vmem:[%s1429_s0 + $0x40] sm:$0xff]  ;;  %v427_v14 = vpack.c.bf16 %v1068_v6, %v1060_v4  ;;  %v27_v15 = vld [vmem:[%s1429_s0 + $0x48] sm:$0x1]  ;;  %v101_v16 = vrot.slane %v21_v5, 1 }
   0x5   :  { %v103_v17 = vrot.slane %v1068_v6, 1  ;;  %v104_v18 = vrot.slane %v23_v7, 1  ;;  %v1016_v19 = vld [vmem:[%s1428_s1] sm:$0xff]   ;;  %v99_v20 = vsel %vm96_vm0, %v97_v8, %v98_v12  ;;  %v106_v21 = vrot.slane %v1077_v9, 1  ;;  %v1017_v24 = vld [vmem:[%s1428_s1 + $0x18] sm:$0xff]   ;;  %v1115_v29 = vld [vmem:[%s1429_s0 + $0x50] sm:$0xff] }
   0x6   :  { %v107_v22 = vrot.slane %v25_v10, 1  ;;  %v109_v23 = vrot.slane %v1085_v11, 1  ;;  %932 = vmatprep.mubr.msk.bf16.mxu0 %vm178_vm1, %v427_v14  ;;  %v1105_v25 = vsel %vm96_vm0, %v100_v13, %v101_v16  ;;  %v110_v27 = vrot.slane %v27_v15, 1  ;;  %912 = vmatprep.subr.bf16.mxu1 %v1016_v19  ;;  %v29_v32 = vld [vmem:[%s1429_s0 + $0x58] sm:$0x1]  ;;  %v1128_v34 = vld [vmem:[%s1429_s0 + $0x60] sm:$0xff] }
   0x7   :  { %v1108_v26 = vsel %vm96_vm0, %v103_v17, %v104_v18  ;;  %v428_v28 = vpack.c.bf16 %v1085_v11, %v1077_v9  ;;  %v161_v31 = vpack.c.bf16 %v1105_v25, %v99_v20  ;;  %948 = vmatprep.subr.bf16.mxu0 %v1017_v24  ;;  %v112_v33 = vrot.slane %v1115_v29, 1  ;;  %v31_v39 = vld [vmem:[%s1429_s0 + $0x68] sm:$0x1]  ;;  %v1143_v40 = vld [vmem:[%s1429_s0 + $0x70] sm:$0xff]  ;;  %v1148_v41 = vld [vmem:[%s1429_s0 + $0x80] sm:$0xff] }
   0x8   :  { %v1118_v30 = vsel %vm96_vm0, %v106_v21, %v107_v22  ;;  %v1131_v35 = vsel %vm96_vm0, %v109_v23, %v110_v27  ;;  %v113_v37 = vrot.slane %v29_v32, 1  ;;  %v115_v38 = vrot.slane %v1128_v34, 1  ;;  %v33_v43 = vld [vmem:[%s1429_s0 + $0x78] sm:$0x1]  ;;  %v1160_v46 = vld [vmem:[%s1429_s0 + $0x90] sm:$0xff]  ;;  %v1165_v47 = vld [vmem:[%s1429_s0 + $0xa0] sm:$0xff] }
   0x9   :  { %v162_v36 = vpack.c.bf16 %v1118_v30, %v1108_v26  ;;  %933 = vmatmul.mubr.msk.bf16.vlgmr.msra.gmra.mrb[0].mxu0 %vm178_vm1, %v428_v28  ;;  %896 = vmatprep.mubr.msk.bf16.mxu1 %vm178_vm1, %v161_v31  ;;  %v429_v42 = vpack.c.bf16 %v1128_v34, %v1115_v29  ;;  %v116_v44 = vrot.slane %v31_v39, 1  ;;  %v118_v45 = vrot.slane %v1143_v40, 1  ;;  %v37_v50 = vld [vmem:[%s1429_s0 + $0x98] sm:$0x1]  ;;  %v39_v51 = vld [vmem:[%s1429_s0 + $0xa8] sm:$0x1] }
   0xa   :  { %949 = vmatpush3.bf16.msra.mxu0 %v1017_v24  ;;  %v1169_v48 = vsel %vm96_vm0, %v112_v33, %v113_v37  ;;  %v119_v49 = vrot.slane %v33_v43, 1  ;;  %v121_v54 = vrot.slane %v1160_v46, 1  ;;  %v122_v55 = vrot.slane %v37_v50, 1  ;;  %v1187_v56 = vld [vmem:[%s1429_s0 + $0xb0] sm:$0xff]  ;;  %v41_v57 = vld [vmem:[%s1429_s0 + $0xb8] sm:$0x1] }
   0xb   :  { %897 = vmatmul.mubr.msk.bf16.vlgmr.msra.gmra.mrb[0].mxu1 %vm178_vm1, %v162_v36  ;;  %v163_v52 = vpack.c.bf16 %v1169_v48, %v1131_v35  ;;  %936 = vmatprep.mubr.msk.bf16.mxu0 %vm178_vm1, %v429_v42  ;;  %v1181_v53 = vsel %vm96_vm0, %v115_v38, %v116_v44  ;;  %v430_v59 = vpack.c.bf16 %v1148_v41, %v1143_v40  ;;  %v124_v60 = vrot.slane %v1165_v47, 1  ;;  %v1201_v62 = vld [vmem:[%s1429_s0 + $0xc0] sm:$0xff]  ;;  %v43_v63 = vld [vmem:[%s1429_s0 + $0xc8] sm:$0x1]  ;;  %v45_v3 = vld [vmem:[%s1429_s0 + $0xd8] sm:$0x1] }
   0xc   :  { %913 = vmatpush3.bf16.msra.mxu1 %v1016_v19  ;;  %v1193_v58 = vsel %vm96_vm0, %v118_v45, %v119_v49  ;;  %v125_v61 = vrot.slane %v39_v51, 1  ;;  %v123_v0 = vsel %vm96_vm0, %v121_v54, %v122_v55  ;;  %v431_v1 = vpack.c.bf16 %v1187_v56, %v1165_v47  ;;  %v1216_v5 = vld [vmem:[%s1429_s0 + $0xe0] sm:$0xff]  ;;  %v47_v7 = vld [vmem:[%s1429_s0 + $0xe8] sm:$0x1]  ;;  %v1232_v17 = vld [vmem:[%s1429_s0 + $0xd0] sm:$0xff] }
   0xd   :  { %900 = vmatprep.mubr.msk.bf16.mxu1 %vm178_vm1, %v163_v52  ;;  %v164_v8 = vpack.c.bf16 %v1193_v58, %v1181_v53  ;;  %v127_v12 = vrot.slane %v1187_v56, 1  ;;  %v128_v14 = vrot.slane %v41_v57, 1  ;;  %v130_v15 = vrot.slane %v1201_v62, 1  ;;  %v1242_v22 = vld [vmem:[%s1429_s0 + $0xf0] sm:$0xff]  ;;  %v49_v32 = vld [vmem:[%s1429_s0 + $0xf8] sm:$0x1] }
   0xe   :  { %v1224_v10 = vsel %vm96_vm0, %v124_v60, %v125_v61  ;;  %v131_v16 = vrot.slane %v43_v63, 1  ;;  %v133_v18 = vrot.slane %v1232_v17, 1  ;;  %v134_v19 = vrot.slane %v45_v3, 1  ;;  %v50_v33 = vld [vmem:[%s1429_s0 + $0x100] sm:$0xff]  ;;  %v51_v36 = vld [vmem:[%s1429_s0 + $0x108] sm:$0x1] }
   0xf   :  { %v165_v13 = vpack.c.bf16 %v1224_v10, %v123_v0  ;;  %v136_v20 = vrot.slane %v1216_v5, 1  ;;  %v137_v21 = vrot.slane %v47_v7, 1  ;;  %v129_v23 = vsel %vm96_vm0, %v127_v12, %v128_v14  ;;  %v52_v49 = vld [vmem:[%s1429_s0 + $0x110] sm:$0xff] }
  0x10   :  { %v132_v24 = vsel %vm96_vm0, %v130_v15, %v131_v16  ;;  %v432_v27 = vpack.c.bf16 %v1232_v17, %v1201_v62  ;;  %v135_v28 = vsel %vm96_vm0, %v133_v18, %v134_v19  ;;  %v433_v37 = vpack.c.bf16 %v1242_v22, %v1216_v5 }
  0x11   :  { %937 = vmatmul.mubr.msk.bf16.gmra.mrb[4].mxu0 %vm178_vm1, %v430_v59  ;;  %v138_v31 = vsel %vm96_vm0, %v136_v20, %v137_v21  ;;  %v166_v38 = vpack.c.bf16 %v132_v24, %v129_v23  ;;  %v139_v39 = vrot.slane %v1242_v22, 1  ;;  %v140_v43 = vrot.slane %v49_v32, 1  ;;  %v35_v59 = vld [vmem:[%s1429_s0 + $0x88] sm:$0x1] }
  0x12   :  { %940 = vmatprep.mubr.msk.bf16.mxu0 %vm178_vm1, %v431_v1  ;;  %v167_v42 = vpack.c.bf16 %v138_v31, %v135_v28  ;;  %v142_v44 = vrot.slane %v50_v33, 1  ;;  %v143_v45 = vrot.slane %v51_v36, 1  ;;  %v434_v52 = vpack.c.bf16 %v52_v49, %v50_v33  ;;  %v1325_v1 = vld [vmem:[%s1430_s2] ss:$0 sm:$0xff] }
  0x13   :  { %901 = vmatmul.mubr.msk.bf16.gmra.mrb[4].mxu1 %vm178_vm1, %v164_v8  ;;  %v141_v50 = vsel %vm96_vm0, %v139_v39, %v140_v43  ;;  %v593_v54 = vpack.c.bf16 %v1108_v26, %v1105_v25  ;;  %v54_v57 = vpack.c.bf16 %v1060_v4, %v1052_v2  ;;  %v594_v60 = vpack.c.bf16 %v1131_v35, %v1118_v30 }
  0x14   :  { %904 = vmatprep.mubr.msk.bf16.mxu1 %vm178_vm1, %v165_v13  ;;  %v144_v51 = vsel %vm96_vm0, %v142_v44, %v143_v45  ;;  %v585_v25 = vrot.slane %v1148_v41, 1  ;;  %v595_v2 = vpack.c.bf16 %v1181_v53, %v1169_v48  ;;  %v586_v4 = vrot.slane %v35_v59, 1 }
  0x15   :  { %v168_v55 = vpack.c.bf16 %v144_v51, %v141_v50  ;;  %v55_v26 = vpack.c.bf16 %v1077_v9, %v1068_v6  ;;  %v56_v61 = vpack.c.bf16 %v1115_v29, %v1085_v11  ;;  %v597_v35 = vpack.c.bf16 %v129_v23, %v1224_v10  ;;  %v53_v11 = vld [vmem:[%s1429_s0 + $0x118] sm:$0x1]  ;;  %v1330_v10 = vld [vmem:[%s1431_s3] ss:$0 sm:$0xff] }
  0x16   :  { %v587_v63 = vsel %vm96_vm0, %v585_v25, %v586_v4  ;;  %v57_v6 = vpack.c.bf16 %v1143_v40, %v1128_v34  ;;  %v58_v9 = vpack.c.bf16 %v1165_v47, %v1160_v46  ;;  %v598_v29 = vpack.c.bf16 %v135_v28, %v132_v24 }
  0x17   :  { %v596_v30 = vpack.c.bf16 %v587_v63, %v1193_v58  ;;  %v588_v41 = vrot.slane %v52_v49, 1  ;;  %v599_v48 = vpack.c.bf16 %v141_v50, %v138_v31  ;;  %v589_v53 = vrot.slane %v53_v11, 1 }
  0x18   :  { %v59_v34 = vpack.c.bf16 %v1201_v62, %v1187_v56  ;;  %v60_v40 = vpack.c.bf16 %v1216_v5, %v1232_v17  ;;  %v61_v58 = vpack.c.bf16 %v50_v33, %v1242_v22 }
  0x19   :  { %941 = vmatmul.mubr.msk.bf16.gmra.mrb[8].mxu0 %vm178_vm1, %v432_v27  ;;  %v590_v46 = vsel %vm96_vm0, %v588_v41, %v589_v53 }
  0x1a   :  { %944 = vmatprep.mubr.msk.bf16.mxu0 %vm178_vm1, %v433_v37  ;;  %v600_v47 = vpack.c.bf16 %v590_v46, %v144_v51 }
  0x1b   :  { %905 = vmatmul.mubr.msk.bf16.gmra.mrb[8].mxu1 %vm178_vm1, %v166_v38 }
  0x1c   :  { %908 = vmatprep.mubr.msk.bf16.mxu1 %vm178_vm1, %v167_v42 }
  0x21   :  { %945 = vmatmul.mubr.msk.bf16.gmra.mrb[12].mxu0 %vm178_vm1, %v434_v52 }
  0x22   :  { %950 = vmatprep.mubr.msk.bf16.mxu0 %vm178_vm1, %v593_v54 }
  0x23   :  { %909 = vmatmul.mubr.msk.bf16.gmra.mrb[12].mxu1 %vm178_vm1, %v168_v55 }
  0x24   :  { %914 = vmatprep.mubr.msk.bf16.mxu1 %vm178_vm1, %v54_v57 }
  0x29   :  { %951 = vmatmul.mubr.msk.bf16.vlgmr.msra.gmra.mrb[0].mxu0 %vm178_vm1, %v594_v60 }
  0x2a   :  { %954 = vmatprep.mubr.msk.bf16.mxu0 %vm178_vm1, %v595_v2 }
  0x2b   :  { %915 = vmatmul.mubr.msk.bf16.vlgmr.msra.gmra.mrb[0].mxu1 %vm178_vm1, %v55_v26 }
  0x2c   :  { %918 = vmatprep.mubr.msk.bf16.mxu1 %vm178_vm1, %v56_v61 }
  0x31   :  { %955 = vmatmul.mubr.msk.bf16.gmra.mrb[4].mxu0 %vm178_vm1, %v596_v30 }
  0x32   :  { %958 = vmatprep.mubr.msk.bf16.mxu0 %vm178_vm1, %v597_v35 }
  0x33   :  { %919 = vmatmul.mubr.msk.bf16.gmra.mrb[4].mxu1 %vm178_vm1, %v57_v6 }
  0x34   :  { %922 = vmatprep.mubr.msk.bf16.mxu1 %vm178_vm1, %v58_v9 }
  0x39   :  { %959 = vmatmul.mubr.msk.bf16.gmra.mrb[8].mxu0 %vm178_vm1, %v598_v29 }
  0x3a   :  { %962 = vmatprep.mubr.msk.bf16.mxu0 %vm178_vm1, %v599_v48 }
  0x3b   :  { %923 = vmatmul.mubr.msk.bf16.gmra.mrb[8].mxu1 %vm178_vm1, %v59_v34 }
  0x3c   :  { %926 = vmatprep.mubr.msk.bf16.mxu1 %vm178_vm1, %v60_v40 }
  0x41   :  { %963 = vmatmul.mubr.msk.bf16.gmra.mrb[12].mxu0 %vm178_vm1, %v600_v47 }
  0x43   :  { %927 = vmatmul.mubr.msk.bf16.gmra.mrb[12].mxu1 %vm178_vm1, %v61_v58 }
  0xfc   :  { %v952_v56 = vpop.f32.mrb[0].mxu0 }
  0xfd   :  { %v668_v62 = vpop.f32.mrb[1].mxu0 }
  0xfe   :  { %v916_v0 = vpop.f32.mrb[0].mxu1  ;;  %v953_v3 = vpop.f32.mrb[2].mxu0 }
  0xff   :  { %v966_v5 = vadd.f32 %v952_v56, %v916_v0  ;;  %v364_v7 = vpop.f32.mrb[1].mxu1  ;;  %v671_v8 = vpop.f32.mrb[3].mxu0 }
 0x100   :  { %v967_v12 = vadd.f32 %v668_v62, %v364_v7  ;;  %v917_v13 = vpop.f32.mrb[2].mxu1 }
 0x101   :  { %v756_v14 = vmul.f32 %v966_v5, %v1325_v1  ;;  %v968_v15 = vadd.f32 %v953_v3, %v917_v13  ;;  %v367_v16 = vpop.f32.mrb[3].mxu1 }
 0x102   :  { %v754_v17 = vmul.f32 %v967_v12, %v1325_v1  ;;  %v969_v18 = vadd.f32 %v671_v8, %v367_v16 }
 0x103   :  { %v779_v19 = vadd.f32 %v1330_v10, %v756_v14  ;;  %v757_v20 = vmul.f32 %v968_v15, %v1325_v1 }
 0x104   :  { %v777_v21 = vadd.f32 %v1330_v10, %v754_v17  ;;  %v755_v22 = vmul.f32 %v969_v18, %v1325_v1  ;;  %v956_v23 = vpop.f32.mrb[4].mxu0 }
 0x105   :  { %796 = vst.msk [vmem:[%s1432_s4 + $0x10] sm:$0xff] %vm793_vm2, %v779_v19  ;;  %v780_v24 = vadd.f32 %v1330_v10, %v757_v20  ;;  %v684_v27 = vpop.f32.mrb[5].mxu0 }
 0x106   :  { %794 = vst.msk [vmem:[%s1432_s4] sm:$0xff] %vm793_vm2, %v777_v21  ;;  %v778_v28 = vadd.f32 %v1330_v10, %v755_v22  ;;  %v920_v31 = vpop.f32.mrb[4].mxu1  ;;  %v957_v32 = vpop.f32.mrb[6].mxu0 }
 0x107   :  { %797 = vst.msk [vmem:[%s1432_s4 + $0x18] sm:$0xff] %vm793_vm2, %v780_v24  ;;  %v970_v33 = vadd.f32 %v956_v23, %v920_v31  ;;  %v380_v36 = vpop.f32.mrb[5].mxu1  ;;  %v687_v37 = vpop.f32.mrb[7].mxu0 }
 0x108   :  { %795 = vst.msk [vmem:[%s1432_s4 + $0x8] sm:$0xff] %vm793_vm2, %v778_v28  ;;  %v971_v38 = vadd.f32 %v684_v27, %v380_v36  ;;  %v921_v39 = vpop.f32.mrb[6].mxu1 }
 0x109   :  { %v760_v42 = vmul.f32 %v970_v33, %v1325_v1  ;;  %v972_v43 = vadd.f32 %v957_v32, %v921_v39  ;;  %v383_v44 = vpop.f32.mrb[7].mxu1 }
 0x10a   :  { %v758_v45 = vmul.f32 %v971_v38, %v1325_v1  ;;  %v973_v49 = vadd.f32 %v687_v37, %v383_v44 }
 0x10b   :  { %v783_v50 = vadd.f32 %v1330_v10, %v760_v42  ;;  %v761_v51 = vmul.f32 %v972_v43, %v1325_v1 }
 0x10c   :  { %v781_v52 = vadd.f32 %v1330_v10, %v758_v45  ;;  %v759_v54 = vmul.f32 %v973_v49, %v1325_v1  ;;  %v960_v55 = vpop.f32.mrb[8].mxu0 }
 0x10d   :  { %800 = vst.msk [vmem:[%s1432_s4 + $0x30] sm:$0xff] %vm793_vm2, %v783_v50  ;;  %v784_v57 = vadd.f32 %v1330_v10, %v761_v51  ;;  %v700_v59 = vpop.f32.mrb[9].mxu0 }
 0x10e   :  { %798 = vst.msk [vmem:[%s1432_s4 + $0x20] sm:$0xff] %vm793_vm2, %v781_v52  ;;  %v782_v60 = vadd.f32 %v1330_v10, %v759_v54  ;;  %v924_v25 = vpop.f32.mrb[8].mxu1  ;;  %v961_v2 = vpop.f32.mrb[10].mxu0 }
 0x10f   :  { %801 = vst.msk [vmem:[%s1432_s4 + $0x38] sm:$0xff] %vm793_vm2, %v784_v57  ;;  %v974_v4 = vadd.f32 %v960_v55, %v924_v25  ;;  %v396_v26 = vpop.f32.mrb[9].mxu1  ;;  %v703_v61 = vpop.f32.mrb[11].mxu0 }
 0x110   :  { %799 = vst.msk [vmem:[%s1432_s4 + $0x28] sm:$0xff] %vm793_vm2, %v782_v60  ;;  %v975_v63 = vadd.f32 %v700_v59, %v396_v26  ;;  %v925_v30 = vpop.f32.mrb[10].mxu1 }
 0x111   :  { %v764_v35 = vmul.f32 %v974_v4, %v1325_v1  ;;  %v976_v6 = vadd.f32 %v961_v2, %v925_v30  ;;  %v399_v9 = vpop.f32.mrb[11].mxu1 }
 0x112   :  { %v762_v11 = vmul.f32 %v975_v63, %v1325_v1  ;;  %v977_v29 = vadd.f32 %v703_v61, %v399_v9 }
 0x113   :  { %v787_v41 = vadd.f32 %v1330_v10, %v764_v35  ;;  %v765_v48 = vmul.f32 %v976_v6, %v1325_v1 }
 0x114   :  { %v785_v53 = vadd.f32 %v1330_v10, %v762_v11  ;;  %v763_v34 = vmul.f32 %v977_v29, %v1325_v1  ;;  %v964_v40 = vpop.f32.mrb[12].mxu0 }
 0x115   :  { %804 = vst.msk [vmem:[%s1432_s4 + $0x50] sm:$0xff] %vm793_vm2, %v787_v41  ;;  %v788_v46 = vadd.f32 %v1330_v10, %v765_v48  ;;  %v716_v47 = vpop.f32.mrb[13].mxu0 }
 0x116   :  { %802 = vst.msk [vmem:[%s1432_s4 + $0x40] sm:$0xff] %vm793_vm2, %v785_v53  ;;  %v786_v58 = vadd.f32 %v1330_v10, %v763_v34  ;;  %v928_v56 = vpop.f32.mrb[12].mxu1  ;;  %v965_v62 = vpop.f32.mrb[14].mxu0 }
 0x117   :  { %805 = vst.msk [vmem:[%s1432_s4 + $0x58] sm:$0xff] %vm793_vm2, %v788_v46  ;;  %v978_v0 = vadd.f32 %v964_v40, %v928_v56  ;;  %v412_v3 = vpop.f32.mrb[13].mxu1  ;;  %v719_v5 = vpop.f32.mrb[15].mxu0 }
 0x118   :  { %803 = vst.msk [vmem:[%s1432_s4 + $0x48] sm:$0xff] %vm793_vm2, %v786_v58  ;;  %v979_v7 = vadd.f32 %v716_v47, %v412_v3  ;;  %v929_v8 = vpop.f32.mrb[14].mxu1 }
 0x119   :  { %v768_v12 = vmul.f32 %v978_v0, %v1325_v1  ;;  %v980_v13 = vadd.f32 %v965_v62, %v929_v8  ;;  %v415_v14 = vpop.f32.mrb[15].mxu1 }
 0x11a   :  { %v766_v15 = vmul.f32 %v979_v7, %v1325_v1  ;;  %v981_v16 = vadd.f32 %v719_v5, %v415_v14 }
 0x11b   :  { %v791_v17 = vadd.f32 %v1330_v10, %v768_v12  ;;  %v769_v18 = vmul.f32 %v980_v13, %v1325_v1 }
 0x11c   :  { %v789_v19 = vadd.f32 %v1330_v10, %v766_v15  ;;  %v767_v20 = vmul.f32 %v981_v16, %v1325_v1 }
 0x11d   :  { %808 = vst.msk [vmem:[%s1432_s4 + $0x70] sm:$0xff] %vm793_vm2, %v791_v17  ;;  %v792_v21 = vadd.f32 %v1330_v10, %v769_v18 }
 0x11e   :  { %806 = vst.msk [vmem:[%s1432_s4 + $0x60] sm:$0xff] %vm793_vm2, %v789_v19  ;;  %v790_v22 = vadd.f32 %v1330_v10, %v767_v20 }
 0x11f   :  { %809 = vst.msk [vmem:[%s1432_s4 + $0x78] sm:$0xff] %vm793_vm2, %v792_v21 }
 0x120   :  { %807 = vst.msk [vmem:[%s1432_s4 + $0x68] sm:$0xff] %vm793_vm2, %v790_v22 }

// kernel: generator_forward.9
= control target key start
LH: loop header
LB: loop body
LE: loop exit
PB: predicated region body
PF: predicated region fallthrough
CT: control target
= control target key end

     0   :  { %vm150_vm0 = vcmask 261120   ;;  %vm88_vm4 = vcmask 1042432   ;;  %vm89_vm5 = vcmask 1046532   ;;  %vm479_vm14 = vcmask 130048   ;;  %s779_s1 = inlined_call_operand.vmem [shape: bf16[4,32,16], index: 1, kind: input, shape index: {}]   ;;  %s780_s0 = inlined_call_operand.vmem [shape: f32[2,5,5,32], index: 0, kind: input, shape index: {}]   ;;  %s781_s2 = inlined_call_operand.vmem [shape: f32[1,16], index: 2, kind: input, shape index: {}]   ;;  %s782_s3 = inlined_call_operand.vmem [shape: f32[1,16], index: 3, kind: input, shape index: {}]   ;;  %s783_s4 = inlined_call_operand.vmem [shape: f32[32,16], index: 4, kind: output, shape index: {}]  }
   0x1   :  { %v588_v0 = vld [vmem:[%s779_s1 + $0x20] sm:$0xff]   ;;  %v589_v1 = vld [vmem:[%s779_s1 + $0x10] sm:$0xff]   ;;  %v590_v2 = vld [vmem:[%s779_s1 + $0x28] sm:$0xff]  }
   0x2   :  { %560 = vmatprep.subr.bf16.mxu0 %v588_v0  ;;  %544 = vmatprep.subr.bf16.mxu1 %v589_v1  ;;  %v591_v3 = vld [vmem:[%s779_s1 + $0x18] sm:$0xff]   ;;  %v19_v4 = vld [vmem:[%s780_s0 + $0x8] sm:$0x1f]  ;;  %v20_v5 = vld [vmem:[%s780_s0 + $0x10] sm:$0x1f] }
   0x3   :  { %561 = vmatpush3.bf16.msra.mxu0 %v588_v0  ;;  %545 = vmatpush3.bf16.msra.mxu1 %v589_v1  ;;  %v21_v6 = vld [vmem:[%s780_s0 + $0x18] sm:$0x1f]  ;;  %v22_v7 = vld [vmem:[%s780_s0 + $0x20] sm:$0x1f]  ;;  %vm29_vm1 = vcmp.gt.f32.partialorder %v19_v4, 0.0  ;;  %vm30_vm2 = vcmp.gt.f32.partialorder %v20_v5, 0.0  ;;  %vm701_vm12 = vmor %vm88_vm4, %vm89_vm5 }
   0x4   :  { %562 = vmatprep.subr.bf16.mxu0 %v590_v2  ;;  %546 = vmatprep.subr.bf16.mxu1 %v591_v3  ;;  %vm31_vm3 = vcmp.gt.f32.partialorder %v21_v6, 0.0  ;;  %v648_v8 = vld [vmem:[%s779_s1] sm:$0xff]   ;;  %vm32_vm6 = vcmp.gt.f32.partialorder %v22_v7, 0.0  ;;  %v39_v9 = vmul.f32 0.2, %v19_v4  ;;  %v653_v11 = vld [vmem:[%s779_s1 + $0x30] sm:$0xff]  }
   0x5   :  { %v40_v10 = vmul.f32 0.2, %v20_v5  ;;  %v41_v12 = vmul.f32 0.2, %v21_v6  ;;  %v42_v13 = vmul.f32 0.2, %v22_v7 }
   0x6   :  { %v24_v14 = vld [vmem:[%s780_s0 + $0x30] sm:$0x1f]  ;;  %v658_v15 = vsel %vm29_vm1, %v19_v4, %v39_v9  ;;  %v25_v17 = vld [vmem:[%s780_s0 + $0x38] sm:$0x1f]  ;;  %v26_v18 = vld [vmem:[%s780_s0 + $0x40] sm:$0x1f] }
   0x7   :  { %563 = vmatpush3.bf16.msra.mxu0 %v590_v2  ;;  %547 = vmatpush3.bf16.msra.mxu1 %v591_v3  ;;  %v660_v16 = vsel %vm30_vm2, %v20_v5, %v40_v10  ;;  %v27_v19 = vld [vmem:[%s780_s0 + $0x48] sm:$0x1f]  ;;  %v673_v20 = vsel %vm31_vm3, %v21_v6, %v41_v12  ;;  %v52_v21 = vsel %vm32_vm6, %v22_v7, %v42_v13  ;;  %vm34_vm7 = vcmp.gt.f32.partialorder %v24_v14, 0.0  ;;  %v18_v23 = vld [vmem:[%s780_s0] sm:$0x1f]  ;;  %v595_v54 = vld [vmem:[%s779_s1 + $0x38] sm:$0xff]  }
   0x8   :  { %568 = vmatprep.subr.bf16.mxu0 %v653_v11  ;;  %v275_v22 = vcombine.low %v658_v15, %v660_v16  ;;  %552 = vmatprep.subr.bf16.mxu1 %v648_v8  ;;  %v276_v24 = vcombine.low %v673_v20, %v52_v21  ;;  %v361_v25 = vcombine.high %v52_v21, %v52_v21  ;;  %v516_v26 = vrot.slane %v52_v21, 9  ;;  %v23_v49 = vld [vmem:[%s780_s0 + $0x28] sm:$0x1f] }
   0x9   :  { %vm35_vm8 = vcmp.gt.f32.partialorder %v25_v17, 0.0  ;;  %vm36_vm9 = vcmp.gt.f32.partialorder %v26_v18, 0.0  ;;  %vm37_vm10 = vcmp.gt.f32.partialorder %v27_v19, 0.0  ;;  %v44_v27 = vmul.f32 0.2, %v24_v14 }
   0xa   :  { %v45_v28 = vmul.f32 0.2, %v25_v17  ;;  %v283_v29 = vpack.c.bf16 %v276_v24, %v275_v22  ;;  %v365_v30 = vrot.slane %v361_v25, 5  ;;  %v46_v31 = vmul.f32 0.2, %v26_v18 }
   0xb   :  { %v47_v32 = vmul.f32 0.2, %v27_v19  ;;  %v683_v33 = vsel %vm34_vm7, %v24_v14, %v44_v27  ;;  %vm28_vm11 = vcmp.gt.f32.partialorder %v18_v23, 0.0  ;;  %v38_v35 = vmul.f32 0.2, %v18_v23 }
   0xc   :  { %v685_v34 = vsel %vm35_vm8, %v25_v17, %v45_v28  ;;  %564 = vmatprep.mubr.msk.bf16.mxu0 %vm150_vm0, %v283_v29  ;;  %v688_v36 = vsel %vm36_vm9, %v26_v18, %v46_v31  ;;  %v81_v39 = vcombine.high %v658_v15, %v658_v15  ;;  %v82_v45 = vcombine.high %v660_v16, %v660_v16 }
   0xd   :  { %v57_v37 = vsel %vm37_vm10, %v27_v19, %v47_v32  ;;  %v277_v38 = vcombine.low %v683_v33, %v685_v34  ;;  %v48_v43 = vsel %vm28_vm11, %v18_v23, %v38_v35  ;;  %v83_v46 = vcombine.high %v673_v20, %v673_v20 }
   0xe   :  { %v278_v40 = vcombine.low %v688_v36, %v57_v37  ;;  %v362_v41 = vcombine.high %v57_v37, %v57_v37  ;;  %v517_v42 = vrot.slane %v57_v37, 9  ;;  %v80_v44 = vcombine.high %v48_v43, %v48_v43 }
   0xf   :  { %v488_v48 = vrot.slane %v48_v43, 9  ;;  %v489_v52 = vrot.slane %v658_v15, 9  ;;  %v97_v53 = vrot.slane %v81_v39, 5  ;;  %v490_v56 = vrot.slane %v660_v16, 9 }
  0x10   :  { %v284_v50 = vpack.c.bf16 %v278_v40, %v277_v38  ;;  %v369_v51 = vrot.slane %v362_v41, 5  ;;  %v93_v55 = vrot.slane %v80_v44, 5  ;;  %v101_v57 = vrot.slane %v82_v45, 5 }
  0x11   :  { %v491_v58 = vrot.slane %v673_v20, 9  ;;  %v98_v59 = vsel %vm701_vm12, %v489_v52, %v97_v53  ;;  %v105_v60 = vrot.slane %v83_v46, 5  ;;  %v366_v61 = vsel %vm701_vm12, %v516_v26, %v365_v30 }
  0x12   :  { %565 = vmatmul.mubr.msk.bf16.vlgmr.msra.gmra.mrb[0].mxu0 %vm150_vm0, %v284_v50  ;;  %vm33_vm13 = vcmp.gt.f32.partialorder %v23_v49, 0.0  ;;  %v94_v62 = vsel %vm701_vm12, %v488_v48, %v93_v55  ;;  %v102_v63 = vsel %vm701_vm12, %v490_v56, %v101_v57  ;;  %v43_v0 = vmul.f32 0.2, %v23_v49 }
  0x13   :  { %v85_v1 = vcombine.high %v683_v33, %v683_v33  ;;  %569 = vmatpush3.bf16.msra.mxu0 %v653_v11  ;;  %v106_v2 = vsel %vm701_vm12, %v491_v58, %v105_v60  ;;  %v123_v3 = vcombine.low %v94_v62, %v98_v59  ;;  %v371_v4 = vcombine.low %v98_v59, %v102_v63 }
  0x14   :  { %v86_v5 = vcombine.high %v685_v34, %v685_v34  ;;  %570 = vmatprep.subr.bf16.mxu0 %v595_v54  ;;  %v124_v6 = vcombine.low %v102_v63, %v106_v2  ;;  %v372_v7 = vcombine.low %v106_v2, %v366_v61  ;;  %v53_v9 = vsel %vm33_vm13, %v23_v49, %v43_v0 }
  0x15   :  { %v87_v10 = vcombine.high %v688_v36, %v688_v36  ;;  %v84_v12 = vcombine.high %v53_v9, %v53_v9  ;;  %v492_v13 = vrot.slane %v53_v9, 9  ;;  %v493_v14 = vrot.slane %v683_v33, 9 }
  0x16   :  { %v113_v11 = vrot.slane %v85_v1, 5  ;;  %v131_v17 = vpack.c.bf16 %v124_v6, %v123_v3  ;;  %v494_v18 = vrot.slane %v685_v34, 9  ;;  %v117_v19 = vrot.slane %v86_v5, 5 }
  0x17   :  { %v495_v21 = vrot.slane %v688_v36, 9  ;;  %571 = vmatpush3.bf16.msra.mxu0 %v595_v54  ;;  %v109_v22 = vrot.slane %v84_v12, 5  ;;  %v121_v24 = vrot.slane %v87_v10, 5  ;;  %v370_v25 = vsel %vm701_vm12, %v517_v42, %v369_v51 }
  0x18   :  { %v114_v23 = vsel %vm701_vm12, %v493_v14, %v113_v11  ;;  %548 = vmatprep.mubr.msk.bf16.mxu1 %vm150_vm0, %v131_v17  ;;  %v118_v26 = vsel %vm701_vm12, %v494_v18, %v117_v19  ;;  %v379_v27 = vpack.c.bf16 %v372_v7, %v371_v4  ;;  %v66_v28 = vcombine.low %v48_v43, %v658_v15  ;;  %v594_v15 = vld [vmem:[%s779_s1 + $0x8] sm:$0xff]  }
  0x19   :  { %v67_v29 = vcombine.low %v660_v16, %v673_v20  ;;  %v110_v30 = vsel %vm701_vm12, %v492_v13, %v109_v22  ;;  %v122_v31 = vsel %vm701_vm12, %v495_v21, %v121_v24  ;;  %v373_v32 = vcombine.low %v114_v23, %v118_v26 }
  0x1a   :  { %v125_v35 = vcombine.low %v110_v30, %v114_v23  ;;  %v126_v37 = vcombine.low %v118_v26, %v122_v31  ;;  %v374_v38 = vcombine.low %v122_v31, %v370_v25  ;;  %572 = vmatprep.mubr.msk.bf16.mxu0 %vm150_vm0, %v379_v27  ;;  %v68_v16 = vcombine.low %v53_v9, %v683_v33  ;;  %v527_v33 = vld [vmem:[%s782_s3] ss:$0 sm:$0xff] }
  0x1b   :  { %v74_v39 = vpack.c.bf16 %v67_v29, %v66_v28  ;;  %v69_v20 = vcombine.low %v685_v34, %v688_v36 }
  0x1c   :  { %v132_v40 = vpack.c.bf16 %v126_v37, %v125_v35  ;;  %v380_v41 = vpack.c.bf16 %v374_v38, %v373_v32 }
  0x1d   :  { %v75_v42 = vpack.c.bf16 %v69_v20, %v68_v16 }
  0x1e   :  { %549 = vmatmul.mubr.msk.bf16.vlgmr.msra.gmra.mrb[0].mxu1 %vm150_vm0, %v132_v40  ;;  %573 = vmatmul.mubr.msk.bf16.vlgmr.msra.gmra.mrb[0].mxu0 %vm150_vm0, %v380_v41 }
  0x1f   :  { %553 = vmatpush3.bf16.msra.mxu1 %v648_v8  ;;  %556 = vmatprep.mubr.msk.bf16.mxu1 %vm150_vm0, %v74_v39  ;;  %v526_v8 = vld [vmem:[%s781_s2] ss:$0 sm:$0xff] }
  0x20   :  { %554 = vmatprep.subr.bf16.mxu1 %v594_v15 }
  0x23   :  { %555 = vmatpush3.bf16.msra.mxu1 %v594_v15 }
  0x2a   :  { %557 = vmatmul.mubr.msk.bf16.vlgmr.msra.gmra.mrb[0].mxu1 %vm150_vm0, %v75_v42 }
  0xf1   :  { %v574_v43 = vpop.f32.mrb[0].mxu0 }
  0xf2   :  { %v438_v44 = vpop.f32.mrb[1].mxu0 }
  0xf3   :  { %v575_v45 = vpop.f32.mrb[2].mxu0 }
  0xf4   :  { %v441_v46 = vpop.f32.mrb[3].mxu0 }
  0xfd   :  { %v558_v47 = vpop.f32.mrb[0].mxu1 }
  0xfe   :  { %v576_v48 = vadd.f32 %v574_v43, %v558_v47  ;;  %v258_v49 = vpop.f32.mrb[1].mxu1 }
  0xff   :  { %v577_v34 = vadd.f32 %v438_v44, %v258_v49  ;;  %v559_v36 = vpop.f32.mrb[2].mxu1 }
 0x100   :  { %v466_v50 = vmul.f32 %v576_v48, %v526_v8  ;;  %v578_v51 = vadd.f32 %v575_v45, %v559_v36  ;;  %v261_v52 = vpop.f32.mrb[3].mxu1 }
 0x101   :  { %v464_v53 = vmul.f32 %v577_v34, %v526_v8  ;;  %v579_v54 = vadd.f32 %v441_v46, %v261_v52 }
 0x102   :  { %v477_v55 = vadd.f32 %v527_v33, %v466_v50  ;;  %v467_v56 = vmul.f32 %v578_v51, %v526_v8 }
 0x103   :  { %v475_v57 = vadd.f32 %v527_v33, %v464_v53  ;;  %v465_v58 = vmul.f32 %v579_v54, %v526_v8 }
 0x104   :  { %482 = vst.msk [vmem:[%s783_s4 + $0x10] sm:$0xff] %vm479_vm14, %v477_v55  ;;  %v478_v59 = vadd.f32 %v527_v33, %v467_v56 }
 0x105   :  { %480 = vst.msk [vmem:[%s783_s4] sm:$0xff] %vm479_vm14, %v475_v57  ;;  %v476_v60 = vadd.f32 %v527_v33, %v465_v58 }
 0x106   :  { %483 = vst.msk [vmem:[%s783_s4 + $0x18] sm:$0xff] %vm479_vm14, %v478_v59 }
 0x107   :  { %481 = vst.msk [vmem:[%s783_s4 + $0x8] sm:$0xff] %vm479_vm14, %v476_v60 }

// kernel: generator_forward.10
= control target key start
LH: loop header
LB: loop body
LE: loop exit
PB: predicated region body
PF: predicated region fallthrough
CT: control target
= control target key end

     0   :  { %v679_v0 = vmov 0.0   ;;  %v51_v2 = vlaneseq  ;;  %vm680_vm0 = vmmov 0   ;;  %v681_v4 = vmov 1983009808   ;;  %s869_s1 = inlined_call_operand.vmem [shape: bf16[4,64,32], index: 1, kind: input, shape index: {}]   ;;  %s870_s0 = inlined_call_operand.vmem [shape: f32[2,3,3,64], index: 0, kind: input, shape index: {}]   ;;  %s871_s2 = inlined_call_operand.vmem [shape: f32[1,32], index: 2, kind: input, shape index: {}]   ;;  %s872_s3 = inlined_call_operand.vmem [shape: f32[1,32], index: 3, kind: input, shape index: {}]   ;;  %s873_s4 = inlined_call_operand.vmem [shape: f32[8,32], index: 4, kind: output, shape index: {}]  }
   0x1   :  { %627 = vmatprep.subr.bf16.mxu0 %v679_v0  ;;  %v663_v1 = vld [vmem:[%s869_s1 + $0x40] sm:$0xff]   ;;  %603 = vmatprep.subr.bf16.mxu1 %v679_v0  ;;  %v49_v5 = vunpack.c.l.s4 %v681_v4  ;;  %v665_v6 = vld [vmem:[%s869_s1 + $0x48] sm:$0xff]   ;;  %vm105_vm1 = vcmask 1040384   ;;  %vm106_vm2 = vcmask 1042434   ;;  %v667_v10 = vld [vmem:[%s869_s1 + $0x50] sm:$0xff]   ;;  %vm108_vm3 = vcmask 1044484  }
   0x2   :  { %v664_v3 = vld [vmem:[%s869_s1 + $0x20] sm:$0xff]   ;;  %635 = vmatprep.mubr.msk.bf16.mxu0 %vm680_vm0, %v679_v0  ;;  %611 = vmatprep.mubr.msk.bf16.mxu1 %vm680_vm0, %v679_v0  ;;  %v666_v7 = vld [vmem:[%s869_s1 + $0x28] sm:$0xff]   ;;  %v52_v8 = vshrl.u32 %v51_v2, 7  ;;  %v668_v11 = vld [vmem:[%s869_s1 + $0x30] sm:$0xff]   ;;  %vm110_vm4 = vcmask 1046534   ;;  %vm180_vm9 = vcmask 523264  }
   0x3   :  { %628 = vmatpush3.bf16.msra.mxu0 %v663_v1  ;;  %604 = vmatpush3.bf16.msra.mxu1 %v664_v3  ;;  %v50_v9 = vunpack.c.0.s8 %v49_v5  ;;  %v19_v12 = vld [vmem:[%s870_s0 + $0x4] sm:$0x7]  ;;  %v20_v13 = vld [vmem:[%s870_s0 + $0x8] sm:$0x7]  ;;  %v22_v14 = vld [vmem:[%s870_s0 + $0x10] sm:$0x7] }
   0x4   :  { %629 = vmatprep.subr.bf16.mxu0 %v679_v0  ;;  %605 = vmatprep.subr.bf16.mxu1 %v679_v0  ;;  %v669_v15 = vld [vmem:[%s869_s1 + $0x58] sm:$0xff]   ;;  %v23_v17 = vld [vmem:[%s870_s0 + $0x14] sm:$0x7]  ;;  %vm25_vm5 = vcmp.gt.f32.partialorder %v19_v12, 0.0  ;;  %vm26_vm6 = vcmp.gt.f32.partialorder %v20_v13, 0.0  ;;  %vm28_vm7 = vcmp.gt.f32.partialorder %v22_v14, 0.0  ;;  %vm758_vm10 = vmor %vm105_vm1, %vm106_vm2 }
   0x5   :  { %v670_v16 = vld [vmem:[%s869_s1 + $0x38] sm:$0xff]   ;;  %v753_v18 = vsub.s32 %v50_v9, %v52_v8  ;;  %vm29_vm8 = vcmp.gt.f32.partialorder %v23_v17, 0.0  ;;  %v31_v19 = vmul.f32 0.2, %v19_v12  ;;  %v32_v20 = vmul.f32 0.2, %v20_v13  ;;  %vm786_vm13 = vmor %vm758_vm10, %vm108_vm3 }
   0x6   :  { %v34_v21 = vmul.f32 0.2, %v22_v14  ;;  %v35_v22 = vmul.f32 0.2, %v23_v17  ;;  %v18_v26 = vld [vmem:[%s870_s0] sm:$0x7]  ;;  %vm799_vm14 = vmor %vm786_vm13, %vm110_vm4 }
   0x7   :  { %630 = vmatpush3.bf16.msra.mxu0 %v665_v6  ;;  %606 = vmatpush3.bf16.msra.mxu1 %v666_v7  ;;  %v763_v24 = vsel %vm25_vm5, %v19_v12, %v31_v19  ;;  %v38_v25 = vsel %vm26_vm6, %v20_v13, %v32_v20  ;;  %v21_v27 = vld [vmem:[%s870_s0 + $0xc] sm:$0x7]  ;;  %vm24_vm11 = vcmp.gt.f32.partialorder %v18_v26, 0.0  ;;  %v30_v37 = vmul.f32 0.2, %v18_v26  ;;  %v671_v50 = vld [vmem:[%s869_s1 + $0x60] sm:$0xff]  }
   0x8   :  { %631 = vmatprep.subr.bf16.mxu0 %v679_v0  ;;  %607 = vmatprep.subr.bf16.mxu1 %v679_v0  ;;  %v771_v28 = vsel %vm28_vm7, %v22_v14, %v34_v21  ;;  %v41_v29 = vsel %vm29_vm8, %v23_v17, %v35_v22  ;;  %v87_v30 = vrot.slane %v763_v24, %v753_v18  ;;  %vm27_vm12 = vcmp.gt.f32.partialorder %v21_v27, 0.0  ;;  %v673_v8 = vld [vmem:[%s869_s1 + $0x68] sm:$0xff]   ;;  %v675_v19 = vld [vmem:[%s869_s1 + $0x70] sm:$0xff]   ;;  %v677_v23 = vld [vmem:[%s869_s1 + $0x78] sm:$0xff]  }
   0x9   :  { %v293_v31 = vcombine.low %v763_v24, %v38_v25  ;;  %v103_v32 = vrot.slane %v771_v28, %v753_v18  ;;  %v294_v33 = vcombine.low %v771_v28, %v41_v29  ;;  %v395_v34 = vrot.slane %v38_v25, %v753_v18  ;;  %v672_v25 = vld [vmem:[%s869_s1] sm:$0xff]  }
   0xa   :  { %v403_v35 = vrot.slane %v41_v29, %v753_v18  ;;  %v33_v44 = vmul.f32 0.2, %v21_v27  ;;  %v36_v45 = vsel %vm24_vm11, %v18_v26, %v30_v37  ;;  %v88_v46 = vcombine.high %v87_v30, %v87_v30 }
   0xb   :  { %632 = vmatpush3.bf16.msra.mxu0 %v667_v10  ;;  %608 = vmatpush3.bf16.msra.mxu1 %v668_v11  ;;  %v301_v36 = vrot.slane %v293_v31, %v753_v18  ;;  %v308_v39 = vrot.slane %v294_v33, %v753_v18  ;;  %v396_v40 = vcombine.high %v395_v34, %v395_v34  ;;  %v566_v42 = vrot.slane %v395_v34, 9  ;;  %v674_v31 = vld [vmem:[%s869_s1 + $0x8] sm:$0xff]   ;;  %v678_v34 = vld [vmem:[%s869_s1 + $0x18] sm:$0xff]  }
   0xc   :  { %633 = vmatprep.subr.bf16.mxu0 %v679_v0  ;;  %609 = vmatprep.subr.bf16.mxu1 %v679_v0  ;;  %v404_v41 = vcombine.high %v403_v35, %v403_v35  ;;  %v567_v43 = vrot.slane %v403_v35, 9  ;;  %v79_v51 = vrot.slane %v36_v45, %v753_v18  ;;  %v39_v53 = vsel %vm27_vm12, %v21_v27, %v33_v44 }
   0xd   :  { %v309_v47 = vcombine.low %v301_v36, %v308_v39  ;;  %v407_v48 = vrot.slane %v396_v40, 7  ;;  %v104_v54 = vcombine.high %v103_v32, %v103_v32  ;;  %v532_v55 = vrot.slane %v87_v30, 9  ;;  %v581_v40 = vld [vmem:[%s871_s2] ss:$0 sm:$0xff] }
   0xe   :  { %v411_v49 = vrot.slane %v404_v41, 7  ;;  %v118_v56 = vrot.slane %v88_v46, 7  ;;  %v80_v58 = vcombine.high %v79_v51, %v79_v51  ;;  %v95_v59 = vrot.slane %v39_v53, %v753_v18 }
   0xf   :  { %634 = vmatpush3.bf16.msra.mxu0 %v669_v15  ;;  %610 = vmatpush3.bf16.msra.mxu1 %v670_v16  ;;  %v311_v57 = vpack.c.bf16 %v309_v47, %v309_v47  ;;  %v531_v60 = vrot.slane %v79_v51, 9  ;;  %v534_v62 = vrot.slane %v103_v32, 9  ;;  %v126_v63 = vrot.slane %v104_v54, 7 }
  0x10   :  { %639 = vmatprep.subr.bf16.mxu0 %v679_v0  ;;  %615 = vmatprep.subr.bf16.mxu1 %v679_v0  ;;  %v119_v61 = vsel %vm799_vm14, %v532_v55, %v118_v56  ;;  %v408_v1 = vsel %vm799_vm14, %v566_v42, %v407_v48  ;;  %v96_v2 = vcombine.high %v95_v59, %v95_v59  ;;  %v114_v3 = vrot.slane %v80_v58, 7 }
  0x11   :  { %v533_v4 = vrot.slane %v95_v59, 9  ;;  %v412_v5 = vsel %vm799_vm14, %v567_v43, %v411_v49  ;;  %v127_v6 = vsel %vm799_vm14, %v534_v62, %v126_v63  ;;  %v413_v7 = vcombine.low %v119_v61, %v408_v1  ;;  %v582_v43 = vld [vmem:[%s872_s3] ss:$0 sm:$0xff] }
  0x12   :  { %636 = vmatmul.mubr.msk.bf16.vlgmr.msra.gmra.mrb[0].mxu0 %vm180_vm9, %v311_v57  ;;  %v115_v9 = vsel %vm799_vm14, %v531_v60, %v114_v3  ;;  %v122_v10 = vrot.slane %v96_v2, 7  ;;  %v414_v11 = vcombine.low %v127_v6, %v412_v5  ;;  %v46_v29 = vcombine.low %v36_v45, %v763_v24  ;;  %v676_v24 = vld [vmem:[%s869_s1 + $0x10] sm:$0xff]  }
  0x13   :  { %640 = vmatpush3.bf16.msra.mxu0 %v671_v50  ;;  %647 = vmatprep.mubr.msk.bf16.mxu0 %vm680_vm0, %v679_v0  ;;  %v128_v12 = vcombine.low %v115_v9, %v119_v61  ;;  %v421_v14 = vrot.slane %v413_v7, %v753_v18  ;;  %v47_v30 = vcombine.low %v39_v53, %v771_v28  ;;  %vm525_vm15 = vcmask 261120  }
  0x14   :  { %641 = vmatprep.subr.bf16.mxu0 %v679_v0  ;;  %v123_v13 = vsel %vm799_vm14, %v533_v4, %v122_v10  ;;  %v428_v15 = vrot.slane %v414_v11, %v753_v18  ;;  %v54_v32 = vrot.slane %v46_v29, %v753_v18 }
  0x15   :  { %v129_v16 = vcombine.low %v123_v13, %v127_v6  ;;  %v136_v17 = vrot.slane %v128_v12, %v753_v18  ;;  %v61_v33 = vrot.slane %v47_v30, %v753_v18 }
  0x16   :  { %v429_v21 = vcombine.low %v421_v14, %v428_v15 }
  0x17   :  { %642 = vmatpush3.bf16.msra.mxu0 %v673_v8  ;;  %v143_v20 = vrot.slane %v129_v16, %v753_v18  ;;  %v62_v28 = vcombine.low %v54_v32, %v61_v33 }
  0x18   :  { %643 = vmatprep.subr.bf16.mxu0 %v679_v0  ;;  %v431_v27 = vpack.c.bf16 %v429_v21, %v429_v21 }
  0x19   :  { %v144_v22 = vcombine.low %v136_v17, %v143_v20  ;;  %v64_v35 = vpack.c.bf16 %v62_v28, %v62_v28 }
  0x1b   :  { %644 = vmatpush3.bf16.msra.mxu0 %v675_v19  ;;  %v146_v26 = vpack.c.bf16 %v144_v22, %v144_v22 }
  0x1c   :  { %645 = vmatprep.subr.bf16.mxu0 %v679_v0 }
  0x1d   :  { %612 = vmatmul.mubr.msk.bf16.vlgmr.msra.gmra.mrb[0].mxu1 %vm180_vm9, %v146_v26 }
  0x1e   :  { %616 = vmatpush3.bf16.msra.mxu1 %v672_v25  ;;  %623 = vmatprep.mubr.msk.bf16.mxu1 %vm680_vm0, %v679_v0 }
  0x1f   :  { %646 = vmatpush3.bf16.msra.mxu0 %v677_v23  ;;  %617 = vmatprep.subr.bf16.mxu1 %v679_v0 }
  0x22   :  { %648 = vmatmul.mubr.msk.bf16.vlgmr.msra.gmra.mrb[0].mxu0 %vm180_vm9, %v431_v27  ;;  %618 = vmatpush3.bf16.msra.mxu1 %v674_v31 }
  0x23   :  { %619 = vmatprep.subr.bf16.mxu1 %v679_v0 }
  0x26   :  { %620 = vmatpush3.bf16.msra.mxu1 %v676_v24 }
  0x27   :  { %621 = vmatprep.subr.bf16.mxu1 %v679_v0 }
  0x2a   :  { %622 = vmatpush3.bf16.msra.mxu1 %v678_v34 }
  0x2d   :  { %624 = vmatmul.mubr.msk.bf16.vlgmr.msra.gmra.mrb[0].mxu1 %vm180_vm9, %v64_v35 }
  0xf5   :  { %v502_v18 = vpop.f32.mrb[0].mxu0 }
  0xf6   :  { %v649_v36 = vpop.f32.mrb[1].mxu0 }
  0xf7   :  { %v505_v37 = vpop.f32.mrb[2].mxu0 }
  0xf8   :  { %v650_v38 = vpop.f32.mrb[3].mxu0 }
 0x100   :  { %v285_v39 = vpop.f32.mrb[0].mxu1 }
 0x101   :  { %v651_v41 = vadd.f32 %v502_v18, %v285_v39  ;;  %v625_v42 = vpop.f32.mrb[1].mxu1 }
 0x102   :  { %v288_v0 = vpop.f32.mrb[2].mxu1 }
 0x103   :  { %v516_v44 = vmul.f32 %v651_v41, %v581_v40  ;;  %v626_v45 = vpop.f32.mrb[3].mxu1 }
 0x105   :  { %v524_v46 = vadd.f32 %v582_v43, %v516_v44 }
 0x107   :  { %526 = vst.msk [vmem:[%s873_s4] sm:$0xff] %vm525_vm15, %v524_v46 }

// kernel: generator_forward.11
= control target key start
LH: loop header
LB: loop body
LE: loop exit
PB: predicated region body
PF: predicated region fallthrough
CT: control target
= control target key end

     0   :  { %v747_v0 = vmov 0.0   ;;  %vm748_vm0 = vmmov 0   ;;  %vm74_vm5 = vcmask 1041409   ;;  %vm500_vm6 = vcmask 517120   ;;  %s951_s1 = inlined_call_operand.vmem [shape: bf16[4,128,64], index: 1, kind: input, shape index: {}]   ;;  %s952_s0 = inlined_call_operand.vmem [shape: f32[2,2,2,128], index: 0, kind: input, shape index: {}]   ;;  %s953_s2 = inlined_call_operand.vmem [shape: f32[1,64], index: 2, kind: input, shape index: {}]   ;;  %s954_s3 = inlined_call_operand.vmem [shape: f32[1,64], index: 3, kind: input, shape index: {}]   ;;  %s955_s4 = inlined_call_operand.vmem [shape: f32[2,64], index: 4, kind: output, shape index: {}]  }
   0x1   :  { %624 = vmatprep.subr.bf16.mxu1 %v747_v0  ;;  %664 = vmatprep.subr.bf16.mxu0 %v747_v0  ;;  %v715_v1 = vld [vmem:[%s951_s1 + $0x40] sm:$0xff]   ;;  %v717_v3 = vld [vmem:[%s951_s1 + $0x48] sm:$0xff]   ;;  %v719_v5 = vld [vmem:[%s951_s1 + $0x50] sm:$0xff]  }
   0x2   :  { %v716_v2 = vld [vmem:[%s951_s1 + $0x80] sm:$0xff]   ;;  %640 = vmatprep.mubr.msk.bf16.mxu1 %vm748_vm0, %v747_v0  ;;  %680 = vmatprep.mubr.msk.bf16.mxu0 %vm748_vm0, %v747_v0  ;;  %v718_v4 = vld [vmem:[%s951_s1 + $0x88] sm:$0xff]   ;;  %v720_v6 = vld [vmem:[%s951_s1 + $0x90] sm:$0xff]  }
   0x3   :  { %625 = vmatpush3.bf16.msra.mxu1 %v715_v1  ;;  %665 = vmatpush3.bf16.msra.mxu0 %v716_v2  ;;  %v721_v7 = vld [vmem:[%s951_s1 + $0x58] sm:$0xff]   ;;  %v723_v9 = vld [vmem:[%s951_s1 + $0x60] sm:$0xff]   ;;  %v725_v15 = vld [vmem:[%s951_s1 + $0x68] sm:$0xff]  }
   0x4   :  { %626 = vmatprep.subr.bf16.mxu1 %v747_v0  ;;  %666 = vmatprep.subr.bf16.mxu0 %v747_v0  ;;  %v722_v8 = vld [vmem:[%s951_s1 + $0x98] sm:$0xff]   ;;  %v724_v10 = vld [vmem:[%s951_s1 + $0xa0] sm:$0xff]   ;;  %v726_v17 = vld [vmem:[%s951_s1 + $0xa8] sm:$0xff]  }
   0x5   :  { %v18_v11 = vld [vmem:[%s952_s0] sm:$0x3]  ;;  %v20_v12 = vld [vmem:[%s952_s0 + $0x4] sm:$0x3]  ;;  %v19_v16 = vld [vmem:[%s952_s0 + $0x2] sm:$0x3] }
   0x6   :  { %vm22_vm1 = vcmp.gt.f32.partialorder %v18_v11, 0.0  ;;  %vm24_vm2 = vcmp.gt.f32.partialorder %v20_v12, 0.0  ;;  %v26_v13 = vmul.f32 0.2, %v18_v11  ;;  %v28_v14 = vmul.f32 0.2, %v20_v12 }
   0x7   :  { %627 = vmatpush3.bf16.msra.mxu1 %v717_v3  ;;  %667 = vmatpush3.bf16.msra.mxu0 %v718_v4  ;;  %v21_v20 = vld [vmem:[%s952_s0 + $0x6] sm:$0x3]  ;;  %vm23_vm3 = vcmp.gt.f32.partialorder %v19_v16, 0.0  ;;  %v27_v21 = vmul.f32 0.2, %v19_v16  ;;  %v727_v26 = vld [vmem:[%s951_s1 + $0x70] sm:$0xff]  }
   0x8   :  { %628 = vmatprep.subr.bf16.mxu1 %v747_v0  ;;  %668 = vmatprep.subr.bf16.mxu0 %v747_v0  ;;  %v30_v18 = vsel %vm22_vm1, %v18_v11, %v26_v13  ;;  %v32_v19 = vsel %vm24_vm2, %v20_v12, %v28_v14  ;;  %vm25_vm4 = vcmp.gt.f32.partialorder %v21_v20, 0.0  ;;  %v29_v24 = vmul.f32 0.2, %v21_v20  ;;  %v728_v31 = vld [vmem:[%s951_s1 + $0xb0] sm:$0xff]   ;;  %v729_v36 = vld [vmem:[%s951_s1 + $0x78] sm:$0xff]   ;;  %v731_v42 = vld [vmem:[%s951_s1] sm:$0xff]  }
   0x9   :  { %v34_v22 = vpack.c.bf16 %v30_v18, %v30_v18  ;;  %v35_v23 = vpack.c.bf16 %v32_v19, %v32_v19  ;;  %v31_v25 = vsel %vm23_vm3, %v19_v16, %v27_v21  ;;  %v730_v38 = vld [vmem:[%s951_s1 + $0xb8] sm:$0xff]   ;;  %v732_v44 = vld [vmem:[%s951_s1 + $0xc0] sm:$0xff]   ;;  %v733_v45 = vld [vmem:[%s951_s1 + $0x8] sm:$0xff]  }
   0xa   :  { %v33_v29 = vsel %vm25_vm4, %v21_v20, %v29_v24  ;;  %v258_v30 = vpack.c.bf16 %v31_v25, %v31_v25  ;;  %v734_v46 = vld [vmem:[%s951_s1 + $0xc8] sm:$0xff]   ;;  %v735_v47 = vld [vmem:[%s951_s1 + $0x10] sm:$0xff]   ;;  %v737_v49 = vld [vmem:[%s951_s1 + $0x18] sm:$0xff]  }
   0xb   :  { %629 = vmatpush3.bf16.msra.mxu1 %v719_v5  ;;  %669 = vmatpush3.bf16.msra.mxu0 %v720_v6  ;;  %v841_v27 = vunpack.c.l.b16 %v34_v22  ;;  %v843_v28 = vunpack.c.l.b16 %v35_v23  ;;  %v259_v32 = vpack.c.bf16 %v33_v29, %v33_v29  ;;  %v736_v48 = vld [vmem:[%s951_s1 + $0xd0] sm:$0xff]   ;;  %v738_v50 = vld [vmem:[%s951_s1 + $0xd8] sm:$0xff]   ;;  %v739_v51 = vld [vmem:[%s951_s1 + $0x20] sm:$0xff]  }
   0xc   :  { %630 = vmatprep.subr.bf16.mxu1 %v747_v0  ;;  %670 = vmatprep.subr.bf16.mxu0 %v747_v0  ;;  %v851_v34 = vunpack.c.l.b16 %v258_v30  ;;  %v740_v52 = vld [vmem:[%s951_s1 + $0xe0] sm:$0xff]   ;;  %v741_v53 = vld [vmem:[%s951_s1 + $0x28] sm:$0xff]   ;;  %v743_v56 = vld [vmem:[%s951_s1 + $0x30] sm:$0xff]  }
   0xd   :  { %v73_v33 = vrot.slane %v841_v27, 1  ;;  %v853_v35 = vunpack.c.l.b16 %v259_v32  ;;  %v742_v54 = vld [vmem:[%s951_s1 + $0xe8] sm:$0xff]   ;;  %v166_v55 = vrot.slane %v843_v28, 7  ;;  %v744_v58 = vld [vmem:[%s951_s1 + $0xf0] sm:$0xff]   ;;  %v745_v59 = vld [vmem:[%s951_s1 + $0x38] sm:$0xff]  }
   0xe   :  { %v391_v57 = vrot.slane %v851_v34, 1  ;;  %v746_v61 = vld [vmem:[%s951_s1 + $0xf8] sm:$0xff]   ;;  %v586_v4 = vld [vmem:[%s953_s2] ss:$0 sm:$0xff] }
   0xf   :  { %631 = vmatpush3.bf16.msra.mxu1 %v721_v7  ;;  %671 = vmatpush3.bf16.msra.mxu0 %v722_v8  ;;  %v75_v37 = vsel %vm74_vm5, %v843_v28, %v73_v33  ;;  %v281_v39 = vrot.slane %v853_v35, 7  ;;  %v167_v60 = vsel %vm74_vm5, %v166_v55, %v841_v27 }
  0x10   :  { %632 = vmatprep.subr.bf16.mxu1 %v747_v0  ;;  %672 = vmatprep.subr.bf16.mxu0 %v747_v0  ;;  %v76_v40 = vpack.c.b16 %v75_v37, %v75_v37  ;;  %v392_v62 = vsel %vm74_vm5, %v853_v35, %v391_v57  ;;  %v168_v63 = vpack.c.b16 %v167_v60, %v167_v60 }
  0x11   :  { %v282_v41 = vsel %vm74_vm5, %v281_v39, %v851_v34  ;;  %v393_v1 = vpack.c.b16 %v392_v62, %v392_v62 }
  0x12   :  { %v283_v43 = vpack.c.b16 %v282_v41, %v282_v41 }
  0x13   :  { %633 = vmatpush3.bf16.msra.mxu1 %v723_v9  ;;  %673 = vmatpush3.bf16.msra.mxu0 %v724_v10 }
  0x14   :  { %634 = vmatprep.subr.bf16.mxu1 %v747_v0  ;;  %674 = vmatprep.subr.bf16.mxu0 %v747_v0 }
  0x17   :  { %635 = vmatpush3.bf16.msra.mxu1 %v725_v15  ;;  %675 = vmatpush3.bf16.msra.mxu0 %v726_v17 }
  0x18   :  { %636 = vmatprep.subr.bf16.mxu1 %v747_v0  ;;  %676 = vmatprep.subr.bf16.mxu0 %v747_v0 }
  0x1b   :  { %637 = vmatpush3.bf16.msra.mxu1 %v727_v26  ;;  %677 = vmatpush3.bf16.msra.mxu0 %v728_v31 }
  0x1c   :  { %638 = vmatprep.subr.bf16.mxu1 %v747_v0  ;;  %678 = vmatprep.subr.bf16.mxu0 %v747_v0 }
  0x1f   :  { %639 = vmatpush3.bf16.msra.mxu1 %v729_v36  ;;  %679 = vmatpush3.bf16.msra.mxu0 %v730_v38 }
  0x20   :  { %644 = vmatprep.subr.bf16.mxu1 %v747_v0  ;;  %684 = vmatprep.subr.bf16.mxu0 %v747_v0 }
  0x22   :  { %641 = vmatmul.mubr.bf16.vlgmr.msra.gmra.mrb[0].mxu1 %v76_v40  ;;  %681 = vmatmul.mubr.bf16.vlgmr.msra.gmra.mrb[0].mxu0 %v283_v43 }
  0x23   :  { %645 = vmatpush3.bf16.msra.mxu1 %v731_v42  ;;  %685 = vmatpush3.bf16.msra.mxu0 %v732_v44 }
  0x24   :  { %646 = vmatprep.subr.bf16.mxu1 %v747_v0  ;;  %686 = vmatprep.subr.bf16.mxu0 %v747_v0 }
  0x25   :  { %660 = vmatprep.mubr.msk.bf16.mxu1 %vm748_vm0, %v747_v0  ;;  %700 = vmatprep.mubr.msk.bf16.mxu0 %vm748_vm0, %v747_v0 }
  0x27   :  { %647 = vmatpush3.bf16.msra.mxu1 %v733_v45  ;;  %687 = vmatpush3.bf16.msra.mxu0 %v734_v46 }
  0x28   :  { %648 = vmatprep.subr.bf16.mxu1 %v747_v0  ;;  %688 = vmatprep.subr.bf16.mxu0 %v747_v0 }
  0x2b   :  { %649 = vmatpush3.bf16.msra.mxu1 %v735_v47  ;;  %689 = vmatpush3.bf16.msra.mxu0 %v736_v48 }
  0x2c   :  { %650 = vmatprep.subr.bf16.mxu1 %v747_v0  ;;  %690 = vmatprep.subr.bf16.mxu0 %v747_v0 }
  0x2f   :  { %651 = vmatpush3.bf16.msra.mxu1 %v737_v49  ;;  %691 = vmatpush3.bf16.msra.mxu0 %v738_v50 }
  0x30   :  { %652 = vmatprep.subr.bf16.mxu1 %v747_v0  ;;  %692 = vmatprep.subr.bf16.mxu0 %v747_v0 }
  0x33   :  { %653 = vmatpush3.bf16.msra.mxu1 %v739_v51  ;;  %693 = vmatpush3.bf16.msra.mxu0 %v740_v52 }
  0x34   :  { %654 = vmatprep.subr.bf16.mxu1 %v747_v0  ;;  %694 = vmatprep.subr.bf16.mxu0 %v747_v0 }
  0x37   :  { %655 = vmatpush3.bf16.msra.mxu1 %v741_v53  ;;  %695 = vmatpush3.bf16.msra.mxu0 %v742_v54 }
  0x38   :  { %656 = vmatprep.subr.bf16.mxu1 %v747_v0  ;;  %696 = vmatprep.subr.bf16.mxu0 %v747_v0 }
  0x3b   :  { %657 = vmatpush3.bf16.msra.mxu1 %v743_v56  ;;  %697 = vmatpush3.bf16.msra.mxu0 %v744_v58 }
  0x3c   :  { %658 = vmatprep.subr.bf16.mxu1 %v747_v0  ;;  %698 = vmatprep.subr.bf16.mxu0 %v747_v0  ;;  %v587_v0 = vld [vmem:[%s954_s3] ss:$0 sm:$0xff] }
  0x3f   :  { %659 = vmatpush3.bf16.msra.mxu1 %v745_v59  ;;  %699 = vmatpush3.bf16.msra.mxu0 %v746_v61 }
  0x42   :  { %661 = vmatmul.mubr.bf16.vlgmr.msra.gmra.mrb[0].mxu1 %v168_v63  ;;  %701 = vmatmul.mubr.bf16.vlgmr.msra.gmra.mrb[0].mxu0 %v393_v1 }
 0x115   :  { %v252_v2 = vpop.f32.mrb[0].mxu1  ;;  %v477_v3 = vpop.f32.mrb[0].mxu0 }
 0x116   :  { %v662_v5 = vpop.f32.mrb[1].mxu1  ;;  %v704_v6 = vadd.f32 %v477_v3, %v252_v2  ;;  %v702_v7 = vpop.f32.mrb[1].mxu0 }
 0x117   :  { %v255_v8 = vpop.f32.mrb[2].mxu1  ;;  %v480_v9 = vpop.f32.mrb[2].mxu0 }
 0x118   :  { %v663_v10 = vpop.f32.mrb[3].mxu1  ;;  %v491_v11 = vmul.f32 %v704_v6, %v586_v4  ;;  %v703_v12 = vpop.f32.mrb[3].mxu0 }
 0x11a   :  { %v499_v13 = vadd.f32 %v587_v0, %v491_v11 }
 0x11c   :  { %501 = vst.msk [vmem:[%s955_s4] sm:$0x3] %vm500_vm6, %v499_v13 }

// kernel: generator_forward.12
= control target key start
LH: loop header
LB: loop body
LE: loop exit
PB: predicated region body
PF: predicated region fallthrough
CT: control target
= control target key end

     0   :  { %v1907_v0 = vmov 0.0   ;;  %vm1908_vm0 = vmmov 0   ;;  %vm56_vm1 = vcmask 1041409   ;;  %vm83_vm2 = vcmask 523264   ;;  %s2309_s1 = inlined_call_operand.vmem [shape: bf16[16,64,32], index: 1, kind: input, shape index: {}]   ;;  %s2310_s0 = inlined_call_operand.vmem [shape: f32[2,3,3,64], index: 0, kind: input, shape index: {}]   ;;  %s2311_s2 = inlined_call_operand.vmem [shape: f32[1,32], index: 2, kind: input, shape index: {}]   ;;  %s2312_s3 = inlined_call_operand.vmem [shape: f32[1,32], index: 3, kind: input, shape index: {}]   ;;  %s2313_s4 = inlined_call_operand.vmem [shape: f32[4,2,32], index: 4, kind: output, shape index: {}]  }
   0x1   :  { %1601 = vmatprep.subr.bf16.mxu0 %v1907_v0  ;;  %1649 = vmatprep.subr.bf16.mxu1 %v1907_v0  ;;  %v1843_v1 = vld [vmem:[%s2309_s1 + $0x20] sm:$0xff]   ;;  %v1845_v3 = vld [vmem:[%s2309_s1 + $0x28] sm:$0xff]   ;;  %v1847_v5 = vld [vmem:[%s2309_s1 + $0x30] sm:$0xff]   ;;  %vm377_vm3 = vcmask 254976  }
   0x2   :  { %v1844_v2 = vld [vmem:[%s2309_s1 + $0xa0] sm:$0xff]   ;;  %1609 = vmatprep.mubr.msk.bf16.mxu0 %vm1908_vm0, %v1907_v0  ;;  %1657 = vmatprep.mubr.msk.bf16.mxu1 %vm1908_vm0, %v1907_v0  ;;  %v1846_v4 = vld [vmem:[%s2309_s1 + $0xa8] sm:$0xff]   ;;  %v1848_v6 = vld [vmem:[%s2309_s1 + $0xb0] sm:$0xff]  }
   0x3   :  { %1602 = vmatpush3.bf16.msra.mxu0 %v1843_v1  ;;  %1650 = vmatpush3.bf16.msra.mxu1 %v1844_v2  ;;  %v18_v7 = vld [vmem:[%s2310_s0] sm:$0x7]  ;;  %v21_v8 = vld [vmem:[%s2310_s0 + $0xc] sm:$0x7]  ;;  %v1849_v9 = vld [vmem:[%s2309_s1 + $0x38] sm:$0xff]  }
   0x4   :  { %1603 = vmatprep.subr.bf16.mxu0 %v1907_v0  ;;  %1651 = vmatprep.subr.bf16.mxu1 %v1907_v0  ;;  %v24_v10 = vmax.f32 %v18_v7, 0.0  ;;  %v27_v11 = vmax.f32 %v21_v8, 0.0  ;;  %v1850_v12 = vld [vmem:[%s2309_s1 + $0xb8] sm:$0xff]   ;;  %v1851_v20 = vld [vmem:[%s2309_s1] sm:$0xff]   ;;  %v1853_v26 = vld [vmem:[%s2309_s1 + $0x8] sm:$0xff]  }
   0x5   :  { %v1852_v23 = vld [vmem:[%s2309_s1 + $0x80] sm:$0xff]   ;;  %v1854_v27 = vld [vmem:[%s2309_s1 + $0x88] sm:$0xff]   ;;  %v1855_v28 = vld [vmem:[%s2309_s1 + $0x10] sm:$0xff]  }
   0x6   :  { %v32_v13 = vpack.c.bf16 %v24_v10, %v24_v10  ;;  %v33_v14 = vpack.c.bf16 %v27_v11, %v27_v11  ;;  %v1856_v29 = vld [vmem:[%s2309_s1 + $0x90] sm:$0xff]   ;;  %v19_v31 = vld [vmem:[%s2310_s0 + $0x4] sm:$0x7]  ;;  %v1857_v33 = vld [vmem:[%s2309_s1 + $0x18] sm:$0xff]  }
   0x7   :  { %1604 = vmatpush3.bf16.msra.mxu0 %v1845_v3  ;;  %1652 = vmatpush3.bf16.msra.mxu1 %v1846_v4  ;;  %v22_v32 = vld [vmem:[%s2310_s0 + $0x10] sm:$0x7]  ;;  %v1858_v34 = vld [vmem:[%s2309_s1 + $0x98] sm:$0xff]   ;;  %v25_v36 = vmax.f32 %v19_v31, 0.0  ;;  %v1859_v39 = vld [vmem:[%s2309_s1 + $0x40] sm:$0xff]  }
   0x8   :  { %1605 = vmatprep.subr.bf16.mxu0 %v1907_v0  ;;  %1653 = vmatprep.subr.bf16.mxu1 %v1907_v0  ;;  %v53_v15 = vunpack.c.l.b16 %v32_v13  ;;  %v54_v16 = vunpack.c.l.b16 %v33_v14  ;;  %v28_v37 = vmax.f32 %v22_v32, 0.0  ;;  %v1860_v40 = vld [vmem:[%s2309_s1 + $0xc0] sm:$0xff]   ;;  %v1861_v43 = vld [vmem:[%s2309_s1 + $0x48] sm:$0xff]   ;;  %v1863_v47 = vld [vmem:[%s2309_s1 + $0x50] sm:$0xff]  }
   0x9   :  { %v197_v41 = vpack.c.bf16 %v25_v36, %v25_v36  ;;  %v1862_v44 = vld [vmem:[%s2309_s1 + $0xc8] sm:$0xff]   ;;  %v1864_v48 = vld [vmem:[%s2309_s1 + $0xd0] sm:$0xff]   ;;  %v1865_v51 = vld [vmem:[%s2309_s1 + $0x58] sm:$0xff]  }
   0xa   :  { %v55_v17 = vrot.slane %v53_v15, 1  ;;  %v397_v18 = vrot.slane %v53_v15, 2  ;;  %v398_v19 = vrot.slane %v54_v16, 1  ;;  %v127_v30 = vrot.slane %v54_v16, 7  ;;  %v1866_v52 = vld [vmem:[%s2309_s1 + $0xd8] sm:$0xff]   ;;  %v1867_v56 = vld [vmem:[%s2309_s1 + $0x60] sm:$0xff]  }
   0xb   :  { %1606 = vmatpush3.bf16.msra.mxu0 %v1847_v5  ;;  %1654 = vmatpush3.bf16.msra.mxu1 %v1848_v6  ;;  %v198_v42 = vpack.c.bf16 %v28_v37, %v28_v37  ;;  %v210_v45 = vunpack.c.l.b16 %v197_v41  ;;  %v1868_v58 = vld [vmem:[%s2309_s1 + $0xe0] sm:$0xff]   ;;  %v1869_v59 = vld [vmem:[%s2309_s1 + $0x68] sm:$0xff]   ;;  %v1871_v61 = vld [vmem:[%s2309_s1 + $0x70] sm:$0xff]  }
   0xc   :  { %1607 = vmatprep.subr.bf16.mxu0 %v1907_v0  ;;  %1655 = vmatprep.subr.bf16.mxu1 %v1907_v0  ;;  %v57_v21 = vsel %vm56_vm1, %v54_v16, %v55_v17  ;;  %v399_v22 = vsel %vm56_vm1, %v398_v19, %v397_v18  ;;  %v128_v35 = vsel %vm56_vm1, %v127_v30, %v53_v15  ;;  %v1870_v60 = vld [vmem:[%s2309_s1 + $0xe8] sm:$0xff]   ;;  %v1872_v62 = vld [vmem:[%s2309_s1 + $0xf0] sm:$0xff]   ;;  %v1873_v4 = vld [vmem:[%s2309_s1 + $0x78] sm:$0xff]  }
   0xd   :  { %v58_v24 = vpack.c.b16 %v57_v21, %v57_v21  ;;  %v400_v25 = vpack.c.b16 %v399_v22, %v399_v22  ;;  %v129_v38 = vpack.c.b16 %v128_v35, %v128_v35  ;;  %v211_v46 = vunpack.c.l.b16 %v198_v42  ;;  %v20_v2 = vld [vmem:[%s2310_s0 + $0x8] sm:$0x7]  ;;  %v23_v3 = vld [vmem:[%s2310_s0 + $0x14] sm:$0x7]  ;;  %v1874_v7 = vld [vmem:[%s2309_s1 + $0xf8] sm:$0xff]  }
   0xe   :  { %v292_v50 = vrot.slane %v210_v45, 1  ;;  %v615_v63 = vrot.slane %v210_v45, 2  ;;  %v26_v5 = vmax.f32 %v20_v2, 0.0  ;;  %v29_v6 = vmax.f32 %v23_v3, 0.0  ;;  %v1875_v14 = vld [vmem:[%s2309_s1 + $0x120] sm:$0xff]   ;;  %v1885_v31 = vld [vmem:[%s2309_s1 + $0x108] sm:$0xff]  }
   0xf   :  { %1608 = vmatpush3.bf16.msra.mxu0 %v1849_v9  ;;  %1656 = vmatpush3.bf16.msra.mxu1 %v1850_v12  ;;  %v212_v49 = vrot.slane %v211_v46, 7  ;;  %v616_v1 = vrot.slane %v211_v46, 1  ;;  %v1876_v15 = vld [vmem:[%s2309_s1 + $0x1a0] sm:$0xff]   ;;  %v1886_v32 = vld [vmem:[%s2309_s1 + $0x188] sm:$0xff]   ;;  %v1889_v35 = vld [vmem:[%s2309_s1 + $0x118] sm:$0xff]  }
  0x10   :  { %1613 = vmatprep.subr.bf16.mxu0 %v1907_v0  ;;  %1661 = vmatprep.subr.bf16.mxu1 %v1907_v0  ;;  %v293_v54 = vsel %vm56_vm1, %v211_v46, %v292_v50  ;;  %v837_v9 = vpack.c.bf16 %v26_v5, %v26_v5  ;;  %v838_v10 = vpack.c.bf16 %v29_v6, %v29_v6  ;;  %v1884_v30 = vld [vmem:[%s2309_s1 + $0x180] sm:$0xff]   ;;  %v1890_v36 = vld [vmem:[%s2309_s1 + $0x198] sm:$0xff]   ;;  %v1895_v41 = vld [vmem:[%s2309_s1 + $0x150] sm:$0xff]  }
  0x11   :  { %v213_v53 = vsel %vm56_vm1, %v212_v49, %v210_v45  ;;  %v2068_v57 = vpack.c.b16 %v293_v54, %v293_v54  ;;  %v617_v8 = vsel %vm56_vm1, %v616_v1, %v615_v63  ;;  %v1891_v37 = vld [vmem:[%s2309_s1 + $0x140] sm:$0xff]   ;;  %v1896_v42 = vld [vmem:[%s2309_s1 + $0x1d0] sm:$0xff]   ;;  %v1901_v49 = vld [vmem:[%s2309_s1 + $0x168] sm:$0xff]  }
  0x12   :  { %1610 = vmatmul.mubr.msk.bf16.vlgmr.msra.gmra.mrb[0].mxu0 %vm83_vm2, %v58_v24  ;;  %1658 = vmatmul.mubr.msk.bf16.vlgmr.msra.gmra.mrb[0].mxu1 %vm83_vm2, %v400_v25  ;;  %v2063_v55 = vpack.c.b16 %v213_v53, %v213_v53  ;;  %v850_v11 = vunpack.c.l.b16 %v837_v9  ;;  %v851_v12 = vunpack.c.l.b16 %v838_v10  ;;  %v618_v13 = vpack.c.b16 %v617_v8, %v617_v8  ;;  %v1879_v25 = vld [vmem:[%s2309_s1 + $0x130] sm:$0xff]   ;;  %v1902_v50 = vld [vmem:[%s2309_s1 + $0x1e8] sm:$0xff]   ;;  %v1905_v53 = vld [vmem:[%s2309_s1 + $0x178] sm:$0xff]  }
  0x13   :  { %1614 = vmatpush3.bf16.msra.mxu0 %v1851_v20  ;;  %1662 = vmatpush3.bf16.msra.mxu1 %v1852_v23  ;;  %v1877_v23 = vld [vmem:[%s2309_s1 + $0x128] sm:$0xff]   ;;  %v1906_v54 = vld [vmem:[%s2309_s1 + $0x1f8] sm:$0xff]  }
  0x14   :  { %1615 = vmatprep.subr.bf16.mxu0 %v1907_v0  ;;  %1663 = vmatprep.subr.bf16.mxu1 %v1907_v0  ;;  %v852_v16 = vrot.slane %v851_v12, 7  ;;  %v932_v17 = vrot.slane %v850_v11, 1  ;;  %v1236_v18 = vrot.slane %v850_v11, 2  ;;  %v1237_v19 = vrot.slane %v851_v12, 1 }
  0x15   :  { %1621 = vmatprep.mubr.msk.bf16.mxu0 %vm1908_vm0, %v1907_v0  ;;  %1669 = vmatprep.mubr.msk.bf16.mxu1 %vm1908_vm0, %v1907_v0 }
  0x16   :  { %v2123_v20 = vsel %vm56_vm1, %v852_v16, %v850_v11  ;;  %v2126_v21 = vsel %vm56_vm1, %v851_v12, %v932_v17  ;;  %v2132_v22 = vsel %vm56_vm1, %v1237_v19, %v1236_v18 }
  0x17   :  { %1616 = vmatpush3.bf16.msra.mxu0 %v1853_v26  ;;  %1664 = vmatpush3.bf16.msra.mxu1 %v1854_v27  ;;  %v1880_v26 = vld [vmem:[%s2309_s1 + $0x1b0] sm:$0xff]   ;;  %v1881_v27 = vld [vmem:[%s2309_s1 + $0x138] sm:$0xff]   ;;  %v854_v45 = vpack.c.b16 %v2123_v20, %v2123_v20  ;;  %v934_v46 = vpack.c.b16 %v2126_v21, %v2126_v21 }
  0x18   :  { %1617 = vmatprep.subr.bf16.mxu0 %v1907_v0  ;;  %1665 = vmatprep.subr.bf16.mxu1 %v1907_v0 }
  0x1b   :  { %1618 = vmatpush3.bf16.msra.mxu0 %v1855_v28  ;;  %1666 = vmatpush3.bf16.msra.mxu1 %v1856_v29  ;;  %v1882_v28 = vld [vmem:[%s2309_s1 + $0x1b8] sm:$0xff]   ;;  %v1883_v29 = vld [vmem:[%s2309_s1 + $0x100] sm:$0xff]  }
  0x1c   :  { %1619 = vmatprep.subr.bf16.mxu0 %v1907_v0  ;;  %1667 = vmatprep.subr.bf16.mxu1 %v1907_v0 }
  0x1f   :  { %1620 = vmatpush3.bf16.msra.mxu0 %v1857_v33  ;;  %1668 = vmatpush3.bf16.msra.mxu1 %v1858_v34  ;;  %v1887_v33 = vld [vmem:[%s2309_s1 + $0x110] sm:$0xff]  }
  0x20   :  { %1625 = vmatprep.subr.bf16.mxu0 %v1907_v0  ;;  %1673 = vmatprep.subr.bf16.mxu1 %v1907_v0  ;;  %v1888_v34 = vld [vmem:[%s2309_s1 + $0x190] sm:$0xff]  }
  0x22   :  { %1622 = vmatmul.mubr.msk.bf16.vlgmr.msra.gmra.mrb[0].mxu0 %vm83_vm2, %v129_v38  ;;  %1670 = vmatmul.mubr.msk.bf16.vlgmr.msra.gmra.mrb[0].mxu1 %vm83_vm2, %v58_v24  ;;  %v1878_v24 = vld [vmem:[%s2309_s1 + $0x1a8] sm:$0xff]   ;;  %v1892_v38 = vld [vmem:[%s2309_s1 + $0x1c0] sm:$0xff]  }
  0x23   :  { %1626 = vmatpush3.bf16.msra.mxu0 %v1859_v39  ;;  %1674 = vmatpush3.bf16.msra.mxu1 %v1860_v40  ;;  %v1893_v39 = vld [vmem:[%s2309_s1 + $0x148] sm:$0xff]  }
  0x24   :  { %1627 = vmatprep.subr.bf16.mxu0 %v1907_v0  ;;  %1675 = vmatprep.subr.bf16.mxu1 %v1907_v0  ;;  %v1894_v40 = vld [vmem:[%s2309_s1 + $0x1c8] sm:$0xff]  }
  0x25   :  { %1633 = vmatprep.mubr.msk.bf16.mxu0 %vm1908_vm0, %v1907_v0  ;;  %1681 = vmatprep.mubr.msk.bf16.mxu1 %vm1908_vm0, %v1907_v0 }
  0x27   :  { %1628 = vmatpush3.bf16.msra.mxu0 %v1861_v43  ;;  %1676 = vmatpush3.bf16.msra.mxu1 %v1862_v44  ;;  %v1897_v43 = vld [vmem:[%s2309_s1 + $0x158] sm:$0xff]  }
  0x28   :  { %1629 = vmatprep.subr.bf16.mxu0 %v1907_v0  ;;  %1677 = vmatprep.subr.bf16.mxu1 %v1907_v0  ;;  %v1898_v44 = vld [vmem:[%s2309_s1 + $0x1d8] sm:$0xff]  }
  0x2b   :  { %1630 = vmatpush3.bf16.msra.mxu0 %v1863_v47  ;;  %1678 = vmatpush3.bf16.msra.mxu1 %v1864_v48  ;;  %v1899_v47 = vld [vmem:[%s2309_s1 + $0x160] sm:$0xff]  }
  0x2c   :  { %1631 = vmatprep.subr.bf16.mxu0 %v1907_v0  ;;  %1679 = vmatprep.subr.bf16.mxu1 %v1907_v0  ;;  %v1900_v48 = vld [vmem:[%s2309_s1 + $0x1e0] sm:$0xff]  }
  0x2f   :  { %1632 = vmatpush3.bf16.msra.mxu0 %v1865_v51  ;;  %1680 = vmatpush3.bf16.msra.mxu1 %v1866_v52  ;;  %v1903_v51 = vld [vmem:[%s2309_s1 + $0x170] sm:$0xff]  }
  0x30   :  { %1637 = vmatprep.subr.bf16.mxu0 %v1907_v0  ;;  %1685 = vmatprep.subr.bf16.mxu1 %v1907_v0  ;;  %v1904_v52 = vld [vmem:[%s2309_s1 + $0x1f0] sm:$0xff]  }
  0x32   :  { %1634 = vmatmul.mubr.msk.bf16.vlgmr.msra.gmra.mrb[0].mxu0 %vm83_vm2, %v2063_v55  ;;  %1682 = vmatmul.mubr.msk.bf16.vlgmr.msra.gmra.mrb[0].mxu1 %vm83_vm2, %v2068_v57 }
  0x33   :  { %1638 = vmatpush3.bf16.msra.mxu0 %v1867_v56  ;;  %1686 = vmatpush3.bf16.msra.mxu1 %v1868_v58  ;;  %v1360_v56 = vld [vmem:[%s2311_s2] ss:$0 sm:$0xff] }
  0x34   :  { %1639 = vmatprep.subr.bf16.mxu0 %v1907_v0  ;;  %1687 = vmatprep.subr.bf16.mxu1 %v1907_v0 }
  0x35   :  { %1645 = vmatprep.mubr.msk.bf16.mxu0 %vm1908_vm0, %v1907_v0  ;;  %1693 = vmatprep.mubr.msk.bf16.mxu1 %vm1908_vm0, %v1907_v0 }
  0x37   :  { %1640 = vmatpush3.bf16.msra.mxu0 %v1869_v59  ;;  %1688 = vmatpush3.bf16.msra.mxu1 %v1870_v60 }
  0x38   :  { %1641 = vmatprep.subr.bf16.mxu0 %v1907_v0  ;;  %1689 = vmatprep.subr.bf16.mxu1 %v1907_v0 }
  0x3b   :  { %1642 = vmatpush3.bf16.msra.mxu0 %v1871_v61  ;;  %1690 = vmatpush3.bf16.msra.mxu1 %v1872_v62 }
  0x3c   :  { %1643 = vmatprep.subr.bf16.mxu0 %v1907_v0  ;;  %1691 = vmatprep.subr.bf16.mxu1 %v1907_v0 }
  0x3f   :  { %1644 = vmatpush3.bf16.msra.mxu0 %v1873_v4  ;;  %1692 = vmatpush3.bf16.msra.mxu1 %v1874_v7 }
  0x40   :  { %1697 = vmatprep.subr.bf16.mxu0 %v1907_v0  ;;  %1745 = vmatprep.subr.bf16.mxu1 %v1907_v0 }
  0x42   :  { %1646 = vmatmul.mubr.msk.bf16.vlgmr.msra.gmra.mrb[0].mxu0 %vm83_vm2, %v2068_v57  ;;  %1694 = vmatmul.mubr.msk.bf16.vlgmr.msra.gmra.mrb[0].mxu1 %vm83_vm2, %v618_v13 }
  0x43   :  { %1698 = vmatpush3.bf16.msra.mxu0 %v1875_v14  ;;  %1746 = vmatpush3.bf16.msra.mxu1 %v1876_v15 }
  0x44   :  { %1699 = vmatprep.subr.bf16.mxu0 %v1907_v0  ;;  %1747 = vmatprep.subr.bf16.mxu1 %v1907_v0 }
  0x45   :  { %1705 = vmatprep.mubr.msk.bf16.mxu0 %vm1908_vm0, %v1907_v0  ;;  %1753 = vmatprep.mubr.msk.bf16.mxu1 %vm1908_vm0, %v1907_v0 }
  0x47   :  { %1700 = vmatpush3.bf16.msra.mxu0 %v1877_v23  ;;  %1748 = vmatpush3.bf16.msra.mxu1 %v1878_v24 }
  0x48   :  { %1701 = vmatprep.subr.bf16.mxu0 %v1907_v0  ;;  %1749 = vmatprep.subr.bf16.mxu1 %v1907_v0 }
  0x4b   :  { %1702 = vmatpush3.bf16.msra.mxu0 %v1879_v25  ;;  %1750 = vmatpush3.bf16.msra.mxu1 %v1880_v26 }
  0x4c   :  { %1703 = vmatprep.subr.bf16.mxu0 %v1907_v0  ;;  %1751 = vmatprep.subr.bf16.mxu1 %v1907_v0 }
  0x4f   :  { %1704 = vmatpush3.bf16.msra.mxu0 %v1881_v27  ;;  %1752 = vmatpush3.bf16.msra.mxu1 %v1882_v28 }
  0x50   :  { %1709 = vmatprep.subr.bf16.mxu0 %v1907_v0  ;;  %1757 = vmatprep.subr.bf16.mxu1 %v1907_v0 }
  0x52   :  { %1706 = vmatmul.mubr.msk.bf16.vlgmr.msra.gmra.mrb[4].mxu0 %vm83_vm2, %v2068_v57  ;;  %1754 = vmatmul.mubr.msk.bf16.vlgmr.msra.gmra.mrb[4].mxu1 %vm83_vm2, %v618_v13 }
  0x53   :  { %1710 = vmatpush3.bf16.msra.mxu0 %v1883_v29  ;;  %1758 = vmatpush3.bf16.msra.mxu1 %v1884_v30 }
  0x54   :  { %1711 = vmatprep.subr.bf16.mxu0 %v1907_v0  ;;  %1759 = vmatprep.subr.bf16.mxu1 %v1907_v0 }
  0x55   :  { %1717 = vmatprep.mubr.msk.bf16.mxu0 %vm1908_vm0, %v1907_v0  ;;  %1765 = vmatprep.mubr.msk.bf16.mxu1 %vm1908_vm0, %v1907_v0 }
  0x57   :  { %1712 = vmatpush3.bf16.msra.mxu0 %v1885_v31  ;;  %1760 = vmatpush3.bf16.msra.mxu1 %v1886_v32 }
  0x58   :  { %1713 = vmatprep.subr.bf16.mxu0 %v1907_v0  ;;  %1761 = vmatprep.subr.bf16.mxu1 %v1907_v0 }
  0x5b   :  { %1714 = vmatpush3.bf16.msra.mxu0 %v1887_v33  ;;  %1762 = vmatpush3.bf16.msra.mxu1 %v1888_v34 }
  0x5c   :  { %1715 = vmatprep.subr.bf16.mxu0 %v1907_v0  ;;  %1763 = vmatprep.subr.bf16.mxu1 %v1907_v0 }
  0x5f   :  { %1716 = vmatpush3.bf16.msra.mxu0 %v1889_v35  ;;  %1764 = vmatpush3.bf16.msra.mxu1 %v1890_v36 }
  0x60   :  { %1721 = vmatprep.subr.bf16.mxu0 %v1907_v0  ;;  %1769 = vmatprep.subr.bf16.mxu1 %v1907_v0 }
  0x62   :  { %1718 = vmatmul.mubr.msk.bf16.vlgmr.msra.gmra.mrb[4].mxu0 %vm83_vm2, %v2063_v55  ;;  %1766 = vmatmul.mubr.msk.bf16.vlgmr.msra.gmra.mrb[4].mxu1 %vm83_vm2, %v2068_v57  ;;  %v1239_v55 = vpack.c.b16 %v2132_v22, %v2132_v22  ;;  %v1361_v57 = vld [vmem:[%s2312_s3] ss:$0 sm:$0xff] }
  0x63   :  { %1722 = vmatpush3.bf16.msra.mxu0 %v1891_v37  ;;  %1770 = vmatpush3.bf16.msra.mxu1 %v1892_v38 }
  0x64   :  { %1723 = vmatprep.subr.bf16.mxu0 %v1907_v0  ;;  %1771 = vmatprep.subr.bf16.mxu1 %v1907_v0 }
  0x65   :  { %1729 = vmatprep.mubr.msk.bf16.mxu0 %vm1908_vm0, %v1907_v0  ;;  %1777 = vmatprep.mubr.msk.bf16.mxu1 %vm1908_vm0, %v1907_v0 }
  0x67   :  { %1724 = vmatpush3.bf16.msra.mxu0 %v1893_v39  ;;  %1772 = vmatpush3.bf16.msra.mxu1 %v1894_v40 }
  0x68   :  { %1725 = vmatprep.subr.bf16.mxu0 %v1907_v0  ;;  %1773 = vmatprep.subr.bf16.mxu1 %v1907_v0 }
  0x6b   :  { %1726 = vmatpush3.bf16.msra.mxu0 %v1895_v41  ;;  %1774 = vmatpush3.bf16.msra.mxu1 %v1896_v42 }
  0x6c   :  { %1727 = vmatprep.subr.bf16.mxu0 %v1907_v0  ;;  %1775 = vmatprep.subr.bf16.mxu1 %v1907_v0 }
  0x6f   :  { %1728 = vmatpush3.bf16.msra.mxu0 %v1897_v43  ;;  %1776 = vmatpush3.bf16.msra.mxu1 %v1898_v44 }
  0x70   :  { %1733 = vmatprep.subr.bf16.mxu0 %v1907_v0  ;;  %1781 = vmatprep.subr.bf16.mxu1 %v1907_v0 }
  0x72   :  { %1730 = vmatmul.mubr.msk.bf16.vlgmr.msra.gmra.mrb[4].mxu0 %vm83_vm2, %v854_v45  ;;  %1778 = vmatmul.mubr.msk.bf16.vlgmr.msra.gmra.mrb[4].mxu1 %vm83_vm2, %v934_v46 }
  0x73   :  { %1734 = vmatpush3.bf16.msra.mxu0 %v1899_v47  ;;  %1782 = vmatpush3.bf16.msra.mxu1 %v1900_v48 }
  0x74   :  { %1735 = vmatprep.subr.bf16.mxu0 %v1907_v0  ;;  %1783 = vmatprep.subr.bf16.mxu1 %v1907_v0 }
  0x75   :  { %1741 = vmatprep.mubr.msk.bf16.mxu0 %vm1908_vm0, %v1907_v0  ;;  %1789 = vmatprep.mubr.msk.bf16.mxu1 %vm1908_vm0, %v1907_v0 }
  0x77   :  { %1736 = vmatpush3.bf16.msra.mxu0 %v1901_v49  ;;  %1784 = vmatpush3.bf16.msra.mxu1 %v1902_v50 }
  0x78   :  { %1737 = vmatprep.subr.bf16.mxu0 %v1907_v0  ;;  %1785 = vmatprep.subr.bf16.mxu1 %v1907_v0 }
  0x7b   :  { %1738 = vmatpush3.bf16.msra.mxu0 %v1903_v51  ;;  %1786 = vmatpush3.bf16.msra.mxu1 %v1904_v52 }
  0x7c   :  { %1739 = vmatprep.subr.bf16.mxu0 %v1907_v0  ;;  %1787 = vmatprep.subr.bf16.mxu1 %v1907_v0 }
  0x7f   :  { %1740 = vmatpush3.bf16.msra.mxu0 %v1905_v53  ;;  %1788 = vmatpush3.bf16.msra.mxu1 %v1906_v54 }
  0x82   :  { %1742 = vmatmul.mubr.msk.bf16.vlgmr.msra.gmra.mrb[4].mxu0 %vm83_vm2, %v934_v46  ;;  %1790 = vmatmul.mubr.msk.bf16.vlgmr.msra.gmra.mrb[4].mxu1 %vm83_vm2, %v1239_v55 }
 0x115   :  { %v356_v58 = vpop.f32.mrb[0].mxu0  ;;  %v680_v59 = vpop.f32.mrb[0].mxu1 }
 0x116   :  { %v369_v0 = vmul.f32 %v1360_v56, %v356_v58  ;;  %v687_v60 = vmul.f32 %v1360_v56, %v680_v59  ;;  %v1647_v61 = vpop.f32.mrb[1].mxu0  ;;  %v1695_v62 = vpop.f32.mrb[1].mxu1 }
 0x117   :  { %v359_v63 = vpop.f32.mrb[2].mxu0  ;;  %v683_v1 = vpop.f32.mrb[2].mxu1 }
 0x118   :  { %v376_v2 = vadd.f32 %v1361_v57, %v369_v0  ;;  %v688_v3 = vadd.f32 %v1361_v57, %v687_v60  ;;  %v1648_v4 = vpop.f32.mrb[3].mxu0  ;;  %v1696_v5 = vpop.f32.mrb[3].mxu1 }
 0x11a   :  { %378 = vst.msk [vmem:[%s2313_s4] sm:$0x3] %vm377_vm3, %v376_v2  ;;  %1414 = vst.msk [vmem:[%s2313_s4 + $0x2] sm:$0x3] %vm377_vm3, %v688_v3 }
 0x155   :  { %v996_v6 = vpop.f32.mrb[4].mxu0  ;;  %v1301_v7 = vpop.f32.mrb[4].mxu1 }
 0x156   :  { %v1003_v8 = vmul.f32 %v1360_v56, %v996_v6  ;;  %v1308_v9 = vmul.f32 %v1360_v56, %v1301_v7  ;;  %v1743_v10 = vpop.f32.mrb[5].mxu0  ;;  %v1791_v11 = vpop.f32.mrb[5].mxu1 }
 0x157   :  { %v999_v12 = vpop.f32.mrb[6].mxu0  ;;  %v1304_v13 = vpop.f32.mrb[6].mxu1 }
 0x158   :  { %v1004_v14 = vadd.f32 %v1361_v57, %v1003_v8  ;;  %v1309_v15 = vadd.f32 %v1361_v57, %v1308_v9  ;;  %v1744_v16 = vpop.f32.mrb[7].mxu0  ;;  %v1792_v17 = vpop.f32.mrb[7].mxu1 }
 0x15a   :  { %1467 = vst.msk [vmem:[%s2313_s4 + $0x4] sm:$0x3] %vm377_vm3, %v1004_v14  ;;  %1520 = vst.msk [vmem:[%s2313_s4 + $0x6] sm:$0x3] %vm377_vm3, %v1309_v15 }

// kernel: generator_forward.13
= control target key start
LH: loop header
LB: loop body
LE: loop exit
PB: predicated region body
PF: predicated region fallthrough
CT: control target
= control target key end

     0   :  { %v67_v0 = vlaneseq  ;;  %v3328_v1 = vmov 0.0   ;;  %v3329_v3 = vmov 1983009808   ;;  %vm3330_vm0 = vmmov 0   ;;  %s4110_s2 = inlined_call_operand.vmem [shape: bf16[16,32,16], index: 2, kind: input, shape index: {}]   ;;  %s4111_s0 = inlined_call_operand.vmem [shape: f32[2,4,4,32], index: 0, kind: input, shape index: {}]   ;;  %s4112_s3 = inlined_call_operand.vmem [shape: bf16[16,32,16], index: 3, kind: input, shape index: {}]   ;;  %s4113_s1 = inlined_call_operand.vmem [shape: f32[2,4,4,32], index: 1, kind: input, shape index: {}]   ;;  %s4114_s4 = inlined_call_operand.vmem [shape: f32[1,16], index: 4, kind: input, shape index: {}]   ;;  %s4115_s5 = inlined_call_operand.vmem [shape: f32[1,16], index: 5, kind: input, shape index: {}]   ;;  %s4116_s6 = inlined_call_operand.vmem [shape: f32[4,8,16], index: 6, kind: output, shape index: {}]  }
   0x1   :  { %2957 = vmatprep.subr.bf16.mxu1 %v3328_v1  ;;  %v3264_v2 = vld [vmem:[%s4110_s2 + $0x50] sm:$0xff]   ;;  %2893 = vmatprep.subr.bf16.mxu0 %v3328_v1  ;;  %v65_v4 = vunpack.c.l.s4 %v3329_v3  ;;  %v3266_v7 = vld [vmem:[%s4110_s2 + $0x58] sm:$0xff]   ;;  %vm117_vm1 = vcmask 1040384   ;;  %v3385_v9 = vld [vmem:[%s4111_s0] sm:$0xf]  ;;  %vm118_vm2 = vcmask 1042434  }
   0x2   :  { %v3265_v5 = vld [vmem:[%s4110_s2 + $0x10] sm:$0xff]   ;;  %2961 = vmatprep.mubr.msk.bf16.mxu1 %vm3330_vm0, %v3328_v1  ;;  %v68_v6 = vshrl.u32 %v67_v0, 7  ;;  %2897 = vmatprep.mubr.msk.bf16.mxu0 %vm3330_vm0, %v3328_v1  ;;  %v25_v10 = vld [vmem:[%s4111_s0 + $0x4] sm:$0xf]  ;;  %v32_v13 = vmax.f32 %v3385_v9, 0.0  ;;  %v3267_v17 = vld [vmem:[%s4110_s2 + $0x18] sm:$0xff]  }
   0x3   :  { %2958 = vmatpush3.bf16.msra.mxu1 %v3264_v2  ;;  %v66_v8 = vunpack.c.0.s8 %v65_v4  ;;  %2894 = vmatpush3.bf16.msra.mxu0 %v3265_v5  ;;  %v3393_v11 = vld [vmem:[%s4111_s0 + $0x10] sm:$0xf]  ;;  %v29_v12 = vld [vmem:[%s4111_s0 + $0x14] sm:$0xf]  ;;  %v3400_v14 = vmax.f32 %v25_v10, 0.0  ;;  %vm176_vm3 = vcmask 261120   ;;  %vm119_vm4 = vmor %vm117_vm1, %vm118_vm2 }
   0x4   :  { %2959 = vmatprep.subr.bf16.mxu1 %v3328_v1  ;;  %2895 = vmatprep.subr.bf16.mxu0 %v3328_v1  ;;  %v36_v15 = vmax.f32 %v3393_v11, 0.0  ;;  %v3408_v18 = vmax.f32 %v29_v12, 0.0  ;;  %v26_v22 = vld [vmem:[%s4111_s0 + $0x8] sm:$0xf]  ;;  %v3426_v23 = vld [vmem:[%s4111_s0 + $0xc] sm:$0xf] }
   0x5   :  { %v3403_v16 = vsub.s32 %v66_v8, %v68_v6  ;;  %v30_v24 = vld [vmem:[%s4111_s0 + $0x18] sm:$0xf]  ;;  %v3439_v26 = vld [vmem:[%s4111_s0 + $0x1c] sm:$0xf]  ;;  %v3441_v27 = vmax.f32 %v26_v22, 0.0  ;;  %v35_v28 = vmax.f32 %v3426_v23, 0.0 }
   0x6   :  { %v3444_v29 = vmax.f32 %v30_v24, 0.0  ;;  %v39_v31 = vmax.f32 %v3439_v26, 0.0  ;;  %vm120_vm5 = vcmask 1044484   ;;  %vm122_vm7 = vcmask 1046534   ;;  %v3269_v49 = vld [vmem:[%s4110_s2 + $0x40] sm:$0xff]   ;;  %v3270_v3 = vld [vmem:[%s4110_s2 + $0x48] sm:$0xff]  }
   0x7   :  { %2960 = vmatpush3.bf16.msra.mxu1 %v3266_v7  ;;  %v91_v19 = vrot.slane %v32_v13, %v3403_v16  ;;  %v3415_v20 = vrot.slane %v3400_v14, %v3403_v16  ;;  %v107_v21 = vrot.slane %v36_v15, %v3403_v16  ;;  %v3433_v25 = vrot.slane %v3408_v18, %v3403_v16  ;;  %vm121_vm6 = vmor %vm119_vm4, %vm120_vm5 }
   0x8   :  { %2896 = vmatpush3.bf16.msra.mxu0 %v3267_v17  ;;  %2965 = vmatprep.subr.bf16.mxu1 %v3328_v1  ;;  %vm3458_vm8 = vmor %vm121_vm6, %vm122_vm7  ;;  %v3475_v52 = vrot.slane %v3441_v27, %v3403_v16  ;;  %v3479_v53 = vrot.slane %v3444_v29, %v3403_v16  ;;  %v3489_v57 = vrot.slane %v35_v28, %v3403_v16  ;;  %vm872_vm9 = vcmask 130048  }
   0x9   :  { %v2614_v30 = vcombine.high %v91_v19, %v3415_v20  ;;  %2901 = vmatprep.subr.bf16.mxu0 %v3328_v1  ;;  %v92_v32 = vcombine.high %v91_v19, %v91_v19  ;;  %v100_v33 = vcombine.high %v3415_v20, %v3415_v20  ;;  %v2615_v34 = vcombine.high %v107_v21, %v3433_v25 }
   0xa   :  { %v108_v35 = vcombine.high %v107_v21, %v107_v21  ;;  %v116_v36 = vcombine.high %v3433_v25, %v3433_v25  ;;  %v2548_v38 = vrot.slane %v91_v19, 9  ;;  %v2549_v42 = vrot.slane %v3415_v20, 9 }
   0xb   :  { %v887_v37 = vrot.slane %v2614_v30, %v3403_v16  ;;  %v126_v39 = vrot.slane %v92_v32, 7  ;;  %v894_v40 = vrot.slane %v2615_v34, %v3403_v16  ;;  %v130_v43 = vrot.slane %v100_v33, 7  ;;  %v3268_v32 = vld [vmem:[%s4110_s2] sm:$0xff]  }
   0xc   :  { %v2550_v44 = vrot.slane %v107_v21, 9  ;;  %v134_v46 = vrot.slane %v108_v35, 7  ;;  %v2551_v47 = vrot.slane %v3433_v25, 9  ;;  %v138_v48 = vrot.slane %v116_v36, 7 }
   0xd   :  { %v127_v45 = vsel %vm3458_vm8, %v2548_v38, %v126_v39  ;;  %v895_v50 = vcombine.low %v887_v37, %v894_v40  ;;  %v3471_v51 = vsel %vm3458_vm8, %v2549_v42, %v130_v43  ;;  %v364_v60 = vcombine.high %v3475_v52, %v3475_v52  ;;  %v3271_v37 = vld [vmem:[%s4110_s2 + $0x8] sm:$0xff]   ;;  %v3548_v40 = vld [vmem:[%s4113_s1] sm:$0xf]  ;;  %v41_v43 = vld [vmem:[%s4113_s1 + $0x4] sm:$0xf] }
   0xe   :  { %v135_v54 = vsel %vm3458_vm8, %v2550_v44, %v134_v46  ;;  %v139_v55 = vsel %vm3458_vm8, %v2551_v47, %v138_v48  ;;  %v140_v56 = vcombine.low %v127_v45, %v3471_v51  ;;  %v372_v61 = vcombine.high %v3479_v53, %v3479_v53  ;;  %v3273_v42 = vld [vmem:[%s4110_s2 + $0x60] sm:$0xff]   ;;  %v3559_v44 = vld [vmem:[%s4113_s1 + $0x10] sm:$0xf]  ;;  %v45_v46 = vld [vmem:[%s4113_s1 + $0x14] sm:$0xf] }
   0xf   :  { %v897_v58 = vpack.c.bf16 %v895_v50, %v895_v50  ;;  %v141_v59 = vcombine.low %v135_v54, %v139_v55  ;;  %v2569_v63 = vrot.slane %v3475_v52, 9  ;;  %v2570_v0 = vrot.slane %v3479_v53, 9  ;;  %v3274_v48 = vld [vmem:[%s4110_s2 + $0x68] sm:$0xff]  }
  0x10   :  { %v148_v62 = vrot.slane %v140_v56, %v3403_v16  ;;  %v1631_v2 = vcombine.high %v3489_v57, %v3489_v57  ;;  %v375_v5 = vrot.slane %v364_v60, 7  ;;  %v379_v6 = vrot.slane %v372_v61, 7  ;;  %v3272_v60 = vld [vmem:[%s4110_s2 + $0x20] sm:$0xff]  }
  0x11   :  { %2962 = vmatmul.mubr.msk.bf16.vlgmr.msra.gmra.mrb[0].mxu1 %vm176_vm3, %v897_v58  ;;  %v155_v4 = vrot.slane %v141_v59, %v3403_v16  ;;  %v3508_v7 = vrot.slane %v39_v31, %v3403_v16  ;;  %v2696_v8 = vrot.slane %v3489_v57, 9  ;;  %v62_v19 = vcombine.low %v32_v13, %v3400_v14 }
  0x12   :  { %v1642_v10 = vrot.slane %v1631_v2, 7  ;;  %2966 = vmatpush3.bf16.msra.mxu1 %v3269_v49  ;;  %2969 = vmatprep.mubr.msk.bf16.mxu1 %vm3330_vm0, %v3328_v1  ;;  %v63_v21 = vcombine.low %v36_v15, %v3408_v18  ;;  %v376_v22 = vsel %vm3458_vm8, %v2569_v63, %v375_v5  ;;  %v380_v13 = vsel %vm3458_vm8, %v2570_v0, %v379_v6  ;;  %v3275_v5 = vld [vmem:[%s4110_s2 + $0x28] sm:$0xff]  }
  0x13   :  { %v156_v12 = vcombine.low %v148_v62, %v155_v4  ;;  %v1639_v17 = vcombine.high %v3508_v7, %v3508_v7  ;;  %2967 = vmatprep.subr.bf16.mxu1 %v3328_v1  ;;  %v2697_v30 = vrot.slane %v3508_v7, 9  ;;  %v70_v15 = vrot.slane %v62_v19, %v3403_v16 }
  0x14   :  { %v1643_v24 = vsel %vm3458_vm8, %v2696_v8, %v1642_v10  ;;  %v77_v35 = vrot.slane %v63_v21, %v3403_v16  ;;  %v381_v38 = vcombine.low %v3471_v51, %v376_v22  ;;  %v382_v39 = vcombine.low %v139_v55, %v380_v13 }
  0x15   :  { %v158_v33 = vpack.c.bf16 %v156_v12, %v156_v12  ;;  %v1646_v34 = vrot.slane %v1639_v17, 7  ;;  %v1648_v9 = vcombine.low %v376_v22, %v1643_v24  ;;  %v48_v47 = vmax.f32 %v3548_v40, 0.0  ;;  %v3277_v17 = vld [vmem:[%s4110_s2 + $0x70] sm:$0xff]  }
  0x16   :  { %2968 = vmatpush3.bf16.msra.mxu1 %v3270_v3  ;;  %v78_v45 = vcombine.low %v70_v15, %v77_v35  ;;  %v389_v49 = vrot.slane %v381_v38, %v3403_v16  ;;  %v396_v50 = vrot.slane %v382_v39, %v3403_v16  ;;  %v3572_v51 = vmax.f32 %v41_v43, 0.0  ;;  %v3276_v39 = vld [vmem:[%s4110_s2 + $0x30] sm:$0xff]  }
  0x17   :  { %2898 = vmatmul.mubr.msk.bf16.vlgmr.msra.gmra.mrb[0].mxu0 %vm176_vm3, %v158_v33  ;;  %v1647_v11 = vsel %vm3458_vm8, %v2697_v30, %v1646_v34  ;;  %2973 = vmatprep.subr.bf16.mxu1 %v3328_v1  ;;  %v52_v54 = vmax.f32 %v3559_v44, 0.0  ;;  %v3577_v55 = vmax.f32 %v45_v46, 0.0  ;;  %v277_v58 = vcombine.low %v3400_v14, %v3441_v27 }
  0x18   :  { %v1649_v36 = vcombine.low %v380_v13, %v1647_v11  ;;  %2902 = vmatpush3.bf16.msra.mxu0 %v3268_v32  ;;  %2905 = vmatprep.mubr.msk.bf16.mxu0 %vm3330_vm0, %v3328_v1  ;;  %v80_v56 = vpack.c.bf16 %v78_v45, %v78_v45  ;;  %v278_v59 = vcombine.low %v3408_v18, %v3444_v29  ;;  %v3278_v32 = vld [vmem:[%s4110_s2 + $0x78] sm:$0xff]  }
  0x19   :  { %2903 = vmatprep.subr.bf16.mxu0 %v3328_v1  ;;  %v3590_v61 = vrot.slane %v48_v47, %v3403_v16  ;;  %v397_v62 = vcombine.low %v389_v49, %v396_v50  ;;  %v3594_v63 = vrot.slane %v3572_v51, %v3403_v16  ;;  %v3599_v14 = vrot.slane %v52_v54, %v3403_v16 }
  0x1a   :  { %v3603_v18 = vrot.slane %v3577_v55, %v3403_v16  ;;  %v1656_v0 = vrot.slane %v1648_v9, %v3403_v16  ;;  %v1663_v2 = vrot.slane %v1649_v36, %v3403_v16  ;;  %v285_v3 = vrot.slane %v277_v58, %v3403_v16 }
  0x1b   :  { %v292_v4 = vrot.slane %v278_v59, %v3403_v16  ;;  %v2633_v6 = vcombine.high %v3415_v20, %v3475_v52  ;;  %v2634_v8 = vcombine.high %v3433_v25, %v3479_v53  ;;  %v551_v10 = vcombine.high %v3590_v61, %v3590_v61  ;;  %v46_v59 = vld [vmem:[%s4113_s1 + $0x18] sm:$0xf] }
  0x1c   :  { %2904 = vmatpush3.bf16.msra.mxu0 %v3271_v37  ;;  %v3623_v12 = vpack.c.bf16 %v397_v62, %v397_v62  ;;  %v559_v19 = vcombine.high %v3594_v63, %v3594_v63  ;;  %v567_v20 = vcombine.high %v3599_v14, %v3599_v14  ;;  %v575_v25 = vcombine.high %v3603_v18, %v3603_v18 }
  0x1d   :  { %2970 = vmatmul.mubr.msk.bf16.vlgmr.msra.gmra.mrb[0].mxu1 %vm176_vm3, %v158_v33  ;;  %2909 = vmatprep.subr.bf16.mxu0 %v3328_v1  ;;  %v3634_v21 = vcombine.low %v1656_v0, %v1663_v2  ;;  %v293_v22 = vcombine.low %v285_v3, %v292_v4  ;;  %v2581_v24 = vrot.slane %v3590_v61, 9  ;;  %v2582_v30 = vrot.slane %v3594_v63, 9  ;;  %v3282_v4 = vld [vmem:[%s4112_s3 + $0x48] sm:$0xff]  }
  0x1e   :  { %2974 = vmatpush3.bf16.msra.mxu1 %v3273_v42  ;;  %2977 = vmatprep.mubr.msk.bf16.mxu1 %vm3330_vm0, %v3328_v1  ;;  %v1076_v33 = vrot.slane %v2633_v6, %v3403_v16  ;;  %v1083_v34 = vrot.slane %v2634_v8, %v3403_v16  ;;  %v578_v9 = vrot.slane %v551_v10, 7  ;;  %v2583_v13 = vrot.slane %v3599_v14, 9  ;;  %v3280_v8 = vld [vmem:[%s4112_s3] sm:$0xff]  }
  0x1f   :  { %2975 = vmatprep.subr.bf16.mxu1 %v3328_v1  ;;  %v582_v11 = vrot.slane %v559_v19, 7  ;;  %v2584_v15 = vrot.slane %v3603_v18, 9  ;;  %v586_v35 = vrot.slane %v567_v20, 7  ;;  %v590_v36 = vrot.slane %v575_v25, 7  ;;  %v3283_v20 = vld [vmem:[%s4112_s3 + $0x8] sm:$0xff]  }
  0x20   :  { %v3650_v37 = vpack.c.bf16 %v293_v22, %v293_v22  ;;  %v1544_v38 = vcombine.low %v3441_v27, %v35_v28  ;;  %v1084_v42 = vcombine.low %v1076_v33, %v1083_v34  ;;  %v1545_v43 = vcombine.low %v3444_v29, %v39_v31  ;;  %v3279_v31 = vld [vmem:[%s4110_s2 + $0x38] sm:$0xff]   ;;  %v3285_v22 = vld [vmem:[%s4112_s3 + $0x50] sm:$0xff]  }
  0x21   :  { %v579_v45 = vsel %vm3458_vm8, %v2581_v24, %v578_v9  ;;  %v3666_v46 = vsel %vm3458_vm8, %v2582_v30, %v582_v11  ;;  %v587_v27 = vsel %vm3458_vm8, %v2583_v13, %v586_v35  ;;  %v3673_v28 = vsel %vm3458_vm8, %v2584_v15, %v590_v36  ;;  %v3286_v11 = vld [vmem:[%s4112_s3 + $0x58] sm:$0xff]   ;;  %v3284_v36 = vld [vmem:[%s4112_s3 + $0x10] sm:$0xff]  }
  0x22   :  { %2976 = vmatpush3.bf16.msra.mxu1 %v3274_v48  ;;  %v1552_v23 = vrot.slane %v1544_v38, %v3403_v16  ;;  %v1559_v26 = vrot.slane %v1545_v43, %v3403_v16  ;;  %v2757_v29 = vcombine.high %v3475_v52, %v3489_v57  ;;  %v2758_v48 = vcombine.high %v3479_v53, %v3508_v7  ;;  %v3281_v52 = vld [vmem:[%s4112_s3 + $0x40] sm:$0xff]   ;;  %v42_v53 = vld [vmem:[%s4113_s1 + $0x8] sm:$0xf]  ;;  %v43_v38 = vld [vmem:[%s4113_s1 + $0xc] sm:$0xf] }
  0x23   :  { %2906 = vmatmul.mubr.msk.bf16.vlgmr.msra.gmra.mrb[0].mxu0 %vm176_vm3, %v80_v56  ;;  %2981 = vmatprep.subr.bf16.mxu1 %v3328_v1  ;;  %v3686_v49 = vpack.c.bf16 %v1084_v42, %v1084_v42  ;;  %v592_v50 = vcombine.low %v579_v45, %v3666_v46  ;;  %v593_v56 = vcombine.low %v587_v27, %v3673_v28  ;;  %v3713_v2 = vmax.f32 %v42_v53, 0.0 }
  0x24   :  { %2910 = vmatpush3.bf16.msra.mxu0 %v3272_v60  ;;  %2913 = vmatprep.mubr.msk.bf16.mxu0 %vm3330_vm0, %v3328_v1  ;;  %v3693_v57 = vcombine.low %v1552_v23, %v1559_v26  ;;  %v2214_v7 = vrot.slane %v2757_v29, %v3403_v16  ;;  %v2221_v58 = vrot.slane %v2758_v48, %v3403_v16  ;;  %v3715_v3 = vmax.f32 %v46_v59, 0.0  ;;  %v3287_v48 = vld [vmem:[%s4112_s3 + $0x18] sm:$0xff]  }
  0x25   :  { %2911 = vmatprep.subr.bf16.mxu0 %v3328_v1  ;;  %v600_v62 = vrot.slane %v592_v50, %v3403_v16  ;;  %v607_v0 = vrot.slane %v593_v56, %v3403_v16  ;;  %v466_v6 = vcombine.low %v52_v54, %v3577_v55  ;;  %v2649_v40 = vcombine.high %v3590_v61, %v3594_v63 }
  0x26   :  { %v3706_v60 = vcombine.low %v2214_v7, %v2221_v58  ;;  %v3738_v19 = vrot.slane %v3715_v3, %v3403_v16  ;;  %v2650_v44 = vcombine.high %v3599_v14, %v3603_v18  ;;  %v51_v45 = vmax.f32 %v43_v38, 0.0 }
  0x27   :  { %v608_v10 = vcombine.low %v600_v62, %v607_v0  ;;  %v480_v54 = vrot.slane %v466_v6, %v3403_v16  ;;  %v1214_v24 = vrot.slane %v2649_v40, %v3403_v16  ;;  %v3289_v62 = vld [vmem:[%s4112_s3 + $0x60] sm:$0xff]  }
  0x28   :  { %2912 = vmatpush3.bf16.msra.mxu0 %v3275_v5  ;;  %v465_v5 = vcombine.low %v48_v47, %v3572_v51  ;;  %v769_v25 = vcombine.high %v3738_v19, %v3738_v19  ;;  %v1221_v30 = vrot.slane %v2650_v44, %v3403_v16  ;;  %v2600_v34 = vrot.slane %v3738_v19, 9 }
  0x29   :  { %2978 = vmatmul.mubr.msk.bf16.vlgmr.msra.gmra.mrb[0].mxu1 %vm176_vm3, %v3623_v12  ;;  %2917 = vmatprep.subr.bf16.mxu0 %v3328_v1  ;;  %v3755_v61 = vpack.c.bf16 %v608_v10, %v608_v10  ;;  %v1932_v26 = vrot.slane %v51_v45, %v3403_v16 }
  0x2a   :  { %2982 = vmatpush3.bf16.msra.mxu1 %v3277_v17  ;;  %2985 = vmatprep.mubr.msk.bf16.mxu1 %vm3330_vm0, %v3328_v1  ;;  %v3734_v17 = vrot.slane %v3713_v2, %v3403_v16  ;;  %v473_v47 = vrot.slane %v465_v5, %v3403_v16  ;;  %v776_v13 = vrot.slane %v769_v25, 7  ;;  %v1222_v15 = vcombine.low %v1214_v24, %v1221_v30 }
  0x2b   :  { %2983 = vmatprep.subr.bf16.mxu1 %v3328_v1  ;;  %v1933_v53 = vcombine.high %v1932_v26, %v1932_v26  ;;  %v2726_v58 = vrot.slane %v1932_v26, 9  ;;  %v674_v24 = vcombine.low %v3572_v51, %v3713_v2  ;;  %v675_v30 = vcombine.low %v3577_v55, %v3715_v3 }
  0x2c   :  { %v761_v14 = vcombine.high %v3734_v17, %v3734_v17  ;;  %v2599_v33 = vrot.slane %v3734_v17, 9  ;;  %v777_v43 = vsel %vm3458_vm8, %v2600_v34, %v776_v13  ;;  %v1224_v27 = vpack.c.bf16 %v1222_v15, %v1222_v15  ;;  %v3293_v15 = vld [vmem:[%s4112_s3 + $0x70] sm:$0xff]  }
  0x2d   :  { %v779_v50 = vcombine.low %v3673_v28, %v777_v43  ;;  %v1944_v5 = vrot.slane %v1933_v53, 7  ;;  %v682_v51 = vrot.slane %v674_v24, %v3403_v16  ;;  %v689_v55 = vrot.slane %v675_v30, %v3403_v16  ;;  %v3308_v53 = vld [vmem:[%s4110_s2 + $0xb0] sm:$0xff]   ;;  %v2609_v24 = vld [vmem:[%s4115_s5] ss:$0 sm:$0xff] }
  0x2e   :  { %2984 = vmatpush3.bf16.msra.mxu1 %v3278_v32  ;;  %v481_v32 = vcombine.low %v473_v47, %v480_v54  ;;  %v772_v9 = vrot.slane %v761_v14, 7  ;;  %v3290_v14 = vld [vmem:[%s4112_s3 + $0x68] sm:$0xff]  }
  0x2f   :  { %2914 = vmatmul.mubr.msk.bf16.vlgmr.msra.gmra.mrb[0].mxu0 %vm176_vm3, %v3650_v37  ;;  %2989 = vmatprep.subr.bf16.mxu1 %v3328_v1  ;;  %v793_v47 = vrot.slane %v779_v50, %v3403_v16  ;;  %v1945_v54 = vsel %vm3458_vm8, %v2726_v58, %v1944_v5  ;;  %v1666_v50 = vpack.c.bf16 %v3634_v21, %v3634_v21  ;;  %v3313_v58 = vld [vmem:[%s4112_s3 + $0xc0] sm:$0xff]  }
  0x30   :  { %2918 = vmatpush3.bf16.msra.mxu0 %v3276_v39  ;;  %2921 = vmatprep.mubr.msk.bf16.mxu0 %vm3330_vm0, %v3328_v1  ;;  %v483_v35 = vpack.c.bf16 %v481_v32, %v481_v32  ;;  %v47_v39 = vld [vmem:[%s4113_s1 + $0x1c] sm:$0xf]  ;;  %v773_v42 = vsel %vm3458_vm8, %v2599_v33, %v772_v9  ;;  %v3288_v32 = vld [vmem:[%s4112_s3 + $0x20] sm:$0xff]   ;;  %v1562_v21 = vpack.c.bf16 %v3693_v57, %v3693_v57 }
  0x31   :  { %2919 = vmatprep.subr.bf16.mxu0 %v3328_v1  ;;  %v55_v23 = vmax.f32 %v47_v39, 0.0  ;;  %v1950_v25 = vcombine.low %v773_v42, %v1945_v54  ;;  %v2224_v57 = vpack.c.bf16 %v3706_v60, %v3706_v60  ;;  %v3312_v60 = vld [vmem:[%s4112_s3 + $0x80] sm:$0xff]   ;;  %v3326_v54 = vld [vmem:[%s4112_s3 + $0xf8] sm:$0xff]  }
  0x32   :  { %v3321_v5 = vld [vmem:[%s4112_s3 + $0xe0] sm:$0xff]  }
  0x33   :  { %v1940_v29 = vrot.slane %v55_v23, %v3403_v16  ;;  %v1847_v56 = vcombine.low %v3715_v3, %v55_v23  ;;  %v1958_v33 = vrot.slane %v1950_v25, %v3403_v16  ;;  %v3301_v23 = vld [vmem:[%s4110_s2 + $0xc0] sm:$0xff]   ;;  %v3327_v25 = vld [vmem:[%s4112_s3 + $0xb8] sm:$0xff]  }
  0x34   :  { %2920 = vmatpush3.bf16.msra.mxu0 %v3279_v31  ;;  %v1846_v31 = vcombine.low %v3713_v2, %v51_v45  ;;  %v3291_v2 = vld [vmem:[%s4112_s3 + $0x28] sm:$0xff]   ;;  %v3297_v45 = vld [vmem:[%s4110_s2 + $0x90] sm:$0xff]  }
  0x35   :  { %2986 = vmatmul.mubr.msk.bf16.vlgmr.msra.gmra.mrb[0].mxu1 %vm176_vm3, %v3686_v49  ;;  %2925 = vmatprep.subr.bf16.mxu0 %v3328_v1  ;;  %v1941_v7 = vcombine.high %v1940_v29, %v1940_v29  ;;  %v2727_v59 = vrot.slane %v1940_v29, 9  ;;  %v2788_v28 = vcombine.high %v3738_v19, %v1940_v29  ;;  %v3300_v29 = vld [vmem:[%s4110_s2 + $0x80] sm:$0xff]  }
  0x36   :  { %2990 = vmatpush3.bf16.msra.mxu1 %v3281_v52  ;;  %2993 = vmatprep.mubr.msk.bf16.mxu1 %vm3330_vm0, %v3328_v1  ;;  %v778_v52 = vcombine.low %v3666_v46, %v773_v42  ;;  %v1854_v0 = vrot.slane %v1846_v31, %v3403_v16  ;;  %v2787_v46 = vcombine.high %v3734_v17, %v1932_v26  ;;  %v3296_v42 = vld [vmem:[%s4110_s2 + $0xd0] sm:$0xff]   ;;  %v3302_v26 = vld [vmem:[%s4110_s2 + $0xc8] sm:$0xff]   ;;  %v3305_v31 = vld [vmem:[%s4110_s2 + $0xe0] sm:$0xff]  }
  0x37   :  { %2991 = vmatprep.subr.bf16.mxu1 %v3328_v1  ;;  %v1948_v6 = vrot.slane %v1941_v7, 7  ;;  %v2475_v44 = vrot.slane %v2788_v28, %v3403_v16  ;;  %v3311_v7 = vld [vmem:[%s4110_s2 + $0xb8] sm:$0xff]  }
  0x38   :  { %v2468_v40 = vrot.slane %v2787_v46, %v3403_v16  ;;  %v3316_v46 = vld [vmem:[%s4112_s3 + $0x90] sm:$0xff]   ;;  %v3319_v28 = vld [vmem:[%s4112_s3 + $0x98] sm:$0xff]  }
  0x3a   :  { %2992 = vmatpush3.bf16.msra.mxu1 %v3282_v4  ;;  %v1861_v4 = vrot.slane %v1847_v56, %v3403_v16  ;;  %v3833_v41 = vcombine.low %v2468_v40, %v2475_v44  ;;  %v3309_v56 = vld [vmem:[%s4110_s2 + $0xf0] sm:$0xff]   ;;  %v3323_v40 = vld [vmem:[%s4112_s3 + $0xa8] sm:$0xff]  }
  0x3b   :  { %2922 = vmatmul.mubr.msk.bf16.vlgmr.msra.gmra.mrb[0].mxu0 %vm176_vm3, %v3623_v12  ;;  %2997 = vmatprep.subr.bf16.mxu1 %v3328_v1 }
  0x3c   :  { %2926 = vmatpush3.bf16.msra.mxu0 %v3280_v8  ;;  %2929 = vmatprep.mubr.msk.bf16.mxu0 %vm3330_vm0, %v3328_v1  ;;  %v786_v8 = vrot.slane %v778_v52, %v3403_v16  ;;  %v3812_v10 = vcombine.low %v1854_v0, %v1861_v4  ;;  %v3304_v52 = vld [vmem:[%s4110_s2 + $0xa0] sm:$0xff]   ;;  %v3317_v0 = vld [vmem:[%s4112_s3 + $0xd0] sm:$0xff]   ;;  %v3318_v4 = vld [vmem:[%s4112_s3 + $0xd8] sm:$0xff]  }
  0x3d   :  { %2927 = vmatprep.subr.bf16.mxu0 %v3328_v1 }
  0x3e   :  { %v794_v9 = vcombine.low %v786_v8, %v793_v47  ;;  %v3320_v8 = vld [vmem:[%s4112_s3 + $0xa0] sm:$0xff]   ;;  %v3325_v47 = vld [vmem:[%s4112_s3 + $0xf0] sm:$0xff]  }
  0x40   :  { %2928 = vmatpush3.bf16.msra.mxu0 %v3283_v20  ;;  %v1949_v20 = vsel %vm3458_vm8, %v2727_v59, %v1948_v6  ;;  %v3853_v3 = vpack.c.bf16 %v794_v9, %v794_v9  ;;  %v3314_v59 = vld [vmem:[%s4112_s3 + $0xc8] sm:$0xff]  }
  0x41   :  { %2994 = vmatmul.mubr.msk.bf16.vlgmr.msra.gmra.mrb[0].mxu1 %vm176_vm3, %v3755_v61  ;;  %2933 = vmatprep.subr.bf16.mxu0 %v3328_v1  ;;  %v3322_v6 = vld [vmem:[%s4112_s3 + $0xe8] sm:$0xff]  }
  0x42   :  { %2998 = vmatpush3.bf16.msra.mxu1 %v3285_v22  ;;  %3001 = vmatprep.mubr.msk.bf16.mxu1 %vm3330_vm0, %v3328_v1  ;;  %v1951_v22 = vcombine.low %v777_v43, %v1949_v20  ;;  %v3298_v43 = vld [vmem:[%s4110_s2 + $0xd8] sm:$0xff]   ;;  %v1864_v20 = vpack.c.bf16 %v3812_v10, %v3812_v10  ;;  %v2478_v10 = vpack.c.bf16 %v3833_v41, %v3833_v41 }
  0x43   :  { %2999 = vmatprep.subr.bf16.mxu1 %v3328_v1 }
  0x44   :  { %v1965_v34 = vrot.slane %v1951_v22, %v3403_v16  ;;  %v2608_v22 = vld [vmem:[%s4114_s4] ss:$0 sm:$0xff] }
  0x46   :  { %3000 = vmatpush3.bf16.msra.mxu1 %v3286_v11  ;;  %v3840_v13 = vcombine.low %v1958_v33, %v1965_v34  ;;  %v2666_v11 = vcombine.high %v3603_v18, %v3738_v19 }
  0x47   :  { %2930 = vmatmul.mubr.msk.bf16.vlgmr.msra.gmra.mrb[0].mxu0 %vm176_vm3, %v483_v35  ;;  %3005 = vmatprep.subr.bf16.mxu1 %v3328_v1  ;;  %v690_v35 = vcombine.low %v682_v51, %v689_v55 }
  0x48   :  { %2934 = vmatpush3.bf16.msra.mxu0 %v3284_v36  ;;  %2937 = vmatprep.mubr.msk.bf16.mxu0 %vm3330_vm0, %v3328_v1  ;;  %v1359_v38 = vrot.slane %v2666_v11, %v3403_v16  ;;  %v1968_v44 = vpack.c.bf16 %v3840_v13, %v3840_v13 }
  0x49   :  { %2935 = vmatprep.subr.bf16.mxu0 %v3328_v1  ;;  %v3872_v18 = vpack.c.bf16 %v690_v35, %v690_v35 }
  0x4c   :  { %2936 = vmatpush3.bf16.msra.mxu0 %v3287_v48  ;;  %v3306_v48 = vld [vmem:[%s4110_s2 + $0xe8] sm:$0xff]  }
  0x4d   :  { %3002 = vmatmul.mubr.msk.bf16.vlgmr.msra.gmra.mrb[0].mxu1 %vm176_vm3, %v1224_v27  ;;  %2941 = vmatprep.subr.bf16.mxu0 %v3328_v1  ;;  %v3299_v27 = vld [vmem:[%s4110_s2 + $0x98] sm:$0xff]  }
  0x4e   :  { %3006 = vmatpush3.bf16.msra.mxu1 %v3289_v62  ;;  %3009 = vmatprep.mubr.msk.bf16.mxu1 %vm3330_vm0, %v3328_v1  ;;  %v3315_v62 = vld [vmem:[%s4112_s3 + $0x88] sm:$0xff]  }
  0x4f   :  { %3007 = vmatprep.subr.bf16.mxu1 %v3328_v1 }
  0x52   :  { %3008 = vmatpush3.bf16.msra.mxu1 %v3290_v14  ;;  %v3324_v14 = vld [vmem:[%s4112_s3 + $0xb0] sm:$0xff]  }
  0x53   :  { %2938 = vmatmul.mubr.msk.bf16.vlgmr.msra.gmra.mrb[0].mxu0 %vm176_vm3, %v3755_v61  ;;  %3013 = vmatprep.subr.bf16.mxu1 %v3328_v1  ;;  %v2665_v61 = vcombine.high %v3594_v63, %v3734_v17  ;;  %v3294_v63 = vld [vmem:[%s4112_s3 + $0x78] sm:$0xff]   ;;  %v3292_v17 = vld [vmem:[%s4112_s3 + $0x30] sm:$0xff]  }
  0x54   :  { %2942 = vmatpush3.bf16.msra.mxu0 %v3288_v32  ;;  %2945 = vmatprep.mubr.msk.bf16.mxu0 %vm3330_vm0, %v3328_v1 }
  0x55   :  { %2943 = vmatprep.subr.bf16.mxu0 %v3328_v1  ;;  %v1352_v36 = vrot.slane %v2665_v61, %v3403_v16  ;;  %v3295_v16 = vld [vmem:[%s4112_s3 + $0x38] sm:$0xff]  }
  0x57   :  { %v1360_v19 = vcombine.low %v1352_v36, %v1359_v38 }
  0x58   :  { %2944 = vmatpush3.bf16.msra.mxu0 %v3291_v2 }
  0x59   :  { %3010 = vmatmul.mubr.msk.bf16.vlgmr.msra.gmra.mrb[0].mxu1 %vm176_vm3, %v3853_v3  ;;  %2949 = vmatprep.subr.bf16.mxu0 %v3328_v1  ;;  %v3887_v39 = vpack.c.bf16 %v1360_v19, %v1360_v19 }
  0x5a   :  { %3014 = vmatpush3.bf16.msra.mxu1 %v3293_v15  ;;  %3017 = vmatprep.mubr.msk.bf16.mxu1 %vm3330_vm0, %v3328_v1 }
  0x5b   :  { %3015 = vmatprep.subr.bf16.mxu1 %v3328_v1 }
  0x5e   :  { %3016 = vmatpush3.bf16.msra.mxu1 %v3294_v63 }
  0x5f   :  { %2946 = vmatmul.mubr.msk.bf16.vlgmr.msra.gmra.mrb[0].mxu0 %vm176_vm3, %v3872_v18  ;;  %3085 = vmatprep.subr.bf16.mxu1 %v3328_v1 }
  0x60   :  { %2950 = vmatpush3.bf16.msra.mxu0 %v3292_v17  ;;  %2953 = vmatprep.mubr.msk.bf16.mxu0 %vm3330_vm0, %v3328_v1 }
  0x61   :  { %2951 = vmatprep.subr.bf16.mxu0 %v3328_v1 }
  0x64   :  { %2952 = vmatpush3.bf16.msra.mxu0 %v3295_v16 }
  0x65   :  { %3018 = vmatmul.mubr.msk.bf16.vlgmr.msra.gmra.mrb[0].mxu1 %vm176_vm3, %v3887_v39  ;;  %3021 = vmatprep.subr.bf16.mxu0 %v3328_v1 }
  0x66   :  { %3086 = vmatpush3.bf16.msra.mxu1 %v3296_v42  ;;  %3089 = vmatprep.mubr.msk.bf16.mxu1 %vm3330_vm0, %v3328_v1 }
  0x67   :  { %3087 = vmatprep.subr.bf16.mxu1 %v3328_v1 }
  0x6a   :  { %3088 = vmatpush3.bf16.msra.mxu1 %v3298_v43 }
  0x6b   :  { %2954 = vmatmul.mubr.msk.bf16.vlgmr.msra.gmra.mrb[0].mxu0 %vm176_vm3, %v3853_v3  ;;  %3093 = vmatprep.subr.bf16.mxu1 %v3328_v1 }
  0x6c   :  { %3022 = vmatpush3.bf16.msra.mxu0 %v3297_v45  ;;  %3025 = vmatprep.mubr.msk.bf16.mxu0 %vm3330_vm0, %v3328_v1 }
  0x6d   :  { %3023 = vmatprep.subr.bf16.mxu0 %v3328_v1  ;;  %3090 = vmatmul.mubr.msk.bf16.vlgmr.msra.gmra.mrb[4].mxu1 %vm176_vm3, %v3686_v49  ;;  %v3303_v49 = vld [vmem:[%s4110_s2 + $0x88] sm:$0xff]  }
  0x6e   :  { %3094 = vmatpush3.bf16.msra.mxu1 %v3301_v23  ;;  %3097 = vmatprep.mubr.msk.bf16.mxu1 %vm3330_vm0, %v3328_v1 }
  0x6f   :  { %3095 = vmatprep.subr.bf16.mxu1 %v3328_v1 }
  0x70   :  { %3024 = vmatpush3.bf16.msra.mxu0 %v3299_v27 }
  0x71   :  { %3029 = vmatprep.subr.bf16.mxu0 %v3328_v1 }
  0x72   :  { %3096 = vmatpush3.bf16.msra.mxu1 %v3302_v26 }
  0x73   :  { %3026 = vmatmul.mubr.msk.bf16.vlgmr.msra.gmra.mrb[4].mxu0 %vm176_vm3, %v3623_v12  ;;  %3101 = vmatprep.subr.bf16.mxu1 %v3328_v1 }
  0x74   :  { %3030 = vmatpush3.bf16.msra.mxu0 %v3300_v29  ;;  %3033 = vmatprep.mubr.msk.bf16.mxu0 %vm3330_vm0, %v3328_v1 }
  0x75   :  { %3031 = vmatprep.subr.bf16.mxu0 %v3328_v1 }
  0x78   :  { %3032 = vmatpush3.bf16.msra.mxu0 %v3303_v49 }
  0x79   :  { %3098 = vmatmul.mubr.msk.bf16.vlgmr.msra.gmra.mrb[4].mxu1 %vm176_vm3, %v3623_v12  ;;  %3037 = vmatprep.subr.bf16.mxu0 %v3328_v1  ;;  %v3307_v12 = vld [vmem:[%s4110_s2 + $0xa8] sm:$0xff]  }
  0x7a   :  { %3102 = vmatpush3.bf16.msra.mxu1 %v3305_v31  ;;  %3105 = vmatprep.mubr.msk.bf16.mxu1 %vm3330_vm0, %v3328_v1 }
  0x7b   :  { %3103 = vmatprep.subr.bf16.mxu1 %v3328_v1 }
  0x7e   :  { %3104 = vmatpush3.bf16.msra.mxu1 %v3306_v48 }
  0x7f   :  { %3034 = vmatmul.mubr.msk.bf16.vlgmr.msra.gmra.mrb[4].mxu0 %vm176_vm3, %v3650_v37  ;;  %3109 = vmatprep.subr.bf16.mxu1 %v3328_v1  ;;  %v3310_v37 = vld [vmem:[%s4110_s2 + $0xf8] sm:$0xff]  }
  0x80   :  { %3038 = vmatpush3.bf16.msra.mxu0 %v3304_v52  ;;  %3041 = vmatprep.mubr.msk.bf16.mxu0 %vm3330_vm0, %v3328_v1 }
  0x81   :  { %3039 = vmatprep.subr.bf16.mxu0 %v3328_v1 }
  0x84   :  { %3040 = vmatpush3.bf16.msra.mxu0 %v3307_v12 }
  0x85   :  { %3106 = vmatmul.mubr.msk.bf16.vlgmr.msra.gmra.mrb[4].mxu1 %vm176_vm3, %v1666_v50  ;;  %3045 = vmatprep.subr.bf16.mxu0 %v3328_v1 }
  0x86   :  { %3110 = vmatpush3.bf16.msra.mxu1 %v3309_v56  ;;  %3113 = vmatprep.mubr.msk.bf16.mxu1 %vm3330_vm0, %v3328_v1 }
  0x87   :  { %3111 = vmatprep.subr.bf16.mxu1 %v3328_v1 }
  0x8a   :  { %3112 = vmatpush3.bf16.msra.mxu1 %v3310_v37 }
  0x8b   :  { %3042 = vmatmul.mubr.msk.bf16.vlgmr.msra.gmra.mrb[4].mxu0 %vm176_vm3, %v1562_v21  ;;  %3117 = vmatprep.subr.bf16.mxu1 %v3328_v1 }
  0x8c   :  { %3046 = vmatpush3.bf16.msra.mxu0 %v3308_v53  ;;  %3049 = vmatprep.mubr.msk.bf16.mxu0 %vm3330_vm0, %v3328_v1 }
  0x8d   :  { %3047 = vmatprep.subr.bf16.mxu0 %v3328_v1 }
  0x90   :  { %3048 = vmatpush3.bf16.msra.mxu0 %v3311_v7 }
  0x91   :  { %3114 = vmatmul.mubr.msk.bf16.vlgmr.msra.gmra.mrb[4].mxu1 %vm176_vm3, %v2224_v57  ;;  %3053 = vmatprep.subr.bf16.mxu0 %v3328_v1 }
  0x92   :  { %3118 = vmatpush3.bf16.msra.mxu1 %v3313_v58  ;;  %3121 = vmatprep.mubr.msk.bf16.mxu1 %vm3330_vm0, %v3328_v1 }
  0x93   :  { %3119 = vmatprep.subr.bf16.mxu1 %v3328_v1 }
  0x96   :  { %3120 = vmatpush3.bf16.msra.mxu1 %v3314_v59 }
  0x97   :  { %3050 = vmatmul.mubr.msk.bf16.vlgmr.msra.gmra.mrb[4].mxu0 %vm176_vm3, %v1666_v50  ;;  %3125 = vmatprep.subr.bf16.mxu1 %v3328_v1 }
  0x98   :  { %3054 = vmatpush3.bf16.msra.mxu0 %v3312_v60  ;;  %3057 = vmatprep.mubr.msk.bf16.mxu0 %vm3330_vm0, %v3328_v1 }
  0x99   :  { %3055 = vmatprep.subr.bf16.mxu0 %v3328_v1 }
  0x9c   :  { %3056 = vmatpush3.bf16.msra.mxu0 %v3315_v62 }
  0x9d   :  { %3122 = vmatmul.mubr.msk.bf16.vlgmr.msra.gmra.mrb[4].mxu1 %vm176_vm3, %v3853_v3  ;;  %3061 = vmatprep.subr.bf16.mxu0 %v3328_v1 }
  0x9e   :  { %3126 = vmatpush3.bf16.msra.mxu1 %v3317_v0  ;;  %3129 = vmatprep.mubr.msk.bf16.mxu1 %vm3330_vm0, %v3328_v1 }
  0x9f   :  { %3127 = vmatprep.subr.bf16.mxu1 %v3328_v1 }
  0xa2   :  { %3128 = vmatpush3.bf16.msra.mxu1 %v3318_v4 }
  0xa3   :  { %3058 = vmatmul.mubr.msk.bf16.vlgmr.msra.gmra.mrb[4].mxu0 %vm176_vm3, %v3872_v18  ;;  %3133 = vmatprep.subr.bf16.mxu1 %v3328_v1 }
  0xa4   :  { %3062 = vmatpush3.bf16.msra.mxu0 %v3316_v46  ;;  %3065 = vmatprep.mubr.msk.bf16.mxu0 %vm3330_vm0, %v3328_v1 }
  0xa5   :  { %3063 = vmatprep.subr.bf16.mxu0 %v3328_v1 }
  0xa8   :  { %3064 = vmatpush3.bf16.msra.mxu0 %v3319_v28 }
  0xa9   :  { %3130 = vmatmul.mubr.msk.bf16.vlgmr.msra.gmra.mrb[4].mxu1 %vm176_vm3, %v3887_v39  ;;  %3069 = vmatprep.subr.bf16.mxu0 %v3328_v1 }
  0xaa   :  { %3134 = vmatpush3.bf16.msra.mxu1 %v3321_v5  ;;  %3137 = vmatprep.mubr.msk.bf16.mxu1 %vm3330_vm0, %v3328_v1 }
  0xab   :  { %3135 = vmatprep.subr.bf16.mxu1 %v3328_v1 }
  0xae   :  { %3136 = vmatpush3.bf16.msra.mxu1 %v3322_v6 }
  0xaf   :  { %3066 = vmatmul.mubr.msk.bf16.vlgmr.msra.gmra.mrb[4].mxu0 %vm176_vm3, %v3853_v3  ;;  %3141 = vmatprep.subr.bf16.mxu1 %v3328_v1 }
  0xb0   :  { %3070 = vmatpush3.bf16.msra.mxu0 %v3320_v8  ;;  %3073 = vmatprep.mubr.msk.bf16.mxu0 %vm3330_vm0, %v3328_v1 }
  0xb1   :  { %3071 = vmatprep.subr.bf16.mxu0 %v3328_v1 }
  0xb4   :  { %3072 = vmatpush3.bf16.msra.mxu0 %v3323_v40 }
  0xb5   :  { %3138 = vmatmul.mubr.msk.bf16.vlgmr.msra.gmra.mrb[4].mxu1 %vm176_vm3, %v1968_v44  ;;  %3077 = vmatprep.subr.bf16.mxu0 %v3328_v1 }
  0xb6   :  { %3142 = vmatpush3.bf16.msra.mxu1 %v3325_v47  ;;  %3145 = vmatprep.mubr.msk.bf16.mxu1 %vm3330_vm0, %v3328_v1 }
  0xb7   :  { %3143 = vmatprep.subr.bf16.mxu1 %v3328_v1 }
  0xba   :  { %3144 = vmatpush3.bf16.msra.mxu1 %v3326_v54 }
  0xbb   :  { %3074 = vmatmul.mubr.msk.bf16.vlgmr.msra.gmra.mrb[4].mxu0 %vm176_vm3, %v1864_v20 }
  0xbc   :  { %3078 = vmatpush3.bf16.msra.mxu0 %v3324_v14  ;;  %3081 = vmatprep.mubr.msk.bf16.mxu0 %vm3330_vm0, %v3328_v1 }
  0xbd   :  { %3079 = vmatprep.subr.bf16.mxu0 %v3328_v1 }
  0xc0   :  { %3080 = vmatpush3.bf16.msra.mxu0 %v3327_v25 }
  0xc1   :  { %3146 = vmatmul.mubr.msk.bf16.vlgmr.msra.gmra.mrb[4].mxu1 %vm176_vm3, %v2478_v10 }
  0xc7   :  { %3082 = vmatmul.mubr.msk.bf16.vlgmr.msra.gmra.mrb[4].mxu0 %vm176_vm3, %v1968_v44 }
 0x138   :  { %v1417_v30 = vpop.f32.mrb[0].mxu1 }
 0x139   :  { %v1424_v32 = vmul.f32 %v2608_v22, %v1417_v30  ;;  %v3019_v33 = vpop.f32.mrb[1].mxu1 }
 0x13a   :  { %v1420_v1 = vpop.f32.mrb[2].mxu1 }
 0x13b   :  { %v1425_v34 = vadd.f32 %v2609_v24, %v1424_v32  ;;  %v3020_v41 = vpop.f32.mrb[3].mxu1 }
 0x13d   :  { %2674 = vst.msk [vmem:[%s4116_s6 + $0x8] sm:$0xff] %vm872_vm9, %v1425_v34 }
 0x13e   :  { %v851_v9 = vpop.f32.mrb[0].mxu0 }
 0x13f   :  { %v864_v13 = vmul.f32 %v2608_v22, %v851_v9  ;;  %v2955_v51 = vpop.f32.mrb[1].mxu0 }
 0x140   :  { %v854_v55 = vpop.f32.mrb[2].mxu0 }
 0x141   :  { %v871_v2 = vadd.f32 %v2609_v24, %v864_v13  ;;  %v2956_v3 = vpop.f32.mrb[3].mxu0 }
 0x143   :  { %873 = vst.msk [vmem:[%s4116_s6] sm:$0xff] %vm872_vm9, %v871_v2 }
 0x194   :  { %v2533_v61 = vpop.f32.mrb[4].mxu1 }
 0x195   :  { %v2540_v11 = vmul.f32 %v2608_v22, %v2533_v61  ;;  %v3147_v15 = vpop.f32.mrb[5].mxu1 }
 0x196   :  { %v2536_v35 = vpop.f32.mrb[6].mxu1 }
 0x197   :  { %v2541_v36 = vadd.f32 %v2609_v24, %v2540_v11  ;;  %v3148_v38 = vpop.f32.mrb[7].mxu1 }
 0x199   :  { %2796 = vst.msk [vmem:[%s4116_s6 + $0x18] sm:$0xff] %vm872_vm9, %v2541_v36 }
 0x19a   :  { %v2023_v63 = vpop.f32.mrb[4].mxu0 }
 0x19b   :  { %v2030_v18 = vmul.f32 %v2608_v22, %v2023_v63  ;;  %v3083_v17 = vpop.f32.mrb[5].mxu0 }
 0x19c   :  { %v2026_v19 = vpop.f32.mrb[6].mxu0 }
 0x19d   :  { %v2031_v16 = vadd.f32 %v2609_v24, %v2030_v18  ;;  %v3084_v39 = vpop.f32.mrb[7].mxu0 }
 0x19f   :  { %2735 = vst.msk [vmem:[%s4116_s6 + $0x10] sm:$0xff] %vm872_vm9, %v2031_v16 }

// kernel: generator_forward.14
= control target key start
LH: loop header
LB: loop body
LE: loop exit
PB: predicated region body
PF: predicated region fallthrough
CT: control target
= control target key end

     0   :  { %vm102_vm0 = vcmask 1042432   ;;  %vm103_vm1 = vcmask 1046532   ;;  %vm840_vm2 = vcmask 1041408   ;;  %vm841_vm3 = vcmask 1045508   ;;  %s4207_s2 = inlined_call_operand.vmem [shape: bf16[16,16,8], index: 2, kind: input, shape index: {}]   ;;  %s4208_s0 = inlined_call_operand.vmem [shape: f32[2,6,6,16], index: 0, kind: input, shape index: {}]   ;;  %s4209_s3 = inlined_call_operand.vmem [shape: bf16[16,16,8], index: 3, kind: input, shape index: {}]   ;;  %s4210_s1 = inlined_call_operand.vmem [shape: f32[2,6,6,16], index: 1, kind: input, shape index: {}]   ;;  %s4211_s4 = inlined_call_operand.vmem [shape: f32[1,8], index: 4, kind: input, shape index: {}]   ;;  %s4212_s5 = inlined_call_operand.vmem [shape: f32[1,8], index: 5, kind: input, shape index: {}]   ;;  %s4213_s6 = inlined_call_operand.vmem [shape: f32[4,32,8], index: 6, kind: output, shape index: {}]  }
   0x1   :  { %v3221_v0 = vld [vmem:[%s4207_s2 + $0x8] sm:$0xff]   ;;  %v24_v2 = vld [vmem:[%s4208_s0] sm:$0x3f]  ;;  %v26_v4 = vld [vmem:[%s4208_s0 + $0x10] sm:$0x3f]  ;;  %vm156_vm5 = vcmask 130048  }
   0x2   :  { %v3222_v1 = vld [vmem:[%s4207_s2 + $0x28] sm:$0xff]   ;;  %2917 = vmatprep.subr.bf16.mxu0 %v3221_v0  ;;  %v27_v5 = vld [vmem:[%s4208_s0 + $0x18] sm:$0x3f]  ;;  %v28_v6 = vld [vmem:[%s4208_s0 + $0x20] sm:$0x3f]  ;;  %v3312_v8 = vmax.f32 %v24_v2, 0.0 }
   0x3   :  { %v25_v3 = vld [vmem:[%s4208_s0 + $0x8] sm:$0x3f]  ;;  %2965 = vmatprep.subr.bf16.mxu1 %v3222_v1  ;;  %2918 = vmatpush3.bf16.msra.mxu0 %v3221_v0  ;;  %v3316_v10 = vmax.f32 %v26_v4, 0.0  ;;  %v3318_v11 = vmax.f32 %v27_v5, 0.0  ;;  %v3320_v12 = vmax.f32 %v28_v6, 0.0  ;;  %v3327_v14 = vld [vmem:[%s4207_s2] sm:$0xff]   ;;  %vm3344_vm4 = vmor %vm102_vm0, %vm103_vm1 }
   0x4   :  { %v29_v7 = vld [vmem:[%s4208_s0 + $0x28] sm:$0x3f]  ;;  %2966 = vmatpush3.bf16.msra.mxu1 %v3222_v1  ;;  %v3314_v9 = vmax.f32 %v25_v3, 0.0  ;;  %v94_v15 = vcombine.high %v3312_v8, %v3312_v8  ;;  %v3340_v19 = vld [vmem:[%s4207_s2 + $0x20] sm:$0xff]   ;;  %v2603_v21 = vrot.slane %v3312_v8, 9  ;;  %2923 = vmatprep.subr.bf16.mxu0 %v3327_v14  ;;  %vm3379_vm6 = vmor %vm840_vm2, %vm841_vm3  ;;  %v2663_v42 = vrot.slane %v3312_v8, 10 }
   0x5   :  { %v3322_v13 = vmax.f32 %v29_v7, 0.0  ;;  %v96_v17 = vcombine.high %v3316_v10, %v3316_v10  ;;  %v97_v18 = vcombine.high %v3318_v11, %v3318_v11  ;;  %v2605_v23 = vrot.slane %v3316_v10, 9  ;;  %2971 = vmatprep.subr.bf16.mxu1 %v3340_v19  ;;  %v30_v48 = vld [vmem:[%s4208_s0 + $0x30] sm:$0x3f]  ;;  %v31_v53 = vld [vmem:[%s4208_s0 + $0x38] sm:$0x3f] }
   0x6   :  { %v95_v16 = vcombine.high %v3314_v9, %v3314_v9  ;;  %v2604_v22 = vrot.slane %v3314_v9, 9  ;;  %v2606_v24 = vrot.slane %v3318_v11, 9  ;;  %v107_v25 = vrot.slane %v94_v15, 5  ;;  %v32_v54 = vld [vmem:[%s4208_s0 + $0x40] sm:$0x3f]  ;;  %v3233_v20 = vld [vmem:[%s4209_s3 + $0x10] sm:$0xff]  }
   0x7   :  { %v115_v27 = vrot.slane %v96_v17, 5  ;;  %v119_v28 = vrot.slane %v97_v18, 5  ;;  %v353_v29 = vcombine.high %v3320_v12, %v3320_v12  ;;  %v2624_v30 = vrot.slane %v3320_v12, 9  ;;  %v33_v55 = vld [vmem:[%s4208_s0 + $0x48] sm:$0x3f] }
   0x8   :  { %v111_v26 = vrot.slane %v95_v16, 5  ;;  %v1677_v31 = vcombine.high %v3322_v13, %v3322_v13  ;;  %v2740_v32 = vrot.slane %v3322_v13, 9  ;;  %v108_v33 = vsel %vm3344_vm4, %v2603_v21, %v107_v25  ;;  %v34_v60 = vld [vmem:[%s4208_s0 + $0x50] sm:$0x3f]  ;;  %v35_v1 = vld [vmem:[%s4208_s0 + $0x58] sm:$0x3f] }
   0x9   :  { %v3368_v35 = vsel %vm3344_vm4, %v2605_v23, %v115_v27  ;;  %v3372_v36 = vsel %vm3344_vm4, %v2606_v24, %v119_v28  ;;  %v357_v39 = vrot.slane %v353_v29, 5  ;;  %v845_v43 = vrot.slane %v94_v15, 6 }
   0xa   :  { %v3364_v34 = vsel %vm3344_vm4, %v2604_v22, %v111_v26  ;;  %v138_v38 = vcombine.low %v3368_v35, %v3372_v36  ;;  %v1681_v41 = vrot.slane %v1677_v31, 5  ;;  %v2664_v44 = vrot.slane %v3314_v9, 10 }
   0xb   :  { %v137_v37 = vcombine.low %v108_v33, %v3364_v34  ;;  %v849_v46 = vrot.slane %v95_v16, 6  ;;  %v2665_v47 = vrot.slane %v3316_v10, 10  ;;  %v3393_v49 = vsel %vm3344_vm4, %v2624_v30, %v357_v39 }
   0xc   :  { %v1682_v50 = vsel %vm3344_vm4, %v2740_v32, %v1681_v41  ;;  %v846_v51 = vsel %vm3379_vm6, %v2663_v42, %v845_v43  ;;  %v853_v52 = vrot.slane %v96_v17, 6  ;;  %v2666_v58 = vrot.slane %v3318_v11, 10 }
   0xd   :  { %v3385_v45 = vpack.c.bf16 %v138_v38, %v137_v37  ;;  %v1687_v56 = vcombine.low %v3393_v49, %v1682_v50  ;;  %v3413_v57 = vsel %vm3379_vm6, %v2664_v44, %v849_v46  ;;  %v857_v59 = vrot.slane %v97_v18, 6 }
   0xe   :  { %v3421_v61 = vsel %vm3379_vm6, %v2665_v47, %v853_v52  ;;  %v875_v62 = vcombine.low %v846_v51, %v3413_v57  ;;  %v2684_v63 = vrot.slane %v3320_v12, 10  ;;  %v1068_v0 = vrot.slane %v353_v29, 6 }
   0xf   :  { %2919 = vmatprep.mubr.msk.bf16.mxu0 %vm156_vm5, %v3385_v45  ;;  %v3428_v2 = vpack.c.bf16 %v1687_v56, %v138_v38  ;;  %v3432_v3 = vsel %vm3379_vm6, %v2666_v58, %v857_v59  ;;  %v2788_v4 = vrot.slane %v3322_v13, 10  ;;  %v2238_v6 = vrot.slane %v1677_v31, 6 }
  0x10   :  { %v876_v5 = vcombine.low %v3421_v61, %v3432_v3  ;;  %v3437_v7 = vmax.f32 %v30_v48, 0.0  ;;  %v3441_v15 = vsel %vm3379_vm6, %v2684_v63, %v1068_v0  ;;  %v3443_v16 = vmax.f32 %v31_v53, 0.0 }
  0x11   :  { %4220 = vst [vmem:[#allocation2_spill] sm:$0xff] %v3428_v2  ;;  %v3445_v17 = vmax.f32 %v32_v54, 0.0  ;;  %v3447_v18 = vmax.f32 %v33_v55, 0.0  ;;  %v2239_v22 = vsel %vm3379_vm6, %v2788_v4, %v2238_v6  ;;  %v3451_v23 = vmax.f32 %v34_v60, 0.0 }
  0x12   :  { %v883_v21 = vpack.c.bf16 %v876_v5, %v875_v62  ;;  %v3453_v24 = vmax.f32 %v35_v1, 0.0  ;;  %v2244_v25 = vcombine.low %v3441_v15, %v2239_v22  ;;  %v98_v26 = vcombine.high %v3437_v7, %v3437_v7 }
  0x13   :  { %v99_v27 = vcombine.high %v3443_v16, %v3443_v16  ;;  %v100_v28 = vcombine.high %v3445_v17, %v3445_v17  ;;  %v101_v29 = vcombine.high %v3447_v18, %v3447_v18  ;;  %v2607_v30 = vrot.slane %v3437_v7, 9 }
  0x14   :  { %2967 = vmatprep.mubr.msk.bf16.mxu1 %vm156_vm5, %v883_v21  ;;  %v2608_v31 = vrot.slane %v3443_v16, 9  ;;  %v2609_v32 = vrot.slane %v3445_v17, 9  ;;  %v3468_v33 = vpack.c.bf16 %v2244_v25, %v876_v5  ;;  %v123_v37 = vrot.slane %v98_v26, 5  ;;  %v3225_v5 = vld [vmem:[%s4207_s2 + $0x10] sm:$0xff]  }
  0x15   :  { %v127_v38 = vrot.slane %v99_v27, 5  ;;  %v131_v39 = vrot.slane %v100_v28, 5  ;;  %v2610_v41 = vrot.slane %v3447_v18, 9  ;;  %v135_v42 = vrot.slane %v101_v29, 5 }
  0x16   :  { %4221 = vst [vmem:[#allocation3_spill] sm:$0xff] %v3468_v33  ;;  %v354_v43 = vcombine.high %v3451_v23, %v3451_v23  ;;  %v2625_v44 = vrot.slane %v3451_v23, 9  ;;  %v124_v46 = vsel %vm3344_vm4, %v2607_v30, %v123_v37  ;;  %v1678_v50 = vcombine.high %v3453_v24, %v3453_v24 }
  0x17   :  { %v3478_v47 = vsel %vm3344_vm4, %v2608_v31, %v127_v38  ;;  %v3482_v48 = vsel %vm3344_vm4, %v2609_v32, %v131_v39  ;;  %v3488_v51 = vsel %vm3344_vm4, %v2610_v41, %v135_v42  ;;  %v2741_v55 = vrot.slane %v3453_v24, 9 }
  0x18   :  { %v139_v52 = vcombine.low %v124_v46, %v3478_v47  ;;  %v361_v53 = vrot.slane %v354_v43, 5  ;;  %v140_v54 = vcombine.low %v3482_v48, %v3488_v51  ;;  %v1685_v56 = vrot.slane %v1678_v50, 5 }
  0x19   :  { %v2667_v58 = vrot.slane %v3437_v7, 10  ;;  %v861_v59 = vrot.slane %v98_v26, 6  ;;  %v2668_v60 = vrot.slane %v3443_v16, 10  ;;  %v865_v62 = vrot.slane %v99_v27, 6 }
  0x1a   :  { %v3496_v63 = vpack.c.bf16 %v140_v54, %v139_v52  ;;  %v3500_v0 = vsel %vm3344_vm4, %v2625_v44, %v361_v53  ;;  %v1686_v1 = vsel %vm3344_vm4, %v2741_v55, %v1685_v56  ;;  %v2669_v4 = vrot.slane %v3445_v17, 10  ;;  %v3226_v44 = vld [vmem:[%s4207_s2 + $0x30] sm:$0xff]  }
  0x1b   :  { %v1688_v6 = vcombine.low %v3500_v0, %v1686_v1  ;;  %v862_v21 = vsel %vm3379_vm6, %v2667_v58, %v861_v59  ;;  %v3513_v22 = vsel %vm3379_vm6, %v2668_v60, %v865_v62  ;;  %v869_v25 = vrot.slane %v100_v28, 6  ;;  %v51_v59 = vld [vmem:[%s4210_s1 + $0x18] sm:$0x3f] }
  0x1c   :  { %2920 = vmatmul.mubr.msk.bf16.vlgmr.msra.gmra.mrb[0].mxu0 %vm156_vm5, %v3496_v63  ;;  %v2670_v26 = vrot.slane %v3447_v18, 10  ;;  %v873_v27 = vrot.slane %v101_v29, 6  ;;  %v877_v30 = vcombine.low %v862_v21, %v3513_v22  ;;  %v2685_v31 = vrot.slane %v3451_v23, 10 }
  0x1d   :  { %v3520_v32 = vpack.c.bf16 %v1688_v6, %v140_v54  ;;  %2924 = vmatpush3.bf16.msra.mxu0 %v3327_v14  ;;  %v3525_v37 = vsel %vm3379_vm6, %v2669_v4, %v869_v25  ;;  %v1072_v38 = vrot.slane %v354_v43, 6  ;;  %v2789_v28 = vrot.slane %v3453_v24, 10  ;;  %v56_v25 = vld [vmem:[%s4210_s1 + $0x40] sm:$0x3f] }
  0x1e   :  { %v3530_v39 = vsel %vm3379_vm6, %v2670_v26, %v873_v27  ;;  %v2242_v29 = vrot.slane %v1678_v50, 6  ;;  %v82_v41 = vcombine.low %v3312_v8, %v3314_v9  ;;  %2929 = vmatprep.subr.bf16.mxu0 %v3225_v5  ;;  %v3542_v43 = vcombine.low %v3316_v10, %v3318_v11  ;;  %v54_v27 = vld [vmem:[%s4210_s1 + $0x30] sm:$0x3f] }
  0x1f   :  { %4222 = vst [vmem:[#allocation4_spill] sm:$0xff] %v3520_v32  ;;  %v878_v42 = vcombine.low %v3525_v37, %v3530_v39  ;;  %v3538_v14 = vsel %vm3379_vm6, %v2685_v31, %v1072_v38  ;;  %v84_v8 = vcombine.low %v3437_v7, %v3443_v16  ;;  %v3553_v50 = vcombine.low %v3445_v17, %v3447_v18 }
  0x20   :  { %v2243_v46 = vsel %vm3379_vm6, %v2789_v28, %v2242_v29  ;;  %v275_v52 = vcombine.low %v3314_v9, %v3316_v10  ;;  %v90_v55 = vpack.c.bf16 %v3542_v43, %v82_v41  ;;  %v276_v56 = vcombine.low %v3318_v11, %v3320_v12  ;;  %v3227_v10 = vld [vmem:[%s4207_s2 + $0x18] sm:$0xff]   ;;  %v48_v11 = vld [vmem:[%s4210_s1] sm:$0x3f] }
  0x21   :  { %v884_v53 = vpack.c.bf16 %v878_v42, %v877_v30  ;;  %v2245_v54 = vcombine.low %v3538_v14, %v2243_v46  ;;  %v91_v9 = vpack.c.bf16 %v3553_v50, %v84_v8  ;;  %v363_v60 = vcombine.low %v3364_v34, %v3368_v35  ;;  %v55_v29 = vld [vmem:[%s4210_s1 + $0x38] sm:$0x3f] }
  0x22   :  { %2925 = vmatprep.mubr.msk.bf16.mxu0 %vm156_vm5, %v90_v55  ;;  %v3572_v7 = vpack.c.bf16 %v276_v56, %v275_v52  ;;  %v364_v62 = vcombine.low %v3372_v36, %v3393_v49  ;;  %v3591_v1 = vmax.f32 %v48_v11, 0.0  ;;  %v3599_v21 = vmax.f32 %v51_v59, 0.0  ;;  %v52_v59 = vld [vmem:[%s4210_s1 + $0x20] sm:$0x3f] }
  0x23   :  { %2968 = vmatmul.mubr.msk.bf16.vlgmr.msra.gmra.mrb[0].mxu1 %vm156_vm5, %v884_v53  ;;  %v3562_v58 = vpack.c.bf16 %v2245_v54, %v878_v42  ;;  %v277_v34 = vcombine.low %v3443_v16, %v3445_v17  ;;  %v278_v35 = vcombine.low %v3447_v18, %v3451_v23  ;;  %v57_v16 = vld [vmem:[%s4210_s1 + $0x48] sm:$0x3f]  ;;  %v3624_v17 = vld [vmem:[%s4207_s2 + $0x38] sm:$0xff]   ;;  %v365_v30 = vcombine.low %v3478_v47, %v3482_v48  ;;  %v3672_v54 = vld [vmem:[%s4209_s3] sm:$0xff]  }
  0x24   :  { %2972 = vmatpush3.bf16.msra.mxu1 %v3340_v19  ;;  %2973 = vmatprep.mubr.msk.bf16.mxu1 %vm156_vm5, %v3385_v45  ;;  %v49_v19 = vld [vmem:[%s4210_s1 + $0x8] sm:$0x3f]  ;;  %v50_v45 = vld [vmem:[%s4210_s1 + $0x10] sm:$0x3f]  ;;  %v3605_v36 = vpack.c.bf16 %v364_v62, %v363_v60  ;;  %v3609_v49 = vcombine.high %v3591_v1, %v3591_v1  ;;  %v3632_v26 = vcombine.high %v3599_v21, %v3599_v21  ;;  %v2634_v28 = vrot.slane %v3591_v1, 9 }
  0x25   :  { %4223 = vst [vmem:[#allocation5_spill] sm:$0xff] %v3562_v58  ;;  %2977 = vmatprep.subr.bf16.mxu1 %v3226_v44  ;;  %v3593_v4 = vmax.f32 %v49_v19, 0.0  ;;  %v3597_v6 = vmax.f32 %v50_v45, 0.0  ;;  %v366_v31 = vcombine.low %v3488_v51, %v3500_v0  ;;  %v3643_v38 = vpack.c.bf16 %v278_v35, %v277_v34 }
  0x26   :  { %v3649_v41 = vmax.f32 %v56_v25, 0.0  ;;  %v3651_v42 = vmax.f32 %v57_v16, 0.0  ;;  %v536_v47 = vrot.slane %v3609_v49, 5  ;;  %v2637_v8 = vrot.slane %v3599_v21, 9 }
  0x27   :  { %v3628_v18 = vcombine.high %v3597_v6, %v3597_v6  ;;  %v2635_v48 = vrot.slane %v3593_v4, 9  ;;  %v2636_v0 = vrot.slane %v3597_v6, 9  ;;  %v1074_v52 = vcombine.low %v3413_v57, %v3421_v61 }
  0x28   :  { %2926 = vmatmul.mubr.msk.bf16.vlgmr.msra.gmra.mrb[0].mxu0 %vm156_vm5, %v91_v9  ;;  %v1075_v53 = vcombine.low %v3432_v3, %v3441_v15  ;;  %v3674_v55 = vmax.f32 %v55_v29, 0.0  ;;  %v1076_v56 = vcombine.low %v3513_v22, %v3525_v37  ;;  %v3680_v9 = vcombine.high %v3649_v41, %v3649_v41 }
  0x29   :  { %2930 = vmatpush3.bf16.msra.mxu0 %v3225_v5  ;;  %2931 = vmatprep.mubr.msk.bf16.mxu0 %vm156_vm5, %v3572_v7  ;;  %v3613_v5 = vcombine.high %v3593_v4, %v3593_v4  ;;  %v544_v46 = vrot.slane %v3628_v18, 5  ;;  %v3684_v57 = vcombine.high %v3651_v42, %v3651_v42  ;;  %v1077_v61 = vcombine.low %v3530_v39, %v3538_v14 }
  0x2a   :  { %2935 = vmatprep.subr.bf16.mxu0 %v3227_v10  ;;  %v3690_v3 = vpack.c.bf16 %v366_v31, %v365_v30  ;;  %v537_v15 = vsel %vm3344_vm4, %v2634_v28, %v536_v47  ;;  %v3713_v11 = vpack.c.bf16 %v1075_v53, %v1074_v52  ;;  %v3719_v19 = vcombine.low %v3597_v6, %v3599_v21  ;;  %v58_v31 = vld [vmem:[%s4210_s1 + $0x50] sm:$0x3f]  ;;  %v3749_v28 = vld [vmem:[%s4209_s3 + $0x20] sm:$0xff]  }
  0x2b   :  { %v540_v51 = vrot.slane %v3613_v5, 5  ;;  %v3702_v37 = vsel %vm3344_vm4, %v2636_v0, %v544_v46  ;;  %v3723_v45 = vcombine.high %v3674_v55, %v3674_v55  ;;  %v2640_v60 = vrot.slane %v3649_v41, 9 }
  0x2c   :  { %v560_v62 = vrot.slane %v3680_v9, 5  ;;  %v2641_v34 = vrot.slane %v3651_v42, 9  ;;  %v564_v35 = vrot.slane %v3684_v57, 5  ;;  %v3741_v30 = vcombine.low %v3649_v41, %v3651_v42 }
  0x2d   :  { %v3696_v22 = vsel %vm3344_vm4, %v2635_v48, %v540_v51  ;;  %v2639_v48 = vrot.slane %v3674_v55, 9  ;;  %v3754_v51 = vmax.f32 %v52_v59, 0.0  ;;  %v556_v0 = vrot.slane %v3723_v45, 5 }
  0x2e   :  { %v566_v25 = vcombine.low %v537_v15, %v3696_v22  ;;  %v2696_v46 = vrot.slane %v3591_v1, 10  ;;  %v3764_v52 = vsel %vm3344_vm4, %v2640_v60, %v560_v62  ;;  %v3768_v53 = vsel %vm3344_vm4, %v2641_v34, %v564_v35 }
  0x2f   :  { %2974 = vmatmul.mubr.msk.bf16.vlgmr.msra.gmra.mrb[0].mxu1 %vm156_vm5, %v3496_v63  ;;  %v3658_v63 = vmax.f32 %v54_v27, 0.0  ;;  %v1220_v15 = vrot.slane %v3613_v5, 6  ;;  %v3771_v59 = vmax.f32 %v58_v31, 0.0  ;;  %v1224_v60 = vrot.slane %v3628_v18, 6  ;;  %v3796_v18 = vld [vmem:[%s4209_s3 + $0x8] sm:$0xff]  }
  0x30   :  { %2978 = vmatpush3.bf16.msra.mxu1 %v3226_v44  ;;  %2979 = vmatprep.mubr.msk.bf16.mxu1 %vm156_vm5, %v3605_v36  ;;  %v548_v44 = vrot.slane %v3632_v26, 5  ;;  %v3808_v35 = vcombine.low %v3764_v52, %v3768_v53  ;;  %vm832_vm7 = vcmask 64512  }
  0x31   :  { %2983 = vmatprep.subr.bf16.mxu1 %v3624_v17  ;;  %v3710_v14 = vcombine.high %v3658_v63, %v3658_v63  ;;  %v451_v27 = vcombine.low %v3658_v63, %v3674_v55  ;;  %v2638_v29 = vrot.slane %v3658_v63, 9 }
  0x32   :  { %v3706_v39 = vsel %vm3344_vm4, %v2637_v8, %v548_v44  ;;  %v1216_v8 = vrot.slane %v3609_v49, 6  ;;  %v2697_v44 = vrot.slane %v3593_v4, 10  ;;  %v2698_v49 = vrot.slane %v3597_v6, 10 }
  0x33   :  { %v3735_v16 = vcombine.low %v3702_v37, %v3706_v39  ;;  %v552_v47 = vrot.slane %v3710_v14, 5  ;;  %v3786_v5 = vpack.c.bf16 %v3741_v30, %v451_v27  ;;  %v59_v27 = vld [vmem:[%s4210_s1 + $0x58] sm:$0x3f] }
  0x34   :  { %2932 = vmatmul.mubr.msk.bf16.vlgmr.msra.gmra.mrb[0].mxu0 %vm156_vm5, %v3643_v38  ;;  %v3819_v31 = vsel %vm3379_vm6, %v2697_v44, %v1220_v15  ;;  %v2653_v15 = vrot.slane %v3771_v59, 9 }
  0x35   :  { %2936 = vmatpush3.bf16.msra.mxu0 %v3227_v10  ;;  %2937 = vmatprep.mubr.msk.bf16.mxu0 %vm156_vm5, %v3605_v36  ;;  %v449_v10 = vcombine.low %v3591_v1, %v3593_v4  ;;  %v3776_v1 = vpack.c.bf16 %v1077_v61, %v1076_v56  ;;  %v3783_v34 = vpack.c.bf16 %v3735_v16, %v566_v25  ;;  %v53_v56 = vld [vmem:[%s4210_s1 + $0x28] sm:$0x3f] }
  0x36   :  { %2941 = vmatprep.subr.bf16.mxu0 %v3672_v54  ;;  %v3800_v61 = vsel %vm3344_vm4, %v2638_v29, %v552_v47  ;;  %v3812_v25 = vsel %vm3379_vm6, %v2696_v46, %v1216_v8  ;;  %v3823_v29 = vcombine.high %v3771_v59, %v3771_v59  ;;  %v1603_v47 = vcombine.low %v3320_v12, %v3322_v13 }
  0x37   :  { %v457_v62 = vpack.c.bf16 %v3719_v19, %v449_v10  ;;  %v3804_v10 = vsel %vm3344_vm4, %v2639_v48, %v556_v0  ;;  %v1604_v48 = vcombine.low %v3451_v23, %v3453_v24  ;;  %v3833_v0 = vsel %vm3379_vm6, %v2698_v49, %v1224_v60 }
  0x38   :  { %v2699_v46 = vrot.slane %v3599_v21, 10  ;;  %v1228_v8 = vrot.slane %v3632_v26, 6  ;;  %v65_v44 = vmax.f32 %v53_v56, 0.0  ;;  %v2652_v12 = vrot.slane %v3754_v51, 9 }
  0x39   :  { %v3841_v23 = vpack.c.bf16 %v1603_v47, %v3542_v43  ;;  %v71_v24 = vmax.f32 %v59_v27, 0.0  ;;  %v3846_v49 = vpack.c.bf16 %v1604_v48, %v3553_v50  ;;  %v3232_v50 = vld [vmem:[%s4209_s3 + $0x28] sm:$0xff]   ;;  %v2714_v48 = vrot.slane %v3754_v51, 10 }
  0x3a   :  { %v1887_v26 = vcombine.low %v3754_v51, %v65_v44  ;;  %v1961_v60 = vcombine.high %v65_v44, %v65_v44  ;;  %v3853_v43 = vsel %vm3379_vm6, %v2699_v46, %v1228_v8  ;;  %v1240_v46 = vrot.slane %v3680_v9, 6 }
  0x3b   :  { %2980 = vmatmul.mubr.msk.bf16.vlgmr.msra.gmra.mrb[0].mxu1 %vm156_vm5, %v3690_v3  ;;  %4224 = vst [vmem:[#allocation6_spill] sm:$0xff] %v3841_v23  ;;  %4225 = vst [vmem:[#allocation7_spill] sm:$0xff] %v3846_v49  ;;  %v1888_v56 = vcombine.low %v3771_v59, %v71_v24  ;;  %v1962_v58 = vcombine.high %v71_v24, %v71_v24  ;;  %v2763_v33 = vrot.slane %v71_v24, 9  ;;  %v2702_v23 = vrot.slane %v3649_v41, 10 }
  0x3c   :  { %2984 = vmatpush3.bf16.msra.mxu1 %v3624_v17  ;;  %2985 = vmatprep.mubr.msk.bf16.mxu1 %vm156_vm5, %v3713_v11  ;;  %v724_v17 = vcombine.high %v3754_v51, %v3754_v51  ;;  %v3856_v27 = vpack.c.bf16 %v1887_v26, %v3719_v19  ;;  %v1965_v47 = vrot.slane %v1961_v60, 5 }
  0x3d   :  { %2989 = vmatprep.subr.bf16.mxu1 %v3749_v28  ;;  %v3863_v49 = vpack.c.bf16 %v1888_v56, %v3741_v30  ;;  %v1969_v2 = vrot.slane %v1962_v58, 5  ;;  %v2506_v56 = vrot.slane %v1961_v60, 6 }
  0x3e   :  { %v728_v13 = vrot.slane %v724_v17, 5  ;;  %v1388_v32 = vrot.slane %v724_v17, 6  ;;  %v2703_v17 = vrot.slane %v3651_v42, 10 }
  0x3f   :  { %v1970_v9 = vsel %vm3344_vm4, %v2763_v33, %v1969_v2  ;;  %v2715_v2 = vrot.slane %v3771_v59, 10  ;;  %v1392_v33 = vrot.slane %v3823_v29, 6 }
  0x40   :  { %2938 = vmatmul.mubr.msk.bf16.vlgmr.msra.gmra.mrb[0].mxu0 %vm156_vm5, %v3690_v3  ;;  %v3869_v19 = vsel %vm3344_vm4, %v2652_v12, %v728_v13  ;;  %v1244_v12 = vrot.slane %v3684_v57, 6 }
  0x41   :  { %2942 = vmatpush3.bf16.msra.mxu0 %v3672_v54  ;;  %2943 = vmatprep.mubr.msk.bf16.mxu0 %vm156_vm5, %v457_v62  ;;  %v732_v54 = vrot.slane %v3823_v29, 5  ;;  %v2762_v62 = vrot.slane %v65_v44, 9  ;;  %v3916_v29 = vsel %vm3379_vm6, %v2702_v23, %v1240_v46 }
  0x42   :  { %2947 = vmatprep.subr.bf16.mxu0 %v3796_v18 }
  0x43   :  { %v1966_v8 = vsel %vm3344_vm4, %v2762_v62, %v1965_v47  ;;  %v3878_v30 = vsel %vm3344_vm4, %v2653_v15, %v732_v54  ;;  %v2810_v62 = vrot.slane %v65_v44, 10  ;;  %v3890_v15 = vsel %vm3379_vm6, %v2714_v48, %v1388_v32 }
  0x44   :  { %v1971_v26 = vcombine.low %v3869_v19, %v1966_v8  ;;  %v1972_v13 = vcombine.low %v3878_v30, %v1970_v9  ;;  %v568_v32 = vcombine.low %v3800_v61, %v3804_v10  ;;  %v1247_v44 = vcombine.low %v3833_v0, %v3853_v43  ;;  %v3234_v9 = vld [vmem:[%s4209_s3 + $0x30] sm:$0xff]  }
  0x45   :  { %v3920_v47 = vsel %vm3379_vm6, %v2703_v17, %v1244_v12  ;;  %v2811_v61 = vrot.slane %v71_v24, 10  ;;  %v2510_v48 = vrot.slane %v1962_v58, 6  ;;  %v2700_v24 = vrot.slane %v3658_v63, 10 }
  0x46   :  { %v3893_v54 = vpack.c.bf16 %v1971_v26, %v3735_v16  ;;  %v3901_v57 = vpack.c.bf16 %v1972_v13, %v3808_v35  ;;  %v1246_v16 = vcombine.low %v3812_v25, %v3819_v31  ;;  %v575_v46 = vpack.c.bf16 %v3808_v35, %v568_v32  ;;  %v3247_v32 = vld [vmem:[%s4209_s3 + $0x48] sm:$0xff]  }
  0x47   :  { %2986 = vmatmul.mubr.msk.bf16.vlgmr.msra.gmra.mrb[0].mxu1 %vm156_vm5, %v3776_v1  ;;  %v2511_v23 = vsel %vm3379_vm6, %v2811_v61, %v2510_v48  ;;  %v1249_v58 = vcombine.low %v3916_v29, %v3920_v47  ;;  %v1232_v8 = vrot.slane %v3710_v14, 6  ;;  %v2701_v17 = vrot.slane %v3674_v55, 10  ;;  %v3252_v61 = vld [vmem:[%s4209_s3 + $0x78] sm:$0xff]  }
  0x48   :  { %2990 = vmatpush3.bf16.msra.mxu1 %v3749_v28  ;;  %2991 = vmatprep.mubr.msk.bf16.mxu1 %vm156_vm5, %v3783_v34  ;;  %v2507_v28 = vsel %vm3379_vm6, %v2810_v62, %v2506_v56  ;;  %v1236_v26 = vrot.slane %v3723_v45, 6  ;;  %v646_v35 = vcombine.low %v3593_v4, %v3597_v6  ;;  %v647_v63 = vcombine.low %v3599_v21, %v3754_v51  ;;  %v3235_v4 = vld [vmem:[%s4209_s3 + $0x18] sm:$0xff]  }
  0x49   :  { %2995 = vmatprep.subr.bf16.mxu1 %v3232_v50  ;;  %v2512_v60 = vcombine.low %v3890_v15, %v2507_v28  ;;  %v1233_v14 = vsel %vm3379_vm6, %v2700_v24, %v1232_v8  ;;  %v734_v21 = vcombine.low %v3696_v22, %v3702_v37  ;;  %v735_v51 = vcombine.low %v3706_v39, %v3869_v19  ;;  %v3236_v22 = vld [vmem:[%s4209_s3 + $0x38] sm:$0xff]   ;;  %v4230_v28 = vld [vmem:[#allocation3_spill] sm:$0xff] }
  0x4a   :  { %v1237_v45 = vsel %vm3379_vm6, %v2701_v17, %v1236_v26  ;;  %v3956_v13 = vpack.c.bf16 %v647_v63, %v646_v35  ;;  %v648_v62 = vcombine.low %v3674_v55, %v3649_v41  ;;  %v649_v56 = vcombine.low %v3651_v42, %v3771_v59  ;;  %v3237_v41 = vld [vmem:[%s4207_s2 + $0x48] sm:$0xff]  }
  0x4b   :  { %v3925_v25 = vpack.c.bf16 %v2512_v60, %v1247_v44  ;;  %v1248_v6 = vcombine.low %v1233_v14, %v1237_v45  ;;  %v736_v42 = vcombine.low %v3804_v10, %v3764_v52  ;;  %v737_v55 = vcombine.low %v3768_v53, %v3878_v30  ;;  %v3238_v53 = vld [vmem:[%s4207_s2 + $0x68] sm:$0xff]   ;;  %v3239_v10 = vld [vmem:[%s4207_s2 + $0x40] sm:$0xff]   ;;  %v3249_v60 = vld [vmem:[%s4209_s3 + $0x50] sm:$0xff]  }
  0x4c   :  { %2944 = vmatmul.mubr.msk.bf16.vlgmr.msra.gmra.mrb[0].mxu0 %vm156_vm5, %v3786_v5  ;;  %v3929_v5 = vsel %vm3379_vm6, %v2715_v2, %v1392_v33  ;;  %v3980_v37 = vpack.c.bf16 %v649_v56, %v648_v62  ;;  %v1394_v39 = vcombine.low %v3819_v31, %v3833_v0  ;;  %v1395_v59 = vcombine.low %v3853_v43, %v3890_v15  ;;  %v3240_v30 = vld [vmem:[%s4207_s2 + $0x60] sm:$0xff]   ;;  %v3241_v15 = vld [vmem:[%s4207_s2 + $0x50] sm:$0xff]   ;;  %v4228_v2 = vld [vmem:[#allocation7_spill] sm:$0xff] }
  0x4d   :  { %2948 = vmatpush3.bf16.msra.mxu0 %v3796_v18  ;;  %2949 = vmatprep.mubr.msk.bf16.mxu0 %vm156_vm5, %v3783_v34  ;;  %v2513_v18 = vcombine.low %v3929_v5, %v2511_v23  ;;  %v1254_v34 = vpack.c.bf16 %v1247_v44, %v1246_v16  ;;  %v1255_v40 = vpack.c.bf16 %v1249_v58, %v1248_v6  ;;  %v4229_v33 = vld [vmem:[#allocation4_spill] sm:$0xff]  ;;  %v3248_v16 = vld [vmem:[%s4209_s3 + $0x68] sm:$0xff]   ;;  %v4231_v44 = vld [vmem:[#allocation5_spill] sm:$0xff] }
  0x4e   :  { %2953 = vmatprep.subr.bf16.mxu0 %v3233_v20  ;;  %v3997_v19 = vpack.c.bf16 %v737_v55, %v736_v42  ;;  %v3999_v52 = vpack.c.bf16 %v1395_v59, %v1394_v39  ;;  %v1396_v31 = vcombine.low %v1237_v45, %v3916_v29  ;;  %v1397_v0 = vcombine.low %v3920_v47, %v3929_v5  ;;  %v3250_v29 = vld [vmem:[%s4209_s3 + $0x70] sm:$0xff]   ;;  %v3251_v47 = vld [vmem:[%s4209_s3 + $0x58] sm:$0xff]  }
  0x4f   :  { %v3948_v12 = vpack.c.bf16 %v2513_v18, %v1249_v58 }
  0x50   :  { %v1403_v43 = vpack.c.bf16 %v1397_v0, %v1396_v31 }
  0x53   :  { %2992 = vmatmul.mubr.msk.bf16.vlgmr.msra.gmra.mrb[0].mxu1 %vm156_vm5, %v575_v46 }
  0x54   :  { %2996 = vmatpush3.bf16.msra.mxu1 %v3232_v50  ;;  %2997 = vmatprep.mubr.msk.bf16.mxu1 %vm156_vm5, %v1254_v34  ;;  %v3968_v50 = vpack.c.bf16 %v735_v51, %v734_v21 }
  0x55   :  { %3001 = vmatprep.subr.bf16.mxu1 %v3234_v9 }
  0x58   :  { %2950 = vmatmul.mubr.msk.bf16.vlgmr.msra.gmra.mrb[0].mxu0 %vm156_vm5, %v575_v46 }
  0x59   :  { %2954 = vmatpush3.bf16.msra.mxu0 %v3233_v20  ;;  %2955 = vmatprep.mubr.msk.bf16.mxu0 %vm156_vm5, %v3956_v13  ;;  %v3242_v20 = vld [vmem:[%s4207_s2 + $0x70] sm:$0xff]  }
  0x5a   :  { %2959 = vmatprep.subr.bf16.mxu0 %v3235_v4 }
  0x5f   :  { %2998 = vmatmul.mubr.msk.bf16.vlgmr.msra.gmra.mrb[0].mxu1 %vm156_vm5, %v1255_v40 }
  0x60   :  { %3002 = vmatpush3.bf16.msra.mxu1 %v3234_v9  ;;  %3003 = vmatprep.mubr.msk.bf16.mxu1 %vm156_vm5, %v3968_v50 }
  0x61   :  { %3007 = vmatprep.subr.bf16.mxu1 %v3236_v22 }
  0x64   :  { %2956 = vmatmul.mubr.msk.bf16.vlgmr.msra.gmra.mrb[0].mxu0 %vm156_vm5, %v3980_v37 }
  0x65   :  { %2960 = vmatpush3.bf16.msra.mxu0 %v3235_v4  ;;  %2961 = vmatprep.mubr.msk.bf16.mxu0 %vm156_vm5, %v3968_v50 }
  0x66   :  { %3013 = vmatprep.subr.bf16.mxu0 %v3237_v41 }
  0x6b   :  { %3004 = vmatmul.mubr.msk.bf16.vlgmr.msra.gmra.mrb[0].mxu1 %vm156_vm5, %v3997_v19 }
  0x6c   :  { %3008 = vmatpush3.bf16.msra.mxu1 %v3236_v22  ;;  %3009 = vmatprep.mubr.msk.bf16.mxu1 %vm156_vm5, %v3999_v52 }
  0x6d   :  { %3061 = vmatprep.subr.bf16.mxu1 %v3238_v53 }
  0x70   :  { %2962 = vmatmul.mubr.msk.bf16.vlgmr.msra.gmra.mrb[0].mxu0 %vm156_vm5, %v3997_v19 }
  0x71   :  { %3014 = vmatpush3.bf16.msra.mxu0 %v3237_v41  ;;  %3015 = vmatprep.mubr.msk.bf16.mxu0 %vm156_vm5, %v3605_v36 }
  0x72   :  { %3019 = vmatprep.subr.bf16.mxu0 %v3239_v10 }
  0x77   :  { %3010 = vmatmul.mubr.msk.bf16.vlgmr.msra.gmra.mrb[0].mxu1 %vm156_vm5, %v1403_v43 }
  0x78   :  { %3062 = vmatpush3.bf16.msra.mxu1 %v3238_v53  ;;  %3063 = vmatprep.mubr.msk.bf16.mxu1 %vm156_vm5, %v3713_v11  ;;  %v3243_v11 = vld [vmem:[%s4207_s2 + $0x58] sm:$0xff]  }
  0x79   :  { %3067 = vmatprep.subr.bf16.mxu1 %v3240_v30  ;;  %3016 = vmatmul.mubr.msk.bf16.vlgmr.msra.gmra.mrb[4].mxu0 %vm156_vm5, %v3690_v3 }
  0x7a   :  { %3020 = vmatpush3.bf16.msra.mxu0 %v3239_v10  ;;  %3021 = vmatprep.mubr.msk.bf16.mxu0 %vm156_vm5, %v3572_v7  ;;  %v4226_v7 = vld [vmem:[#allocation6_spill] sm:$0xff] }
  0x7b   :  { %3025 = vmatprep.subr.bf16.mxu0 %v3241_v15 }
  0x7f   :  { %3064 = vmatmul.mubr.msk.bf16.vlgmr.msra.gmra.mrb[4].mxu1 %vm156_vm5, %v3776_v1  ;;  %v3244_v1 = vld [vmem:[%s4207_s2 + $0x78] sm:$0xff]  }
  0x80   :  { %3068 = vmatpush3.bf16.msra.mxu1 %v3240_v30  ;;  %3069 = vmatprep.mubr.msk.bf16.mxu1 %vm156_vm5, %v3605_v36  ;;  %v4227_v36 = vld [vmem:[#allocation2_spill] sm:$0xff] }
  0x81   :  { %3073 = vmatprep.subr.bf16.mxu1 %v3242_v20 }
  0x85   :  { %3022 = vmatmul.mubr.msk.bf16.vlgmr.msra.gmra.mrb[4].mxu0 %vm156_vm5, %v3643_v38  ;;  %v3245_v38 = vld [vmem:[%s4209_s3 + $0x40] sm:$0xff]  }
  0x86   :  { %3026 = vmatpush3.bf16.msra.mxu0 %v3241_v15  ;;  %3027 = vmatprep.mubr.msk.bf16.mxu0 %vm156_vm5, %v4226_v7 }
  0x87   :  { %3031 = vmatprep.subr.bf16.mxu0 %v3243_v11 }
  0x8b   :  { %3070 = vmatmul.mubr.msk.bf16.vlgmr.msra.gmra.mrb[4].mxu1 %vm156_vm5, %v3690_v3  ;;  %v3246_v3 = vld [vmem:[%s4209_s3 + $0x60] sm:$0xff]  }
  0x8c   :  { %3074 = vmatpush3.bf16.msra.mxu1 %v3242_v20  ;;  %3075 = vmatprep.mubr.msk.bf16.mxu1 %vm156_vm5, %v4227_v36 }
  0x8d   :  { %3079 = vmatprep.subr.bf16.mxu1 %v3244_v1 }
  0x91   :  { %3028 = vmatmul.mubr.msk.bf16.vlgmr.msra.gmra.mrb[4].mxu0 %vm156_vm5, %v4228_v2 }
  0x92   :  { %3032 = vmatpush3.bf16.msra.mxu0 %v3243_v11  ;;  %3033 = vmatprep.mubr.msk.bf16.mxu0 %vm156_vm5, %v4227_v36 }
  0x93   :  { %3037 = vmatprep.subr.bf16.mxu0 %v3245_v38 }
  0x97   :  { %3076 = vmatmul.mubr.msk.bf16.vlgmr.msra.gmra.mrb[4].mxu1 %vm156_vm5, %v4229_v33 }
  0x98   :  { %3080 = vmatpush3.bf16.msra.mxu1 %v3244_v1  ;;  %3081 = vmatprep.mubr.msk.bf16.mxu1 %vm156_vm5, %v4230_v28 }
  0x99   :  { %3085 = vmatprep.subr.bf16.mxu1 %v3246_v3 }
  0x9d   :  { %3034 = vmatmul.mubr.msk.bf16.vlgmr.msra.gmra.mrb[4].mxu0 %vm156_vm5, %v4229_v33 }
  0x9e   :  { %3038 = vmatpush3.bf16.msra.mxu0 %v3245_v38  ;;  %3039 = vmatprep.mubr.msk.bf16.mxu0 %vm156_vm5, %v3956_v13 }
  0x9f   :  { %3043 = vmatprep.subr.bf16.mxu0 %v3247_v32 }
  0xa3   :  { %3082 = vmatmul.mubr.msk.bf16.vlgmr.msra.gmra.mrb[4].mxu1 %vm156_vm5, %v4231_v44 }
  0xa4   :  { %3086 = vmatpush3.bf16.msra.mxu1 %v3246_v3  ;;  %3087 = vmatprep.mubr.msk.bf16.mxu1 %vm156_vm5, %v3968_v50 }
  0xa5   :  { %3091 = vmatprep.subr.bf16.mxu1 %v3248_v16 }
  0xa9   :  { %3040 = vmatmul.mubr.msk.bf16.vlgmr.msra.gmra.mrb[4].mxu0 %vm156_vm5, %v3980_v37 }
  0xaa   :  { %3044 = vmatpush3.bf16.msra.mxu0 %v3247_v32  ;;  %3045 = vmatprep.mubr.msk.bf16.mxu0 %vm156_vm5, %v3968_v50 }
  0xab   :  { %3049 = vmatprep.subr.bf16.mxu0 %v3249_v60 }
  0xaf   :  { %3088 = vmatmul.mubr.msk.bf16.vlgmr.msra.gmra.mrb[4].mxu1 %vm156_vm5, %v3997_v19 }
  0xb0   :  { %3092 = vmatpush3.bf16.msra.mxu1 %v3248_v16  ;;  %3093 = vmatprep.mubr.msk.bf16.mxu1 %vm156_vm5, %v3999_v52 }
  0xb1   :  { %3097 = vmatprep.subr.bf16.mxu1 %v3250_v29 }
  0xb5   :  { %3046 = vmatmul.mubr.msk.bf16.vlgmr.msra.gmra.mrb[4].mxu0 %vm156_vm5, %v3997_v19 }
  0xb6   :  { %3050 = vmatpush3.bf16.msra.mxu0 %v3249_v60  ;;  %3051 = vmatprep.mubr.msk.bf16.mxu0 %vm156_vm5, %v3856_v27  ;;  %v4125_v27 = vld [vmem:[%s4212_s5] ss:$0 sm:$0xff] }
  0xb7   :  { %3055 = vmatprep.subr.bf16.mxu0 %v3251_v47 }
  0xbb   :  { %3094 = vmatmul.mubr.msk.bf16.vlgmr.msra.gmra.mrb[4].mxu1 %vm156_vm5, %v1403_v43 }
  0xbc   :  { %3098 = vmatpush3.bf16.msra.mxu1 %v3250_v29  ;;  %3099 = vmatprep.mubr.msk.bf16.mxu1 %vm156_vm5, %v3893_v54 }
  0xbd   :  { %3103 = vmatprep.subr.bf16.mxu1 %v3252_v61 }
  0xc1   :  { %3052 = vmatmul.mubr.msk.bf16.vlgmr.msra.gmra.mrb[4].mxu0 %vm156_vm5, %v3863_v49  ;;  %v2659_v49 = vld [vmem:[%s4211_s4] ss:$0 sm:$0xff] }
  0xc2   :  { %3056 = vmatpush3.bf16.msra.mxu0 %v3251_v47  ;;  %3057 = vmatprep.mubr.msk.bf16.mxu0 %vm156_vm5, %v3893_v54 }
  0xc7   :  { %3100 = vmatmul.mubr.msk.bf16.vlgmr.msra.gmra.mrb[4].mxu1 %vm156_vm5, %v3901_v57 }
  0xc8   :  { %3104 = vmatpush3.bf16.msra.mxu1 %v3252_v61  ;;  %3105 = vmatprep.mubr.msk.bf16.mxu1 %vm156_vm5, %v3925_v25 }
  0xcd   :  { %3058 = vmatmul.mubr.msk.bf16.vlgmr.msra.gmra.mrb[4].mxu0 %vm156_vm5, %v3901_v57 }
  0xd3   :  { %3106 = vmatmul.mubr.msk.bf16.vlgmr.msra.gmra.mrb[4].mxu1 %vm156_vm5, %v3948_v12 }
 0x143   :  { %v2963_v54 = vpop.f32.mrb[0].mxu0 }
 0x144   :  { %v820_v48 = vmul.f32 %v2963_v54, %v2659_v49  ;;  %v793_v5 = vpop.f32.mrb[1].mxu0 }
 0x145   :  { %v818_v25 = vmul.f32 %v2659_v49, %v793_v5  ;;  %v2964_v23 = vpop.f32.mrb[2].mxu0 }
 0x146   :  { %v830_v57 = vadd.f32 %v4125_v27, %v820_v48  ;;  %v821_v46 = vmul.f32 %v2964_v23, %v2659_v49  ;;  %v796_v24 = vpop.f32.mrb[3].mxu0 }
 0x147   :  { %v828_v58 = vadd.f32 %v4125_v27, %v818_v25  ;;  %v819_v18 = vmul.f32 %v2659_v49, %v796_v24 }
 0x148   :  { %835 = vst.msk [vmem:[%s4213_s6 + $0x10] sm:$0xff] %vm832_vm7, %v830_v57  ;;  %v831_v34 = vadd.f32 %v4125_v27, %v821_v46 }
 0x149   :  { %833 = vst.msk [vmem:[%s4213_s6] sm:$0xff] %vm832_vm7, %v828_v58  ;;  %v829_v8 = vadd.f32 %v4125_v27, %v819_v18 }
 0x14a   :  { %v3011_v17 = vpop.f32.mrb[0].mxu1  ;;  %836 = vst.msk [vmem:[%s4213_s6 + $0x18] sm:$0xff] %vm832_vm7, %v831_v34 }
 0x14b   :  { %v1474_v26 = vmul.f32 %v3011_v17, %v2659_v49  ;;  %v1453_v9 = vpop.f32.mrb[1].mxu1  ;;  %834 = vst.msk [vmem:[%s4213_s6 + $0x8] sm:$0xff] %vm832_vm7, %v829_v8 }
 0x14c   :  { %v1472_v35 = vmul.f32 %v2659_v49, %v1453_v9  ;;  %v3012_v63 = vpop.f32.mrb[2].mxu1 }
 0x14d   :  { %v1478_v12 = vadd.f32 %v4125_v27, %v1474_v26  ;;  %v1475_v14 = vmul.f32 %v3012_v63, %v2659_v49  ;;  %v1456_v45 = vpop.f32.mrb[3].mxu1 }
 0x14e   :  { %v1476_v13 = vadd.f32 %v4125_v27, %v1472_v35  ;;  %v1473_v4 = vmul.f32 %v2659_v49, %v1456_v45 }
 0x14f   :  { %2723 = vst.msk [vmem:[%s4213_s6 + $0x30] sm:$0xff] %vm832_vm7, %v1478_v12  ;;  %v1479_v6 = vadd.f32 %v4125_v27, %v1475_v14 }
 0x150   :  { %2721 = vst.msk [vmem:[%s4213_s6 + $0x20] sm:$0xff] %vm832_vm7, %v1476_v13  ;;  %v1477_v21 = vadd.f32 %v4125_v27, %v1473_v4 }
 0x151   :  { %2724 = vst.msk [vmem:[%s4213_s6 + $0x38] sm:$0xff] %vm832_vm7, %v1479_v6 }
 0x152   :  { %2722 = vst.msk [vmem:[%s4213_s6 + $0x28] sm:$0xff] %vm832_vm7, %v1477_v21 }
 0x1a0   :  { %v3059_v51 = vpop.f32.mrb[4].mxu0 }
 0x1a1   :  { %v2047_v40 = vmul.f32 %v3059_v51, %v2659_v49  ;;  %v2026_v50 = vpop.f32.mrb[5].mxu0 }
 0x1a2   :  { %v2045_v62 = vmul.f32 %v2659_v49, %v2026_v50  ;;  %v3060_v56 = vpop.f32.mrb[6].mxu0 }
 0x1a3   :  { %v2051_v22 = vadd.f32 %v4125_v27, %v2047_v40  ;;  %v2048_v37 = vmul.f32 %v3060_v56, %v2659_v49  ;;  %v2029_v41 = vpop.f32.mrb[7].mxu0 }
 0x1a4   :  { %v2049_v42 = vadd.f32 %v4125_v27, %v2045_v62  ;;  %v2046_v55 = vmul.f32 %v2659_v49, %v2029_v41 }
 0x1a5   :  { %2771 = vst.msk [vmem:[%s4213_s6 + $0x50] sm:$0xff] %vm832_vm7, %v2051_v22  ;;  %v2052_v39 = vadd.f32 %v4125_v27, %v2048_v37 }
 0x1a6   :  { %v3107_v59 = vpop.f32.mrb[4].mxu1  ;;  %2769 = vst.msk [vmem:[%s4213_s6 + $0x40] sm:$0xff] %vm832_vm7, %v2049_v42  ;;  %v2050_v19 = vadd.f32 %v4125_v27, %v2046_v55 }
 0x1a7   :  { %v2588_v52 = vmul.f32 %v3107_v59, %v2659_v49  ;;  %v2567_v53 = vpop.f32.mrb[5].mxu1  ;;  %2772 = vst.msk [vmem:[%s4213_s6 + $0x58] sm:$0xff] %vm832_vm7, %v2052_v39 }
 0x1a8   :  { %v2586_v10 = vmul.f32 %v2659_v49, %v2567_v53  ;;  %v3108_v31 = vpop.f32.mrb[6].mxu1  ;;  %2770 = vst.msk [vmem:[%s4213_s6 + $0x48] sm:$0xff] %vm832_vm7, %v2050_v19 }
 0x1a9   :  { %v2592_v0 = vadd.f32 %v4125_v27, %v2588_v52  ;;  %v2589_v43 = vmul.f32 %v3108_v31, %v2659_v49  ;;  %v2570_v30 = vpop.f32.mrb[7].mxu1 }
 0x1aa   :  { %v2590_v15 = vadd.f32 %v4125_v27, %v2586_v10  ;;  %v2587_v20 = vmul.f32 %v2659_v49, %v2570_v30 }
 0x1ab   :  { %2819 = vst.msk [vmem:[%s4213_s6 + $0x70] sm:$0xff] %vm832_vm7, %v2592_v0  ;;  %v2593_v11 = vadd.f32 %v4125_v27, %v2589_v43 }
 0x1ac   :  { %2817 = vst.msk [vmem:[%s4213_s6 + $0x60] sm:$0xff] %vm832_vm7, %v2590_v15  ;;  %v2591_v7 = vadd.f32 %v4125_v27, %v2587_v20 }
 0x1ad   :  { %2820 = vst.msk [vmem:[%s4213_s6 + $0x78] sm:$0xff] %vm832_vm7, %v2593_v11 }
 0x1ae   :  { %2818 = vst.msk [vmem:[%s4213_s6 + $0x68] sm:$0xff] %vm832_vm7, %v2591_v7 }

// kernel: generator_forward.15
= control target key start
LH: loop header
LB: loop body
LE: loop exit
PB: predicated region body
PF: predicated region fallthrough
CT: control target
= control target key end

     0   :  { %vm327_vm0 = vcmask 1043456   ;;  %vm227_vm1 = vcmask 1046528   ;;  %vm302_vm2 = vcmask 64512   ;;  %vm1650_vm3 = vcmask 1045504   ;;  %s8924_s2 = inlined_call_operand.vmem [shape: bf16[16,8,3], index: 2, kind: input, shape index: {}]   ;;  %s8925_s0 = inlined_call_operand.vmem [shape: f32[2,10,10,8], index: 0, kind: input, shape index: {}]   ;;  %s8926_s3 = inlined_call_operand.vmem [shape: bf16[16,8,3], index: 3, kind: input, shape index: {}]   ;;  %s8927_s1 = inlined_call_operand.vmem [shape: f32[2,10,10,8], index: 1, kind: input, shape index: {}]   ;;  %s8928_s4 = inlined_call_operand.vmem [shape: f32[1,3], index: 4, kind: input, shape index: {}]   ;;  %s8929_s5 = inlined_call_operand.vmem [shape: f32[1,3], index: 5, kind: input, shape index: {}]   ;;  %s8930_s6 = inlined_call_operand.vmem [shape: f32[4,128,3], index: 6, kind: output, shape index: {}]  }
   0x1   :  { %v4944_v0 = vld [vmem:[%s8924_s2 + $0x4] sm:$0xf]  ;;  %v5017_v1 = vld [vmem:[%s8924_s2 + $0x14] sm:$0xf]  ;;  %v25_v5 = vld [vmem:[%s8925_s0 + $0x8] sm:$0x3] }
   0x2   :  { %v24_v2 = vld [vmem:[%s8925_s0] sm:$0xff]  ;;  %6592 = vmatprep.subr.msk.bf16.mxu0 %vm327_vm0, %v4944_v0  ;;  %6600 = vmatprep.subr.msk.bf16.mxu1 %vm327_vm0, %v5017_v1  ;;  %v329_v3 = vsel %vm327_vm0, %v4944_v0, 0  ;;  %v1750_v4 = vsel %vm327_vm0, %v5017_v1, 0  ;;  %v26_v6 = vld [vmem:[%s8925_s0 + $0x10] sm:$0xff]  ;;  %v27_v8 = vld [vmem:[%s8925_s0 + $0x18] sm:$0x3] }
   0x3   :  { %v28_v7 = vld [vmem:[%s8925_s0 + $0x20] sm:$0xff]  ;;  %5569 = vmatpush3.bf16.msra.mxu0 %v329_v3  ;;  %5713 = vmatpush3.bf16.msra.mxu1 %v1750_v4  ;;  %v29_v9 = vld [vmem:[%s8925_s0 + $0x28] sm:$0x3]  ;;  %v30_v10 = vld [vmem:[%s8925_s0 + $0x30] sm:$0xff]  ;;  %v6818_v11 = vmax.f32 %v24_v2, 0.0  ;;  %v65_v15 = vmax.f32 %v25_v5, 0.0 }
   0x4   :  { %v31_v12 = vld [vmem:[%s8925_s0 + $0x38] sm:$0x3]  ;;  %v32_v13 = vld [vmem:[%s8925_s0 + $0x40] sm:$0xff]  ;;  %v33_v14 = vld [vmem:[%s8925_s0 + $0x48] sm:$0x3]  ;;  %v6829_v16 = vmax.f32 %v26_v6, 0.0 }
   0x5   :  { %v67_v17 = vmax.f32 %v27_v8, 0.0  ;;  %v6831_v18 = vmax.f32 %v28_v7, 0.0  ;;  %v69_v19 = vmax.f32 %v29_v9, 0.0  ;;  %v194_v20 = vld [vmem:[%s8924_s2] sm:$0xf]  ;;  %v6836_v21 = vmax.f32 %v30_v10, 0.0 }
   0x6   :  { %v71_v22 = vmax.f32 %v31_v12, 0.0  ;;  %v6838_v23 = vmax.f32 %v32_v13, 0.0  ;;  %v73_v24 = vmax.f32 %v33_v14, 0.0  ;;  %6593 = vmatprep.subr.msk.bf16.mxu0 %vm327_vm0, %v194_v20  ;;  %v5016_v25 = vld [vmem:[%s8924_s2 + $0x10] sm:$0xf]  ;;  %v228_v26 = vrot.slane %v6818_v11, 1 }
   0x7   :  { %v229_v27 = vrot.slane %v65_v15, 1  ;;  %v231_v28 = vrot.slane %v6829_v16, 1  ;;  %v232_v29 = vrot.slane %v67_v17, 1  ;;  %6601 = vmatprep.subr.msk.bf16.mxu1 %vm327_vm0, %v5016_v25  ;;  %v234_v30 = vrot.slane %v6831_v18, 1  ;;  %v34_v53 = vld [vmem:[%s8925_s0 + $0x50] sm:$0xff]  ;;  %v36_v59 = vld [vmem:[%s8925_s0 + $0x60] sm:$0xff] }
   0x8   :  { %v235_v31 = vrot.slane %v69_v19, 1  ;;  %v237_v32 = vrot.slane %v6836_v21, 1  ;;  %v238_v33 = vrot.slane %v71_v22, 1  ;;  %v240_v36 = vrot.slane %v6838_v23, 1  ;;  %v35_v54 = vld [vmem:[%s8925_s0 + $0x58] sm:$0x3] }
   0x9   :  { %v230_v34 = vsel %vm227_vm1, %v228_v26, %v229_v27  ;;  %v233_v35 = vsel %vm227_vm1, %v231_v28, %v232_v29  ;;  %v241_v37 = vrot.slane %v73_v24, 1  ;;  %v1651_v41 = vrot.slane %v6818_v11, 2  ;;  %v37_v60 = vld [vmem:[%s8925_s0 + $0x68] sm:$0x3]  ;;  %v38_v1 = vld [vmem:[%s8925_s0 + $0x70] sm:$0xff] }
   0xa   :  { %v236_v38 = vsel %vm227_vm1, %v234_v30, %v235_v31  ;;  %v6854_v39 = vsel %vm227_vm1, %v237_v32, %v238_v33  ;;  %v6856_v40 = vpack.c.bf16 %v233_v35, %v230_v34  ;;  %v1652_v44 = vrot.slane %v65_v15, 2  ;;  %v39_v2 = vld [vmem:[%s8925_s0 + $0x78] sm:$0x3]  ;;  %v6909_v7 = vld [vmem:[%s8924_s2 + $0x8] sm:$0xf]  ;;  %v44_v31 = vld [vmem:[%s8925_s0 + $0xa0] sm:$0xff] }
   0xb   :  { %v6860_v42 = vpack.c.bf16 %v6854_v39, %v236_v38  ;;  %v6862_v43 = vpack.c.bf16 %v236_v38, %v233_v35  ;;  %v6865_v45 = vsel %vm227_vm1, %v240_v36, %v241_v37  ;;  %v1654_v46 = vrot.slane %v6829_v16, 2  ;;  %v6921_v13 = vld [vmem:[%s8924_s2 + $0x18] sm:$0xf]  ;;  %v45_v26 = vld [vmem:[%s8925_s0 + $0xa8] sm:$0x3]  ;;  %v46_v32 = vld [vmem:[%s8925_s0 + $0xb0] sm:$0xff] }
   0xc   :  { %5570 = vmatprep.mubr.msk.bf16.mxu0 %vm302_vm2, %v6856_v40  ;;  %v1655_v47 = vrot.slane %v67_v17, 2  ;;  %v1657_v48 = vrot.slane %v6831_v18, 2  ;;  %v1653_v49 = vsel %vm1650_vm3, %v1651_v41, %v1652_v44  ;;  %v1658_v50 = vrot.slane %v69_v19, 2  ;;  %v47_v37 = vld [vmem:[%s8925_s0 + $0xb8] sm:$0x3]  ;;  %v48_v38 = vld [vmem:[%s8925_s0 + $0xc0] sm:$0xff] }
   0xd   :  { %9013 = vst [vmem:[#allocation2_spill] sm:$0xff] %v6860_v42  ;;  %9014 = vst [vmem:[#allocation3_spill] sm:$0xff] %v6862_v43  ;;  %v1660_v51 = vrot.slane %v6836_v21, 2  ;;  %v1661_v52 = vrot.slane %v71_v22, 2  ;;  %5571 = vmatmul.mubr.msk.bf16.vlgmr.msra.gmra.mrb[0].mxu0 %vm302_vm2, %v6860_v42  ;;  %v1663_v56 = vrot.slane %v6838_v23, 2  ;;  %v1664_v57 = vrot.slane %v73_v24, 2 }
   0xe   :  { %v1656_v55 = vsel %vm1650_vm3, %v1654_v46, %v1655_v47  ;;  %v453_v58 = vsel %vm327_vm0, %v194_v20, 0  ;;  %v1659_v61 = vsel %vm1650_vm3, %v1657_v48, %v1658_v50  ;;  %v1850_v0 = vsel %vm327_vm0, %v5016_v25, 0  ;;  %v49_v41 = vld [vmem:[%s8925_s0 + $0xc8] sm:$0x3] }
   0xf   :  { %v1662_v62 = vsel %vm1650_vm3, %v1660_v51, %v1661_v52  ;;  %v1715_v63 = vpack.c.bf16 %v1656_v55, %v1653_v49  ;;  %5587 = vmatpush3.bf16.msra.mxu0 %v453_v58  ;;  %v1665_v3 = vsel %vm1650_vm3, %v1663_v56, %v1664_v57  ;;  %v6902_v5 = vpack.c.bf16 %v1659_v61, %v1656_v55  ;;  %v50_v55 = vld [vmem:[%s8925_s0 + $0xd0] sm:$0xff] }
  0x10   :  { %v6900_v4 = vpack.c.bf16 %v1662_v62, %v1659_v61  ;;  %v6904_v6 = vmax.f32 %v34_v53, 0.0  ;;  %v6912_v8 = vpack.c.bf16 %v1665_v3, %v1662_v62  ;;  %v75_v9 = vmax.f32 %v35_v54, 0.0  ;;  %6594 = vmatprep.subr.msk.bf16.mxu0 %vm327_vm0, %v6909_v7  ;;  %v51_v62 = vld [vmem:[%s8925_s0 + $0xd8] sm:$0x3] }
  0x11   :  { %9016 = vst [vmem:[#allocation5_spill] sm:$0xff] %v6902_v5  ;;  %5714 = vmatprep.mubr.msk.bf16.mxu1 %vm302_vm2, %v1715_v63  ;;  %v6914_v10 = vmax.f32 %v36_v59, 0.0  ;;  %v77_v12 = vmax.f32 %v37_v60, 0.0  ;;  %v6927_v17 = vmax.f32 %v38_v1, 0.0  ;;  %v79_v19 = vmax.f32 %v39_v2, 0.0 }
  0x12   :  { %9015 = vst [vmem:[#allocation4_spill] sm:$0xff] %v6900_v4  ;;  %9017 = vst [vmem:[#allocation6_spill] sm:$0xff] %v6912_v8  ;;  %5715 = vmatmul.mubr.msk.bf16.vlgmr.msra.gmra.mrb[0].mxu1 %vm302_vm2, %v6900_v4  ;;  %v243_v14 = vrot.slane %v6904_v6, 1  ;;  %v1666_v15 = vrot.slane %v6904_v6, 2  ;;  %v244_v20 = vrot.slane %v75_v9, 1  ;;  %v1667_v22 = vrot.slane %v75_v9, 2 }
  0x13   :  { %5731 = vmatpush3.bf16.msra.mxu1 %v1850_v0  ;;  %v246_v24 = vrot.slane %v6914_v10, 1  ;;  %v247_v25 = vrot.slane %v77_v12, 1  ;;  %v249_v27 = vrot.slane %v6927_v17, 1  ;;  %v250_v28 = vrot.slane %v79_v19, 1 }
  0x14   :  { %v1669_v29 = vrot.slane %v6914_v10, 2  ;;  %v1670_v30 = vrot.slane %v77_v12, 2  ;;  %6602 = vmatprep.subr.msk.bf16.mxu1 %vm327_vm0, %v6921_v13  ;;  %v6944_v33 = vsel %vm227_vm1, %v243_v14, %v244_v20  ;;  %v6947_v34 = vsel %vm1650_vm3, %v1666_v15, %v1667_v22 }
  0x15   :  { %v6950_v35 = vsel %vm227_vm1, %v246_v24, %v247_v25  ;;  %v1672_v36 = vrot.slane %v6927_v17, 2  ;;  %v6964_v44 = vpack.c.bf16 %v6944_v33, %v6865_v45  ;;  %v6967_v46 = vpack.c.bf16 %v6947_v34, %v1665_v3  ;;  %v52_v24 = vld [vmem:[%s8925_s0 + $0xe0] sm:$0xff] }
  0x16   :  { %v6970_v47 = vsel %vm227_vm1, %v249_v27, %v250_v28  ;;  %v6973_v48 = vsel %vm1650_vm3, %v1669_v29, %v1670_v30  ;;  %v1673_v50 = vrot.slane %v79_v19, 2  ;;  %v6979_v51 = vmax.f32 %v44_v31, 0.0  ;;  %v53_v29 = vld [vmem:[%s8925_s0 + $0xe8] sm:$0x3]  ;;  %v54_v30 = vld [vmem:[%s8925_s0 + $0xf0] sm:$0xff] }
  0x17   :  { %9018 = vst [vmem:[#allocation7_spill] sm:$0xff] %v6964_v44  ;;  %9019 = vst [vmem:[#allocation8_spill] sm:$0xff] %v6967_v46  ;;  %v6977_v49 = vpack.c.bf16 %v6970_v47, %v6950_v35  ;;  %v85_v52 = vmax.f32 %v45_v26, 0.0  ;;  %5574 = vmatprep.mubr.msk.bf16.mxu0 %vm302_vm2, %v6964_v44  ;;  %5718 = vmatprep.mubr.msk.bf16.mxu1 %vm302_vm2, %v6967_v46  ;;  %v6985_v53 = vmax.f32 %v46_v32, 0.0  ;;  %v87_v54 = vmax.f32 %v47_v37, 0.0 }
  0x18   :  { %v6990_v56 = vmax.f32 %v48_v38, 0.0  ;;  %v89_v57 = vmax.f32 %v49_v41, 0.0  ;;  %v6995_v58 = vsel %vm1650_vm3, %v1672_v36, %v1673_v50  ;;  %v252_v59 = vrot.slane %v6979_v51, 1  ;;  %v55_v38 = vld [vmem:[%s8925_s0 + $0xf8] sm:$0x3] }
  0x19   :  { %9020 = vst [vmem:[#allocation9_spill] sm:$0xff] %v6977_v49  ;;  %5575 = vmatmul.mubr.msk.bf16.gmra.mrb[4].mxu0 %vm302_vm2, %v6977_v49  ;;  %v253_v60 = vrot.slane %v85_v52, 1  ;;  %v1675_v61 = vrot.slane %v6979_v51, 2  ;;  %v7004_v63 = vpack.c.bf16 %v6995_v58, %v6973_v48  ;;  %v255_v0 = vrot.slane %v6985_v53, 1 }
  0x1a   :  { %v256_v1 = vrot.slane %v87_v54, 1  ;;  %v1676_v2 = vrot.slane %v85_v52, 2  ;;  %v1678_v9 = vrot.slane %v6985_v53, 2  ;;  %v1679_v12 = vrot.slane %v87_v54, 2 }
  0x1b   :  { %9021 = vst [vmem:[#allocation10_spill] sm:$0xff] %v7004_v63  ;;  %v254_v3 = vsel %vm227_vm1, %v252_v59, %v253_v60  ;;  %v7009_v14 = vmax.f32 %v50_v55, 0.0  ;;  %5719 = vmatmul.mubr.msk.bf16.gmra.mrb[4].mxu1 %vm302_vm2, %v7004_v63  ;;  %v91_v20 = vmax.f32 %v51_v62, 0.0  ;;  %v258_v22 = vrot.slane %v6990_v56, 1 }
  0x1c   :  { %v7014_v15 = vsel %vm227_vm1, %v255_v0, %v256_v1  ;;  %v1677_v19 = vsel %vm1650_vm3, %v1675_v61, %v1676_v2  ;;  %v7025_v26 = vsel %vm1650_vm3, %v1678_v9, %v1679_v12  ;;  %v259_v27 = vrot.slane %v89_v57, 1  ;;  %v56_v2 = vld [vmem:[%s8925_s0 + $0x100] sm:$0xff]  ;;  %v58_v9 = vld [vmem:[%s8925_s0 + $0x110] sm:$0xff] }
  0x1d   :  { %v7022_v25 = vpack.c.bf16 %v7014_v15, %v254_v3  ;;  %v261_v28 = vrot.slane %v7009_v14, 1  ;;  %v1719_v31 = vpack.c.bf16 %v7025_v26, %v1677_v19  ;;  %v262_v32 = vrot.slane %v91_v20, 1  ;;  %v57_v3 = vld [vmem:[%s8925_s0 + $0x108] sm:$0x3] }
  0x1e   :  { %v1681_v36 = vrot.slane %v6990_v56, 2  ;;  %v1682_v37 = vrot.slane %v89_v57, 2  ;;  %v7042_v41 = vsel %vm227_vm1, %v258_v22, %v259_v27  ;;  %v1684_v50 = vrot.slane %v7009_v14, 2 }
  0x1f   :  { %5578 = vmatprep.mubr.msk.bf16.mxu0 %vm302_vm2, %v7022_v25  ;;  %v1685_v52 = vrot.slane %v91_v20, 2  ;;  %v7045_v54 = vmax.f32 %v52_v24, 0.0  ;;  %5722 = vmatprep.mubr.msk.bf16.mxu1 %vm302_vm2, %v1719_v31  ;;  %v7049_v55 = vsel %vm227_vm1, %v261_v28, %v262_v32  ;;  %v93_v59 = vmax.f32 %v53_v29, 0.0  ;;  %v59_v24 = vld [vmem:[%s8925_s0 + $0x118] sm:$0x3] }
  0x20   :  { %v1683_v57 = vsel %vm1650_vm3, %v1681_v36, %v1682_v37  ;;  %v7052_v60 = vmax.f32 %v54_v30, 0.0  ;;  %v7056_v61 = vpack.c.bf16 %v7049_v55, %v7042_v41  ;;  %v95_v0 = vmax.f32 %v55_v38, 0.0 }
  0x21   :  { %v1686_v62 = vsel %vm1650_vm3, %v1684_v50, %v1685_v52  ;;  %v264_v1 = vrot.slane %v7045_v54, 1  ;;  %v265_v19 = vrot.slane %v93_v59, 1  ;;  %v1687_v22 = vrot.slane %v7045_v54, 2 }
  0x22   :  { %9022 = vst [vmem:[#allocation11_spill] sm:$0xff] %v7056_v61  ;;  %v7069_v12 = vpack.c.bf16 %v1686_v62, %v1683_v57  ;;  %v267_v20 = vrot.slane %v7052_v60, 1  ;;  %5579 = vmatmul.mubr.msk.bf16.gmra.mrb[8].mxu0 %vm302_vm2, %v7056_v61  ;;  %v268_v27 = vrot.slane %v95_v0, 1  ;;  %v1688_v28 = vrot.slane %v93_v59, 2 }
  0x23   :  { %v1690_v29 = vrot.slane %v7052_v60, 2  ;;  %v1691_v30 = vrot.slane %v95_v0, 2  ;;  %v7082_v31 = vsel %vm227_vm1, %v264_v1, %v265_v19  ;;  %v7084_v32 = vmax.f32 %v56_v2, 0.0 }
  0x24   :  { %9023 = vst [vmem:[#allocation12_spill] sm:$0xff] %v7069_v12  ;;  %5723 = vmatmul.mubr.msk.bf16.gmra.mrb[8].mxu1 %vm302_vm2, %v7069_v12  ;;  %v97_v36 = vmax.f32 %v57_v3, 0.0  ;;  %v7086_v37 = vmax.f32 %v58_v9, 0.0  ;;  %v7089_v38 = vsel %vm227_vm1, %v267_v20, %v268_v27  ;;  %v1689_v50 = vsel %vm1650_vm3, %v1687_v22, %v1688_v28 }
  0x25   :  { %v1692_v52 = vsel %vm1650_vm3, %v1690_v29, %v1691_v30  ;;  %v99_v59 = vmax.f32 %v59_v24, 0.0  ;;  %v7095_v0 = vpack.c.bf16 %v7089_v38, %v7082_v31  ;;  %v270_v1 = vrot.slane %v7084_v32, 1 }
  0x26   :  { %v7097_v12 = vpack.c.bf16 %v1692_v52, %v1689_v50  ;;  %v271_v2 = vrot.slane %v97_v36, 1  ;;  %v273_v3 = vrot.slane %v7086_v37, 1  ;;  %v1693_v19 = vrot.slane %v7084_v32, 2 }
  0x27   :  { %9024 = vst [vmem:[#allocation13_spill] sm:$0xff] %v7095_v0  ;;  %v274_v9 = vrot.slane %v99_v59, 1  ;;  %v1694_v20 = vrot.slane %v97_v36, 2  ;;  %5582 = vmatprep.mubr.msk.bf16.mxu0 %vm302_vm2, %v7095_v0  ;;  %v1696_v24 = vrot.slane %v7086_v37, 2  ;;  %v1697_v27 = vrot.slane %v99_v59, 2 }
  0x28   :  { %9025 = vst [vmem:[#allocation14_spill] sm:$0xff] %v7097_v12  ;;  %5726 = vmatprep.mubr.msk.bf16.mxu1 %vm302_vm2, %v7097_v12  ;;  %v7107_v22 = vsel %vm227_vm1, %v270_v1, %v271_v2  ;;  %v186_v30 = vpack.c.bf16 %v6829_v16, %v6818_v11  ;;  %v7130_v59 = vpack.c.bf16 %v6831_v18, %v6829_v16  ;;  %vm1631_vm4 = vcmask 23552  }
  0x29   :  { %v7111_v28 = vsel %vm227_vm1, %v273_v3, %v274_v9  ;;  %v1695_v29 = vsel %vm1650_vm3, %v1693_v19, %v1694_v20  ;;  %v7121_v12 = vsel %vm1650_vm3, %v1696_v24, %v1697_v27  ;;  %v7134_v11 = vpack.c.bf16 %v6838_v23, %v6836_v21 }
  0x2a   :  { %v7118_v36 = vpack.c.bf16 %v7111_v28, %v7107_v22  ;;  %v7124_v1 = vpack.c.bf16 %v7121_v12, %v1695_v29  ;;  %9028 = vst [vmem:[#allocation17_spill] sm:$0xff] %v7130_v59  ;;  %v7141_v2 = vpack.c.bf16 %v6914_v10, %v6904_v6  ;;  %v7147_v16 = vpack.c.bf16 %v7045_v54, %v7009_v14 }
  0x2b   :  { %9029 = vst [vmem:[#allocation18_spill] sm:$0xff] %v7134_v11  ;;  %v7151_v3 = vpack.c.bf16 %v6836_v21, %v6831_v18  ;;  %v7155_v9 = vpack.c.bf16 %v6973_v48, %v6947_v34  ;;  %v587_v19 = vsel %vm327_vm0, %v6909_v7, 0  ;;  %v7161_v20 = vpack.c.bf16 %v6904_v6, %v6838_v23  ;;  %v4970_v18 = vld [vmem:[%s8924_s2 + $0xc] sm:$0xf]  ;;  %v5043_v23 = vld [vmem:[%s8924_s2 + $0x1c] sm:$0xf] }
  0x2c   :  { %9026 = vst [vmem:[#allocation15_spill] sm:$0xff] %v7118_v36  ;;  %9027 = vst [vmem:[#allocation16_spill] sm:$0xff] %v7124_v1  ;;  %5583 = vmatmul.mubr.msk.bf16.gmra.mrb[12].mxu0 %vm302_vm2, %v7118_v36  ;;  %5727 = vmatmul.mubr.msk.bf16.gmra.mrb[12].mxu1 %vm302_vm2, %v7124_v1  ;;  %v7166_v24 = vpack.c.bf16 %v1683_v57, %v7025_v26  ;;  %v7173_v21 = vpack.c.bf16 %v1689_v50, %v1686_v62  ;;  %v749_v57 = vsel %vm327_vm0, %v4970_v18, 0  ;;  %v108_v1 = vld [vmem:[%s8927_s1 + $0x20] sm:$0xff] }
  0x2d   :  { %5588 = vmatprep.mubr.msk.bf16.mxu0 %vm302_vm2, %v186_v30  ;;  %9030 = vst [vmem:[#allocation19_spill] sm:$0xff] %v7141_v2  ;;  %5732 = vmatprep.mubr.msk.bf16.mxu1 %vm302_vm2, %v6856_v40  ;;  %9031 = vst [vmem:[#allocation20_spill] sm:$0xff] %v7147_v16  ;;  %v1952_v40 = vsel %vm327_vm0, %v6921_v13, 0  ;;  %v7175_v7 = vpack.c.bf16 %v1695_v29, %v1692_v52  ;;  %v7189_v6 = vpack.c.bf16 %v6927_v17, %v6914_v10  ;;  %v872_v29 = vld [vmem:[%s8926_s3] sm:$0xf] }
  0x2e   :  { %9032 = vst [vmem:[#allocation21_spill] sm:$0xff] %v7151_v3  ;;  %9033 = vst [vmem:[#allocation22_spill] sm:$0xff] %v7155_v9  ;;  %v190_v13 = vpack.c.bf16 %v6985_v53, %v6979_v51  ;;  %v7203_v10 = vpack.c.bf16 %v7009_v14, %v6990_v56  ;;  %v7207_v34 = vpack.c.bf16 %v7052_v60, %v7045_v54  ;;  %v40_v51 = vld [vmem:[%s8925_s0 + $0x80] sm:$0xff]  ;;  %v7227_v14 = vld [vmem:[%s8925_s0 + $0x88] sm:$0x3]  ;;  %v2110_v52 = vsel %vm327_vm0, %v5043_v23, 0 }
  0x2f   :  { %9034 = vst [vmem:[#allocation23_spill] sm:$0xff] %v7161_v20  ;;  %9035 = vst [vmem:[#allocation24_spill] sm:$0xff] %v7166_v24  ;;  %v7219_v48 = vpack.c.bf16 %v7086_v37, %v7084_v32  ;;  %v81_v26 = vmax.f32 %v7227_v14, 0.0  ;;  %v7242_v54 = vpack.c.bf16 %v6865_v45, %v6854_v39  ;;  %v7249_v27 = vpack.c.bf16 %v6950_v35, %v6944_v33  ;;  %v5052_v39 = vld [vmem:[%s8926_s3 + $0x10] sm:$0xf] }
  0x30   :  { %9036 = vst [vmem:[#allocation25_spill] sm:$0xff] %v7173_v21  ;;  %9037 = vst [vmem:[#allocation26_spill] sm:$0xff] %v7175_v7  ;;  %v7280_v30 = vpack.c.bf16 %v6990_v56, %v6985_v53  ;;  %v61_v53 = vld [vmem:[%s8925_s0 + $0x128] sm:$0x3]  ;;  %v130_v56 = vld [vmem:[%s8927_s1 + $0xd0] sm:$0xff] }
  0x31   :  { %9038 = vst [vmem:[#allocation27_spill] sm:$0xff] %v7189_v6  ;;  %9039 = vst [vmem:[#allocation28_spill] sm:$0xff] %v7203_v10  ;;  %v707_v50 = vrot.slane %v81_v26, 1 }
  0x32   :  { %9040 = vst [vmem:[#allocation29_spill] sm:$0xff] %v7207_v34  ;;  %9041 = vst [vmem:[#allocation30_spill] sm:$0xff] %v7219_v48 }
  0x33   :  { %9043 = vst [vmem:[#allocation32_spill] sm:$0xff] %v7242_v54  ;;  %9044 = vst [vmem:[#allocation33_spill] sm:$0xff] %v7249_v27 }
  0x34   :  { %5589 = vmatmul.mubr.msk.bf16.vlgmr.msra.gmra.mrb[0].mxu0 %vm302_vm2, %v7151_v3  ;;  %5733 = vmatmul.mubr.msk.bf16.vlgmr.msra.gmra.mrb[0].mxu1 %vm302_vm2, %v6860_v42  ;;  %9048 = vst [vmem:[#allocation37_spill] sm:$0xff] %v7280_v30  ;;  %v7541_v42 = vld [vmem:[%s8927_s1 + $0xb8] sm:$0x3] }
  0x35   :  { %5605 = vmatpush3.bf16.msra.mxu0 %v587_v19  ;;  %5749 = vmatpush3.bf16.msra.mxu1 %v1952_v40  ;;  %v110_v19 = vld [vmem:[%s8927_s1 + $0x30] sm:$0xff]  ;;  %v112_v40 = vld [vmem:[%s8927_s1 + $0x40] sm:$0xff] }
  0x36   :  { %5592 = vmatprep.mubr.msk.bf16.mxu0 %vm302_vm2, %v7161_v20  ;;  %5736 = vmatprep.mubr.msk.bf16.mxu1 %vm302_vm2, %v6964_v44 }
  0x37   :  { %6595 = vmatprep.subr.msk.bf16.mxu0 %vm327_vm0, %v4970_v18  ;;  %6603 = vmatprep.subr.msk.bf16.mxu1 %vm327_vm0, %v5043_v23  ;;  %v132_v18 = vld [vmem:[%s8927_s1 + $0xe0] sm:$0xff] }
  0x38   :  { %v7320_v14 = vmax.f32 %v132_v18, 0.0  ;;  %v7413_v18 = vld [vmem:[%s8927_s1 + $0x8] sm:$0x3] }
  0x3c   :  { %5593 = vmatmul.mubr.msk.bf16.gmra.mrb[4].mxu0 %vm302_vm2, %v7189_v6  ;;  %5737 = vmatmul.mubr.msk.bf16.gmra.mrb[4].mxu1 %vm302_vm2, %v6977_v49 }
  0x3d   :  { %5596 = vmatprep.mubr.msk.bf16.mxu0 %vm302_vm2, %v190_v13  ;;  %5740 = vmatprep.mubr.msk.bf16.mxu1 %vm302_vm2, %v7022_v25  ;;  %v7237_v25 = vmax.f32 %v40_v51, 0.0  ;;  %v101_v13 = vmax.f32 %v61_v53, 0.0  ;;  %v7318_v51 = vmax.f32 %v130_v56, 0.0  ;;  %v104_v53 = vld [vmem:[%s8927_s1] sm:$0xff]  ;;  %v106_v56 = vld [vmem:[%s8927_s1 + $0x10] sm:$0xff] }
  0x3f   :  { %9042 = vst [vmem:[#allocation31_spill] sm:$0xff] %v7237_v25  ;;  %v706_v62 = vrot.slane %v7237_v25, 1  ;;  %v7271_v33 = vpack.c.bf16 %v7237_v25, %v6927_v17  ;;  %v7290_v17 = vpack.c.bf16 %v7042_v41, %v7014_v15  ;;  %v7306_v15 = vmax.f32 %v110_v19, 0.0 }
  0x40   :  { %v7308_v41 = vmax.f32 %v112_v40, 0.0  ;;  %v7340_v19 = vpack.c.bf16 %v7107_v22, %v7089_v38  ;;  %v2068_v38 = vrot.slane %v81_v26, 2  ;;  %v2228_v22 = vsel %vm327_vm0, %v5052_v39, 0 }
  0x41   :  { %v7264_v45 = vsel %vm227_vm1, %v706_v62, %v707_v50  ;;  %9046 = vst [vmem:[#allocation35_spill] sm:$0xff] %v7271_v33  ;;  %9049 = vst [vmem:[#allocation38_spill] sm:$0xff] %v7290_v17  ;;  %v7328_v62 = vpack.c.bf16 %v7320_v14, %v7318_v51  ;;  %v7332_v50 = vpack.c.bf16 %v7082_v31, %v7049_v55 }
  0x42   :  { %9045 = vst [vmem:[#allocation34_spill] sm:$0xff] %v7264_v45  ;;  %v7276_v35 = vpack.c.bf16 %v7264_v45, %v6970_v47  ;;  %v60_v47 = vld [vmem:[%s8925_s0 + $0x120] sm:$0xff]  ;;  %9054 = vst [vmem:[#allocation43_spill] sm:$0xff] %v7340_v19  ;;  %v1057_v45 = vrot.slane %v7308_v41, 1 }
  0x43   :  { %v7314_v23 = vmax.f32 %v60_v47, 0.0  ;;  %9051 = vst [vmem:[#allocation40_spill] sm:$0xff] %v7328_v62  ;;  %9052 = vst [vmem:[#allocation41_spill] sm:$0xff] %v7332_v50  ;;  %v710_v47 = vrot.slane %v101_v13, 1 }
  0x44   :  { %5597 = vmatmul.mubr.msk.bf16.gmra.mrb[8].mxu0 %vm302_vm2, %v7203_v10  ;;  %5741 = vmatmul.mubr.msk.bf16.gmra.mrb[8].mxu1 %vm302_vm2, %v7056_v61  ;;  %9047 = vst [vmem:[#allocation36_spill] sm:$0xff] %v7276_v35 }
  0x45   :  { %5600 = vmatprep.mubr.msk.bf16.mxu0 %vm302_vm2, %v7207_v34  ;;  %5744 = vmatprep.mubr.msk.bf16.mxu1 %vm302_vm2, %v7095_v0  ;;  %9050 = vst [vmem:[#allocation39_spill] sm:$0xff] %v7314_v23  ;;  %v709_v40 = vrot.slane %v7314_v23, 1  ;;  %v124_v34 = vld [vmem:[%s8927_s1 + $0xa0] sm:$0xff]  ;;  %v7528_v0 = vld [vmem:[%s8927_s1 + $0xa8] sm:$0x3] }
  0x47   :  { %v7352_v55 = vsel %vm227_vm1, %v709_v40, %v710_v47  ;;  %v7426_v40 = vmax.f32 %v104_v53, 0.0  ;;  %v7428_v47 = vmax.f32 %v106_v56, 0.0  ;;  %v7444_v53 = vld [vmem:[%s8927_s1 + $0x38] sm:$0x3] }
  0x48   :  { %9055 = vst [vmem:[#allocation44_spill] sm:$0xff] %v7352_v55  ;;  %v7360_v31 = vpack.c.bf16 %v7352_v55, %v7111_v28  ;;  %v7378_v28 = vld [vmem:[%s8926_s3 + $0x4] sm:$0xf]  ;;  %v7460_v55 = vld [vmem:[%s8927_s1 + $0x48] sm:$0x3] }
  0x49   :  { %v1045_v56 = vrot.slane %v7426_v40, 1 }
  0x4a   :  { %9057 = vst [vmem:[#allocation46_spill] sm:$0xff] %v7360_v31 }
  0x4c   :  { %5601 = vmatmul.mubr.msk.bf16.gmra.mrb[12].mxu0 %vm302_vm2, %v7219_v48  ;;  %5745 = vmatmul.mubr.msk.bf16.gmra.mrb[12].mxu1 %vm302_vm2, %v7118_v36  ;;  %v864_v36 = vpack.c.bf16 %v7428_v47, %v7426_v40 }
  0x4d   :  { %5606 = vmatprep.mubr.msk.bf16.mxu0 %vm302_vm2, %v7130_v59  ;;  %5750 = vmatprep.mubr.msk.bf16.mxu1 %vm302_vm2, %v6862_v43 }
  0x54   :  { %5607 = vmatmul.mubr.msk.bf16.vlgmr.msra.gmra.mrb[0].mxu0 %vm302_vm2, %v7134_v11  ;;  %5751 = vmatmul.mubr.msk.bf16.vlgmr.msra.gmra.mrb[0].mxu1 %vm302_vm2, %v7242_v54 }
  0x55   :  { %5623 = vmatpush3.bf16.msra.mxu0 %v749_v57  ;;  %5767 = vmatpush3.bf16.msra.mxu1 %v2110_v52  ;;  %v7324_v57 = vpack.c.bf16 %v7308_v41, %v7306_v15  ;;  %v7336_v52 = vpack.c.bf16 %v7084_v32, %v7052_v60  ;;  %v7356_v60 = vpack.c.bf16 %v7314_v23, %v7086_v37  ;;  %v898_v32 = vsel %vm327_vm0, %v872_v29, 0 }
  0x56   :  { %5610 = vmatprep.mubr.msk.bf16.mxu0 %vm302_vm2, %v7141_v2  ;;  %5754 = vmatprep.mubr.msk.bf16.mxu1 %vm302_vm2, %v7249_v27  ;;  %v2067_v37 = vrot.slane %v7237_v25, 2  ;;  %v9065_v25 = vmax.f32 %v7460_v55, 0.0  ;;  %v7601_v2 = vld [vmem:[%s8927_s1 + $0xc8] sm:$0x3] }
  0x57   :  { %6596 = vmatprep.subr.msk.bf16.mxu0 %vm327_vm0, %v872_v29  ;;  %6604 = vmatprep.subr.msk.bf16.mxu1 %vm327_vm0, %v5052_v39  ;;  %9053 = vst [vmem:[#allocation42_spill] sm:$0xff] %v7336_v52  ;;  %9056 = vst [vmem:[#allocation45_spill] sm:$0xff] %v7356_v60  ;;  %v7385_v29 = vld [vmem:[%s8926_s3 + $0x14] sm:$0xf] }
  0x58   :  { %v7390_v26 = vsel %vm1650_vm3, %v2067_v37, %v2068_v38  ;;  %v2070_v38 = vrot.slane %v7314_v23, 2  ;;  %v1058_v49 = vrot.slane %v9065_v25, 1 }
  0x59   :  { %9058 = vst [vmem:[#allocation47_spill] sm:$0xff] %v7390_v26  ;;  %v7400_v39 = vpack.c.bf16 %v7390_v26, %v6995_v58  ;;  %v7418_v58 = vld [vmem:[%s8927_s1 + $0x18] sm:$0x3]  ;;  %v7439_v26 = vld [vmem:[%s8927_s1 + $0x28] sm:$0x3] }
  0x5a   :  { %v9060_v63 = vmax.f32 %v7418_v58, 0.0  ;;  %v9063_v10 = vmax.f32 %v7439_v26, 0.0 }
  0x5b   :  { %9059 = vst [vmem:[#allocation48_spill] sm:$0xff] %v7400_v39 }
  0x5c   :  { %5611 = vmatmul.mubr.msk.bf16.gmra.mrb[4].mxu0 %vm302_vm2, %v7271_v33  ;;  %5755 = vmatmul.mubr.msk.bf16.gmra.mrb[4].mxu1 %vm302_vm2, %v7276_v35  ;;  %v1049_v46 = vrot.slane %v9060_v63, 1 }
  0x5d   :  { %5614 = vmatprep.mubr.msk.bf16.mxu0 %vm302_vm2, %v7280_v30  ;;  %5758 = vmatprep.mubr.msk.bf16.mxu1 %vm302_vm2, %v7290_v17  ;;  %v7560_v30 = vmax.f32 %v124_v34, 0.0 }
  0x64   :  { %5615 = vmatmul.mubr.msk.bf16.gmra.mrb[8].mxu0 %vm302_vm2, %v7147_v16  ;;  %5759 = vmatmul.mubr.msk.bf16.gmra.mrb[8].mxu1 %vm302_vm2, %v7332_v50 }
  0x65   :  { %5618 = vmatprep.mubr.msk.bf16.mxu0 %vm302_vm2, %v7336_v52  ;;  %5762 = vmatprep.mubr.msk.bf16.mxu1 %vm302_vm2, %v7340_v19 }
  0x6c   :  { %5619 = vmatmul.mubr.msk.bf16.gmra.mrb[12].mxu0 %vm302_vm2, %v7356_v60  ;;  %5763 = vmatmul.mubr.msk.bf16.gmra.mrb[12].mxu1 %vm302_vm2, %v7360_v31 }
  0x6d   :  { %5624 = vmatprep.mubr.msk.bf16.mxu0 %vm302_vm2, %v6862_v43  ;;  %5768 = vmatprep.mubr.msk.bf16.mxu1 %vm302_vm2, %v6902_v5 }
  0x74   :  { %5625 = vmatmul.mubr.msk.bf16.vlgmr.msra.gmra.mrb[0].mxu0 %vm302_vm2, %v7242_v54  ;;  %5769 = vmatmul.mubr.msk.bf16.vlgmr.msra.gmra.mrb[0].mxu1 %vm302_vm2, %v6912_v8  ;;  %v7709_v8 = vld [vmem:[%s8927_s1 + $0x118] sm:$0x3] }
  0x75   :  { %5641 = vmatpush3.bf16.msra.mxu0 %v898_v32  ;;  %5785 = vmatpush3.bf16.msra.mxu1 %v2228_v22  ;;  %v8939_v32 = vmax.f32 %v7413_v18, 0.0  ;;  %v2071_v22 = vrot.slane %v101_v13, 2  ;;  %v1048_v13 = vrot.slane %v7428_v47, 1  ;;  %v9005_v43 = vmax.f32 %v7709_v8, 0.0 }
  0x76   :  { %5628 = vmatprep.mubr.msk.bf16.mxu0 %vm302_vm2, %v7249_v27  ;;  %5772 = vmatprep.mubr.msk.bf16.mxu1 %vm302_vm2, %v7155_v9 }
  0x77   :  { %6597 = vmatprep.subr.msk.bf16.mxu0 %vm327_vm0, %v7378_v28  ;;  %6605 = vmatprep.subr.msk.bf16.mxu1 %vm327_vm0, %v7385_v29  ;;  %v1046_v37 = vrot.slane %v8939_v32, 1  ;;  %v7455_v4 = vsel %vm1650_vm3, %v2070_v38, %v2071_v22  ;;  %v7466_v32 = vmax.f32 %v108_v1, 0.0  ;;  %v114_v38 = vld [vmem:[%s8927_s1 + $0x50] sm:$0xff]  ;;  %v7476_v22 = vld [vmem:[%s8927_s1 + $0x58] sm:$0x3]  ;;  %v7486_v23 = vsel %vm227_vm1, %v1048_v13, %v1049_v46 }
  0x78   :  { %9061 = vst [vmem:[#allocation49_spill] sm:$0xff] %v7455_v4  ;;  %v7482_v1 = vpack.c.bf16 %v7455_v4, %v7121_v12  ;;  %v7490_v48 = vmax.f32 %v114_v38, 0.0  ;;  %v1052_v12 = vrot.slane %v9063_v10, 1  ;;  %v1054_v4 = vrot.slane %v7306_v15, 1  ;;  %v118_v38 = vld [vmem:[%s8927_s1 + $0x70] sm:$0xff] }
  0x79   :  { %v1047_v63 = vsel %vm227_vm1, %v1045_v56, %v1046_v37  ;;  %v1051_v61 = vrot.slane %v7466_v32, 1  ;;  %v9064_v37 = vmax.f32 %v7444_v53, 0.0  ;;  %v116_v56 = vld [vmem:[%s8927_s1 + $0x60] sm:$0xff]  ;;  %v7512_v10 = vld [vmem:[%s8927_s1 + $0x68] sm:$0x3]  ;;  %v9066_v44 = vmax.f32 %v7476_v22, 0.0 }
  0x7a   :  { %9062 = vst [vmem:[#allocation50_spill] sm:$0xff] %v7482_v1  ;;  %v7504_v13 = vpack.c.bf16 %v7486_v23, %v1047_v63  ;;  %v126_v63 = vld [vmem:[%s8927_s1 + $0xb0] sm:$0xff]  ;;  %v1060_v6 = vrot.slane %v7490_v48, 1  ;;  %v7552_v60 = vmax.f32 %v116_v56, 0.0  ;;  %v7557_v52 = vmax.f32 %v118_v38, 0.0 }
  0x7b   :  { %v1055_v46 = vrot.slane %v9064_v37, 1  ;;  %v7517_v37 = vld [vmem:[%s8927_s1 + $0x78] sm:$0x3]  ;;  %v1061_v20 = vrot.slane %v9066_v44, 1  ;;  %v7547_v3 = vsel %vm227_vm1, %v1051_v61, %v1052_v12  ;;  %v8968_v44 = vmax.f32 %v7512_v10, 0.0 }
  0x7c   :  { %5629 = vmatmul.mubr.msk.bf16.gmra.mrb[4].mxu0 %vm302_vm2, %v7276_v35  ;;  %5773 = vmatmul.mubr.msk.bf16.gmra.mrb[4].mxu1 %vm302_vm2, %v7400_v39  ;;  %v8971_v16 = vmax.f32 %v7517_v37, 0.0  ;;  %v7563_v61 = vmax.f32 %v126_v63, 0.0  ;;  %v7568_v12 = vpack.c.bf16 %v7306_v15, %v7466_v32  ;;  %v7573_v56 = vsel %vm227_vm1, %v1057_v45, %v1058_v49  ;;  %v128_v49 = vld [vmem:[%s8927_s1 + $0xc0] sm:$0xff] }
  0x7d   :  { %5632 = vmatprep.mubr.msk.bf16.mxu0 %vm302_vm2, %v7290_v17  ;;  %5776 = vmatprep.mubr.msk.bf16.mxu1 %vm302_vm2, %v7166_v24  ;;  %v7550_v25 = vsel %vm227_vm1, %v1054_v4, %v1055_v46  ;;  %v1144_v46 = vsel %vm327_vm0, %v7378_v28, 0  ;;  %v7576_v38 = vsel %vm227_vm1, %v1060_v6, %v1061_v20  ;;  %v7584_v63 = vpack.c.bf16 %v7490_v48, %v7308_v41  ;;  %v138_v17 = vld [vmem:[%s8927_s1 + $0x110] sm:$0xff] }
  0x7e   :  { %9067 = vst [vmem:[#allocation51_spill] sm:$0xff] %v7568_v12  ;;  %v7580_v34 = vpack.c.bf16 %v7550_v25, %v7547_v3  ;;  %v1063_v4 = vrot.slane %v7552_v60, 1  ;;  %v1066_v20 = vrot.slane %v7557_v52, 1  ;;  %v1067_v6 = vrot.slane %v8971_v16, 1 }
  0x7f   :  { %9068 = vst [vmem:[#allocation52_spill] sm:$0xff] %v7584_v63  ;;  %v1069_v45 = vrot.slane %v7560_v30, 1  ;;  %v9069_v28 = vmax.f32 %v7528_v0, 0.0  ;;  %v7607_v11 = vpack.c.bf16 %v7576_v38, %v7573_v56  ;;  %v1072_v59 = vrot.slane %v7563_v61, 1 }
  0x80   :  { %v9070_v16 = vmax.f32 %v7541_v42, 0.0  ;;  %v7726_v5 = vmax.f32 %v138_v17, 0.0 }
  0x81   :  { %v1070_v33 = vrot.slane %v9069_v28, 1  ;;  %v7615_v28 = vld [vmem:[%s8927_s1 + $0xd8] sm:$0x3] }
  0x82   :  { %v8989_v24 = vmax.f32 %v7615_v28, 0.0 }
  0x84   :  { %5633 = vmatmul.mubr.msk.bf16.gmra.mrb[8].mxu0 %vm302_vm2, %v7332_v50  ;;  %5777 = vmatmul.mubr.msk.bf16.gmra.mrb[8].mxu1 %vm302_vm2, %v7173_v21  ;;  %v7645_v21 = vld [vmem:[%s8926_s3 + $0x18] sm:$0xf] }
  0x85   :  { %5636 = vmatprep.mubr.msk.bf16.mxu0 %vm302_vm2, %v7340_v19  ;;  %5780 = vmatprep.mubr.msk.bf16.mxu1 %vm302_vm2, %v7175_v7  ;;  %v7635_v7 = vld [vmem:[%s8926_s3 + $0x8] sm:$0xf] }
  0x8c   :  { %5637 = vmatmul.mubr.msk.bf16.gmra.mrb[12].mxu0 %vm302_vm2, %v7360_v31  ;;  %5781 = vmatmul.mubr.msk.bf16.gmra.mrb[12].mxu1 %vm302_vm2, %v7482_v1  ;;  %v1073_v1 = vrot.slane %v9070_v16, 1  ;;  %v134_v31 = vld [vmem:[%s8927_s1 + $0xf0] sm:$0xff]  ;;  %v7630_v16 = vld [vmem:[%s8927_s1 + $0xf8] sm:$0x3] }
  0x8d   :  { %5642 = vmatprep.mubr.msk.bf16.mxu0 %vm302_vm2, %v864_v36  ;;  %5786 = vmatprep.mubr.msk.bf16.mxu1 %vm302_vm2, %v7504_v13  ;;  %v1064_v36 = vrot.slane %v8968_v44, 1  ;;  %v2442_v44 = vsel %vm327_vm0, %v7385_v29, 0  ;;  %v7625_v29 = vld [vmem:[%s8927_s1 + $0xe8] sm:$0x3]  ;;  %v9076_v9 = vmax.f32 %v7630_v16, 0.0 }
  0x8e   :  { %v7660_v19 = vsel %vm227_vm1, %v1072_v59, %v1073_v1  ;;  %v9075_v39 = vmax.f32 %v7625_v29, 0.0 }
  0x8f   :  { %v7650_v50 = vsel %vm227_vm1, %v1063_v4, %v1064_v36  ;;  %9072 = vst [vmem:[#allocation54_spill] sm:$0xff] %v7660_v19  ;;  %v9074_v4 = vmax.f32 %v7601_v2, 0.0  ;;  %v1079_v36 = vrot.slane %v8989_v24, 1  ;;  %v1085_v27 = vrot.slane %v9076_v9, 1 }
  0x90   :  { %v1082_v35 = vrot.slane %v9075_v39, 1 }
  0x94   :  { %5643 = vmatmul.mubr.msk.bf16.vlgmr.msra.gmra.mrb[0].mxu0 %vm302_vm2, %v7568_v12  ;;  %5787 = vmatmul.mubr.msk.bf16.vlgmr.msra.gmra.mrb[0].mxu1 %vm302_vm2, %v7580_v34  ;;  %v7639_v12 = vmax.f32 %v128_v49, 0.0  ;;  %v1071_v49 = vsel %vm227_vm1, %v1069_v45, %v1070_v33  ;;  %v7670_v33 = vpack.c.bf16 %v7557_v52, %v7552_v60  ;;  %v1078_v45 = vrot.slane %v7318_v51, 1 }
  0x95   :  { %5659 = vmatpush3.bf16.msra.mxu0 %v1144_v46  ;;  %5803 = vmatpush3.bf16.msra.mxu1 %v2442_v44  ;;  %v7653_v46 = vsel %vm227_vm1, %v1066_v20, %v1067_v6  ;;  %v7662_v44 = vmax.f32 %v134_v31, 0.0  ;;  %v868_v31 = vpack.c.bf16 %v7563_v61, %v7560_v30  ;;  %v1076_v20 = vrot.slane %v9074_v4, 1  ;;  %v7698_v4 = vld [vmem:[%s8927_s1 + $0x108] sm:$0x3] }
  0x96   :  { %5646 = vmatprep.mubr.msk.bf16.mxu0 %vm302_vm2, %v7584_v63  ;;  %9071 = vst [vmem:[#allocation53_spill] sm:$0xff] %v7653_v46  ;;  %5790 = vmatprep.mubr.msk.bf16.mxu1 %vm302_vm2, %v7607_v11  ;;  %9073 = vst [vmem:[#allocation55_spill] sm:$0xff] %v7670_v33  ;;  %v7676_v59 = vpack.c.bf16 %v7653_v46, %v7650_v50  ;;  %v1075_v1 = vrot.slane %v7639_v12, 1  ;;  %v7684_v6 = vpack.c.bf16 %v7660_v19, %v1071_v49  ;;  %v136_v63 = vld [vmem:[%s8927_s1 + $0x100] sm:$0xff] }
  0x97   :  { %6598 = vmatprep.subr.msk.bf16.mxu0 %vm327_vm0, %v7635_v7  ;;  %6606 = vmatprep.subr.msk.bf16.mxu1 %vm327_vm0, %v7645_v21  ;;  %v1081_v49 = vrot.slane %v7320_v14, 1  ;;  %v1084_v24 = vrot.slane %v7662_v44, 1  ;;  %v7719_v54 = vmax.f32 %v136_v63, 0.0  ;;  %v7724_v9 = vsel %vm227_vm1, %v1078_v45, %v1079_v36 }
  0x98   :  { %v7717_v39 = vsel %vm227_vm1, %v1075_v1, %v1076_v20  ;;  %9078 = vst [vmem:[#allocation57_spill] sm:$0xff] %v7724_v9  ;;  %v7738_v63 = vpack.c.bf16 %v7318_v51, %v7639_v12  ;;  %v7746_v17 = vpack.c.bf16 %v7662_v44, %v7320_v14  ;;  %v1091_v20 = vrot.slane %v9005_v43, 1 }
  0x99   :  { %9077 = vst [vmem:[#allocation56_spill] sm:$0xff] %v7717_v39  ;;  %v7731_v62 = vsel %vm227_vm1, %v1081_v49, %v1082_v35  ;;  %v7742_v36 = vpack.c.bf16 %v7724_v9, %v7717_v39  ;;  %v1087_v1 = vrot.slane %v7719_v54, 1  ;;  %v2343_v45 = vrot.slane %v7426_v40, 2 }
  0x9a   :  { %9079 = vst [vmem:[#allocation58_spill] sm:$0xff] %v7738_v63  ;;  %9080 = vst [vmem:[#allocation59_spill] sm:$0xff] %v7746_v17  ;;  %v9081_v49 = vmax.f32 %v7413_v18, 0.0  ;;  %v2346_v39 = vrot.slane %v7428_v47, 2  ;;  %v9082_v19 = vmax.f32 %v7418_v58, 0.0 }
  0x9c   :  { %5647 = vmatmul.mubr.msk.bf16.gmra.mrb[4].mxu0 %vm302_vm2, %v7670_v33  ;;  %5791 = vmatmul.mubr.msk.bf16.gmra.mrb[4].mxu1 %vm302_vm2, %v7676_v59  ;;  %v9006_v33 = vmax.f32 %v7698_v4, 0.0  ;;  %v2344_v9 = vrot.slane %v9081_v49, 2  ;;  %v2347_v46 = vrot.slane %v9082_v19, 2  ;;  %v7784_v49 = vpack.c.bf16 %v7726_v5, %v7719_v54 }
  0x9d   :  { %5650 = vmatprep.mubr.msk.bf16.mxu0 %vm302_vm2, %v868_v31  ;;  %5794 = vmatprep.mubr.msk.bf16.mxu1 %vm302_vm2, %v7684_v6  ;;  %v7734_v31 = vsel %vm227_vm1, %v1084_v24, %v1085_v27  ;;  %v1090_v27 = vrot.slane %v7726_v5, 1 }
  0x9e   :  { %v7751_v35 = vpack.c.bf16 %v7734_v31, %v7731_v62  ;;  %v1088_v24 = vrot.slane %v9006_v33, 1  ;;  %v2345_v19 = vsel %vm1650_vm3, %v2343_v45, %v2344_v9  ;;  %v7780_v58 = vsel %vm1650_vm3, %v2346_v39, %v2347_v46 }
  0x9f   :  { %v7776_v40 = vsel %vm227_vm1, %v1090_v27, %v1091_v20  ;;  %9083 = vst [vmem:[#allocation60_spill] sm:$0xff] %v7780_v58  ;;  %v2349_v33 = vrot.slane %v7466_v32, 2  ;;  %v2352_v9 = vrot.slane %v7306_v15, 2  ;;  %v9085_v46 = vmax.f32 %v7444_v53, 0.0 }
  0xa0   :  { %v7773_v18 = vsel %vm227_vm1, %v1087_v1, %v1088_v24  ;;  %v2407_v1 = vpack.c.bf16 %v7780_v58, %v2345_v19  ;;  %v9084_v24 = vmax.f32 %v7439_v26, 0.0  ;;  %v2355_v20 = vrot.slane %v7308_v41, 2 }
  0xa1   :  { %v7788_v43 = vpack.c.bf16 %v7776_v40, %v7773_v18  ;;  %v2353_v39 = vrot.slane %v9085_v46, 2  ;;  %v9086_v45 = vmax.f32 %v7460_v55, 0.0  ;;  %v9087_v19 = vmax.f32 %v7476_v22, 0.0 }
  0xa2   :  { %v2350_v27 = vrot.slane %v9084_v24, 2  ;;  %v1294_v53 = vsel %vm327_vm0, %v7635_v7, 0 }
  0xa3   :  { %v2359_v58 = vrot.slane %v9087_v19, 2  ;;  %v7814_v41 = vsel %vm1650_vm3, %v2352_v9, %v2353_v39  ;;  %v9090_v9 = vmax.f32 %v7528_v0, 0.0  ;;  %v9091_v39 = vmax.f32 %v7541_v42, 0.0  ;;  %v5079_v0 = vld [vmem:[%s8926_s3 + $0x1c] sm:$0xf] }
  0xa4   :  { %5651 = vmatmul.mubr.msk.bf16.gmra.mrb[8].mxu0 %vm302_vm2, %v7738_v63  ;;  %5795 = vmatmul.mubr.msk.bf16.gmra.mrb[8].mxu1 %vm302_vm2, %v7742_v36  ;;  %v2358_v63 = vrot.slane %v7490_v48, 2  ;;  %v7811_v15 = vsel %vm1650_vm3, %v2349_v33, %v2350_v27  ;;  %v2361_v33 = vrot.slane %v7552_v60, 2  ;;  %v2367_v27 = vrot.slane %v7560_v30, 2 }
  0xa5   :  { %5654 = vmatprep.mubr.msk.bf16.mxu0 %vm302_vm2, %v7746_v17  ;;  %5798 = vmatprep.mubr.msk.bf16.mxu1 %vm302_vm2, %v7751_v35  ;;  %v2356_v17 = vrot.slane %v9086_v45, 2  ;;  %v7826_v22 = vpack.c.bf16 %v7814_v41, %v7811_v15  ;;  %v2368_v46 = vrot.slane %v9090_v9, 2 }
  0xa6   :  { %v7820_v26 = vsel %vm1650_vm3, %v2358_v63, %v2359_v58  ;;  %v9089_v63 = vmax.f32 %v7517_v37, 0.0  ;;  %v5005_v37 = vld [vmem:[%s8926_s3 + $0xc] sm:$0xf] }
  0xa7   :  { %v7817_v55 = vsel %vm1650_vm3, %v2355_v20, %v2356_v17  ;;  %v2364_v17 = vrot.slane %v7557_v52, 2  ;;  %v2369_v20 = vsel %vm1650_vm3, %v2367_v27, %v2368_v46  ;;  %v9094_v27 = vmax.f32 %v7625_v29, 0.0 }
  0xa8   :  { %v2365_v58 = vrot.slane %v9089_v63, 2  ;;  %v7839_v7 = vpack.c.bf16 %v7820_v26, %v7817_v55  ;;  %v2382_v46 = vrot.slane %v7662_v44, 2 }
  0xa9   :  { %v2380_v9 = vrot.slane %v9094_v27, 2  ;;  %v7971_v27 = vpack.c.bf16 %v7552_v60, %v7490_v48  ;;  %v5193_v48 = vld [vmem:[%s8924_s2 + $0x34] sm:$0xf] }
  0xaa   :  { %v7862_v30 = vsel %vm1650_vm3, %v2364_v17, %v2365_v58  ;;  %v9093_v17 = vmax.f32 %v7615_v28, 0.0  ;;  %v2379_v58 = vrot.slane %v7320_v14, 2 }
  0xac   :  { %5655 = vmatmul.mubr.msk.bf16.gmra.mrb[12].mxu0 %vm302_vm2, %v7784_v49  ;;  %5799 = vmatmul.mubr.msk.bf16.gmra.mrb[12].mxu1 %vm302_vm2, %v7788_v43  ;;  %v2377_v63 = vrot.slane %v9093_v17, 2  ;;  %v7903_v14 = vsel %vm1650_vm3, %v2379_v58, %v2380_v9  ;;  %v7946_v17 = vpack.c.bf16 %v7547_v3, %v7486_v23  ;;  %v121_v58 = vld [vmem:[%s8927_s1 + $0x88] sm:$0x3] }
  0xad   :  { %5660 = vmatprep.mubr.msk.bf16.mxu0 %vm302_vm2, %v7504_v13  ;;  %5804 = vmatprep.mubr.msk.bf16.mxu1 %vm302_vm2, %v2407_v1  ;;  %v2560_v13 = vsel %vm327_vm0, %v7645_v21, 0  ;;  %v9088_v1 = vmax.f32 %v7512_v10, 0.0  ;;  %v2370_v21 = vrot.slane %v7563_v61, 2  ;;  %v2371_v10 = vrot.slane %v9091_v39, 2 }
  0xae   :  { %v161_v23 = vmax.f32 %v121_v58, 0.0 }
  0xaf   :  { %v2362_v24 = vrot.slane %v9088_v1, 2  ;;  %v7868_v45 = vsel %vm1650_vm3, %v2370_v21, %v2371_v10  ;;  %v9095_v21 = vmax.f32 %v7630_v16, 0.0  ;;  %v2385_v16 = vrot.slane %v7719_v54, 2 }
  0xb0   :  { %v9097_v10 = vmax.f32 %v7698_v4, 0.0 }
  0xb1   :  { %v7859_v42 = vsel %vm1650_vm3, %v2361_v33, %v2362_v24  ;;  %v9092_v33 = vmax.f32 %v7601_v2, 0.0  ;;  %v2376_v24 = vrot.slane %v7318_v51, 2  ;;  %v2383_v39 = vrot.slane %v9095_v21, 2 }
  0xb2   :  { %v7874_v19 = vpack.c.bf16 %v7862_v30, %v7859_v42  ;;  %v2718_v21 = vsel %vm327_vm0, %v5079_v0, 0 }
  0xb3   :  { %v2374_v1 = vrot.slane %v9092_v33, 2  ;;  %v7900_v51 = vsel %vm1650_vm3, %v2376_v24, %v2377_v63  ;;  %v7906_v28 = vsel %vm1650_vm3, %v2382_v46, %v2383_v39  ;;  %v7942_v24 = vpack.c.bf16 %v7466_v32, %v7428_v47  ;;  %v120_v63 = vld [vmem:[%s8927_s1 + $0x80] sm:$0xff] }
  0xb4   :  { %5661 = vmatmul.mubr.msk.bf16.vlgmr.msra.gmra.mrb[0].mxu0 %vm302_vm2, %v7580_v34  ;;  %5805 = vmatmul.mubr.msk.bf16.vlgmr.msra.gmra.mrb[0].mxu1 %vm302_vm2, %v7826_v22  ;;  %v7962_v3 = vmax.f32 %v120_v63, 0.0  ;;  %v7966_v47 = vpack.c.bf16 %v7573_v56, %v7550_v25  ;;  %v1456_v32 = vsel %vm327_vm0, %v5005_v37, 0  ;;  %v1414_v46 = vrot.slane %v161_v23, 1  ;;  %v5105_v25 = vld [vmem:[%s8924_s2 + $0x24] sm:$0xf]  ;;  %v9100_v56 = vld [vmem:[#allocation53_spill] sm:$0xff] }
  0xb5   :  { %5677 = vmatpush3.bf16.msra.mxu0 %v1294_v53  ;;  %5821 = vmatpush3.bf16.msra.mxu1 %v2560_v13  ;;  %v2373_v53 = vrot.slane %v7639_v12, 2  ;;  %v2411_v13 = vpack.c.bf16 %v7868_v45, %v2369_v20  ;;  %v2386_v20 = vrot.slane %v9097_v10, 2  ;;  %v7977_v39 = vpack.c.bf16 %v7650_v50, %v7576_v38 }
  0xb6   :  { %5664 = vmatprep.mubr.msk.bf16.mxu0 %vm302_vm2, %v7607_v11  ;;  %5808 = vmatprep.mubr.msk.bf16.mxu1 %vm302_vm2, %v7839_v7  ;;  %v1413_v9 = vrot.slane %v7962_v3, 1  ;;  %v7999_v60 = vpack.c.bf16 %v7962_v3, %v7557_v52  ;;  %v141_v52 = vld [vmem:[%s8927_s1 + $0x128] sm:$0x3]  ;;  %v8040_v63 = vpack.c.bf16 %v7773_v18, %v7734_v31  ;;  %v9105_v31 = vld [vmem:[#allocation60_spill] sm:$0xff] }
  0xb7   :  { %6599 = vmatprep.subr.msk.bf16.mxu0 %vm327_vm0, %v5005_v37  ;;  %6607 = vmatprep.subr.msk.bf16.mxu1 %vm327_vm0, %v5079_v0  ;;  %v7897_v2 = vsel %vm1650_vm3, %v2373_v53, %v2374_v1  ;;  %v2388_v53 = vrot.slane %v7726_v5, 2  ;;  %v7931_v4 = vsel %vm1650_vm3, %v2385_v16, %v2386_v20  ;;  %v8008_v37 = vpack.c.bf16 %v7639_v12, %v7563_v61  ;;  %v9101_v0 = vld [vmem:[#allocation54_spill] sm:$0xff]  ;;  %v9102_v16 = vld [vmem:[#allocation56_spill] sm:$0xff] }
  0xb8   :  { %v7910_v29 = vpack.c.bf16 %v7900_v51, %v7897_v2  ;;  %v7992_v50 = vsel %vm227_vm1, %v1413_v9, %v1414_v46  ;;  %v8012_v10 = vpack.c.bf16 %v9102_v16, %v9101_v0  ;;  %v140_v20 = vld [vmem:[%s8927_s1 + $0x120] sm:$0xff]  ;;  %v181_v12 = vmax.f32 %v141_v52, 0.0  ;;  %v9104_v9 = vld [vmem:[#allocation40_spill] sm:$0xff]  ;;  %v5210_v52 = vld [vmem:[%s8924_s2 + $0x38] sm:$0xf] }
  0xb9   :  { %v8004_v38 = vpack.c.bf16 %v7992_v50, %v9100_v56  ;;  %v8028_v61 = vmax.f32 %v140_v20, 0.0  ;;  %v8064_v18 = vpack.c.bf16 %v7811_v15, %v9105_v31  ;;  %v2675_v15 = vrot.slane %v7962_v3, 2  ;;  %v5104_v0 = vld [vmem:[%s8924_s2 + $0x20] sm:$0xf]  ;;  %v9109_v16 = vld [vmem:[#allocation32_spill] sm:$0xff] }
  0xba   :  { %v2676_v46 = vrot.slane %v161_v23, 2  ;;  %v8083_v56 = vpack.c.bf16 %v7859_v42, %v7820_v26  ;;  %v8110_v42 = vpack.c.bf16 %v7897_v2, %v7868_v45  ;;  %v8126_v45 = vpack.c.bf16 %v7931_v4, %v7906_v28  ;;  %v9110_v20 = vld [vmem:[#allocation6_spill] sm:$0xff] }
  0xbb   :  { %v1416_v58 = vrot.slane %v8028_v61, 1  ;;  %v2678_v2 = vrot.slane %v8028_v61, 2  ;;  %v2679_v23 = vrot.slane %v181_v12, 2  ;;  %v9115_v31 = vld [vmem:[#allocation38_spill] sm:$0xff] }
  0xbc   :  { %5665 = vmatmul.mubr.msk.bf16.gmra.mrb[4].mxu0 %vm302_vm2, %v7676_v59  ;;  %5809 = vmatmul.mubr.msk.bf16.gmra.mrb[4].mxu1 %vm302_vm2, %v7874_v19 }
  0xbd   :  { %5668 = vmatprep.mubr.msk.bf16.mxu0 %vm302_vm2, %v7684_v6  ;;  %5812 = vmatprep.mubr.msk.bf16.mxu1 %vm302_vm2, %v2411_v13  ;;  %v7915_v6 = vpack.c.bf16 %v7906_v28, %v7903_v14  ;;  %v9098_v13 = vmax.f32 %v7709_v8, 0.0  ;;  %v9107_v28 = vld [vmem:[#allocation3_spill] sm:$0xff] }
  0xbf   :  { %9096 = vst [vmem:[#allocation61_spill] sm:$0xff] %v7915_v6  ;;  %v2389_v33 = vrot.slane %v9098_v13, 2 }
  0xc1   :  { %v7934_v1 = vsel %vm1650_vm3, %v2388_v53, %v2389_v33  ;;  %v9103_v53 = vld [vmem:[#allocation57_spill] sm:$0xff]  ;;  %v8036_v33 = vpack.c.bf16 %v7719_v54, %v7662_v44 }
  0xc2   :  { %v7938_v8 = vpack.c.bf16 %v7934_v1, %v7931_v4  ;;  %v8032_v13 = vpack.c.bf16 %v7731_v62, %v9103_v53  ;;  %v8056_v62 = vpack.c.bf16 %v8028_v61, %v7726_v5  ;;  %v8076_v5 = vpack.c.bf16 %v7817_v55, %v7814_v41  ;;  %v5192_v41 = vld [vmem:[%s8924_s2 + $0x30] sm:$0xf]  ;;  %v9108_v4 = vld [vmem:[#allocation5_spill] sm:$0xff]  ;;  %v9112_v53 = vld [vmem:[#allocation22_spill] sm:$0xff] }
  0xc3   :  { %v8098_v55 = vsel %vm1650_vm3, %v2675_v15, %v2676_v46  ;;  %v9117_v15 = vld [vmem:[#allocation41_spill] sm:$0xff] }
  0xc4   :  { %5669 = vmatmul.mubr.msk.bf16.gmra.mrb[8].mxu0 %vm302_vm2, %v7742_v36  ;;  %5813 = vmatmul.mubr.msk.bf16.gmra.mrb[8].mxu1 %vm302_vm2, %v7910_v29  ;;  %9099 = vst [vmem:[#allocation62_spill] sm:$0xff] %v7938_v8  ;;  %v8106_v26 = vpack.c.bf16 %v8098_v55, %v7862_v30  ;;  %v8122_v30 = vpack.c.bf16 %v7903_v14, %v7900_v51  ;;  %v9118_v46 = vld [vmem:[#allocation25_spill] sm:$0xff] }
  0xc5   :  { %5672 = vmatprep.mubr.msk.bf16.mxu0 %vm302_vm2, %v7751_v35  ;;  %5816 = vmatprep.mubr.msk.bf16.mxu1 %vm302_vm2, %v7915_v6  ;;  %v8138_v51 = vsel %vm1650_vm3, %v2678_v2, %v2679_v23  ;;  %v9122_v2 = vld [vmem:[#allocation50_spill] sm:$0xff]  ;;  %v9123_v23 = vld [vmem:[#allocation17_spill] sm:$0xff] }
  0xc6   :  { %9106 = vst [vmem:[#allocation53_spill] sm:$0xff] %v8138_v51  ;;  %v8142_v14 = vpack.c.bf16 %v8138_v51, %v7934_v1  ;;  %v5122_v1 = vld [vmem:[%s8924_s2 + $0x28] sm:$0xf] }
  0xcc   :  { %5673 = vmatmul.mubr.msk.bf16.gmra.mrb[12].mxu0 %vm302_vm2, %v7788_v43  ;;  %5817 = vmatmul.mubr.msk.bf16.gmra.mrb[12].mxu1 %vm302_vm2, %v7938_v8 }
  0xcd   :  { %5678 = vmatprep.mubr.msk.bf16.mxu0 %vm302_vm2, %v7942_v24  ;;  %5822 = vmatprep.mubr.msk.bf16.mxu1 %vm302_vm2, %v7946_v17 }
  0xd4   :  { %5679 = vmatmul.mubr.msk.bf16.vlgmr.msra.gmra.mrb[0].mxu0 %vm302_vm2, %v7324_v57  ;;  %5823 = vmatmul.mubr.msk.bf16.vlgmr.msra.gmra.mrb[0].mxu1 %vm302_vm2, %v7966_v47 }
  0xd5   :  { %5695 = vmatpush3.bf16.msra.mxu0 %v1456_v32  ;;  %5839 = vmatpush3.bf16.msra.mxu1 %v2718_v21  ;;  %v1417_v32 = vrot.slane %v181_v12, 1  ;;  %v3936_v21 = vsel %vm327_vm0, %v5193_v48, 0  ;;  %v9111_v12 = vld [vmem:[#allocation33_spill] sm:$0xff] }
  0xd6   :  { %5682 = vmatprep.mubr.msk.bf16.mxu0 %vm302_vm2, %v7971_v27  ;;  %5826 = vmatprep.mubr.msk.bf16.mxu1 %vm302_vm2, %v7977_v39 }
  0xd7   :  { %6608 = vmatprep.subr.msk.bf16.mxu0 %vm327_vm0, %v5105_v25  ;;  %6616 = vmatprep.subr.msk.bf16.mxu1 %vm327_vm0, %v5193_v48  ;;  %v8052_v54 = vsel %vm227_vm1, %v1416_v58, %v1417_v32  ;;  %v4036_v48 = vsel %vm327_vm0, %v5192_v41, 0  ;;  %v9113_v58 = vld [vmem:[#allocation36_spill] sm:$0xff] }
  0xd8   :  { %v8060_v44 = vpack.c.bf16 %v8052_v54, %v7776_v40  ;;  %v2903_v40 = vsel %vm327_vm0, %v5105_v25, 0  ;;  %v3003_v25 = vsel %vm327_vm0, %v5104_v0, 0  ;;  %v9114_v32 = vld [vmem:[#allocation48_spill] sm:$0xff] }
  0xdc   :  { %5683 = vmatmul.mubr.msk.bf16.gmra.mrb[4].mxu0 %vm302_vm2, %v7999_v60  ;;  %5827 = vmatmul.mubr.msk.bf16.gmra.mrb[4].mxu1 %vm302_vm2, %v8004_v38 }
  0xdd   :  { %5686 = vmatprep.mubr.msk.bf16.mxu0 %vm302_vm2, %v8008_v37  ;;  %5830 = vmatprep.mubr.msk.bf16.mxu1 %vm302_vm2, %v8012_v10 }
  0xe4   :  { %5687 = vmatmul.mubr.msk.bf16.gmra.mrb[8].mxu0 %vm302_vm2, %v9104_v9  ;;  %5831 = vmatmul.mubr.msk.bf16.gmra.mrb[8].mxu1 %vm302_vm2, %v8032_v13 }
  0xe5   :  { %5690 = vmatprep.mubr.msk.bf16.mxu0 %vm302_vm2, %v8036_v33  ;;  %5834 = vmatprep.mubr.msk.bf16.mxu1 %vm302_vm2, %v8040_v63 }
  0xec   :  { %5691 = vmatmul.mubr.msk.bf16.gmra.mrb[12].mxu0 %vm302_vm2, %v8056_v62  ;;  %5835 = vmatmul.mubr.msk.bf16.gmra.mrb[12].mxu1 %vm302_vm2, %v8060_v44 }
  0xed   :  { %5696 = vmatprep.mubr.msk.bf16.mxu0 %vm302_vm2, %v7946_v17  ;;  %5840 = vmatprep.mubr.msk.bf16.mxu1 %vm302_vm2, %v8064_v18 }
  0xf4   :  { %5697 = vmatmul.mubr.msk.bf16.vlgmr.msra.gmra.mrb[0].mxu0 %vm302_vm2, %v7966_v47  ;;  %5841 = vmatmul.mubr.msk.bf16.vlgmr.msra.gmra.mrb[0].mxu1 %vm302_vm2, %v8076_v5 }
  0xf5   :  { %5857 = vmatpush3.bf16.msra.mxu0 %v2903_v40  ;;  %6001 = vmatpush3.bf16.msra.mxu1 %v3936_v21  ;;  %v9116_v40 = vld [vmem:[#allocation24_spill] sm:$0xff]  ;;  %v9119_v21 = vld [vmem:[#allocation43_spill] sm:$0xff] }
  0xf6   :  { %5700 = vmatprep.mubr.msk.bf16.mxu0 %vm302_vm2, %v7977_v39  ;;  %5844 = vmatprep.mubr.msk.bf16.mxu1 %vm302_vm2, %v8083_v56 }
  0xf7   :  { %6609 = vmatprep.subr.msk.bf16.mxu0 %vm327_vm0, %v5104_v0  ;;  %6617 = vmatprep.subr.msk.bf16.mxu1 %vm327_vm0, %v5192_v41  ;;  %v9120_v0 = vld [vmem:[#allocation26_spill] sm:$0xff] }
  0xf8   :  { %v9121_v41 = vld [vmem:[#allocation46_spill] sm:$0xff] }
  0xfc   :  { %5701 = vmatmul.mubr.msk.bf16.gmra.mrb[4].mxu0 %vm302_vm2, %v8004_v38  ;;  %5845 = vmatmul.mubr.msk.bf16.gmra.mrb[4].mxu1 %vm302_vm2, %v8106_v26 }
  0xfd   :  { %5704 = vmatprep.mubr.msk.bf16.mxu0 %vm302_vm2, %v8012_v10  ;;  %5848 = vmatprep.mubr.msk.bf16.mxu1 %vm302_vm2, %v8110_v42 }
 0x104   :  { %5705 = vmatmul.mubr.msk.bf16.gmra.mrb[8].mxu0 %vm302_vm2, %v8032_v13  ;;  %5849 = vmatmul.mubr.msk.bf16.gmra.mrb[8].mxu1 %vm302_vm2, %v8122_v30 }
 0x105   :  { %5708 = vmatprep.mubr.msk.bf16.mxu0 %vm302_vm2, %v8040_v63  ;;  %5852 = vmatprep.mubr.msk.bf16.mxu1 %vm302_vm2, %v8126_v45 }
 0x10c   :  { %5709 = vmatmul.mubr.msk.bf16.gmra.mrb[12].mxu0 %vm302_vm2, %v8060_v44  ;;  %5853 = vmatmul.mubr.msk.bf16.gmra.mrb[12].mxu1 %vm302_vm2, %v8142_v14 }
 0x10d   :  { %5858 = vmatprep.mubr.msk.bf16.mxu0 %vm302_vm2, %v9107_v28  ;;  %6002 = vmatprep.mubr.msk.bf16.mxu1 %vm302_vm2, %v9108_v4  ;;  %v3113_v4 = vsel %vm327_vm0, %v5122_v1, 0 }
 0x114   :  { %5859 = vmatmul.mubr.msk.bf16.vlgmr.msra.gmra.mrb[16].mxu0 %vm302_vm2, %v9109_v16  ;;  %6003 = vmatmul.mubr.msk.bf16.vlgmr.msra.gmra.mrb[16].mxu1 %vm302_vm2, %v9110_v20  ;;  %v5131_v20 = vld [vmem:[%s8924_s2 + $0x2c] sm:$0xf] }
 0x115   :  { %5875 = vmatpush3.bf16.msra.mxu0 %v3003_v25  ;;  %6019 = vmatpush3.bf16.msra.mxu1 %v4036_v48  ;;  %v4138_v25 = vsel %vm327_vm0, %v5210_v52, 0  ;;  %v9124_v48 = vld [vmem:[#allocation18_spill] sm:$0xff] }
 0x116   :  { %5862 = vmatprep.mubr.msk.bf16.mxu0 %vm302_vm2, %v9111_v12  ;;  %6006 = vmatprep.mubr.msk.bf16.mxu1 %vm302_vm2, %v9112_v53  ;;  %v5219_v53 = vld [vmem:[%s8924_s2 + $0x3c] sm:$0xf] }
 0x117   :  { %6610 = vmatprep.subr.msk.bf16.mxu0 %vm327_vm0, %v5122_v1  ;;  %6618 = vmatprep.subr.msk.bf16.mxu1 %vm327_vm0, %v5210_v52  ;;  %v9126_v1 = vld [vmem:[#allocation35_spill] sm:$0xff]  ;;  %v9128_v52 = vld [vmem:[#allocation20_spill] sm:$0xff] }
 0x11c   :  { %5863 = vmatmul.mubr.msk.bf16.gmra.mrb[20].mxu0 %vm302_vm2, %v9113_v58  ;;  %6007 = vmatmul.mubr.msk.bf16.gmra.mrb[20].mxu1 %vm302_vm2, %v9114_v32  ;;  %v43_v32 = vld [vmem:[%s8925_s0 + $0x98] sm:$0x3] }
 0x11d   :  { %5866 = vmatprep.mubr.msk.bf16.mxu0 %vm302_vm2, %v9115_v31  ;;  %6010 = vmatprep.mubr.msk.bf16.mxu1 %vm302_vm2, %v9116_v40  ;;  %v9131_v40 = vld [vmem:[#allocation21_spill] sm:$0xff] }
 0x124   :  { %5867 = vmatmul.mubr.msk.bf16.gmra.mrb[24].mxu0 %vm302_vm2, %v9117_v15  ;;  %6011 = vmatmul.mubr.msk.bf16.gmra.mrb[24].mxu1 %vm302_vm2, %v9118_v46 }
 0x125   :  { %5870 = vmatprep.mubr.msk.bf16.mxu0 %vm302_vm2, %v9119_v21  ;;  %6014 = vmatprep.mubr.msk.bf16.mxu1 %vm302_vm2, %v9120_v0  ;;  %v3251_v0 = vsel %vm327_vm0, %v5131_v20, 0 }
 0x12c   :  { %5871 = vmatmul.mubr.msk.bf16.gmra.mrb[28].mxu0 %vm302_vm2, %v9121_v41  ;;  %6015 = vmatmul.mubr.msk.bf16.gmra.mrb[28].mxu1 %vm302_vm2, %v9122_v2 }
 0x12d   :  { %5876 = vmatprep.mubr.msk.bf16.mxu0 %vm302_vm2, %v9123_v23  ;;  %6020 = vmatprep.mubr.msk.bf16.mxu1 %vm302_vm2, %v9107_v28  ;;  %v9125_v28 = vld [vmem:[#allocation19_spill] sm:$0xff] }
 0x134   :  { %5877 = vmatmul.mubr.msk.bf16.vlgmr.msra.gmra.mrb[16].mxu0 %vm302_vm2, %v9124_v48  ;;  %6021 = vmatmul.mubr.msk.bf16.vlgmr.msra.gmra.mrb[16].mxu1 %vm302_vm2, %v9109_v16  ;;  %v9127_v16 = vld [vmem:[#allocation37_spill] sm:$0xff]  ;;  %v9134_v48 = vld [vmem:[#allocation7_spill] sm:$0xff] }
 0x135   :  { %5893 = vmatpush3.bf16.msra.mxu0 %v3113_v4  ;;  %6037 = vmatpush3.bf16.msra.mxu1 %v4138_v25  ;;  %v4272_v4 = vsel %vm327_vm0, %v5219_v53, 0  ;;  %v9133_v25 = vld [vmem:[#allocation23_spill] sm:$0xff] }
 0x136   :  { %5880 = vmatprep.mubr.msk.bf16.mxu0 %vm302_vm2, %v9125_v28  ;;  %6024 = vmatprep.mubr.msk.bf16.mxu1 %vm302_vm2, %v9111_v12  ;;  %v9129_v12 = vld [vmem:[#allocation42_spill] sm:$0xff]  ;;  %v5228_v28 = vld [vmem:[%s8926_s3 + $0x30] sm:$0xf] }
 0x137   :  { %6611 = vmatprep.subr.msk.bf16.mxu0 %vm327_vm0, %v5131_v20  ;;  %6619 = vmatprep.subr.msk.bf16.mxu1 %vm327_vm0, %v5219_v53  ;;  %v9135_v20 = vld [vmem:[#allocation27_spill] sm:$0xff] }
 0x13c   :  { %5881 = vmatmul.mubr.msk.bf16.gmra.mrb[20].mxu0 %vm302_vm2, %v9126_v1  ;;  %6025 = vmatmul.mubr.msk.bf16.gmra.mrb[20].mxu1 %vm302_vm2, %v9113_v58  ;;  %v42_v58 = vld [vmem:[%s8925_s0 + $0x90] sm:$0xff]  ;;  %v9136_v1 = vld [vmem:[#allocation9_spill] sm:$0xff] }
 0x13d   :  { %5884 = vmatprep.mubr.msk.bf16.mxu0 %vm302_vm2, %v9127_v16  ;;  %6028 = vmatprep.mubr.msk.bf16.mxu1 %vm302_vm2, %v9115_v31  ;;  %v9130_v31 = vld [vmem:[#allocation45_spill] sm:$0xff]  ;;  %v82_v46 = vmax.f32 %v42_v58, 0.0  ;;  %v9137_v16 = vld [vmem:[#allocation31_spill] sm:$0xff] }
 0x13f   :  { %v3232_v2 = vrot.slane %v82_v46, 1  ;;  %v4253_v8 = vrot.slane %v82_v46, 2 }
 0x144   :  { %5885 = vmatmul.mubr.msk.bf16.gmra.mrb[24].mxu0 %vm302_vm2, %v9128_v52  ;;  %6029 = vmatmul.mubr.msk.bf16.gmra.mrb[24].mxu1 %vm302_vm2, %v9117_v15  ;;  %v9132_v15 = vld [vmem:[#allocation2_spill] sm:$0xff]  ;;  %v3102_v52 = vpack.c.bf16 %v82_v46, %v9137_v16 }
 0x145   :  { %5888 = vmatprep.mubr.msk.bf16.mxu0 %vm302_vm2, %v9129_v12  ;;  %6032 = vmatprep.mubr.msk.bf16.mxu1 %vm302_vm2, %v9119_v21  ;;  %v83_v21 = vmax.f32 %v43_v32, 0.0  ;;  %v9138_v12 = vld [vmem:[#allocation34_spill] sm:$0xff]  ;;  %v62_v32 = vld [vmem:[%s8925_s0 + $0x130] sm:$0xff] }
 0x146   :  { %v9143_v16 = vld [vmem:[#allocation30_spill] sm:$0xff] }
 0x147   :  { %v3233_v23 = vrot.slane %v83_v21, 1  ;;  %v4254_v6 = vrot.slane %v83_v21, 2  ;;  %v9149_v21 = vld [vmem:[#allocation10_spill] sm:$0xff] }
 0x149   :  { %v3234_v53 = vsel %vm227_vm1, %v3232_v2, %v3233_v23  ;;  %v102_v2 = vmax.f32 %v62_v32, 0.0  ;;  %v9146_v32 = vld [vmem:[#allocation44_spill] sm:$0xff]  ;;  %v4255_v46 = vsel %vm1650_vm3, %v4253_v8, %v4254_v6 }
 0x14a   :  { %v3240_v58 = vpack.c.bf16 %v3234_v53, %v9138_v12  ;;  %v9142_v53 = vld [vmem:[#allocation13_spill] sm:$0xff] }
 0x14b   :  { %v4256_v6 = vrot.slane %v102_v2, 2 }
 0x14c   :  { %5889 = vmatmul.mubr.msk.bf16.gmra.mrb[28].mxu0 %vm302_vm2, %v9130_v31  ;;  %6033 = vmatmul.mubr.msk.bf16.gmra.mrb[28].mxu1 %vm302_vm2, %v9121_v41  ;;  %v5140_v41 = vld [vmem:[%s8926_s3 + $0x20] sm:$0xf]  ;;  %v63_v31 = vld [vmem:[%s8925_s0 + $0x138] sm:$0x3] }
 0x14d   :  { %5894 = vmatprep.mubr.msk.bf16.mxu0 %vm302_vm2, %v9131_v40  ;;  %6038 = vmatprep.mubr.msk.bf16.mxu1 %vm302_vm2, %v9132_v15  ;;  %v9139_v40 = vld [vmem:[#allocation28_spill] sm:$0xff]  ;;  %v103_v23 = vmax.f32 %v63_v31, 0.0 }
 0x14f   :  { %v4257_v8 = vrot.slane %v103_v23, 2 }
 0x154   :  { %5895 = vmatmul.mubr.msk.bf16.vlgmr.msra.gmra.mrb[16].mxu0 %vm302_vm2, %v9133_v25  ;;  %6039 = vmatmul.mubr.msk.bf16.vlgmr.msra.gmra.mrb[16].mxu1 %vm302_vm2, %v9134_v48  ;;  %v3236_v25 = vrot.slane %v103_v23, 1 }
 0x155   :  { %5911 = vmatpush3.bf16.msra.mxu0 %v3251_v0  ;;  %6055 = vmatpush3.bf16.msra.mxu1 %v4272_v4  ;;  %v9140_v0 = vld [vmem:[#allocation11_spill] sm:$0xff]  ;;  %v3235_v4 = vrot.slane %v102_v2, 1 }
 0x156   :  { %5898 = vmatprep.mubr.msk.bf16.mxu0 %vm302_vm2, %v9135_v20  ;;  %6042 = vmatprep.mubr.msk.bf16.mxu1 %vm302_vm2, %v9136_v1  ;;  %v9141_v20 = vld [vmem:[#allocation29_spill] sm:$0xff] }
 0x157   :  { %6612 = vmatprep.subr.msk.bf16.mxu0 %vm327_vm0, %v5140_v41  ;;  %6620 = vmatprep.subr.msk.bf16.mxu1 %vm327_vm0, %v5228_v28  ;;  %v3237_v12 = vsel %vm227_vm1, %v3235_v4, %v3236_v25  ;;  %v4390_v4 = vsel %vm327_vm0, %v5228_v28, 0  ;;  %v9148_v25 = vld [vmem:[#allocation8_spill] sm:$0xff] }
 0x158   :  { %v3241_v31 = vpack.c.bf16 %v3237_v12, %v9146_v32  ;;  %v9151_v28 = vld [vmem:[#allocation12_spill] sm:$0xff]  ;;  %v4258_v12 = vsel %vm1650_vm3, %v4256_v6, %v4257_v8 }
 0x15c   :  { %5899 = vmatmul.mubr.msk.bf16.gmra.mrb[20].mxu0 %vm302_vm2, %v3102_v52  ;;  %6043 = vmatmul.mubr.msk.bf16.gmra.mrb[20].mxu1 %vm302_vm2, %v3240_v58  ;;  %v9144_v52 = vld [vmem:[#allocation15_spill] sm:$0xff] }
 0x15d   :  { %5902 = vmatprep.mubr.msk.bf16.mxu0 %vm302_vm2, %v9139_v40  ;;  %6046 = vmatprep.mubr.msk.bf16.mxu1 %vm302_vm2, %v9140_v0  ;;  %v9145_v40 = vld [vmem:[#allocation39_spill] sm:$0xff] }
 0x15e   :  { %v3103_v51 = vpack.c.bf16 %v102_v2, %v9145_v40 }
 0x164   :  { %5903 = vmatmul.mubr.msk.bf16.gmra.mrb[24].mxu0 %vm302_vm2, %v9141_v20  ;;  %6047 = vmatmul.mubr.msk.bf16.gmra.mrb[24].mxu1 %vm302_vm2, %v9142_v53  ;;  %v9147_v20 = vld [vmem:[#allocation4_spill] sm:$0xff] }
 0x165   :  { %5906 = vmatprep.mubr.msk.bf16.mxu0 %vm302_vm2, %v9143_v16  ;;  %6050 = vmatprep.mubr.msk.bf16.mxu1 %vm302_vm2, %v9144_v52  ;;  %v3369_v16 = vsel %vm327_vm0, %v5140_v41, 0  ;;  %v9150_v41 = vld [vmem:[#allocation47_spill] sm:$0xff] }
 0x16c   :  { %5907 = vmatmul.mubr.msk.bf16.gmra.mrb[28].mxu0 %vm302_vm2, %v3103_v51  ;;  %6051 = vmatmul.mubr.msk.bf16.gmra.mrb[28].mxu1 %vm302_vm2, %v3241_v31  ;;  %v5149_v51 = vld [vmem:[%s8926_s3 + $0x24] sm:$0xf] }
 0x16d   :  { %5912 = vmatprep.mubr.msk.bf16.mxu0 %vm302_vm2, %v9132_v15  ;;  %6056 = vmatprep.mubr.msk.bf16.mxu1 %vm302_vm2, %v9147_v20  ;;  %v5237_v15 = vld [vmem:[%s8926_s3 + $0x34] sm:$0xf]  ;;  %v3487_v2 = vsel %vm327_vm0, %v5149_v51, 0 }
 0x16e   :  { %v4508_v23 = vsel %vm327_vm0, %v5237_v15, 0 }
 0x174   :  { %5913 = vmatmul.mubr.msk.bf16.vlgmr.msra.gmra.mrb[16].mxu0 %vm302_vm2, %v9134_v48  ;;  %6057 = vmatmul.mubr.msk.bf16.vlgmr.msra.gmra.mrb[16].mxu1 %vm302_vm2, %v9148_v25  ;;  %v4261_v48 = vpack.c.bf16 %v4255_v46, %v9150_v41  ;;  %v9155_v41 = vld [vmem:[#allocation51_spill] sm:$0xff] }
 0x175   :  { %5929 = vmatpush3.bf16.msra.mxu0 %v3369_v16  ;;  %6073 = vmatpush3.bf16.msra.mxu1 %v4390_v4 }
 0x176   :  { %5916 = vmatprep.mubr.msk.bf16.mxu0 %vm302_vm2, %v9136_v1  ;;  %6060 = vmatprep.mubr.msk.bf16.mxu1 %vm302_vm2, %v9149_v21  ;;  %v9152_v1 = vld [vmem:[#allocation14_spill] sm:$0xff] }
 0x177   :  { %6613 = vmatprep.subr.msk.bf16.mxu0 %vm327_vm0, %v5149_v51  ;;  %6621 = vmatprep.subr.msk.bf16.mxu1 %vm327_vm0, %v5237_v15 }
 0x17c   :  { %5917 = vmatmul.mubr.msk.bf16.gmra.mrb[20].mxu0 %vm302_vm2, %v3240_v58  ;;  %6061 = vmatmul.mubr.msk.bf16.gmra.mrb[20].mxu1 %vm302_vm2, %v4261_v48  ;;  %v9153_v58 = vld [vmem:[#allocation16_spill] sm:$0xff] }
 0x17d   :  { %5920 = vmatprep.mubr.msk.bf16.mxu0 %vm302_vm2, %v9140_v0  ;;  %6064 = vmatprep.mubr.msk.bf16.mxu1 %vm302_vm2, %v9151_v28  ;;  %v9154_v0 = vld [vmem:[#allocation49_spill] sm:$0xff] }
 0x17e   :  { %v4262_v40 = vpack.c.bf16 %v4258_v12, %v9154_v0 }
 0x184   :  { %5921 = vmatmul.mubr.msk.bf16.gmra.mrb[24].mxu0 %vm302_vm2, %v9142_v53  ;;  %6065 = vmatmul.mubr.msk.bf16.gmra.mrb[24].mxu1 %vm302_vm2, %v9152_v1  ;;  %v5158_v53 = vld [vmem:[%s8926_s3 + $0x28] sm:$0xf] }
 0x185   :  { %5924 = vmatprep.mubr.msk.bf16.mxu0 %vm302_vm2, %v9144_v52  ;;  %6068 = vmatprep.mubr.msk.bf16.mxu1 %vm302_vm2, %v9153_v58 }
 0x18c   :  { %5925 = vmatmul.mubr.msk.bf16.gmra.mrb[28].mxu0 %vm302_vm2, %v3241_v31  ;;  %6069 = vmatmul.mubr.msk.bf16.gmra.mrb[28].mxu1 %vm302_vm2, %v4262_v40 }
 0x18d   :  { %5930 = vmatprep.mubr.msk.bf16.mxu0 %vm302_vm2, %v7942_v24  ;;  %6074 = vmatprep.mubr.msk.bf16.mxu1 %vm302_vm2, %v7946_v17  ;;  %v5246_v24 = vld [vmem:[%s8926_s3 + $0x38] sm:$0xf] }
 0x194   :  { %5931 = vmatmul.mubr.msk.bf16.vlgmr.msra.gmra.mrb[16].mxu0 %vm302_vm2, %v7324_v57  ;;  %6075 = vmatmul.mubr.msk.bf16.vlgmr.msra.gmra.mrb[16].mxu1 %vm302_vm2, %v7966_v47  ;;  %v3613_v57 = vsel %vm327_vm0, %v5158_v53, 0 }
 0x195   :  { %5947 = vmatpush3.bf16.msra.mxu0 %v3487_v2  ;;  %6091 = vmatpush3.bf16.msra.mxu1 %v4508_v23 }
 0x196   :  { %5934 = vmatprep.mubr.msk.bf16.mxu0 %vm302_vm2, %v7971_v27  ;;  %6078 = vmatprep.mubr.msk.bf16.mxu1 %vm302_vm2, %v7977_v39  ;;  %v4626_v27 = vsel %vm327_vm0, %v5246_v24, 0 }
 0x197   :  { %6614 = vmatprep.subr.msk.bf16.mxu0 %vm327_vm0, %v5158_v53  ;;  %6622 = vmatprep.subr.msk.bf16.mxu1 %vm327_vm0, %v5246_v24 }
 0x19c   :  { %5935 = vmatmul.mubr.msk.bf16.gmra.mrb[20].mxu0 %vm302_vm2, %v7999_v60  ;;  %6079 = vmatmul.mubr.msk.bf16.gmra.mrb[20].mxu1 %vm302_vm2, %v8004_v38  ;;  %v8383_v60 = vld [vmem:[%s8926_s3 + $0x2c] sm:$0xf] }
 0x19d   :  { %5938 = vmatprep.mubr.msk.bf16.mxu0 %vm302_vm2, %v8008_v37  ;;  %6082 = vmatprep.mubr.msk.bf16.mxu1 %vm302_vm2, %v8012_v10  ;;  %v3751_v58 = vsel %vm327_vm0, %v8383_v60, 0 }
 0x1a4   :  { %5939 = vmatmul.mubr.msk.bf16.gmra.mrb[24].mxu0 %vm302_vm2, %v9104_v9  ;;  %6083 = vmatmul.mubr.msk.bf16.gmra.mrb[24].mxu1 %vm302_vm2, %v8032_v13 }
 0x1a5   :  { %5942 = vmatprep.mubr.msk.bf16.mxu0 %vm302_vm2, %v8036_v33  ;;  %6086 = vmatprep.mubr.msk.bf16.mxu1 %vm302_vm2, %v8040_v63 }
 0x1ac   :  { %5943 = vmatmul.mubr.msk.bf16.gmra.mrb[28].mxu0 %vm302_vm2, %v8056_v62  ;;  %6087 = vmatmul.mubr.msk.bf16.gmra.mrb[28].mxu1 %vm302_vm2, %v8060_v44 }
 0x1ad   :  { %5948 = vmatprep.mubr.msk.bf16.mxu0 %vm302_vm2, %v7946_v17  ;;  %6092 = vmatprep.mubr.msk.bf16.mxu1 %vm302_vm2, %v8064_v18  ;;  %v8390_v17 = vld [vmem:[%s8926_s3 + $0x3c] sm:$0xf] }
 0x1ae   :  { %v4760_v53 = vsel %vm327_vm0, %v8390_v17, 0 }
 0x1b4   :  { %5949 = vmatmul.mubr.msk.bf16.vlgmr.msra.gmra.mrb[16].mxu0 %vm302_vm2, %v7966_v47  ;;  %6093 = vmatmul.mubr.msk.bf16.vlgmr.msra.gmra.mrb[16].mxu1 %vm302_vm2, %v8076_v5  ;;  %v8415_v47 = vld [vmem:[%s8928_s4] ss:$0 sm:$0xff] }
 0x1b5   :  { %5965 = vmatpush3.bf16.msra.mxu0 %v3613_v57  ;;  %6109 = vmatpush3.bf16.msra.mxu1 %v4626_v27 }
 0x1b6   :  { %5952 = vmatprep.mubr.msk.bf16.mxu0 %vm302_vm2, %v7977_v39  ;;  %6096 = vmatprep.mubr.msk.bf16.mxu1 %vm302_vm2, %v8083_v56  ;;  %v122_v39 = vld [vmem:[%s8927_s1 + $0x90] sm:$0xff] }
 0x1b7   :  { %6615 = vmatprep.subr.msk.bf16.mxu0 %vm327_vm0, %v8383_v60  ;;  %6623 = vmatprep.subr.msk.bf16.mxu1 %vm327_vm0, %v8390_v17  ;;  %v8437_v56 = vmax.f32 %v122_v39, 0.0 }
 0x1b9   :  { %v3732_v6 = vrot.slane %v8437_v56, 1 }
 0x1bc   :  { %5953 = vmatmul.mubr.msk.bf16.gmra.mrb[20].mxu0 %vm302_vm2, %v8004_v38  ;;  %6097 = vmatmul.mubr.msk.bf16.gmra.mrb[20].mxu1 %vm302_vm2, %v8106_v26  ;;  %v8427_v38 = vld [vmem:[%s8929_s5] ss:$0 sm:$0xff] }
 0x1bd   :  { %5956 = vmatprep.mubr.msk.bf16.mxu0 %vm302_vm2, %v8012_v10  ;;  %6100 = vmatprep.mubr.msk.bf16.mxu1 %vm302_vm2, %v8110_v42  ;;  %v8432_v10 = vld [vmem:[%s8927_s1 + $0x98] sm:$0x3] }
 0x1be   :  { %v163_v32 = vmax.f32 %v8432_v10, 0.0 }
 0x1c0   :  { %v3733_v12 = vrot.slane %v163_v32, 1 }
 0x1c4   :  { %5957 = vmatmul.mubr.msk.bf16.gmra.mrb[24].mxu0 %vm302_vm2, %v8032_v13  ;;  %6101 = vmatmul.mubr.msk.bf16.gmra.mrb[24].mxu1 %vm302_vm2, %v8122_v30 }
 0x1c5   :  { %5960 = vmatprep.mubr.msk.bf16.mxu0 %vm302_vm2, %v8040_v63  ;;  %6104 = vmatprep.mubr.msk.bf16.mxu1 %vm302_vm2, %v8126_v45 }
 0x1c7   :  { %v5698_v37 = vpop.f32.mrb[0].mxu0  ;;  %v5842_v33 = vpop.f32.mrb[0].mxu1 }
 0x1c8   :  { %v1579_v13 = vmul.f32 %v5698_v37, %v8415_v47  ;;  %v1492_v63 = vpop.f32.mrb[1].mxu0  ;;  %v2835_v9 = vmul.f32 %v5842_v33, %v8415_v47  ;;  %v2754_v18 = vpop.f32.mrb[1].mxu1 }
 0x1c9   :  { %v1577_v62 = vmul.f32 %v8415_v47, %v1492_v63  ;;  %v5699_v5 = vpop.f32.mrb[2].mxu0  ;;  %v2833_v42 = vmul.f32 %v8415_v47, %v2754_v18  ;;  %v5843_v45 = vpop.f32.mrb[2].mxu1  ;;  %v9156_v18 = vld [vmem:[#allocation52_spill] sm:$0xff] }
 0x1ca   :  { %v1601_v26 = vadd.f32 %v8427_v38, %v1579_v13  ;;  %v1580_v30 = vmul.f32 %v5699_v5, %v8415_v47  ;;  %v1495_v52 = vpop.f32.mrb[3].mxu0  ;;  %v2851_v31 = vadd.f32 %v8427_v38, %v2835_v9  ;;  %v2836_v16 = vmul.f32 %v5843_v45, %v8415_v47  ;;  %v2757_v51 = vpop.f32.mrb[3].mxu1 }
 0x1cb   :  { %v1599_v20 = vadd.f32 %v8427_v38, %v1577_v62  ;;  %v1578_v4 = vmul.f32 %v8415_v47, %v1495_v52  ;;  %v2849_v25 = vadd.f32 %v8427_v38, %v2833_v42  ;;  %v2834_v46 = vmul.f32 %v8415_v47, %v2757_v51  ;;  %v9157_v52 = vld [vmem:[#allocation55_spill] sm:$0xff] }
 0x1cc   :  { %6624 = vtanh.f32 %v1601_v26  ;;  %v1602_v15 = vadd.f32 %v8427_v38, %v1580_v30  ;;  %5961 = vmatmul.mubr.msk.bf16.gmra.mrb[28].mxu0 %vm302_vm2, %v8060_v44  ;;  %v2852_v21 = vadd.f32 %v8427_v38, %v2836_v16  ;;  %6105 = vmatmul.mubr.msk.bf16.gmra.mrb[28].mxu1 %vm302_vm2, %v8142_v14  ;;  %v3734_v42 = vsel %vm227_vm1, %v3732_v6, %v3733_v12 }
 0x1cd   :  { %6626 = vtanh.f32 %v2851_v31  ;;  %5966 = vmatprep.mubr.msk.bf16.mxu0 %vm302_vm2, %v9155_v41  ;;  %v1600_v48 = vadd.f32 %v8427_v38, %v1578_v4  ;;  %6110 = vmatprep.mubr.msk.bf16.mxu1 %vm302_vm2, %v7580_v34  ;;  %v2850_v28 = vadd.f32 %v8427_v38, %v2834_v46  ;;  %v142_v31 = vld [vmem:[%s8927_s1 + $0x130] sm:$0xff]  ;;  %v8508_v41 = vpack.c.bf16 %v3734_v42, %v7992_v50 }
 0x1ce   :  { %6628 = vtanh.f32 %v1599_v20 }
 0x1cf   :  { %6630 = vtanh.f32 %v2849_v25  ;;  %v5702_v44 = vpop.f32.mrb[4].mxu0  ;;  %v5846_v14 = vpop.f32.mrb[4].mxu1 }
 0x1d0   :  { %6632 = vtanh.f32 %v1602_v15  ;;  %v1583_v8 = vmul.f32 %v5702_v44, %v8415_v47  ;;  %v1508_v1 = vpop.f32.mrb[5].mxu0  ;;  %v2839_v0 = vmul.f32 %v5846_v14, %v8415_v47  ;;  %v2770_v2 = vpop.f32.mrb[5].mxu1  ;;  %v8516_v14 = vmax.f32 %v142_v31, 0.0 }
 0x1d1   :  { %6634 = vtanh.f32 %v2852_v21  ;;  %v1581_v40 = vmul.f32 %v8415_v47, %v1508_v1  ;;  %v5703_v23 = vpop.f32.mrb[6].mxu0  ;;  %v2837_v57 = vmul.f32 %v8415_v47, %v2770_v2  ;;  %v5847_v60 = vpop.f32.mrb[6].mxu1  ;;  %v3602_v21 = vpack.c.bf16 %v8437_v56, %v7962_v3 }
 0x1d2   :  { %6636 = vtanh.f32 %v1600_v48  ;;  %v1605_v24 = vadd.f32 %v8427_v38, %v1583_v8  ;;  %v1584_v27 = vmul.f32 %v5703_v23, %v8415_v47  ;;  %v1511_v39 = vpop.f32.mrb[7].mxu0  ;;  %v2855_v37 = vadd.f32 %v8427_v38, %v2839_v0  ;;  %v2773_v63 = vpop.f32.mrb[7].mxu1 }
 0x1d3   :  { %6638 = vtanh.f32 %v2850_v28  ;;  %v1603_v13 = vadd.f32 %v8427_v38, %v1581_v40  ;;  %v2840_v33 = vmul.f32 %v5847_v60, %v8415_v47  ;;  %v2853_v17 = vadd.f32 %v8427_v38, %v2837_v57  ;;  %v8528_v40 = vld [vmem:[%s8927_s1 + $0x138] sm:$0x3] }
 0x1d4   :  { %6640 = vtanh.f32 %v1605_v24  ;;  %v1606_v9 = vadd.f32 %v8427_v38, %v1584_v27  ;;  %v1582_v62 = vmul.f32 %v8415_v47, %v1511_v39  ;;  %5967 = vmatmul.mubr.msk.bf16.vlgmr.msra.gmra.mrb[16].mxu0 %vm302_vm2, %v9156_v18  ;;  %v2838_v26 = vmul.f32 %v8415_v47, %v2773_v63  ;;  %6111 = vmatmul.mubr.msk.bf16.vlgmr.msra.gmra.mrb[16].mxu1 %vm302_vm2, %v7607_v11 }
 0x1d5   :  { %6642 = vtanh.f32 %v2855_v37  ;;  %v2856_v5 = vadd.f32 %v8427_v38, %v2840_v33  ;;  %5983 = vmatpush3.bf16.msra.mxu0 %v3751_v58  ;;  %6127 = vmatpush3.bf16.msra.mxu1 %v4760_v53 }
 0x1d6   :  { %v6625_v30 = vpop.eup %6624  ;;  %6644 = vtanh.f32 %v1603_v13  ;;  %v1604_v45 = vadd.f32 %v8427_v38, %v1582_v62  ;;  %5970 = vmatprep.mubr.msk.bf16.mxu0 %vm302_vm2, %v9157_v52  ;;  %v2854_v16 = vadd.f32 %v8427_v38, %v2838_v26  ;;  %6114 = vmatprep.mubr.msk.bf16.mxu1 %vm302_vm2, %v7676_v59 }
 0x1d7   :  { %v6627_v20 = vpop.eup %6626  ;;  %1634 = vst.msk [vmem:[%s8930_s6 + $0x10] sm:$0xff] %vm1631_vm4, %v6625_v30  ;;  %6646 = vtanh.f32 %v2853_v17  ;;  %v5706_v4 = vpop.f32.mrb[8].mxu0  ;;  %v9158_v17 = vld [vmem:[#allocation58_spill] sm:$0xff] }
 0x1d8   :  { %v6629_v51 = vpop.eup %6628  ;;  %5090 = vst.msk [vmem:[%s8930_s6 + $0x90] sm:$0xff] %vm1631_vm4, %v6627_v20  ;;  %6648 = vtanh.f32 %v1606_v9  ;;  %v1587_v25 = vmul.f32 %v5706_v4, %v8415_v47  ;;  %v5850_v15 = vpop.f32.mrb[8].mxu1  ;;  %v183_v9 = vmax.f32 %v8528_v40, 0.0  ;;  %v3735_v20 = vrot.slane %v8516_v14, 1 }
 0x1d9   :  { %v1524_v46 = vpop.f32.mrb[9].mxu0  ;;  %v6631_v48 = vpop.eup %6630  ;;  %1632 = vst.msk [vmem:[%s8930_s6] sm:$0xff] %vm1631_vm4, %v6629_v51  ;;  %6650 = vtanh.f32 %v2856_v5  ;;  %v2843_v28 = vmul.f32 %v5850_v15, %v8415_v47 }
 0x1da   :  { %v1585_v44 = vmul.f32 %v8415_v47, %v1524_v46  ;;  %v2786_v6 = vpop.f32.mrb[9].mxu1  ;;  %v5707_v8 = vpop.f32.mrb[10].mxu0  ;;  %5088 = vst.msk [vmem:[%s8930_s6 + $0x80] sm:$0xff] %vm1631_vm4, %v6631_v48  ;;  %6652 = vtanh.f32 %v1604_v45  ;;  %v1609_v3 = vadd.f32 %v8427_v38, %v1587_v25  ;;  %v3736_v46 = vrot.slane %v183_v9, 1 }
 0x1db   :  { %v6633_v1 = vpop.eup %6632  ;;  %v2841_v50 = vmul.f32 %v8415_v47, %v2786_v6  ;;  %v1588_v58 = vmul.f32 %v5707_v8, %v8415_v47  ;;  %v5851_v12 = vpop.f32.mrb[10].mxu1  ;;  %6654 = vtanh.f32 %v2854_v16  ;;  %v2859_v23 = vadd.f32 %v8427_v38, %v2843_v28 }
 0x1dc   :  { %v1527_v0 = vpop.f32.mrb[11].mxu0  ;;  %v6635_v2 = vpop.eup %6634  ;;  %1635 = vst.msk [vmem:[%s8930_s6 + $0x18] sm:$0xff] %vm1631_vm4, %v6633_v1  ;;  %v1607_v53 = vadd.f32 %v8427_v38, %v1585_v44  ;;  %v2844_v24 = vmul.f32 %v5851_v12, %v8415_v47  ;;  %6656 = vtanh.f32 %v1609_v3  ;;  %5971 = vmatmul.mubr.msk.bf16.gmra.mrb[20].mxu0 %vm302_vm2, %v3602_v21  ;;  %6115 = vmatmul.mubr.msk.bf16.gmra.mrb[20].mxu1 %vm302_vm2, %v8508_v41 }
 0x1dd   :  { %v2789_v57 = vpop.f32.mrb[11].mxu1  ;;  %v6637_v27 = vpop.eup %6636  ;;  %5091 = vst.msk [vmem:[%s8930_s6 + $0x98] sm:$0xff] %vm1631_vm4, %v6635_v2  ;;  %v2857_v60 = vadd.f32 %v8427_v38, %v2841_v50  ;;  %v1610_v39 = vadd.f32 %v8427_v38, %v1588_v58  ;;  %v1586_v37 = vmul.f32 %v8415_v47, %v1527_v0  ;;  %6658 = vtanh.f32 %v2859_v23  ;;  %5974 = vmatprep.mubr.msk.bf16.mxu0 %vm302_vm2, %v9158_v17 }
 0x1de   :  { %v6639_v13 = vpop.eup %6638  ;;  %1633 = vst.msk [vmem:[%s8930_s6 + $0x8] sm:$0xff] %vm1631_vm4, %v6637_v27  ;;  %v2860_v33 = vadd.f32 %v8427_v38, %v2844_v24  ;;  %v2842_v63 = vmul.f32 %v8415_v47, %v2789_v57  ;;  %6660 = vtanh.f32 %v1607_v53  ;;  %6118 = vmatprep.mubr.msk.bf16.mxu1 %vm302_vm2, %v7742_v36  ;;  %v9159_v24 = vld [vmem:[#allocation59_spill] sm:$0xff]  ;;  %v3603_v17 = vpack.c.bf16 %v8516_v14, %v8028_v61 }
 0x1df   :  { %v6641_v62 = vpop.eup %6640  ;;  %5089 = vst.msk [vmem:[%s8930_s6 + $0x88] sm:$0xff] %vm1631_vm4, %v6639_v13  ;;  %v1608_v18 = vadd.f32 %v8427_v38, %v1586_v37  ;;  %6662 = vtanh.f32 %v2857_v60  ;;  %v5710_v42 = vpop.f32.mrb[12].mxu0  ;;  %v3737_v13 = vsel %vm227_vm1, %v3735_v20, %v3736_v46 }
 0x1e0   :  { %v6643_v5 = vpop.eup %6642  ;;  %1638 = vst.msk [vmem:[%s8930_s6 + $0x30] sm:$0xff] %vm1631_vm4, %v6641_v62  ;;  %v2858_v26 = vadd.f32 %v8427_v38, %v2842_v63  ;;  %6664 = vtanh.f32 %v1610_v39  ;;  %v1591_v45 = vmul.f32 %v5710_v42, %v8415_v47  ;;  %v5854_v52 = vpop.f32.mrb[12].mxu1 }
 0x1e1   :  { %v6645_v30 = vpop.eup %6644  ;;  %5094 = vst.msk [vmem:[%s8930_s6 + $0xb0] sm:$0xff] %vm1631_vm4, %v6643_v5  ;;  %v1540_v31 = vpop.f32.mrb[13].mxu0  ;;  %6666 = vtanh.f32 %v2860_v33  ;;  %v2847_v4 = vmul.f32 %v5854_v52, %v8415_v47 }
 0x1e2   :  { %v6647_v16 = vpop.eup %6646  ;;  %1636 = vst.msk [vmem:[%s8930_s6 + $0x20] sm:$0xff] %vm1631_vm4, %v6645_v30  ;;  %v1589_v51 = vmul.f32 %v8415_v47, %v1540_v31  ;;  %v2802_v25 = vpop.f32.mrb[13].mxu1  ;;  %6668 = vtanh.f32 %v1608_v18  ;;  %v1613_v48 = vadd.f32 %v8427_v38, %v1591_v45  ;;  %v3741_v18 = vpack.c.bf16 %v3737_v13, %v8052_v54 }
 0x1e3   :  { %v5711_v15 = vpop.f32.mrb[14].mxu0  ;;  %v6649_v21 = vpop.eup %6648  ;;  %5092 = vst.msk [vmem:[%s8930_s6 + $0xa0] sm:$0xff] %vm1631_vm4, %v6647_v16  ;;  %v2845_v28 = vmul.f32 %v8415_v47, %v2802_v25  ;;  %6670 = vtanh.f32 %v2858_v26  ;;  %v2863_v3 = vadd.f32 %v8427_v38, %v2847_v4  ;;  %v4742_v31 = vrot.slane %v163_v32, 2 }
 0x1e4   :  { %v1592_v44 = vmul.f32 %v5711_v15, %v8415_v47  ;;  %v5855_v6 = vpop.f32.mrb[14].mxu1  ;;  %v1543_v8 = vpop.f32.mrb[15].mxu0  ;;  %1639 = vst.msk [vmem:[%s8930_s6 + $0x38] sm:$0xff] %vm1631_vm4, %v6649_v21  ;;  %v1611_v50 = vadd.f32 %v8427_v38, %v1589_v51  ;;  %6672 = vtanh.f32 %v1613_v48  ;;  %5975 = vmatmul.mubr.msk.bf16.gmra.mrb[24].mxu0 %vm302_vm2, %v9159_v24  ;;  %6119 = vmatmul.mubr.msk.bf16.gmra.mrb[24].mxu1 %vm302_vm2, %v7751_v35 }
 0x1e5   :  { %v6651_v1 = vpop.eup %6650  ;;  %v2848_v58 = vmul.f32 %v5855_v6, %v8415_v47  ;;  %v2805_v12 = vpop.f32.mrb[15].mxu1  ;;  %v2861_v2 = vadd.f32 %v8427_v38, %v2845_v28  ;;  %v1590_v53 = vmul.f32 %v8415_v47, %v1543_v8  ;;  %6674 = vtanh.f32 %v2863_v3  ;;  %5978 = vmatprep.mubr.msk.bf16.mxu0 %vm302_vm2, %v7784_v49  ;;  %6122 = vmatprep.mubr.msk.bf16.mxu1 %vm302_vm2, %v7788_v43 }
 0x1e6   :  { %v6653_v0 = vpop.eup %6652  ;;  %5095 = vst.msk [vmem:[%s8930_s6 + $0xb8] sm:$0xff] %vm1631_vm4, %v6651_v1  ;;  %v1614_v23 = vadd.f32 %v8427_v38, %v1592_v44  ;;  %v2846_v60 = vmul.f32 %v8415_v47, %v2805_v12  ;;  %6676 = vtanh.f32 %v1611_v50 }
 0x1e7   :  { %v6655_v57 = vpop.eup %6654  ;;  %1637 = vst.msk [vmem:[%s8930_s6 + $0x28] sm:$0xff] %vm1631_vm4, %v6653_v0  ;;  %v2864_v27 = vadd.f32 %v8427_v38, %v2848_v58  ;;  %v1612_v37 = vadd.f32 %v8427_v38, %v1590_v53  ;;  %6678 = vtanh.f32 %v2861_v2 }
 0x1e8   :  { %v6657_v39 = vpop.eup %6656  ;;  %5093 = vst.msk [vmem:[%s8930_s6 + $0xa8] sm:$0xff] %vm1631_vm4, %v6655_v57  ;;  %v2862_v49 = vadd.f32 %v8427_v38, %v2846_v60  ;;  %6680 = vtanh.f32 %v1614_v23 }
 0x1e9   :  { %v6659_v33 = vpop.eup %6658  ;;  %1642 = vst.msk [vmem:[%s8930_s6 + $0x50] sm:$0xff] %vm1631_vm4, %v6657_v39  ;;  %6682 = vtanh.f32 %v2864_v27 }
 0x1ea   :  { %v6661_v63 = vpop.eup %6660  ;;  %5098 = vst.msk [vmem:[%s8930_s6 + $0xd0] sm:$0xff] %vm1631_vm4, %v6659_v33  ;;  %6684 = vtanh.f32 %v1612_v37 }
 0x1eb   :  { %v6663_v62 = vpop.eup %6662  ;;  %1640 = vst.msk [vmem:[%s8930_s6 + $0x40] sm:$0xff] %vm1631_vm4, %v6661_v63  ;;  %6686 = vtanh.f32 %v2862_v49 }
 0x1ec   :  { %v6665_v5 = vpop.eup %6664  ;;  %5096 = vst.msk [vmem:[%s8930_s6 + $0xc0] sm:$0xff] %vm1631_vm4, %v6663_v62  ;;  %5979 = vmatmul.mubr.msk.bf16.gmra.mrb[28].mxu0 %vm302_vm2, %v3603_v17  ;;  %6123 = vmatmul.mubr.msk.bf16.gmra.mrb[28].mxu1 %vm302_vm2, %v3741_v18 }
 0x1ed   :  { %v6667_v26 = vpop.eup %6666  ;;  %1643 = vst.msk [vmem:[%s8930_s6 + $0x58] sm:$0xff] %vm1631_vm4, %v6665_v5  ;;  %5984 = vmatprep.mubr.msk.bf16.mxu0 %vm302_vm2, %v7580_v34  ;;  %6128 = vmatprep.mubr.msk.bf16.mxu1 %vm302_vm2, %v7826_v22  ;;  %v4741_v22 = vrot.slane %v8437_v56, 2 }
 0x1ee   :  { %v6669_v61 = vpop.eup %6668  ;;  %5099 = vst.msk [vmem:[%s8930_s6 + $0xd8] sm:$0xff] %vm1631_vm4, %v6667_v26 }
 0x1ef   :  { %v6671_v54 = vpop.eup %6670  ;;  %1641 = vst.msk [vmem:[%s8930_s6 + $0x48] sm:$0xff] %vm1631_vm4, %v6669_v61 }
 0x1f0   :  { %v6673_v42 = vpop.eup %6672  ;;  %5097 = vst.msk [vmem:[%s8930_s6 + $0xc8] sm:$0xff] %vm1631_vm4, %v6671_v54 }
 0x1f1   :  { %v6675_v30 = vpop.eup %6674  ;;  %1646 = vst.msk [vmem:[%s8930_s6 + $0x70] sm:$0xff] %vm1631_vm4, %v6673_v42 }
 0x1f2   :  { %v6677_v45 = vpop.eup %6676  ;;  %5102 = vst.msk [vmem:[%s8930_s6 + $0xf0] sm:$0xff] %vm1631_vm4, %v6675_v30 }
 0x1f3   :  { %v6679_v34 = vpop.eup %6678  ;;  %1644 = vst.msk [vmem:[%s8930_s6 + $0x60] sm:$0xff] %vm1631_vm4, %v6677_v45 }
 0x1f4   :  { %v6681_v52 = vpop.eup %6680  ;;  %5100 = vst.msk [vmem:[%s8930_s6 + $0xe0] sm:$0xff] %vm1631_vm4, %v6679_v34  ;;  %5985 = vmatmul.mubr.msk.bf16.vlgmr.msra.gmra.mrb[16].mxu0 %vm302_vm2, %v7607_v11  ;;  %6129 = vmatmul.mubr.msk.bf16.vlgmr.msra.gmra.mrb[16].mxu1 %vm302_vm2, %v7839_v7  ;;  %v4743_v11 = vsel %vm1650_vm3, %v4741_v22, %v4742_v31  ;;  %v4745_v7 = vrot.slane %v183_v9, 2 }
 0x1f5   :  { %v6683_v20 = vpop.eup %6682  ;;  %1647 = vst.msk [vmem:[%s8930_s6 + $0x78] sm:$0xff] %vm1631_vm4, %v6681_v52  ;;  %5988 = vmatprep.mubr.msk.bf16.mxu0 %vm302_vm2, %v7676_v59  ;;  %6132 = vmatprep.mubr.msk.bf16.mxu1 %vm302_vm2, %v7874_v19  ;;  %v4749_v10 = vpack.c.bf16 %v4743_v11, %v8098_v55  ;;  %v4744_v59 = vrot.slane %v8516_v14, 2  ;;  %v9160_v19 = vld [vmem:[#allocation61_spill] sm:$0xff]  ;;  %v9161_v55 = vld [vmem:[#allocation62_spill] sm:$0xff] }
 0x1f6   :  { %v6685_v16 = vpop.eup %6684  ;;  %5103 = vst.msk [vmem:[%s8930_s6 + $0xf8] sm:$0xff] %vm1631_vm4, %v6683_v20 }
 0x1f7   :  { %v6687_v4 = vpop.eup %6686  ;;  %1645 = vst.msk [vmem:[%s8930_s6 + $0x68] sm:$0xff] %vm1631_vm4, %v6685_v16 }
 0x1f8   :  { %5101 = vst.msk [vmem:[%s8930_s6 + $0xe8] sm:$0xff] %vm1631_vm4, %v6687_v4 }
 0x1fc   :  { %5989 = vmatmul.mubr.msk.bf16.gmra.mrb[20].mxu0 %vm302_vm2, %v8508_v41  ;;  %6133 = vmatmul.mubr.msk.bf16.gmra.mrb[20].mxu1 %vm302_vm2, %v4749_v10 }
 0x1fd   :  { %5992 = vmatprep.mubr.msk.bf16.mxu0 %vm302_vm2, %v7742_v36  ;;  %6136 = vmatprep.mubr.msk.bf16.mxu1 %vm302_vm2, %v7910_v29  ;;  %v4746_v36 = vsel %vm1650_vm3, %v4744_v59, %v4745_v7  ;;  %v9162_v29 = vld [vmem:[#allocation53_spill] sm:$0xff] }
 0x1fe   :  { %v4750_v56 = vpack.c.bf16 %v4746_v36, %v9162_v29 }
 0x204   :  { %5993 = vmatmul.mubr.msk.bf16.gmra.mrb[24].mxu0 %vm302_vm2, %v7751_v35  ;;  %6137 = vmatmul.mubr.msk.bf16.gmra.mrb[24].mxu1 %vm302_vm2, %v9160_v19 }
 0x205   :  { %5996 = vmatprep.mubr.msk.bf16.mxu0 %vm302_vm2, %v7788_v43  ;;  %6140 = vmatprep.mubr.msk.bf16.mxu1 %vm302_vm2, %v9161_v55 }
 0x20c   :  { %5997 = vmatmul.mubr.msk.bf16.gmra.mrb[28].mxu0 %vm302_vm2, %v3741_v18  ;;  %6141 = vmatmul.mubr.msk.bf16.gmra.mrb[28].mxu1 %vm302_vm2, %v4750_v56 }
 0x2c7   :  { %v5986_v32 = vpop.f32.mrb[16].mxu0  ;;  %v6130_v41 = vpop.f32.mrb[16].mxu1 }
 0x2c8   :  { %v3868_v35 = vmul.f32 %v5986_v32, %v8415_v47  ;;  %v3787_v14 = vpop.f32.mrb[17].mxu0  ;;  %v4877_v40 = vmul.f32 %v6130_v41, %v8415_v47  ;;  %v4796_v9 = vpop.f32.mrb[17].mxu1 }
 0x2c9   :  { %v3866_v43 = vmul.f32 %v8415_v47, %v3787_v14  ;;  %v5987_v51 = vpop.f32.mrb[18].mxu0  ;;  %v4875_v15 = vmul.f32 %v8415_v47, %v4796_v9  ;;  %v6131_v21 = vpop.f32.mrb[18].mxu1 }
 0x2ca   :  { %v3884_v25 = vadd.f32 %v8427_v38, %v3868_v35  ;;  %v3869_v46 = vmul.f32 %v5987_v51, %v8415_v47  ;;  %v3790_v48 = vpop.f32.mrb[19].mxu0  ;;  %v4893_v28 = vadd.f32 %v8427_v38, %v4877_v40  ;;  %v4878_v6 = vmul.f32 %v6131_v21, %v8415_v47  ;;  %v4799_v1 = vpop.f32.mrb[19].mxu1 }
 0x2cb   :  { %v3882_v44 = vadd.f32 %v8427_v38, %v3866_v43  ;;  %v3867_v8 = vmul.f32 %v8415_v47, %v3790_v48  ;;  %v4891_v3 = vadd.f32 %v8427_v38, %v4875_v15  ;;  %v4876_v58 = vmul.f32 %v8415_v47, %v4799_v1 }
 0x2cc   :  { %6688 = vtanh.f32 %v3884_v25  ;;  %v3885_v50 = vadd.f32 %v8427_v38, %v3869_v46  ;;  %v4894_v12 = vadd.f32 %v8427_v38, %v4878_v6 }
 0x2cd   :  { %6690 = vtanh.f32 %v4893_v28  ;;  %v3883_v0 = vadd.f32 %v8427_v38, %v3867_v8  ;;  %v4892_v2 = vadd.f32 %v8427_v38, %v4876_v58 }
 0x2ce   :  { %6692 = vtanh.f32 %v3882_v44 }
 0x2cf   :  { %6694 = vtanh.f32 %v4891_v3  ;;  %v5990_v23 = vpop.f32.mrb[20].mxu0  ;;  %v6134_v24 = vpop.f32.mrb[20].mxu1 }
 0x2d0   :  { %6696 = vtanh.f32 %v3885_v50  ;;  %v3872_v53 = vmul.f32 %v5990_v23, %v8415_v47  ;;  %v3803_v57 = vpop.f32.mrb[21].mxu0  ;;  %v4881_v27 = vmul.f32 %v6134_v24, %v8415_v47  ;;  %v4812_v39 = vpop.f32.mrb[21].mxu1 }
 0x2d1   :  { %6698 = vtanh.f32 %v4894_v12  ;;  %v3870_v60 = vmul.f32 %v8415_v47, %v3803_v57  ;;  %v5991_v37 = vpop.f32.mrb[22].mxu0  ;;  %v4879_v33 = vmul.f32 %v8415_v47, %v4812_v39  ;;  %v6135_v63 = vpop.f32.mrb[22].mxu1 }
 0x2d2   :  { %6700 = vtanh.f32 %v3883_v0  ;;  %v3888_v13 = vadd.f32 %v8427_v38, %v3872_v53  ;;  %v3873_v49 = vmul.f32 %v5991_v37, %v8415_v47  ;;  %v3806_v17 = vpop.f32.mrb[23].mxu0  ;;  %v4897_v62 = vadd.f32 %v8427_v38, %v4881_v27  ;;  %v4815_v26 = vpop.f32.mrb[23].mxu1 }
 0x2d3   :  { %6702 = vtanh.f32 %v4892_v2  ;;  %v3886_v18 = vadd.f32 %v8427_v38, %v3870_v60  ;;  %v4882_v5 = vmul.f32 %v6135_v63, %v8415_v47  ;;  %v4895_v61 = vadd.f32 %v8427_v38, %v4879_v33 }
 0x2d4   :  { %6704 = vtanh.f32 %v3888_v13  ;;  %v3889_v54 = vadd.f32 %v8427_v38, %v3873_v49  ;;  %v3871_v42 = vmul.f32 %v8415_v47, %v3806_v17  ;;  %v4880_v45 = vmul.f32 %v8415_v47, %v4815_v26 }
 0x2d5   :  { %6706 = vtanh.f32 %v4897_v62  ;;  %v4898_v30 = vadd.f32 %v8427_v38, %v4882_v5 }
 0x2d6   :  { %v6689_v34 = vpop.eup %6688  ;;  %6708 = vtanh.f32 %v3886_v18  ;;  %v3887_v52 = vadd.f32 %v8427_v38, %v3871_v42  ;;  %v4896_v31 = vadd.f32 %v8427_v38, %v4880_v45 }
 0x2d7   :  { %v6691_v22 = vpop.eup %6690  ;;  %5178 = vst.msk [vmem:[%s8930_s6 + $0x110] sm:$0xff] %vm1631_vm4, %v6689_v34  ;;  %6710 = vtanh.f32 %v4895_v61  ;;  %v5994_v20 = vpop.f32.mrb[24].mxu0 }
 0x2d8   :  { %v6693_v16 = vpop.eup %6692  ;;  %5266 = vst.msk [vmem:[%s8930_s6 + $0x190] sm:$0xff] %vm1631_vm4, %v6691_v22  ;;  %6712 = vtanh.f32 %v3889_v54  ;;  %v3876_v4 = vmul.f32 %v5994_v20, %v8415_v47  ;;  %v6138_v11 = vpop.f32.mrb[24].mxu1 }
 0x2d9   :  { %v3819_v10 = vpop.f32.mrb[25].mxu0  ;;  %v6695_v59 = vpop.eup %6694  ;;  %5176 = vst.msk [vmem:[%s8930_s6 + $0x100] sm:$0xff] %vm1631_vm4, %v6693_v16  ;;  %6714 = vtanh.f32 %v4898_v30  ;;  %v4885_v7 = vmul.f32 %v6138_v11, %v8415_v47 }
 0x2da   :  { %v3874_v19 = vmul.f32 %v8415_v47, %v3819_v10  ;;  %v4828_v55 = vpop.f32.mrb[25].mxu1  ;;  %v5995_v36 = vpop.f32.mrb[26].mxu0  ;;  %5264 = vst.msk [vmem:[%s8930_s6 + $0x180] sm:$0xff] %vm1631_vm4, %v6695_v59  ;;  %6716 = vtanh.f32 %v3887_v52  ;;  %v3892_v56 = vadd.f32 %v8427_v38, %v3876_v4 }
 0x2db   :  { %v6697_v29 = vpop.eup %6696  ;;  %v4883_v32 = vmul.f32 %v8415_v47, %v4828_v55  ;;  %v3877_v35 = vmul.f32 %v5995_v36, %v8415_v47  ;;  %v6139_v41 = vpop.f32.mrb[26].mxu1  ;;  %6718 = vtanh.f32 %v4896_v31  ;;  %v4901_v43 = vadd.f32 %v8427_v38, %v4885_v7 }
 0x2dc   :  { %v3822_v14 = vpop.f32.mrb[27].mxu0  ;;  %v6699_v40 = vpop.eup %6698  ;;  %5179 = vst.msk [vmem:[%s8930_s6 + $0x118] sm:$0xff] %vm1631_vm4, %v6697_v29  ;;  %v3890_v9 = vadd.f32 %v8427_v38, %v3874_v19  ;;  %v4886_v51 = vmul.f32 %v6139_v41, %v8415_v47  ;;  %6720 = vtanh.f32 %v3892_v56 }
 0x2dd   :  { %v4831_v25 = vpop.f32.mrb[27].mxu1  ;;  %v6701_v15 = vpop.eup %6700  ;;  %5267 = vst.msk [vmem:[%s8930_s6 + $0x198] sm:$0xff] %vm1631_vm4, %v6699_v40  ;;  %v4899_v46 = vadd.f32 %v8427_v38, %v4883_v32  ;;  %v3893_v21 = vadd.f32 %v8427_v38, %v3877_v35  ;;  %v3875_v48 = vmul.f32 %v8415_v47, %v3822_v14  ;;  %6722 = vtanh.f32 %v4901_v43 }
 0x2de   :  { %v6703_v28 = vpop.eup %6702  ;;  %5177 = vst.msk [vmem:[%s8930_s6 + $0x108] sm:$0xff] %vm1631_vm4, %v6701_v15  ;;  %v4902_v44 = vadd.f32 %v8427_v38, %v4886_v51  ;;  %v4884_v6 = vmul.f32 %v8415_v47, %v4831_v25  ;;  %6724 = vtanh.f32 %v3890_v9 }
 0x2df   :  { %v6705_v8 = vpop.eup %6704  ;;  %5265 = vst.msk [vmem:[%s8930_s6 + $0x188] sm:$0xff] %vm1631_vm4, %v6703_v28  ;;  %v3891_v1 = vadd.f32 %v8427_v38, %v3875_v48  ;;  %6726 = vtanh.f32 %v4899_v46  ;;  %v5998_v58 = vpop.f32.mrb[28].mxu0 }
 0x2e0   :  { %v6707_v3 = vpop.eup %6706  ;;  %5182 = vst.msk [vmem:[%s8930_s6 + $0x130] sm:$0xff] %vm1631_vm4, %v6705_v8  ;;  %v4900_v50 = vadd.f32 %v8427_v38, %v4884_v6  ;;  %6728 = vtanh.f32 %v3893_v21  ;;  %v3880_v0 = vmul.f32 %v5998_v58, %v8415_v47  ;;  %v6142_v2 = vpop.f32.mrb[28].mxu1 }
 0x2e1   :  { %v6709_v12 = vpop.eup %6708  ;;  %5270 = vst.msk [vmem:[%s8930_s6 + $0x1b0] sm:$0xff] %vm1631_vm4, %v6707_v3  ;;  %v3835_v23 = vpop.f32.mrb[29].mxu0  ;;  %6730 = vtanh.f32 %v4902_v44  ;;  %v4889_v24 = vmul.f32 %v6142_v2, %v8415_v47 }
 0x2e2   :  { %v6711_v53 = vpop.eup %6710  ;;  %5180 = vst.msk [vmem:[%s8930_s6 + $0x120] sm:$0xff] %vm1631_vm4, %v6709_v12  ;;  %v3878_v57 = vmul.f32 %v8415_v47, %v3835_v23  ;;  %v4844_v27 = vpop.f32.mrb[29].mxu1  ;;  %6732 = vtanh.f32 %v3891_v1  ;;  %v3896_v37 = vadd.f32 %v8427_v38, %v3880_v0 }
 0x2e3   :  { %v5999_v60 = vpop.f32.mrb[30].mxu0  ;;  %v6713_v39 = vpop.eup %6712  ;;  %5268 = vst.msk [vmem:[%s8930_s6 + $0x1a0] sm:$0xff] %vm1631_vm4, %v6711_v53  ;;  %v4887_v13 = vmul.f32 %v8415_v47, %v4844_v27  ;;  %6734 = vtanh.f32 %v4900_v50  ;;  %v4905_v62 = vadd.f32 %v8427_v38, %v4889_v24 }
 0x2e4   :  { %v3881_v33 = vmul.f32 %v5999_v60, %v8415_v47  ;;  %v6143_v49 = vpop.f32.mrb[30].mxu1  ;;  %v3838_v63 = vpop.f32.mrb[31].mxu0  ;;  %5183 = vst.msk [vmem:[%s8930_s6 + $0x138] sm:$0xff] %vm1631_vm4, %v6713_v39  ;;  %v3894_v18 = vadd.f32 %v8427_v38, %v3878_v57  ;;  %6736 = vtanh.f32 %v3896_v37 }
 0x2e5   :  { %v6715_v17 = vpop.eup %6714  ;;  %v4890_v5 = vmul.f32 %v6143_v49, %v8415_v47  ;;  %v4847_v26 = vpop.f32.mrb[31].mxu1  ;;  %v4903_v54 = vadd.f32 %v8427_v38, %v4887_v13  ;;  %v3879_v30 = vmul.f32 %v8415_v47, %v3838_v63  ;;  %6738 = vtanh.f32 %v4905_v62 }
 0x2e6   :  { %v6717_v61 = vpop.eup %6716  ;;  %5271 = vst.msk [vmem:[%s8930_s6 + $0x1b8] sm:$0xff] %vm1631_vm4, %v6715_v17  ;;  %v3897_v42 = vadd.f32 %v8427_v38, %v3881_v33  ;;  %v4888_v52 = vmul.f32 %v8415_v47, %v4847_v26  ;;  %6740 = vtanh.f32 %v3894_v18 }
 0x2e7   :  { %v6719_v45 = vpop.eup %6718  ;;  %5181 = vst.msk [vmem:[%s8930_s6 + $0x128] sm:$0xff] %vm1631_vm4, %v6717_v61  ;;  %v4906_v34 = vadd.f32 %v8427_v38, %v4890_v5  ;;  %v3895_v31 = vadd.f32 %v8427_v38, %v3879_v30  ;;  %6742 = vtanh.f32 %v4903_v54 }
 0x2e8   :  { %v6721_v22 = vpop.eup %6720  ;;  %5269 = vst.msk [vmem:[%s8930_s6 + $0x1a8] sm:$0xff] %vm1631_vm4, %v6719_v45  ;;  %v4904_v16 = vadd.f32 %v8427_v38, %v4888_v52  ;;  %6744 = vtanh.f32 %v3897_v42 }
 0x2e9   :  { %v6723_v20 = vpop.eup %6722  ;;  %5186 = vst.msk [vmem:[%s8930_s6 + $0x150] sm:$0xff] %vm1631_vm4, %v6721_v22  ;;  %6746 = vtanh.f32 %v4906_v34 }
 0x2ea   :  { %v6725_v4 = vpop.eup %6724  ;;  %5274 = vst.msk [vmem:[%s8930_s6 + $0x1d0] sm:$0xff] %vm1631_vm4, %v6723_v20  ;;  %6748 = vtanh.f32 %v3895_v31 }
 0x2eb   :  { %v6727_v47 = vpop.eup %6726  ;;  %5184 = vst.msk [vmem:[%s8930_s6 + $0x140] sm:$0xff] %vm1631_vm4, %v6725_v4  ;;  %6750 = vtanh.f32 %v4904_v16 }
 0x2ec   :  { %v6729_v11 = vpop.eup %6728  ;;  %5272 = vst.msk [vmem:[%s8930_s6 + $0x1c0] sm:$0xff] %vm1631_vm4, %v6727_v47 }
 0x2ed   :  { %v6731_v38 = vpop.eup %6730  ;;  %5187 = vst.msk [vmem:[%s8930_s6 + $0x158] sm:$0xff] %vm1631_vm4, %v6729_v11 }
 0x2ee   :  { %v6733_v10 = vpop.eup %6732  ;;  %5275 = vst.msk [vmem:[%s8930_s6 + $0x1d8] sm:$0xff] %vm1631_vm4, %v6731_v38 }
 0x2ef   :  { %v6735_v59 = vpop.eup %6734  ;;  %5185 = vst.msk [vmem:[%s8930_s6 + $0x148] sm:$0xff] %vm1631_vm4, %v6733_v10 }
 0x2f0   :  { %v6737_v7 = vpop.eup %6736  ;;  %5273 = vst.msk [vmem:[%s8930_s6 + $0x1c8] sm:$0xff] %vm1631_vm4, %v6735_v59 }
 0x2f1   :  { %v6739_v19 = vpop.eup %6738  ;;  %5190 = vst.msk [vmem:[%s8930_s6 + $0x170] sm:$0xff] %vm1631_vm4, %v6737_v7 }
 0x2f2   :  { %v6741_v55 = vpop.eup %6740  ;;  %5278 = vst.msk [vmem:[%s8930_s6 + $0x1f0] sm:$0xff] %vm1631_vm4, %v6739_v19 }
 0x2f3   :  { %v6743_v36 = vpop.eup %6742  ;;  %5188 = vst.msk [vmem:[%s8930_s6 + $0x160] sm:$0xff] %vm1631_vm4, %v6741_v55 }
 0x2f4   :  { %v6745_v29 = vpop.eup %6744  ;;  %5276 = vst.msk [vmem:[%s8930_s6 + $0x1e0] sm:$0xff] %vm1631_vm4, %v6743_v36 }
 0x2f5   :  { %v6747_v56 = vpop.eup %6746  ;;  %5191 = vst.msk [vmem:[%s8930_s6 + $0x178] sm:$0xff] %vm1631_vm4, %v6745_v29 }
 0x2f6   :  { %v6749_v32 = vpop.eup %6748  ;;  %5279 = vst.msk [vmem:[%s8930_s6 + $0x1f8] sm:$0xff] %vm1631_vm4, %v6747_v56 }
 0x2f7   :  { %v6751_v35 = vpop.eup %6750  ;;  %5189 = vst.msk [vmem:[%s8930_s6 + $0x168] sm:$0xff] %vm1631_vm4, %v6749_v32 }
 0x2f8   :  { %5277 = vst.msk [vmem:[%s8930_s6 + $0x1e8] sm:$0xff] %vm1631_vm4, %v6751_v35 }

</bundles_post_ra>
